<compile_context>
chip_gen: v6e
topology: v6e:2x2x1
jax: 0.10.0
libtpu: 0.0.40
codegen_flags: <defaults>
</compile_context>

<pallas_src>
import functools

import jax
import jax.numpy as jnp
from jax.experimental import pallas as pl
from jax.experimental.pallas import tpu as pltpu


# Static layout constants (input 64x64 implied by Linear(32*16*16, 64)).
WG1, CIN1P = 36, 8     # conv1 column-group width: L1 = 32*36 = 1152 = 9*128; Cin 3->8
WG2, CIN2P = 24, 16    # conv2 column-group width: L2 = 16*24 =  384 = 3*128
N2_PAD = 128           # fc2 output padded 14 -> 128 for lane-dense stores


def _round_up(x, m):
    return (x + m - 1) // m * m


def _pick_bt(batch):
    """Images per conv grid step: amortize the ~0.35us per-step overhead, but
    keep >= 2 grid steps so both v7x TensorCores get work (v5e/v6e: 1 TC)."""
    if batch < 4:
        return 1
    return min(8, batch // 2)


# ----------------------------------------------------------------------------
# Fused Conv2d(3x3, pad=1) + bias + ReLU + MaxPool2d(2): one dot per image
# ----------------------------------------------------------------------------
def _conv_pool_kernel(x_ref, w_ref, b_ref, o_ref, *, bt, cout, wg, lo):
    """Fused conv+bias+ReLU+2x2-pool for BT images.

    x_ref: (BT, 4, Cinp, Qd) bf16 parity-split input slabs:
           x_ref[t, a*2+c, ci, i*wg + j] == padded_input[t, ci, 2*i + a, 2*j + c]
    w_ref: (4*Cout, 16*Cinp) bf16 folded weights: row block p = pooling parity,
           column block m = (slab, row/col offset) combo; invalid combos are 0.
    b_ref: (Cout, 1) f32
    o_ref: (BT, Cout, Lo) bf16.  Column r = i*wg + j is the pooled output at
           (i, j) for j < W/2; the tail columns of each row group are junk and
           are dropped by the wrapper.
    """
    w = w_ref[...]                              # resident, hoisted out of the loop
    b = b_ref[...]
    for t in range(bt):                          # static unroll over the batch tile
        parts = []
        for s in range(4):                       # slab = input (row, col) parity
            for oh in range(2):                  # row-group offset
                for ow in range(2):              # column offset
                    q0 = oh * wg + ow
                    parts.append(x_ref[t, s, :, q0:q0 + lo])     # (Cinp, Lo) bf16
        rhs = jnp.concatenate(parts, axis=0)                     # (16*Cinp, Lo)
        acc = jnp.dot(w, rhs, preferred_element_type=jnp.float32)  # (4*Cout, Lo)
        # 2x2 max-pool == max over the four pooling-parity row blocks.
        pooled = jnp.maximum(jnp.maximum(acc[:cout], acc[cout:2 * cout]),
                             jnp.maximum(acc[2 * cout:3 * cout], acc[3 * cout:]))
        # bias + ReLU after the max (both commute with max); lane-dense store.
        o_ref[t] = jnp.maximum(pooled + b, 0.0).astype(o_ref.dtype)


def _parity_split(x, wg, cin_pad):
    """(B, C, H, W) -> (B, 4, cin_pad, (H//2 + 2) * wg) bf16 parity-split slabs.

    out[b, a*2+c, ci, i*wg + j] = padded(x)[b, ci, 2*i + a, 2*j + c], where
    padded() adds the conv's one-pixel zero ring; channels >= C, rows
    i >= H//2+1 and columns j >= W//2+1 are zero guards so every in-kernel
    shifted slice stays in bounds and L = (H//2)*wg is a multiple of 128.
    """
    b, c, h, w = x.shape
    hh, hw = h // 2, w // 2
    p = jnp.pad(x.astype(jnp.bfloat16),
                ((0, 0), (0, cin_pad - c), (1, 1), (1, 1)))
    p = p.reshape(b, cin_pad, hh + 1, 2, hw + 1, 2)
    p = jnp.transpose(p, (0, 3, 5, 1, 2, 4))              # (B, a, c, C, i, j)
    p = jnp.pad(p, ((0, 0),) * 4 + ((0, 1), (0, wg - (hw + 1))))
    return p.reshape(b, 4, cin_pad, (hh + 2) * wg)


def _fold_conv_weights(w_oihw, cin_pad):
    """(Cout, Cin, 3, 3) torch-layout weights -> (4*Cout, 16*cin_pad) bf16.

    Row block p = ph*2+pw (pooling parity); column block m = (a*2+c)*4 + oh*2+ow
    holds W[:, :, dh, dw] with dh = 2*oh + a - ph, dw = 2*ow + c - pw when those
    are valid taps, else zeros.  One-time host-side prep (outside the forward).
    """
    w = jnp.asarray(w_oihw, jnp.float32)
    cout, cin = w.shape[0], w.shape[1]
    w = jnp.pad(w, ((0, 0), (0, cin_pad - cin), (0, 0), (0, 0)))
    zeros = jnp.zeros((cout, cin_pad), jnp.float32)
    rows = []
    for ph in range(2):
        for pw in range(2):
            cols = []
            for a in range(2):
                for c in range(2):
                    for oh in range(2):
                        for ow in range(2):
                            dh = 2 * oh + a - ph
                            dw = 2 * ow + c - pw
                            if 0 <= dh <= 2 and 0 <= dw <= 2:
                                cols.append(w[:, :, dh, dw])
                            else:
                                cols.append(zeros)
            rows.append(jnp.concatenate(cols, axis=1))
    return jnp.concatenate(rows, axis=0).astype(jnp.bfloat16)


def conv_relu_pool_call(xp, w_fold, b_col, *, cout, half_h, wg, bt):
    """xp: (B, 4, Cinp, Qd) bf16 -> (B, Cout, half_h*wg) bf16 (junk tail cols)."""
    batch, _, cinp, qd = xp.shape
    lo = half_h * wg
    grid = batch // bt
    flops = 2 * batch * (4 * cout) * (16 * cinp) * lo
    bytes_accessed = (xp.size * 2 + batch * cout * lo * 2 +
                      w_fold.size * 2 + b_col.size * 4)

    return pl.pallas_call(
        functools.partial(_conv_pool_kernel, bt=bt, cout=cout, wg=wg, lo=lo),
        out_shape=jax.ShapeDtypeStruct((batch, cout, lo), jnp.bfloat16),
        grid=(grid,),
        in_specs=[
            pl.BlockSpec((bt, 4, cinp, qd), lambda i: (i, 0, 0, 0)),
            pl.BlockSpec((4 * cout, 16 * cinp), lambda i: (0, 0)),
            pl.BlockSpec((cout, 1), lambda i: (0, 0)),
        ],
        out_specs=pl.BlockSpec((bt, cout, lo), lambda i: (i, 0, 0)),
        compiler_params=pltpu.CompilerParams(
            dimension_semantics=("parallel",),
            vmem_limit_bytes=32 * 1024 * 1024,
        ),
        cost_estimate=pl.CostEstimate(
            flops=flops, transcendentals=0, bytes_accessed=bytes_accessed),
    )(xp, w_fold, b_col)


# ----------------------------------------------------------------------------
# Fused Linear(8192,64)+ReLU+Linear(64,14->128 padded)+Sigmoid kernel
# ----------------------------------------------------------------------------
def _fc_head_kernel(x_ref, w1_ref, b1_ref, w2_ref, b2_ref, o_ref):
    h = jnp.dot(x_ref[...], w1_ref[...], preferred_element_type=jnp.float32)
    h = jnp.maximum(h + b1_ref[...], 0.0)
    y = jnp.dot(h.astype(jnp.bfloat16), w2_ref[...],
                preferred_element_type=jnp.float32)
    o_ref[...] = jax.nn.sigmoid(y + b2_ref[...])


def fc_head_call(flat, w1, b1, w2p, b2p):
    """flat: (B, 8192) bf16 -> (B, 14) f32 sigmoid outputs."""
    batch, k = flat.shape
    n1 = w1.shape[1]
    n_pad = w2p.shape[1]
    tm = _round_up(batch, 8) if batch <= 256 else 128
    bf = _round_up(batch, tm)
    if bf != batch:                      # full tiles: no partial-block handling
        flat = jnp.pad(flat, ((0, bf - batch), (0, 0)))
    grid = bf // tm
    flops = 2 * bf * (k * n1 + n1 * n_pad)
    bytes_accessed = (flat.size * 2 + w1.size * 2 + w2p.size * 2 +
                      b1.size * 4 + b2p.size * 4 + bf * n_pad * 4)

    out = pl.pallas_call(
        _fc_head_kernel,
        out_shape=jax.ShapeDtypeStruct((bf, n_pad), jnp.float32),
        grid=(grid,),
        in_specs=[
            pl.BlockSpec((tm, k), lambda i: (i, 0)),
            pl.BlockSpec((k, n1), lambda i: (0, 0)),
            pl.BlockSpec((1, n1), lambda i: (0, 0)),
            pl.BlockSpec((n1, n_pad), lambda i: (0, 0)),
            pl.BlockSpec((1, n_pad), lambda i: (0, 0)),
        ],
        out_specs=pl.BlockSpec((tm, n_pad), lambda i: (i, 0)),
        compiler_params=pltpu.CompilerParams(
            dimension_semantics=("parallel",),
            vmem_limit_bytes=32 * 1024 * 1024,
        ),
        cost_estimate=pl.CostEstimate(
            flops=flops, transcendentals=bf * n_pad, bytes_accessed=bytes_accessed),
    )(flat, w1, b1, w2p, b2p)
    return out[:batch, :14]


# ----------------------------------------------------------------------------
# One-time parameter re-layout (outside the jitted forward)
# ----------------------------------------------------------------------------
def preprocess_params(params):
    return {
        "c1_w": _fold_conv_weights(params["conv1_w"], CIN1P),        # (64, 128) bf16
        "c1_b": params["conv1_b"].reshape(16, 1).astype(jnp.float32),
        "c2_w": _fold_conv_weights(params["conv2_w"], CIN2P),        # (128, 256) bf16
        "c2_b": params["conv2_b"].reshape(32, 1).astype(jnp.float32),
        "fc1_w": params["fc1_w"].astype(jnp.bfloat16),               # (8192, 64)
        "fc1_b": params["fc1_b"].reshape(1, 64).astype(jnp.float32),
        "fc2_w": jnp.pad(params["fc2_w"].astype(jnp.bfloat16),
                         ((0, 0), (0, N2_PAD - 14))),                # (64, 128)
        "fc2_b": jnp.pad(params["fc2_b"].reshape(1, 14).astype(jnp.float32),
                         ((0, 0), (0, N2_PAD - 14))),                # (1, 128)
    }


# ----------------------------------------------------------------------------
# Full model
# ----------------------------------------------------------------------------
@jax.jit
def galaxy_zoo_regressor(x_nchw, pp):
    """Forward pass.  x_nchw: (B, 3, 64, 64) float32 -> (B, 14) in (0, 1)."""
    batch = x_nchw.shape[0]
    bt = _pick_bt(batch)
    bp = _round_up(batch, bt)
    if bp != batch:
        x_nchw = jnp.pad(x_nchw, ((0, bp - batch), (0, 0), (0, 0), (0, 0)))

    # conv1 + ReLU + pool  (B, 3, 64, 64) -> (B, 16, 32, 32)
    xp1 = _parity_split(x_nchw, WG1, CIN1P)                         # (B,4,8,1224) bf16
    y1 = conv_relu_pool_call(xp1, pp["c1_w"], pp["c1_b"],
                             cout=16, half_h=32, wg=WG1, bt=bt)     # (B,16,1152) bf16
    y1 = y1.reshape(bp, 16, 32, WG1)[:, :, :, :32]                  # drop junk cols

    # conv2 + ReLU + pool  (B, 16, 32, 32) -> (B, 32, 16, 16)
    xp2 = _parity_split(y1, WG2, CIN2P)                             # (B,4,16,432) bf16
    y2 = conv_relu_pool_call(xp2, pp["c2_w"], pp["c2_b"],
                             cout=32, half_h=16, wg=WG2, bt=bt)     # (B,32,384) bf16
    y2 = y2.reshape(bp, 32, 16, WG2)[:, :, :, :16]                  # (B,32,16,16)

    # NCHW flatten == torch.nn.Flatten semantics; fused fc1+ReLU+fc2+Sigmoid.
    flat = y2.reshape(bp, 32 * 16 * 16)                             # (B, 8192) bf16
    probs = fc_head_call(flat, pp["fc1_w"], pp["fc1_b"], pp["fc2_w"], pp["fc2_b"])
    return probs[:batch]


def init_params(key):
    # PyTorch-style layouts: conv weights OIHW; fc weights stored as (in, out).
    # (When loading real torch weights, transpose Linear weights from (out, in).)
    ks = jax.random.split(key, 8)

    def u(k, shape, fan_in):
        bound = 1.0 / (fan_in ** 0.5)
        return jax.random.uniform(k, shape, jnp.float32, -bound, bound)

    return {
        "conv1_w": u(ks[0], (16, 3, 3, 3), 3 * 9),
        "conv1_b": u(ks[1], (16,), 3 * 9),
        "conv2_w": u(ks[2], (32, 16, 3, 3), 16 * 9),
        "conv2_b": u(ks[3], (32,), 16 * 9),
        "fc1_w": u(ks[4], (32 * 16 * 16, 64), 32 * 16 * 16),
        "fc1_b": u(ks[5], (64,), 32 * 16 * 16),
        "fc2_w": u(ks[6], (64, 14), 64),
        "fc2_b": u(ks[7], (14,), 64),
    }


def _reference_forward(x, params):
    """Pure-XLA f32 reference matching the PyTorch module."""
    dn = ("NCHW", "OIHW", "NCHW")
    y = jax.lax.conv_general_dilated(x, params["conv1_w"], (1, 1), "SAME",
                                     dimension_numbers=dn)
    y = jnp.maximum(y + params["conv1_b"][None, :, None, None], 0.0)
    y = jax.lax.reduce_window(y, -jnp.inf, jax.lax.max,
                              (1, 1, 2, 2), (1, 1, 2, 2), "VALID")
    y = jax.lax.conv_general_dilated(y, params["conv2_w"], (1, 1), "SAME",
                                     dimension_numbers=dn)
    y = jnp.maximum(y + params["conv2_b"][None, :, None, None], 0.0)
    y = jax.lax.reduce_window(y, -jnp.inf, jax.lax.max,
                              (1, 1, 2, 2), (1, 1, 2, 2), "VALID")
    f = y.reshape(y.shape[0], -1)
    h = jnp.maximum(f @ params["fc1_w"] + params["fc1_b"], 0.0)
    return jax.nn.sigmoid(h @ params["fc2_w"] + params["fc2_b"])


if __name__ == "__main__":
    key = jax.random.PRNGKey(0)
    pkey, xkey = jax.random.split(key)
    params = init_params(pkey)
    pp = preprocess_params(params)   # one-time weight re-layout, outside the jit
    # Input spatial size implied by Linear(32*16*16, 64): 64x64 after two /2 pools.
    # Batch 4 exercises the batch-blocked path (BT=2 images/step, grid=2).
    x = jax.random.normal(xkey, (4, 3, 64, 64), jnp.float32)

    out = jax.block_until_ready(galaxy_zoo_regressor(x, pp))
    ref = jax.block_until_ready(_reference_forward(x, params))

    assert out.shape == (4, 14), out.shape
    assert bool(jnp.all(jnp.isfinite(out)))
    assert bool(jnp.all((out > 0.0) & (out < 1.0)))            # sigmoid range
    max_err = float(jnp.max(jnp.abs(out - ref)))               # bf16-matmul tolerance
    assert max_err < 1e-2, max_err
    print("KERNEL_OK")
</pallas_src>

<mosaic_0001>
module attributes {stable_mosaic.version = 11 : i64} {
  func.func @_conv_pool_kernel(%arg0: i32, %arg1: memref<2x4x8x1224xbf16, #tpu.memory_space<vmem>>, %arg2: memref<64x128xbf16, #tpu.memory_space<vmem>>, %arg3: memref<16x1xf32, #tpu.memory_space<vmem>>, %arg4: memref<2x16x1152xbf16, #tpu.memory_space<vmem>>) attributes {dimension_semantics = [#tpu.dimension_semantics<parallel>], iteration_bounds = array<i64: 2>, scalar_prefetch = 0 : i64, scratch_operands = 0 : i64, tpu.core_type = #tpu.core_type<tc>, window_params = [{transform_indices = @transform_0, window_bounds = array<i64: 2, 4, 8, 1224>}, {pipeline_mode = #tpu.pipeline_mode<synchronous>, transform_indices = @transform_1, window_bounds = array<i64: 64, 128>}, {pipeline_mode = #tpu.pipeline_mode<synchronous>, transform_indices = @transform_2, window_bounds = array<i64: 16, 1>}, {transform_indices = @transform_3, window_bounds = array<i64: 2, 16, 1152>}]} {
    %c0 = arith.constant 0 : index
    %c0_0 = arith.constant 0 : index
    %0 = vector.load %arg2[%c0, %c0_0] : memref<64x128xbf16, #tpu.memory_space<vmem>>, vector<64x128xbf16>
    %c0_1 = arith.constant 0 : index
    %c0_2 = arith.constant 0 : index
    %1 = vector.load %arg3[%c0_1, %c0_2] : memref<16x1xf32, #tpu.memory_space<vmem>>, vector<16x1xf32>
    %c0_3 = arith.constant 0 : index
    %c0_4 = arith.constant 0 : index
    %c0_5 = arith.constant 0 : index
    %c0_6 = arith.constant 0 : index
    %2 = vector.load %arg1[%c0_3, %c0_4, %c0_5, %c0_6] : memref<2x4x8x1224xbf16, #tpu.memory_space<vmem>>, vector<1x1x8x1152xbf16>
    %3 = vector.shape_cast %2 : vector<1x1x8x1152xbf16> to vector<8x1152xbf16>
    %c0_7 = arith.constant 0 : index
    %c0_8 = arith.constant 0 : index
    %c0_9 = arith.constant 0 : index
    %c1 = arith.constant 1 : index
    %4 = vector.load %arg1[%c0_7, %c0_8, %c0_9, %c1] : memref<2x4x8x1224xbf16, #tpu.memory_space<vmem>>, vector<1x1x8x1152xbf16>
    %5 = vector.shape_cast %4 : vector<1x1x8x1152xbf16> to vector<8x1152xbf16>
    %c0_10 = arith.constant 0 : index
    %c0_11 = arith.constant 0 : index
    %c0_12 = arith.constant 0 : index
    %c36 = arith.constant 36 : index
    %6 = vector.load %arg1[%c0_10, %c0_11, %c0_12, %c36] : memref<2x4x8x1224xbf16, #tpu.memory_space<vmem>>, vector<1x1x8x1152xbf16>
    %7 = vector.shape_cast %6 : vector<1x1x8x1152xbf16> to vector<8x1152xbf16>
    %c0_13 = arith.constant 0 : index
    %c0_14 = arith.constant 0 : index
    %c0_15 = arith.constant 0 : index
    %c37 = arith.constant 37 : index
    %8 = vector.load %arg1[%c0_13, %c0_14, %c0_15, %c37] : memref<2x4x8x1224xbf16, #tpu.memory_space<vmem>>, vector<1x1x8x1152xbf16>
    %9 = vector.shape_cast %8 : vector<1x1x8x1152xbf16> to vector<8x1152xbf16>
    %c0_16 = arith.constant 0 : index
    %c1_17 = arith.constant 1 : index
    %c0_18 = arith.constant 0 : index
    %c0_19 = arith.constant 0 : index
    %10 = vector.load %arg1[%c0_16, %c1_17, %c0_18, %c0_19] : memref<2x4x8x1224xbf16, #tpu.memory_space<vmem>>, vector<1x1x8x1152xbf16>
    %11 = vector.shape_cast %10 : vector<1x1x8x1152xbf16> to vector<8x1152xbf16>
    %c0_20 = arith.constant 0 : index
    %c1_21 = arith.constant 1 : index
    %c0_22 = arith.constant 0 : index
    %c1_23 = arith.constant 1 : index
    %12 = vector.load %arg1[%c0_20, %c1_21, %c0_22, %c1_23] : memref<2x4x8x1224xbf16, #tpu.memory_space<vmem>>, vector<1x1x8x1152xbf16>
    %13 = vector.shape_cast %12 : vector<1x1x8x1152xbf16> to vector<8x1152xbf16>
    %c0_24 = arith.constant 0 : index
    %c1_25 = arith.constant 1 : index
    %c0_26 = arith.constant 0 : index
    %c36_27 = arith.constant 36 : index
    %14 = vector.load %arg1[%c0_24, %c1_25, %c0_26, %c36_27] : memref<2x4x8x1224xbf16, #tpu.memory_space<vmem>>, vector<1x1x8x1152xbf16>
    %15 = vector.shape_cast %14 : vector<1x1x8x1152xbf16> to vector<8x1152xbf16>
    %c0_28 = arith.constant 0 : index
    %c1_29 = arith.constant 1 : index
    %c0_30 = arith.constant 0 : index
    %c37_31 = arith.constant 37 : index
    %16 = vector.load %arg1[%c0_28, %c1_29, %c0_30, %c37_31] : memref<2x4x8x1224xbf16, #tpu.memory_space<vmem>>, vector<1x1x8x1152xbf16>
    %17 = vector.shape_cast %16 : vector<1x1x8x1152xbf16> to vector<8x1152xbf16>
    %c0_32 = arith.constant 0 : index
    %c2 = arith.constant 2 : index
    %c0_33 = arith.constant 0 : index
    %c0_34 = arith.constant 0 : index
    %18 = vector.load %arg1[%c0_32, %c2, %c0_33, %c0_34] : memref<2x4x8x1224xbf16, #tpu.memory_space<vmem>>, vector<1x1x8x1152xbf16>
    %19 = vector.shape_cast %18 : vector<1x1x8x1152xbf16> to vector<8x1152xbf16>
    %c0_35 = arith.constant 0 : index
    %c2_36 = arith.constant 2 : index
    %c0_37 = arith.constant 0 : index
    %c1_38 = arith.constant 1 : index
    %20 = vector.load %arg1[%c0_35, %c2_36, %c0_37, %c1_38] : memref<2x4x8x1224xbf16, #tpu.memory_space<vmem>>, vector<1x1x8x1152xbf16>
    %21 = vector.shape_cast %20 : vector<1x1x8x1152xbf16> to vector<8x1152xbf16>
    %c0_39 = arith.constant 0 : index
    %c2_40 = arith.constant 2 : index
    %c0_41 = arith.constant 0 : index
    %c36_42 = arith.constant 36 : index
    %22 = vector.load %arg1[%c0_39, %c2_40, %c0_41, %c36_42] : memref<2x4x8x1224xbf16, #tpu.memory_space<vmem>>, vector<1x1x8x1152xbf16>
    %23 = vector.shape_cast %22 : vector<1x1x8x1152xbf16> to vector<8x1152xbf16>
    %c0_43 = arith.constant 0 : index
    %c2_44 = arith.constant 2 : index
    %c0_45 = arith.constant 0 : index
    %c37_46 = arith.constant 37 : index
    %24 = vector.load %arg1[%c0_43, %c2_44, %c0_45, %c37_46] : memref<2x4x8x1224xbf16, #tpu.memory_space<vmem>>, vector<1x1x8x1152xbf16>
    %25 = vector.shape_cast %24 : vector<1x1x8x1152xbf16> to vector<8x1152xbf16>
    %c0_47 = arith.constant 0 : index
    %c3 = arith.constant 3 : index
    %c0_48 = arith.constant 0 : index
    %c0_49 = arith.constant 0 : index
    %26 = vector.load %arg1[%c0_47, %c3, %c0_48, %c0_49] : memref<2x4x8x1224xbf16, #tpu.memory_space<vmem>>, vector<1x1x8x1152xbf16>
    %27 = vector.shape_cast %26 : vector<1x1x8x1152xbf16> to vector<8x1152xbf16>
    %c0_50 = arith.constant 0 : index
    %c3_51 = arith.constant 3 : index
    %c0_52 = arith.constant 0 : index
    %c1_53 = arith.constant 1 : index
    %28 = vector.load %arg1[%c0_50, %c3_51, %c0_52, %c1_53] : memref<2x4x8x1224xbf16, #tpu.memory_space<vmem>>, vector<1x1x8x1152xbf16>
    %29 = vector.shape_cast %28 : vector<1x1x8x1152xbf16> to vector<8x1152xbf16>
    %c0_54 = arith.constant 0 : index
    %c3_55 = arith.constant 3 : index
    %c0_56 = arith.constant 0 : index
    %c36_57 = arith.constant 36 : index
    %30 = vector.load %arg1[%c0_54, %c3_55, %c0_56, %c36_57] : memref<2x4x8x1224xbf16, #tpu.memory_space<vmem>>, vector<1x1x8x1152xbf16>
    %31 = vector.shape_cast %30 : vector<1x1x8x1152xbf16> to vector<8x1152xbf16>
    %c0_58 = arith.constant 0 : index
    %c3_59 = arith.constant 3 : index
    %c0_60 = arith.constant 0 : index
    %c37_61 = arith.constant 37 : index
    %32 = vector.load %arg1[%c0_58, %c3_59, %c0_60, %c37_61] : memref<2x4x8x1224xbf16, #tpu.memory_space<vmem>>, vector<1x1x8x1152xbf16>
    %33 = vector.shape_cast %32 : vector<1x1x8x1152xbf16> to vector<8x1152xbf16>
    %34 = tpu.concatenate %3, %5, %7, %9, %11, %13, %15, %17, %19, %21, %23, %25, %27, %29, %31, %33 in 0 : vector<8x1152xbf16>, vector<8x1152xbf16>, vector<8x1152xbf16>, vector<8x1152xbf16>, vector<8x1152xbf16>, vector<8x1152xbf16>, vector<8x1152xbf16>, vector<8x1152xbf16>, vector<8x1152xbf16>, vector<8x1152xbf16>, vector<8x1152xbf16>, vector<8x1152xbf16>, vector<8x1152xbf16>, vector<8x1152xbf16>, vector<8x1152xbf16>, vector<8x1152xbf16> -> vector<128x1152xbf16>
    %cst = arith.constant dense<0.000000e+00> : vector<64x1152xf32>
    %35 = tpu.matmul %0, %34, %cst {dimension_numbers = #tpu.dot_dimension_numbers<[1], [0], [0], [1], [0, 0, 1, 1], [], []>} : vector<64x128xbf16>, vector<128x1152xbf16>, vector<64x1152xf32> -> vector<64x1152xf32>
    %36 = vector.extract_strided_slice %35 {offsets = [0, 0], sizes = [16, 1152], strides = [1, 1]} : vector<64x1152xf32> to vector<16x1152xf32>
    %37 = vector.extract_strided_slice %35 {offsets = [16, 0], sizes = [16, 1152], strides = [1, 1]} : vector<64x1152xf32> to vector<16x1152xf32>
    %38 = arith.maximumf %36, %37 : vector<16x1152xf32>
    %39 = vector.extract_strided_slice %35 {offsets = [32, 0], sizes = [16, 1152], strides = [1, 1]} : vector<64x1152xf32> to vector<16x1152xf32>
    %40 = vector.extract_strided_slice %35 {offsets = [48, 0], sizes = [16, 1152], strides = [1, 1]} : vector<64x1152xf32> to vector<16x1152xf32>
    %41 = arith.maximumf %39, %40 : vector<16x1152xf32>
    %42 = arith.maximumf %38, %41 : vector<16x1152xf32>
    %43 = vector.broadcast %1 : vector<16x1xf32> to vector<16x1152xf32>
    %44 = arith.addf %42, %43 : vector<16x1152xf32>
    %cst_62 = arith.constant 0.000000e+00 : f32
    %45 = vector.broadcast %cst_62 : f32 to vector<16x1152xf32>
    %46 = arith.maximumf %44, %45 : vector<16x1152xf32>
    %47 = arith.truncf %46 : vector<16x1152xf32> to vector<16x1152xbf16>
    %c0_63 = arith.constant 0 : index
    %c0_64 = arith.constant 0 : index
    %c0_65 = arith.constant 0 : index
    %48 = vector.load %arg4[%c0_63, %c0_64, %c0_65] : memref<2x16x1152xbf16, #tpu.memory_space<vmem>>, vector<1x16x1152xbf16>
    %49 = vector.shape_cast %48 : vector<1x16x1152xbf16> to vector<16x1152xbf16>
    %50 = vector.shape_cast %47 : vector<16x1152xbf16> to vector<1x16x1152xbf16>
    tpu.vector_store %arg4[%c0_63, %c0_64, %c0_65], %50 {strides = array<i32>} : memref<2x16x1152xbf16, #tpu.memory_space<vmem>>, vector<1x16x1152xbf16>,
    %c1_66 = arith.constant 1 : index
    %c0_67 = arith.constant 0 : index
    %c0_68 = arith.constant 0 : index
    %c0_69 = arith.constant 0 : index
    %51 = vector.load %arg1[%c1_66, %c0_67, %c0_68, %c0_69] : memref<2x4x8x1224xbf16, #tpu.memory_space<vmem>>, vector<1x1x8x1152xbf16>
    %52 = vector.shape_cast %51 : vector<1x1x8x1152xbf16> to vector<8x1152xbf16>
    %c1_70 = arith.constant 1 : index
    %c0_71 = arith.constant 0 : index
    %c0_72 = arith.constant 0 : index
    %c1_73 = arith.constant 1 : index
    %53 = vector.load %arg1[%c1_70, %c0_71, %c0_72, %c1_73] : memref<2x4x8x1224xbf16, #tpu.memory_space<vmem>>, vector<1x1x8x1152xbf16>
    %54 = vector.shape_cast %53 : vector<1x1x8x1152xbf16> to vector<8x1152xbf16>
    %c1_74 = arith.constant 1 : index
    %c0_75 = arith.constant 0 : index
    %c0_76 = arith.constant 0 : index
    %c36_77 = arith.constant 36 : index
    %55 = vector.load %arg1[%c1_74, %c0_75, %c0_76, %c36_77] : memref<2x4x8x1224xbf16, #tpu.memory_space<vmem>>, vector<1x1x8x1152xbf16>
    %56 = vector.shape_cast %55 : vector<1x1x8x1152xbf16> to vector<8x1152xbf16>
    %c1_78 = arith.constant 1 : index
    %c0_79 = arith.constant 0 : index
    %c0_80 = arith.constant 0 : index
    %c37_81 = arith.constant 37 : index
    %57 = vector.load %arg1[%c1_78, %c0_79, %c0_80, %c37_81] : memref<2x4x8x1224xbf16, #tpu.memory_space<vmem>>, vector<1x1x8x1152xbf16>
    %58 = vector.shape_cast %57 : vector<1x1x8x1152xbf16> to vector<8x1152xbf16>
    %c1_82 = arith.constant 1 : index
    %c1_83 = arith.constant 1 : index
    %c0_84 = arith.constant 0 : index
    %c0_85 = arith.constant 0 : index
    %59 = vector.load %arg1[%c1_82, %c1_83, %c0_84, %c0_85] : memref<2x4x8x1224xbf16, #tpu.memory_space<vmem>>, vector<1x1x8x1152xbf16>
    %60 = vector.shape_cast %59 : vector<1x1x8x1152xbf16> to vector<8x1152xbf16>
    %c1_86 = arith.constant 1 : index
    %c1_87 = arith.constant 1 : index
    %c0_88 = arith.constant 0 : index
    %c1_89 = arith.constant 1 : index
    %61 = vector.load %arg1[%c1_86, %c1_87, %c0_88, %c1_89] : memref<2x4x8x1224xbf16, #tpu.memory_space<vmem>>, vector<1x1x8x1152xbf16>
    %62 = vector.shape_cast %61 : vector<1x1x8x1152xbf16> to vector<8x1152xbf16>
    %c1_90 = arith.constant 1 : index
    %c1_91 = arith.constant 1 : index
    %c0_92 = arith.constant 0 : index
    %c36_93 = arith.constant 36 : index
    %63 = vector.load %arg1[%c1_90, %c1_91, %c0_92, %c36_93] : memref<2x4x8x1224xbf16, #tpu.memory_space<vmem>>, vector<1x1x8x1152xbf16>
    %64 = vector.shape_cast %63 : vector<1x1x8x1152xbf16> to vector<8x1152xbf16>
    %c1_94 = arith.constant 1 : index
    %c1_95 = arith.constant 1 : index
    %c0_96 = arith.constant 0 : index
    %c37_97 = arith.constant 37 : index
    %65 = vector.load %arg1[%c1_94, %c1_95, %c0_96, %c37_97] : memref<2x4x8x1224xbf16, #tpu.memory_space<vmem>>, vector<1x1x8x1152xbf16>
    %66 = vector.shape_cast %65 : vector<1x1x8x1152xbf16> to vector<8x1152xbf16>
    %c1_98 = arith.constant 1 : index
    %c2_99 = arith.constant 2 : index
    %c0_100 = arith.constant 0 : index
    %c0_101 = arith.constant 0 : index
    %67 = vector.load %arg1[%c1_98, %c2_99, %c0_100, %c0_101] : memref<2x4x8x1224xbf16, #tpu.memory_space<vmem>>, vector<1x1x8x1152xbf16>
    %68 = vector.shape_cast %67 : vector<1x1x8x1152xbf16> to vector<8x1152xbf16>
    %c1_102 = arith.constant 1 : index
    %c2_103 = arith.constant 2 : index
    %c0_104 = arith.constant 0 : index
    %c1_105 = arith.constant 1 : index
    %69 = vector.load %arg1[%c1_102, %c2_103, %c0_104, %c1_105] : memref<2x4x8x1224xbf16, #tpu.memory_space<vmem>>, vector<1x1x8x1152xbf16>
    %70 = vector.shape_cast %69 : vector<1x1x8x1152xbf16> to vector<8x1152xbf16>
    %c1_106 = arith.constant 1 : index
    %c2_107 = arith.constant 2 : index
    %c0_108 = arith.constant 0 : index
    %c36_109 = arith.constant 36 : index
    %71 = vector.load %arg1[%c1_106, %c2_107, %c0_108, %c36_109] : memref<2x4x8x1224xbf16, #tpu.memory_space<vmem>>, vector<1x1x8x1152xbf16>
    %72 = vector.shape_cast %71 : vector<1x1x8x1152xbf16> to vector<8x1152xbf16>
    %c1_110 = arith.constant 1 : index
    %c2_111 = arith.constant 2 : index
    %c0_112 = arith.constant 0 : index
    %c37_113 = arith.constant 37 : index
    %73 = vector.load %arg1[%c1_110, %c2_111, %c0_112, %c37_113] : memref<2x4x8x1224xbf16, #tpu.memory_space<vmem>>, vector<1x1x8x1152xbf16>
    %74 = vector.shape_cast %73 : vector<1x1x8x1152xbf16> to vector<8x1152xbf16>
    %c1_114 = arith.constant 1 : index
    %c3_115 = arith.constant 3 : index
    %c0_116 = arith.constant 0 : index
    %c0_117 = arith.constant 0 : index
    %75 = vector.load %arg1[%c1_114, %c3_115, %c0_116, %c0_117] : memref<2x4x8x1224xbf16, #tpu.memory_space<vmem>>, vector<1x1x8x1152xbf16>
    %76 = vector.shape_cast %75 : vector<1x1x8x1152xbf16> to vector<8x1152xbf16>
    %c1_118 = arith.constant 1 : index
    %c3_119 = arith.constant 3 : index
    %c0_120 = arith.constant 0 : index
    %c1_121 = arith.constant 1 : index
    %77 = vector.load %arg1[%c1_118, %c3_119, %c0_120, %c1_121] : memref<2x4x8x1224xbf16, #tpu.memory_space<vmem>>, vector<1x1x8x1152xbf16>
    %78 = vector.shape_cast %77 : vector<1x1x8x1152xbf16> to vector<8x1152xbf16>
    %c1_122 = arith.constant 1 : index
    %c3_123 = arith.constant 3 : index
    %c0_124 = arith.constant 0 : index
    %c36_125 = arith.constant 36 : index
    %79 = vector.load %arg1[%c1_122, %c3_123, %c0_124, %c36_125] : memref<2x4x8x1224xbf16, #tpu.memory_space<vmem>>, vector<1x1x8x1152xbf16>
    %80 = vector.shape_cast %79 : vector<1x1x8x1152xbf16> to vector<8x1152xbf16>
    %c1_126 = arith.constant 1 : index
    %c3_127 = arith.constant 3 : index
    %c0_128 = arith.constant 0 : index
    %c37_129 = arith.constant 37 : index
    %81 = vector.load %arg1[%c1_126, %c3_127, %c0_128, %c37_129] : memref<2x4x8x1224xbf16, #tpu.memory_space<vmem>>, vector<1x1x8x1152xbf16>
    %82 = vector.shape_cast %81 : vector<1x1x8x1152xbf16> to vector<8x1152xbf16>
    %83 = tpu.concatenate %52, %54, %56, %58, %60, %62, %64, %66, %68, %70, %72, %74, %76, %78, %80, %82 in 0 : vector<8x1152xbf16>, vector<8x1152xbf16>, vector<8x1152xbf16>, vector<8x1152xbf16>, vector<8x1152xbf16>, vector<8x1152xbf16>, vector<8x1152xbf16>, vector<8x1152xbf16>, vector<8x1152xbf16>, vector<8x1152xbf16>, vector<8x1152xbf16>, vector<8x1152xbf16>, vector<8x1152xbf16>, vector<8x1152xbf16>, vector<8x1152xbf16>, vector<8x1152xbf16> -> vector<128x1152xbf16>
    %cst_130 = arith.constant dense<0.000000e+00> : vector<64x1152xf32>
    %84 = tpu.matmul %0, %83, %cst_130 {dimension_numbers = #tpu.dot_dimension_numbers<[1], [0], [0], [1], [0, 0, 1, 1], [], []>} : vector<64x128xbf16>, vector<128x1152xbf16>, vector<64x1152xf32> -> vector<64x1152xf32>
    %85 = vector.extract_strided_slice %84 {offsets = [0, 0], sizes = [16, 1152], strides = [1, 1]} : vector<64x1152xf32> to vector<16x1152xf32>
    %86 = vector.extract_strided_slice %84 {offsets = [16, 0], sizes = [16, 1152], strides = [1, 1]} : vector<64x1152xf32> to vector<16x1152xf32>
    %87 = arith.maximumf %85, %86 : vector<16x1152xf32>
    %88 = vector.extract_strided_slice %84 {offsets = [32, 0], sizes = [16, 1152], strides = [1, 1]} : vector<64x1152xf32> to vector<16x1152xf32>
    %89 = vector.extract_strided_slice %84 {offsets = [48, 0], sizes = [16, 1152], strides = [1, 1]} : vector<64x1152xf32> to vector<16x1152xf32>
    %90 = arith.maximumf %88, %89 : vector<16x1152xf32>
    %91 = arith.maximumf %87, %90 : vector<16x1152xf32>
    %92 = vector.broadcast %1 : vector<16x1xf32> to vector<16x1152xf32>
    %93 = arith.addf %91, %92 : vector<16x1152xf32>
    %cst_131 = arith.constant 0.000000e+00 : f32
    %94 = vector.broadcast %cst_131 : f32 to vector<16x1152xf32>
    %95 = arith.maximumf %93, %94 : vector<16x1152xf32>
    %96 = arith.truncf %95 : vector<16x1152xf32> to vector<16x1152xbf16>
    %c1_132 = arith.constant 1 : index
    %c0_133 = arith.constant 0 : index
    %c0_134 = arith.constant 0 : index
    %97 = vector.load %arg4[%c1_132, %c0_133, %c0_134] : memref<2x16x1152xbf16, #tpu.memory_space<vmem>>, vector<1x16x1152xbf16>
    %98 = vector.shape_cast %97 : vector<1x16x1152xbf16> to vector<16x1152xbf16>
    %99 = vector.shape_cast %96 : vector<16x1152xbf16> to vector<1x16x1152xbf16>
    tpu.vector_store %arg4[%c1_132, %c0_133, %c0_134], %99 {strides = array<i32>} : memref<2x16x1152xbf16, #tpu.memory_space<vmem>>, vector<1x16x1152xbf16>,
    return
  }
  func.func @transform_0(%arg0: i32) -> (i32, i32, i32, i32) {
    %c0_i32 = arith.constant 0 : i32
    %c0_i32_0 = arith.constant 0 : i32
    %c0_i32_1 = arith.constant 0 : i32
    %c0_i32_2 = arith.constant 0 : i32
    return %arg0, %c0_i32, %c0_i32_0, %c0_i32_1 : i32, i32, i32, i32
  }
  func.func @transform_1(%arg0: i32) -> (i32, i32) {
    %c0_i32 = arith.constant 0 : i32
    %c0_i32_0 = arith.constant 0 : i32
    %c0_i32_1 = arith.constant 0 : i32
    return %c0_i32, %c0_i32_0 : i32, i32
  }
  func.func @transform_2(%arg0: i32) -> (i32, i32) {
    %c0_i32 = arith.constant 0 : i32
    %c0_i32_0 = arith.constant 0 : i32
    %c0_i32_1 = arith.constant 0 : i32
    return %c0_i32, %c0_i32_0 : i32, i32
  }
  func.func @transform_3(%arg0: i32) -> (i32, i32, i32) {
    %c0_i32 = arith.constant 0 : i32
    %c0_i32_0 = arith.constant 0 : i32
    %c0_i32_1 = arith.constant 0 : i32
    return %arg0, %c0_i32, %c0_i32_0 : i32, i32, i32
  }
}

module attributes {stable_mosaic.version = 11 : i64} {
  func.func @_conv_pool_kernel(%arg0: i32, %arg1: memref<2x4x16x432xbf16, #tpu.memory_space<vmem>>, %arg2: memref<128x256xbf16, #tpu.memory_space<vmem>>, %arg3: memref<32x1xf32, #tpu.memory_space<vmem>>, %arg4: memref<2x32x384xbf16, #tpu.memory_space<vmem>>) attributes {dimension_semantics = [#tpu.dimension_semantics<parallel>], iteration_bounds = array<i64: 2>, scalar_prefetch = 0 : i64, scratch_operands = 0 : i64, tpu.core_type = #tpu.core_type<tc>, window_params = [{transform_indices = @transform_0, window_bounds = array<i64: 2, 4, 16, 432>}, {pipeline_mode = #tpu.pipeline_mode<synchronous>, transform_indices = @transform_1, window_bounds = array<i64: 128, 256>}, {pipeline_mode = #tpu.pipeline_mode<synchronous>, transform_indices = @transform_2, window_bounds = array<i64: 32, 1>}, {transform_indices = @transform_3, window_bounds = array<i64: 2, 32, 384>}]} {
    %c0 = arith.constant 0 : index
    %c0_0 = arith.constant 0 : index
    %0 = vector.load %arg2[%c0, %c0_0] : memref<128x256xbf16, #tpu.memory_space<vmem>>, vector<128x256xbf16>
    %c0_1 = arith.constant 0 : index
    %c0_2 = arith.constant 0 : index
    %1 = vector.load %arg3[%c0_1, %c0_2] : memref<32x1xf32, #tpu.memory_space<vmem>>, vector<32x1xf32>
    %c0_3 = arith.constant 0 : index
    %c0_4 = arith.constant 0 : index
    %c0_5 = arith.constant 0 : index
    %c0_6 = arith.constant 0 : index
    %2 = vector.load %arg1[%c0_3, %c0_4, %c0_5, %c0_6] : memref<2x4x16x432xbf16, #tpu.memory_space<vmem>>, vector<1x1x16x384xbf16>
    %3 = vector.shape_cast %2 : vector<1x1x16x384xbf16> to vector<16x384xbf16>
    %c0_7 = arith.constant 0 : index
    %c0_8 = arith.constant 0 : index
    %c0_9 = arith.constant 0 : index
    %c1 = arith.constant 1 : index
    %4 = vector.load %arg1[%c0_7, %c0_8, %c0_9, %c1] : memref<2x4x16x432xbf16, #tpu.memory_space<vmem>>, vector<1x1x16x384xbf16>
    %5 = vector.shape_cast %4 : vector<1x1x16x384xbf16> to vector<16x384xbf16>
    %c0_10 = arith.constant 0 : index
    %c0_11 = arith.constant 0 : index
    %c0_12 = arith.constant 0 : index
    %c24 = arith.constant 24 : index
    %6 = vector.load %arg1[%c0_10, %c0_11, %c0_12, %c24] : memref<2x4x16x432xbf16, #tpu.memory_space<vmem>>, vector<1x1x16x384xbf16>
    %7 = vector.shape_cast %6 : vector<1x1x16x384xbf16> to vector<16x384xbf16>
    %c0_13 = arith.constant 0 : index
    %c0_14 = arith.constant 0 : index
    %c0_15 = arith.constant 0 : index
    %c25 = arith.constant 25 : index
    %8 = vector.load %arg1[%c0_13, %c0_14, %c0_15, %c25] : memref<2x4x16x432xbf16, #tpu.memory_space<vmem>>, vector<1x1x16x384xbf16>
    %9 = vector.shape_cast %8 : vector<1x1x16x384xbf16> to vector<16x384xbf16>
    %c0_16 = arith.constant 0 : index
    %c1_17 = arith.constant 1 : index
    %c0_18 = arith.constant 0 : index
    %c0_19 = arith.constant 0 : index
    %10 = vector.load %arg1[%c0_16, %c1_17, %c0_18, %c0_19] : memref<2x4x16x432xbf16, #tpu.memory_space<vmem>>, vector<1x1x16x384xbf16>
    %11 = vector.shape_cast %10 : vector<1x1x16x384xbf16> to vector<16x384xbf16>
    %c0_20 = arith.constant 0 : index
    %c1_21 = arith.constant 1 : index
    %c0_22 = arith.constant 0 : index
    %c1_23 = arith.constant 1 : index
    %12 = vector.load %arg1[%c0_20, %c1_21, %c0_22, %c1_23] : memref<2x4x16x432xbf16, #tpu.memory_space<vmem>>, vector<1x1x16x384xbf16>
    %13 = vector.shape_cast %12 : vector<1x1x16x384xbf16> to vector<16x384xbf16>
    %c0_24 = arith.constant 0 : index
    %c1_25 = arith.constant 1 : index
    %c0_26 = arith.constant 0 : index
    %c24_27 = arith.constant 24 : index
    %14 = vector.load %arg1[%c0_24, %c1_25, %c0_26, %c24_27] : memref<2x4x16x432xbf16, #tpu.memory_space<vmem>>, vector<1x1x16x384xbf16>
    %15 = vector.shape_cast %14 : vector<1x1x16x384xbf16> to vector<16x384xbf16>
    %c0_28 = arith.constant 0 : index
    %c1_29 = arith.constant 1 : index
    %c0_30 = arith.constant 0 : index
    %c25_31 = arith.constant 25 : index
    %16 = vector.load %arg1[%c0_28, %c1_29, %c0_30, %c25_31] : memref<2x4x16x432xbf16, #tpu.memory_space<vmem>>, vector<1x1x16x384xbf16>
    %17 = vector.shape_cast %16 : vector<1x1x16x384xbf16> to vector<16x384xbf16>
    %c0_32 = arith.constant 0 : index
    %c2 = arith.constant 2 : index
    %c0_33 = arith.constant 0 : index
    %c0_34 = arith.constant 0 : index
    %18 = vector.load %arg1[%c0_32, %c2, %c0_33, %c0_34] : memref<2x4x16x432xbf16, #tpu.memory_space<vmem>>, vector<1x1x16x384xbf16>
    %19 = vector.shape_cast %18 : vector<1x1x16x384xbf16> to vector<16x384xbf16>
    %c0_35 = arith.constant 0 : index
    %c2_36 = arith.constant 2 : index
    %c0_37 = arith.constant 0 : index
    %c1_38 = arith.constant 1 : index
    %20 = vector.load %arg1[%c0_35, %c2_36, %c0_37, %c1_38] : memref<2x4x16x432xbf16, #tpu.memory_space<vmem>>, vector<1x1x16x384xbf16>
    %21 = vector.shape_cast %20 : vector<1x1x16x384xbf16> to vector<16x384xbf16>
    %c0_39 = arith.constant 0 : index
    %c2_40 = arith.constant 2 : index
    %c0_41 = arith.constant 0 : index
    %c24_42 = arith.constant 24 : index
    %22 = vector.load %arg1[%c0_39, %c2_40, %c0_41, %c24_42] : memref<2x4x16x432xbf16, #tpu.memory_space<vmem>>, vector<1x1x16x384xbf16>
    %23 = vector.shape_cast %22 : vector<1x1x16x384xbf16> to vector<16x384xbf16>
    %c0_43 = arith.constant 0 : index
    %c2_44 = arith.constant 2 : index
    %c0_45 = arith.constant 0 : index
    %c25_46 = arith.constant 25 : index
    %24 = vector.load %arg1[%c0_43, %c2_44, %c0_45, %c25_46] : memref<2x4x16x432xbf16, #tpu.memory_space<vmem>>, vector<1x1x16x384xbf16>
    %25 = vector.shape_cast %24 : vector<1x1x16x384xbf16> to vector<16x384xbf16>
    %c0_47 = arith.constant 0 : index
    %c3 = arith.constant 3 : index
    %c0_48 = arith.constant 0 : index
    %c0_49 = arith.constant 0 : index
    %26 = vector.load %arg1[%c0_47, %c3, %c0_48, %c0_49] : memref<2x4x16x432xbf16, #tpu.memory_space<vmem>>, vector<1x1x16x384xbf16>
    %27 = vector.shape_cast %26 : vector<1x1x16x384xbf16> to vector<16x384xbf16>
    %c0_50 = arith.constant 0 : index
    %c3_51 = arith.constant 3 : index
    %c0_52 = arith.constant 0 : index
    %c1_53 = arith.constant 1 : index
    %28 = vector.load %arg1[%c0_50, %c3_51, %c0_52, %c1_53] : memref<2x4x16x432xbf16, #tpu.memory_space<vmem>>, vector<1x1x16x384xbf16>
    %29 = vector.shape_cast %28 : vector<1x1x16x384xbf16> to vector<16x384xbf16>
    %c0_54 = arith.constant 0 : index
    %c3_55 = arith.constant 3 : index
    %c0_56 = arith.constant 0 : index
    %c24_57 = arith.constant 24 : index
    %30 = vector.load %arg1[%c0_54, %c3_55, %c0_56, %c24_57] : memref<2x4x16x432xbf16, #tpu.memory_space<vmem>>, vector<1x1x16x384xbf16>
    %31 = vector.shape_cast %30 : vector<1x1x16x384xbf16> to vector<16x384xbf16>
    %c0_58 = arith.constant 0 : index
    %c3_59 = arith.constant 3 : index
    %c0_60 = arith.constant 0 : index
    %c25_61 = arith.constant 25 : index
    %32 = vector.load %arg1[%c0_58, %c3_59, %c0_60, %c25_61] : memref<2x4x16x432xbf16, #tpu.memory_space<vmem>>, vector<1x1x16x384xbf16>
    %33 = vector.shape_cast %32 : vector<1x1x16x384xbf16> to vector<16x384xbf16>
    %34 = tpu.concatenate %3, %5, %7, %9, %11, %13, %15, %17, %19, %21, %23, %25, %27, %29, %31, %33 in 0 : vector<16x384xbf16>, vector<16x384xbf16>, vector<16x384xbf16>, vector<16x384xbf16>, vector<16x384xbf16>, vector<16x384xbf16>, vector<16x384xbf16>, vector<16x384xbf16>, vector<16x384xbf16>, vector<16x384xbf16>, vector<16x384xbf16>, vector<16x384xbf16>, vector<16x384xbf16>, vector<16x384xbf16>, vector<16x384xbf16>, vector<16x384xbf16> -> vector<256x384xbf16>
    %cst = arith.constant dense<0.000000e+00> : vector<128x384xf32>
    %35 = tpu.matmul %0, %34, %cst {dimension_numbers = #tpu.dot_dimension_numbers<[1], [0], [0], [1], [0, 0, 1, 1], [], []>} : vector<128x256xbf16>, vector<256x384xbf16>, vector<128x384xf32> -> vector<128x384xf32>
    %36 = vector.extract_strided_slice %35 {offsets = [0, 0], sizes = [32, 384], strides = [1, 1]} : vector<128x384xf32> to vector<32x384xf32>
    %37 = vector.extract_strided_slice %35 {offsets = [32, 0], sizes = [32, 384], strides = [1, 1]} : vector<128x384xf32> to vector<32x384xf32>
    %38 = arith.maximumf %36, %37 : vector<32x384xf32>
    %39 = vector.extract_strided_slice %35 {offsets = [64, 0], sizes = [32, 384], strides = [1, 1]} : vector<128x384xf32> to vector<32x384xf32>
    %40 = vector.extract_strided_slice %35 {offsets = [96, 0], sizes = [32, 384], strides = [1, 1]} : vector<128x384xf32> to vector<32x384xf32>
    %41 = arith.maximumf %39, %40 : vector<32x384xf32>
    %42 = arith.maximumf %38, %41 : vector<32x384xf32>
    %43 = vector.broadcast %1 : vector<32x1xf32> to vector<32x384xf32>
    %44 = arith.addf %42, %43 : vector<32x384xf32>
    %cst_62 = arith.constant 0.000000e+00 : f32
    %45 = vector.broadcast %cst_62 : f32 to vector<32x384xf32>
    %46 = arith.maximumf %44, %45 : vector<32x384xf32>
    %47 = arith.truncf %46 : vector<32x384xf32> to vector<32x384xbf16>
    %c0_63 = arith.constant 0 : index
    %c0_64 = arith.constant 0 : index
    %c0_65 = arith.constant 0 : index
    %48 = vector.load %arg4[%c0_63, %c0_64, %c0_65] : memref<2x32x384xbf16, #tpu.memory_space<vmem>>, vector<1x32x384xbf16>
    %49 = vector.shape_cast %48 : vector<1x32x384xbf16> to vector<32x384xbf16>
    %50 = vector.shape_cast %47 : vector<32x384xbf16> to vector<1x32x384xbf16>
    tpu.vector_store %arg4[%c0_63, %c0_64, %c0_65], %50 {strides = array<i32>} : memref<2x32x384xbf16, #tpu.memory_space<vmem>>, vector<1x32x384xbf16>,
    %c1_66 = arith.constant 1 : index
    %c0_67 = arith.constant 0 : index
    %c0_68 = arith.constant 0 : index
    %c0_69 = arith.constant 0 : index
    %51 = vector.load %arg1[%c1_66, %c0_67, %c0_68, %c0_69] : memref<2x4x16x432xbf16, #tpu.memory_space<vmem>>, vector<1x1x16x384xbf16>
    %52 = vector.shape_cast %51 : vector<1x1x16x384xbf16> to vector<16x384xbf16>
    %c1_70 = arith.constant 1 : index
    %c0_71 = arith.constant 0 : index
    %c0_72 = arith.constant 0 : index
    %c1_73 = arith.constant 1 : index
    %53 = vector.load %arg1[%c1_70, %c0_71, %c0_72, %c1_73] : memref<2x4x16x432xbf16, #tpu.memory_space<vmem>>, vector<1x1x16x384xbf16>
    %54 = vector.shape_cast %53 : vector<1x1x16x384xbf16> to vector<16x384xbf16>
    %c1_74 = arith.constant 1 : index
    %c0_75 = arith.constant 0 : index
    %c0_76 = arith.constant 0 : index
    %c24_77 = arith.constant 24 : index
    %55 = vector.load %arg1[%c1_74, %c0_75, %c0_76, %c24_77] : memref<2x4x16x432xbf16, #tpu.memory_space<vmem>>, vector<1x1x16x384xbf16>
    %56 = vector.shape_cast %55 : vector<1x1x16x384xbf16> to vector<16x384xbf16>
    %c1_78 = arith.constant 1 : index
    %c0_79 = arith.constant 0 : index
    %c0_80 = arith.constant 0 : index
    %c25_81 = arith.constant 25 : index
    %57 = vector.load %arg1[%c1_78, %c0_79, %c0_80, %c25_81] : memref<2x4x16x432xbf16, #tpu.memory_space<vmem>>, vector<1x1x16x384xbf16>
    %58 = vector.shape_cast %57 : vector<1x1x16x384xbf16> to vector<16x384xbf16>
    %c1_82 = arith.constant 1 : index
    %c1_83 = arith.constant 1 : index
    %c0_84 = arith.constant 0 : index
    %c0_85 = arith.constant 0 : index
    %59 = vector.load %arg1[%c1_82, %c1_83, %c0_84, %c0_85] : memref<2x4x16x432xbf16, #tpu.memory_space<vmem>>, vector<1x1x16x384xbf16>
    %60 = vector.shape_cast %59 : vector<1x1x16x384xbf16> to vector<16x384xbf16>
    %c1_86 = arith.constant 1 : index
    %c1_87 = arith.constant 1 : index
    %c0_88 = arith.constant 0 : index
    %c1_89 = arith.constant 1 : index
    %61 = vector.load %arg1[%c1_86, %c1_87, %c0_88, %c1_89] : memref<2x4x16x432xbf16, #tpu.memory_space<vmem>>, vector<1x1x16x384xbf16>
    %62 = vector.shape_cast %61 : vector<1x1x16x384xbf16> to vector<16x384xbf16>
    %c1_90 = arith.constant 1 : index
    %c1_91 = arith.constant 1 : index
    %c0_92 = arith.constant 0 : index
    %c24_93 = arith.constant 24 : index
    %63 = vector.load %arg1[%c1_90, %c1_91, %c0_92, %c24_93] : memref<2x4x16x432xbf16, #tpu.memory_space<vmem>>, vector<1x1x16x384xbf16>
    %64 = vector.shape_cast %63 : vector<1x1x16x384xbf16> to vector<16x384xbf16>
    %c1_94 = arith.constant 1 : index
    %c1_95 = arith.constant 1 : index
    %c0_96 = arith.constant 0 : index
    %c25_97 = arith.constant 25 : index
    %65 = vector.load %arg1[%c1_94, %c1_95, %c0_96, %c25_97] : memref<2x4x16x432xbf16, #tpu.memory_space<vmem>>, vector<1x1x16x384xbf16>
    %66 = vector.shape_cast %65 : vector<1x1x16x384xbf16> to vector<16x384xbf16>
    %c1_98 = arith.constant 1 : index
    %c2_99 = arith.constant 2 : index
    %c0_100 = arith.constant 0 : index
    %c0_101 = arith.constant 0 : index
    %67 = vector.load %arg1[%c1_98, %c2_99, %c0_100, %c0_101] : memref<2x4x16x432xbf16, #tpu.memory_space<vmem>>, vector<1x1x16x384xbf16>
    %68 = vector.shape_cast %67 : vector<1x1x16x384xbf16> to vector<16x384xbf16>
    %c1_102 = arith.constant 1 : index
    %c2_103 = arith.constant 2 : index
    %c0_104 = arith.constant 0 : index
    %c1_105 = arith.constant 1 : index
    %69 = vector.load %arg1[%c1_102, %c2_103, %c0_104, %c1_105] : memref<2x4x16x432xbf16, #tpu.memory_space<vmem>>, vector<1x1x16x384xbf16>
    %70 = vector.shape_cast %69 : vector<1x1x16x384xbf16> to vector<16x384xbf16>
    %c1_106 = arith.constant 1 : index
    %c2_107 = arith.constant 2 : index
    %c0_108 = arith.constant 0 : index
    %c24_109 = arith.constant 24 : index
    %71 = vector.load %arg1[%c1_106, %c2_107, %c0_108, %c24_109] : memref<2x4x16x432xbf16, #tpu.memory_space<vmem>>, vector<1x1x16x384xbf16>
    %72 = vector.shape_cast %71 : vector<1x1x16x384xbf16> to vector<16x384xbf16>
    %c1_110 = arith.constant 1 : index
    %c2_111 = arith.constant 2 : index
    %c0_112 = arith.constant 0 : index
    %c25_113 = arith.constant 25 : index
    %73 = vector.load %arg1[%c1_110, %c2_111, %c0_112, %c25_113] : memref<2x4x16x432xbf16, #tpu.memory_space<vmem>>, vector<1x1x16x384xbf16>
    %74 = vector.shape_cast %73 : vector<1x1x16x384xbf16> to vector<16x384xbf16>
    %c1_114 = arith.constant 1 : index
    %c3_115 = arith.constant 3 : index
    %c0_116 = arith.constant 0 : index
    %c0_117 = arith.constant 0 : index
    %75 = vector.load %arg1[%c1_114, %c3_115, %c0_116, %c0_117] : memref<2x4x16x432xbf16, #tpu.memory_space<vmem>>, vector<1x1x16x384xbf16>
    %76 = vector.shape_cast %75 : vector<1x1x16x384xbf16> to vector<16x384xbf16>
    %c1_118 = arith.constant 1 : index
    %c3_119 = arith.constant 3 : index
    %c0_120 = arith.constant 0 : index
    %c1_121 = arith.constant 1 : index
    %77 = vector.load %arg1[%c1_118, %c3_119, %c0_120, %c1_121] : memref<2x4x16x432xbf16, #tpu.memory_space<vmem>>, vector<1x1x16x384xbf16>
    %78 = vector.shape_cast %77 : vector<1x1x16x384xbf16> to vector<16x384xbf16>
    %c1_122 = arith.constant 1 : index
    %c3_123 = arith.constant 3 : index
    %c0_124 = arith.constant 0 : index
    %c24_125 = arith.constant 24 : index
    %79 = vector.load %arg1[%c1_122, %c3_123, %c0_124, %c24_125] : memref<2x4x16x432xbf16, #tpu.memory_space<vmem>>, vector<1x1x16x384xbf16>
    %80 = vector.shape_cast %79 : vector<1x1x16x384xbf16> to vector<16x384xbf16>
    %c1_126 = arith.constant 1 : index
    %c3_127 = arith.constant 3 : index
    %c0_128 = arith.constant 0 : index
    %c25_129 = arith.constant 25 : index
    %81 = vector.load %arg1[%c1_126, %c3_127, %c0_128, %c25_129] : memref<2x4x16x432xbf16, #tpu.memory_space<vmem>>, vector<1x1x16x384xbf16>
    %82 = vector.shape_cast %81 : vector<1x1x16x384xbf16> to vector<16x384xbf16>
    %83 = tpu.concatenate %52, %54, %56, %58, %60, %62, %64, %66, %68, %70, %72, %74, %76, %78, %80, %82 in 0 : vector<16x384xbf16>, vector<16x384xbf16>, vector<16x384xbf16>, vector<16x384xbf16>, vector<16x384xbf16>, vector<16x384xbf16>, vector<16x384xbf16>, vector<16x384xbf16>, vector<16x384xbf16>, vector<16x384xbf16>, vector<16x384xbf16>, vector<16x384xbf16>, vector<16x384xbf16>, vector<16x384xbf16>, vector<16x384xbf16>, vector<16x384xbf16> -> vector<256x384xbf16>
    %cst_130 = arith.constant dense<0.000000e+00> : vector<128x384xf32>
    %84 = tpu.matmul %0, %83, %cst_130 {dimension_numbers = #tpu.dot_dimension_numbers<[1], [0], [0], [1], [0, 0, 1, 1], [], []>} : vector<128x256xbf16>, vector<256x384xbf16>, vector<128x384xf32> -> vector<128x384xf32>
    %85 = vector.extract_strided_slice %84 {offsets = [0, 0], sizes = [32, 384], strides = [1, 1]} : vector<128x384xf32> to vector<32x384xf32>
    %86 = vector.extract_strided_slice %84 {offsets = [32, 0], sizes = [32, 384], strides = [1, 1]} : vector<128x384xf32> to vector<32x384xf32>
    %87 = arith.maximumf %85, %86 : vector<32x384xf32>
    %88 = vector.extract_strided_slice %84 {offsets = [64, 0], sizes = [32, 384], strides = [1, 1]} : vector<128x384xf32> to vector<32x384xf32>
    %89 = vector.extract_strided_slice %84 {offsets = [96, 0], sizes = [32, 384], strides = [1, 1]} : vector<128x384xf32> to vector<32x384xf32>
    %90 = arith.maximumf %88, %89 : vector<32x384xf32>
    %91 = arith.maximumf %87, %90 : vector<32x384xf32>
    %92 = vector.broadcast %1 : vector<32x1xf32> to vector<32x384xf32>
    %93 = arith.addf %91, %92 : vector<32x384xf32>
    %cst_131 = arith.constant 0.000000e+00 : f32
    %94 = vector.broadcast %cst_131 : f32 to vector<32x384xf32>
    %95 = arith.maximumf %93, %94 : vector<32x384xf32>
    %96 = arith.truncf %95 : vector<32x384xf32> to vector<32x384xbf16>
    %c1_132 = arith.constant 1 : index
    %c0_133 = arith.constant 0 : index
    %c0_134 = arith.constant 0 : index
    %97 = vector.load %arg4[%c1_132, %c0_133, %c0_134] : memref<2x32x384xbf16, #tpu.memory_space<vmem>>, vector<1x32x384xbf16>
    %98 = vector.shape_cast %97 : vector<1x32x384xbf16> to vector<32x384xbf16>
    %99 = vector.shape_cast %96 : vector<32x384xbf16> to vector<1x32x384xbf16>
    tpu.vector_store %arg4[%c1_132, %c0_133, %c0_134], %99 {strides = array<i32>} : memref<2x32x384xbf16, #tpu.memory_space<vmem>>, vector<1x32x384xbf16>,
    return
  }
  func.func @transform_0(%arg0: i32) -> (i32, i32, i32, i32) {
    %c0_i32 = arith.constant 0 : i32
    %c0_i32_0 = arith.constant 0 : i32
    %c0_i32_1 = arith.constant 0 : i32
    %c0_i32_2 = arith.constant 0 : i32
    return %arg0, %c0_i32, %c0_i32_0, %c0_i32_1 : i32, i32, i32, i32
  }
  func.func @transform_1(%arg0: i32) -> (i32, i32) {
    %c0_i32 = arith.constant 0 : i32
    %c0_i32_0 = arith.constant 0 : i32
    %c0_i32_1 = arith.constant 0 : i32
    return %c0_i32, %c0_i32_0 : i32, i32
  }
  func.func @transform_2(%arg0: i32) -> (i32, i32) {
    %c0_i32 = arith.constant 0 : i32
    %c0_i32_0 = arith.constant 0 : i32
    %c0_i32_1 = arith.constant 0 : i32
    return %c0_i32, %c0_i32_0 : i32, i32
  }
  func.func @transform_3(%arg0: i32) -> (i32, i32, i32) {
    %c0_i32 = arith.constant 0 : i32
    %c0_i32_0 = arith.constant 0 : i32
    %c0_i32_1 = arith.constant 0 : i32
    return %arg0, %c0_i32, %c0_i32_0 : i32, i32, i32
  }
}

module attributes {stable_mosaic.version = 11 : i64} {
  func.func @_fc_head_kernel(%arg0: i32, %arg1: memref<8x8192xbf16, #tpu.memory_space<vmem>>, %arg2: memref<8192x64xbf16, #tpu.memory_space<vmem>>, %arg3: memref<1x64xf32, #tpu.memory_space<vmem>>, %arg4: memref<64x128xbf16, #tpu.memory_space<vmem>>, %arg5: memref<1x128xf32, #tpu.memory_space<vmem>>, %arg6: memref<8x128xf32, #tpu.memory_space<vmem>>) attributes {dimension_semantics = [#tpu.dimension_semantics<parallel>], iteration_bounds = array<i64: 1>, scalar_prefetch = 0 : i64, scratch_operands = 0 : i64, tpu.core_type = #tpu.core_type<tc>, window_params = [{transform_indices = @transform_0, window_bounds = array<i64: 8, 8192>}, {pipeline_mode = #tpu.pipeline_mode<synchronous>, transform_indices = @transform_1, window_bounds = array<i64: 8192, 64>}, {pipeline_mode = #tpu.pipeline_mode<synchronous>, transform_indices = @transform_2, window_bounds = array<i64: 1, 64>}, {pipeline_mode = #tpu.pipeline_mode<synchronous>, transform_indices = @transform_3, window_bounds = array<i64: 64, 128>}, {pipeline_mode = #tpu.pipeline_mode<synchronous>, transform_indices = @transform_4, window_bounds = array<i64: 1, 128>}, {transform_indices = @transform_5, window_bounds = array<i64: 8, 128>}]} {
    %c0 = arith.constant 0 : index
    %c0_0 = arith.constant 0 : index
    %0 = vector.load %arg1[%c0, %c0_0] : memref<8x8192xbf16, #tpu.memory_space<vmem>>, vector<8x8192xbf16>
    %c0_1 = arith.constant 0 : index
    %c0_2 = arith.constant 0 : index
    %1 = vector.load %arg2[%c0_1, %c0_2] : memref<8192x64xbf16, #tpu.memory_space<vmem>>, vector<8192x64xbf16>
    %cst = arith.constant dense<0.000000e+00> : vector<8x64xf32>
    %2 = tpu.matmul %0, %1, %cst {dimension_numbers = #tpu.dot_dimension_numbers<[1], [0], [0], [1], [0, 0, 1, 1], [], []>} : vector<8x8192xbf16>, vector<8192x64xbf16>, vector<8x64xf32> -> vector<8x64xf32>
    %c0_3 = arith.constant 0 : index
    %c0_4 = arith.constant 0 : index
    %3 = vector.load %arg3[%c0_3, %c0_4] : memref<1x64xf32, #tpu.memory_space<vmem>>, vector<1x64xf32>
    %4 = vector.broadcast %3 : vector<1x64xf32> to vector<8x64xf32>
    %5 = arith.addf %2, %4 : vector<8x64xf32>
    %cst_5 = arith.constant 0.000000e+00 : f32
    %6 = vector.broadcast %cst_5 : f32 to vector<8x64xf32>
    %7 = arith.maximumf %5, %6 : vector<8x64xf32>
    %8 = arith.truncf %7 : vector<8x64xf32> to vector<8x64xbf16>
    %c0_6 = arith.constant 0 : index
    %c0_7 = arith.constant 0 : index
    %9 = vector.load %arg4[%c0_6, %c0_7] : memref<64x128xbf16, #tpu.memory_space<vmem>>, vector<64x128xbf16>
    %cst_8 = arith.constant dense<0.000000e+00> : vector<8x128xf32>
    %10 = tpu.matmul %8, %9, %cst_8 {dimension_numbers = #tpu.dot_dimension_numbers<[1], [0], [0], [1], [0, 0, 1, 1], [], []>} : vector<8x64xbf16>, vector<64x128xbf16>, vector<8x128xf32> -> vector<8x128xf32>
    %c0_9 = arith.constant 0 : index
    %c0_10 = arith.constant 0 : index
    %11 = vector.load %arg5[%c0_9, %c0_10] : memref<1x128xf32, #tpu.memory_space<vmem>>, vector<1x128xf32>
    %12 = vector.broadcast %11 : vector<1x128xf32> to vector<8x128xf32>
    %13 = arith.addf %10, %12 : vector<8x128xf32>
    %14 = arith.negf %13 : vector<8x128xf32>
    %15 = math.exp %14 : vector<8x128xf32>
    %cst_11 = arith.constant 1.000000e+00 : f32
    %16 = vector.broadcast %cst_11 : f32 to vector<8x128xf32>
    %17 = arith.addf %16, %15 : vector<8x128xf32>
    %18 = arith.divf %16, %17 : vector<8x128xf32>
    %c0_12 = arith.constant 0 : index
    %c0_13 = arith.constant 0 : index
    %19 = vector.load %arg6[%c0_12, %c0_13] : memref<8x128xf32, #tpu.memory_space<vmem>>, vector<8x128xf32>
    tpu.vector_store %arg6[%c0_12, %c0_13], %18 {strides = array<i32>} : memref<8x128xf32, #tpu.memory_space<vmem>>, vector<8x128xf32>,
    return
  }
  func.func @transform_0(%arg0: i32) -> (i32, i32) {
    %c0_i32 = arith.constant 0 : i32
    %c0_i32_0 = arith.constant 0 : i32
    return %arg0, %c0_i32 : i32, i32
  }
  func.func @transform_1(%arg0: i32) -> (i32, i32) {
    %c0_i32 = arith.constant 0 : i32
    %c0_i32_0 = arith.constant 0 : i32
    %c0_i32_1 = arith.constant 0 : i32
    return %c0_i32, %c0_i32_0 : i32, i32
  }
  func.func @transform_2(%arg0: i32) -> (i32, i32) {
    %c0_i32 = arith.constant 0 : i32
    %c0_i32_0 = arith.constant 0 : i32
    %c0_i32_1 = arith.constant 0 : i32
    return %c0_i32, %c0_i32_0 : i32, i32
  }
  func.func @transform_3(%arg0: i32) -> (i32, i32) {
    %c0_i32 = arith.constant 0 : i32
    %c0_i32_0 = arith.constant 0 : i32
    %c0_i32_1 = arith.constant 0 : i32
    return %c0_i32, %c0_i32_0 : i32, i32
  }
  func.func @transform_4(%arg0: i32) -> (i32, i32) {
    %c0_i32 = arith.constant 0 : i32
    %c0_i32_0 = arith.constant 0 : i32
    %c0_i32_1 = arith.constant 0 : i32
    return %c0_i32, %c0_i32_0 : i32, i32
  }
  func.func @transform_5(%arg0: i32) -> (i32, i32) {
    %c0_i32 = arith.constant 0 : i32
    %c0_i32_0 = arith.constant 0 : i32
    return %arg0, %c0_i32 : i32, i32
  }
}

</mosaic_0001>

<bundles_post_ra>
// kernel: galaxy_zoo_regressor.3
= control target key start
LH: loop header
LB: loop body
LE: loop exit
PB: predicated region body
PF: predicated region fallthrough
CT: control target
= control target key end

     0   :  { %s3275_s12 = smov 0   ;;  %s5303_s0 = inlined_call_operand.vmem [shape: bf16[4,4,8,1224], index: 0, kind: input, shape index: {}]   ;;  %s5304_s1 = inlined_call_operand.vmem [shape: bf16[64,128], index: 1, kind: input, shape index: {}]   ;;  %s5305_s2 = inlined_call_operand.vmem [shape: f32[16,1], index: 2, kind: input, shape index: {}]   ;;  %s5306_s3 = inlined_call_operand.vmem [shape: bf16[4,16,1152], index: 3, kind: output, shape index: {}]  }
   0x1 LB: > { %s2864_s13 = sadd.s32 4294967295, %s3249_s12   ;;  %p2868_p0 = scmp.ge.s32.totalorder %s3249_s12, 1  ;;  %s3249_s12 = sphi %s3275_s12, %s13_s12  }
   0x2   : > { %p139_p1 = scmp.lt.s32.totalorder %s3249_s12, 3 }
   0x4   : > { %p140_p2 = pnand %p2868_p0, %p139_p1 }
   0x6   : > { %143 = sbr.rel (%p140_p2) target bundleno = 841 (0x349), region = 32 }
   0xb   : > { %s2869_s14 = sshll.u32 %s2864_s13, 1  ;;  %s3251_s19 = smov 127   ;;  %v5307_v44 = vmov 0   ;;  %vm325_vm0 = vcmask 744448   ;;  %vm295_vm1 = vcmask 752640   ;;  %vm680_vm2 = vcmask 1043456  }
   0xc   : > { %p166_p3 = scmp.lt.s32.totalorder %s2869_s14, 3  ;;  %s3252_s20 = smov 92   ;;  %1025 = vmatprep.mubr.bf16.mxu0 %v5307_v44  ;;  %1098 = vmatprep.mubr.bf16.mxu1 %v5307_v44  ;;  %vm265_vm3 = vcmask 1039360  }
   0xd   : > { %s3253_s21 = smov 91   ;;  %3146 = vset.pattern.permute.xlu1 %v5307_v44  ;;  %3145 = vset.pattern.permute.xlu0 %v5307_v44 }
   0xe   : > { %s5407_s14 = smov (!%p166_p3, %s2869_s14), 3 }
   0xf   : > { %s3131_s15 = smul.u32 160, %s5407_s14 }
  0x10   : > { %s3132_s17 = smul.u32 72, %s5407_s14 }
  0x11   : > { %s3289_s18 = scalar_lea.vmem %s5303_s0, %s3131_s15 }
  0x12   : > { %v191_v0 = vld [vmem:[%s3289_s18 + $0x8] sm:$0xff]  ;;  %v190_v1 = vld [vmem:[%s3289_s18] sm:$0xff]  ;;  %v192_v6 = vld [vmem:[%s3289_s18 + $0x10] sm:$0xff] }
  0x13   : > { %v3293_v2 = vcombine.low %v191_v0, %v191_v0  ;;  %v3295_v3 = vcombine.low %v190_v1, %v190_v1  ;;  %v3301_v4 = vcombine.high %v191_v0, %v191_v0  ;;  %v3303_v5 = vcombine.high %v190_v1, %v190_v1  ;;  %v193_v9 = vld [vmem:[%s3289_s18 + $0x18] sm:$0xff]  ;;  %v195_v12 = vld [vmem:[%s3289_s18 + $0x20] sm:$0xff]  ;;  %v2879_v20 = vld [vmem:[%s3289_s18 + $0x50] sm:$0xff] }
  0x14   : > { %v3310_v7 = vcombine.high %v192_v6, %v192_v6  ;;  %v3312_v8 = vcombine.low %v192_v6, %v192_v6  ;;  %v3319_v10 = vcombine.high %v193_v9, %v193_v9  ;;  %v3321_v11 = vcombine.low %v193_v9, %v193_v9  ;;  %v2886_v15 = vld [vmem:[%s3289_s18 + $0x80] sm:$0xff]  ;;  %v2885_v16 = vld [vmem:[%s3289_s18 + $0x78] sm:$0xff]  ;;  %v2874_v25 = vld [vmem:[%s3289_s18 + $0x30] sm:$0xff] }
  0x15   : > { %249 = vrot.lane.b32.xlu1 %v3293_v2, %s3251_s19  ;;  %245 = vrot.lane.b32.xlu0 %v3295_v3, %s3251_s19  ;;  %v3328_v13 = vcombine.high %v195_v12, %v195_v12  ;;  %v3330_v14 = vcombine.low %v195_v12, %v195_v12  ;;  %v3354_v17 = vcombine.low %v2886_v15, %v2886_v15  ;;  %v2880_v22 = vld [vmem:[%s3289_s18 + $0x58] sm:$0xff]  ;;  %v2873_v26 = vld [vmem:[%s3289_s18 + $0x28] sm:$0xff] }
  0x16   : > { %5327 = vst [vmem:[#allocation2_spill] sm:$0xff] %v3310_v7  ;;  %5328 = vst [vmem:[#allocation3_spill] sm:$0xff] %v3312_v8  ;;  %v3356_v18 = vcombine.high %v2885_v16, %v2885_v16  ;;  %v3366_v19 = vcombine.low %v2885_v16, %v2885_v16  ;;  %v3377_v21 = vcombine.high %v2879_v20, %v2879_v20  ;;  %v2887_v29 = vld [vmem:[%s3289_s18 + $0x88] sm:$0xff]  ;;  %v2881_v34 = vld [vmem:[%s3289_s18 + $0x60] sm:$0xff] }
  0x17   : > { %5329 = vst [vmem:[#allocation4_spill] sm:$0xff] %v3321_v11  ;;  %v3384_v23 = vcombine.low %v2880_v22, %v2880_v22  ;;  %v3390_v24 = vcombine.low %v2879_v20, %v2879_v20  ;;  %v3406_v27 = vcombine.low %v2874_v25, %v2874_v25  ;;  %v3408_v28 = vcombine.high %v2873_v26, %v2873_v26  ;;  %v3467_v36 = vld [vmem:[%s3289_s18 + $0x38] sm:$0xff]  ;;  %v3492_v43 = vld [vmem:[%s3289_s18 + $0x90] sm:$0xff]  ;;  %v3545_v57 = vld [vmem:[%s3289_s18 + $0x68] sm:$0xff] }
  0x18   : > { %v3419_v30 = vcombine.low %v2887_v29, %v2887_v29  ;;  %v3421_v31 = vcombine.high %v2886_v15, %v2886_v15  ;;  %v3431_v32 = vcombine.low %v2873_v26, %v2873_v26  ;;  %v3449_v33 = vcombine.high %v2880_v22, %v2880_v22  ;;  %v3576_v6 = vld [vmem:[%s3289_s18 + $0x40] sm:$0xff] }
  0x19   : > { %251 = vrot.lane.b32.xlu1 %v3301_v4, %s3251_s19  ;;  %247 = vrot.lane.b32.xlu0 %v3303_v5, %s3251_s19  ;;  %v3456_v35 = vcombine.low %v2881_v34, %v2881_v34  ;;  %v3479_v39 = vcombine.low %v3467_v36, %v3467_v36  ;;  %v3481_v40 = vcombine.high %v2874_v25, %v2874_v25 }
  0x1a   : > { %v3508_v47 = vcombine.low %v3492_v43, %v3492_v43  ;;  %v3510_v48 = vcombine.high %v2887_v29, %v2887_v29  ;;  %v3557_v60 = vcombine.low %v3545_v57, %v3545_v57  ;;  %v3559_v61 = vcombine.high %v2881_v34, %v2881_v34 }
  0x1b   : > { %v3591_v22 = vcombine.low %v3576_v6, %v3576_v6  ;;  %v3595_v25 = vcombine.high %v3467_v36, %v3467_v36 }
  0x1c   : > { %5333 = vst [vmem:[#allocation8_spill] sm:$0xff] %v3557_v60 }
  0x1d   : > { %255 = vrot.lane.b32.xlu1 %v3310_v7, %s3251_s19  ;;  %253 = vrot.lane.b32.xlu0 %v3312_v8, %s3251_s19  ;;  %5336 = vst [vmem:[#allocation11_spill] sm:$0xff] %v3591_v22 }
  0x21   : > { %259 = vrot.lane.b32.xlu1 %v3319_v10, %s3251_s19  ;;  %257 = vrot.lane.b32.xlu0 %v3321_v11, %s3251_s19 }
  0x25   : > { %263 = vrot.lane.b32.xlu1 %v3328_v13, %s3251_s19  ;;  %261 = vrot.lane.b32.xlu0 %v3330_v14, %s3251_s19 }
  0x29   : > { %277 = vrot.lane.b32.xlu1 %v3303_v5, %s3252_s20  ;;  %275 = vrot.lane.b32.xlu0 %v3295_v3, %s3252_s20 }
  0x2d   : > { %281 = vrot.lane.b32.xlu1 %v3301_v4, %s3252_s20  ;;  %279 = vrot.lane.b32.xlu0 %v3293_v2, %s3252_s20 }
  0x31   : > { %285 = vrot.lane.b32.xlu1 %v3310_v7, %s3252_s20  ;;  %283 = vrot.lane.b32.xlu0 %v3312_v8, %s3252_s20 }
  0x35   : > { %289 = vrot.lane.b32.xlu1 %v3319_v10, %s3252_s20  ;;  %287 = vrot.lane.b32.xlu0 %v3321_v11, %s3252_s20 }
  0x39   : > { %626 = vrot.lane.b32.xlu1 %v3354_v17, %s3252_s20  ;;  %624 = vrot.lane.b32.xlu0 %v3356_v18, %s3252_s20 }
  0x3d   : > { %655 = vrot.lane.b32.xlu1 %v3354_v17, %s3253_s21  ;;  %653 = vrot.lane.b32.xlu0 %v3356_v18, %s3253_s21 }
  0x41   : > { %651 = vrot.lane.b32.xlu1 %v3366_v19, %s3253_s21  ;;  %622 = vrot.lane.b32.xlu0 %v3366_v19, %s3252_s20 }
  0x45   : > { %597 = vrot.lane.b32.xlu1 %v3354_v17, %s3251_s19  ;;  %595 = vrot.lane.b32.xlu0 %v3356_v18, %s3251_s19 }
  0x49   : > { %509 = vrot.lane.b32.xlu1 %v3377_v21, %s3252_s20  ;;  %593 = vrot.lane.b32.xlu0 %v3366_v19, %s3251_s19 }
  0x4d   : > { %538 = vrot.lane.b32.xlu1 %v3377_v21, %s3253_s21  ;;  %511 = vrot.lane.b32.xlu0 %v3384_v23, %s3252_s20 }
  0x51   : > { %507 = vrot.lane.b32.xlu1 %v3390_v24, %s3252_s20  ;;  %540 = vrot.lane.b32.xlu0 %v3384_v23, %s3253_s21 }
  0x55   : > { %480 = vrot.lane.b32.xlu1 %v3377_v21, %s3251_s19  ;;  %536 = vrot.lane.b32.xlu0 %v3390_v24, %s3253_s21 }
  0x59   : > { %478 = vrot.lane.b32.xlu1 %v3390_v24, %s3251_s19  ;;  %482 = vrot.lane.b32.xlu0 %v3384_v23, %s3251_s19 }
  0x5d   : > { %396 = vrot.lane.b32.xlu1 %v3406_v27, %s3252_s20  ;;  %394 = vrot.lane.b32.xlu0 %v3408_v28, %s3252_s20 }
  0x61   : > { %425 = vrot.lane.b32.xlu1 %v3406_v27, %s3253_s21  ;;  %423 = vrot.lane.b32.xlu0 %v3408_v28, %s3253_s21 }
  0x65   : > { %630 = vrot.lane.b32.xlu1 %v3419_v30, %s3252_s20  ;;  %628 = vrot.lane.b32.xlu0 %v3421_v31, %s3252_s20 }
  0x69   : > { %659 = vrot.lane.b32.xlu1 %v3419_v30, %s3253_s21  ;;  %657 = vrot.lane.b32.xlu0 %v3421_v31, %s3253_s21 }
  0x6d   : > { %421 = vrot.lane.b32.xlu1 %v3431_v32, %s3253_s21  ;;  %392 = vrot.lane.b32.xlu0 %v3431_v32, %s3252_s20 }
  0x71   : > { %367 = vrot.lane.b32.xlu1 %v3406_v27, %s3251_s19  ;;  %365 = vrot.lane.b32.xlu0 %v3408_v28, %s3251_s19 }
  0x75   : > { %601 = vrot.lane.b32.xlu1 %v3419_v30, %s3251_s19  ;;  %599 = vrot.lane.b32.xlu0 %v3421_v31, %s3251_s19 }
  0x79   : > { %307 = vrot.lane.b32.xlu1 %v3303_v5, %s3253_s21  ;;  %363 = vrot.lane.b32.xlu0 %v3431_v32, %s3251_s19 }
  0x7d   : > { %513 = vrot.lane.b32.xlu1 %v3449_v33, %s3252_s20  ;;  %309 = vrot.lane.b32.xlu0 %v3293_v2, %s3253_s21 }
  0x81   : > { %542 = vrot.lane.b32.xlu1 %v3449_v33, %s3253_s21  ;;  %515 = vrot.lane.b32.xlu0 %v3456_v35, %s3252_s20 }
  0x85   : > { %305 = vrot.lane.b32.xlu1 %v3295_v3, %s3253_s21  ;;  %544 = vrot.lane.b32.xlu0 %v3456_v35, %s3253_s21 }
  0x87   : > { %v3469_v37 = vpop.permute.xlu1 %249  ;;  %v3471_v38 = vpop.permute.xlu0 %245 }
  0x89   : > { %486 = vrot.lane.b32.xlu1 %v3456_v35, %s3251_s19  ;;  %484 = vrot.lane.b32.xlu0 %v3449_v33, %s3251_s19 }
  0x8b   : > { %v3483_v41 = vpop.permute.xlu1 %251  ;;  %v3485_v42 = vpop.permute.xlu0 %247 }
  0x8d   : > { %400 = vrot.lane.b32.xlu1 %v3479_v39, %s3252_s20  ;;  %398 = vrot.lane.b32.xlu0 %v3481_v40, %s3252_s20 }
  0x8f   : > { %v3496_v45 = vpop.permute.xlu1 %255  ;;  %v3498_v46 = vpop.permute.xlu0 %253 }
  0x91   : > { %429 = vrot.lane.b32.xlu1 %v3479_v39, %s3253_s21  ;;  %427 = vrot.lane.b32.xlu0 %v3481_v40, %s3253_s21 }
  0x93   : > { %v3512_v49 = vpop.permute.xlu1 %259  ;;  %v3514_v50 = vpop.permute.xlu0 %257 }
  0x94   : > { %5330 = vst [vmem:[#allocation5_spill] sm:$0xff] %v3512_v49 }
  0x95   : > { %634 = vrot.lane.b32.xlu1 %v3508_v47, %s3252_s20  ;;  %632 = vrot.lane.b32.xlu0 %v3510_v48, %s3252_s20 }
  0x97   : > { %v3520_v51 = vpop.permute.xlu1 %263  ;;  %v3522_v52 = vpop.permute.xlu0 %261 }
  0x98   : > { %5331 = vst [vmem:[#allocation6_spill] sm:$0xff] %v3520_v51  ;;  %5332 = vst [vmem:[#allocation7_spill] sm:$0xff] %v3522_v52 }
  0x99   : > { %663 = vrot.lane.b32.xlu1 %v3508_v47, %s3253_s21  ;;  %661 = vrot.lane.b32.xlu0 %v3510_v48, %s3253_s21 }
  0x9b   : > { %v3528_v53 = vpop.permute.xlu1 %277  ;;  %v3530_v54 = vpop.permute.xlu0 %275 }
  0x9d   : > { %371 = vrot.lane.b32.xlu1 %v3479_v39, %s3251_s19  ;;  %369 = vrot.lane.b32.xlu0 %v3481_v40, %s3251_s19 }
  0x9f   : > { %v3536_v55 = vpop.permute.xlu1 %281  ;;  %v3538_v56 = vpop.permute.xlu0 %279 }
  0xa1   : > { %605 = vrot.lane.b32.xlu1 %v3508_v47, %s3251_s19  ;;  %603 = vrot.lane.b32.xlu0 %v3510_v48, %s3251_s19 }
  0xa3   : > { %v3547_v58 = vpop.permute.xlu1 %285  ;;  %v3549_v59 = vpop.permute.xlu0 %283 }
  0xa5   : > { %313 = vrot.lane.b32.xlu1 %v3312_v8, %s3253_s21  ;;  %311 = vrot.lane.b32.xlu0 %v3301_v4, %s3253_s21 }
  0xa7   : > { %v3561_v62 = vpop.permute.xlu1 %289  ;;  %v3563_v63 = vpop.permute.xlu0 %287 }
  0xa8   : > { %5334 = vst [vmem:[#allocation9_spill] sm:$0xff] %v3561_v62  ;;  %5335 = vst [vmem:[#allocation10_spill] sm:$0xff] %v3563_v63 }
  0xa9   : > { %519 = vrot.lane.b32.xlu1 %v3557_v60, %s3252_s20  ;;  %517 = vrot.lane.b32.xlu0 %v3559_v61, %s3252_s20 }
  0xab   : > { %v3569_v0 = vpop.permute.xlu1 %626  ;;  %v625_v1 = vpop.permute.xlu0 %624 }
  0xac   : > { %v643_v15 = vsel %vm295_vm1, %v625_v1, %v3569_v0 }
  0xad   : > { %548 = vrot.lane.b32.xlu1 %v3557_v60, %s3253_s21  ;;  %546 = vrot.lane.b32.xlu0 %v3559_v61, %s3253_s21 }
  0xaf   : > { %v3578_v9 = vpop.permute.xlu1 %655  ;;  %v654_v12 = vpop.permute.xlu0 %653 }
  0xb0   : > { %v672_v16 = vsel %vm325_vm0, %v654_v12, %v3578_v9 }
  0xb1   : > { %490 = vrot.lane.b32.xlu1 %v3557_v60, %s3251_s19  ;;  %488 = vrot.lane.b32.xlu0 %v3559_v61, %s3251_s19  ;;  %v939_v20 = vsel %vm680_vm2, %v643_v15, %v672_v16  ;;  %v3605_v16 = vld [vmem:[%s3289_s18 + $0x98] sm:$0xff] }
  0xb2   : > { %993 = vmatprep.subr.bf16.mxu0 %v939_v20 }
  0xb3   : > { %v652_v26 = vpop.permute.xlu1 %651  ;;  %v623_v29 = vpop.permute.xlu0 %622 }
  0xb4   : > { %v671_v34 = vsel %vm325_vm0, %v652_v26, %v654_v12  ;;  %v642_v44 = vsel %vm295_vm1, %v623_v29, %v625_v1  ;;  %v3621_v26 = vcombine.high %v3492_v43, %v3492_v43 }
  0xb5   : > { %404 = vrot.lane.b32.xlu1 %v3591_v22, %s3252_s20  ;;  %402 = vrot.lane.b32.xlu0 %v3595_v25, %s3252_s20  ;;  %v935_v15 = vsel %vm680_vm2, %v642_v44, %v671_v34  ;;  %v2933_v44 = vcombine.low %v3605_v16, %v3605_v16 }
  0xb6   : > { %994 = vmatpush1.bf16.msra.mxu0 %v935_v15 }
  0xb7   : > { %v3607_v36 = vpop.permute.xlu1 %597  ;;  %v596_v20 = vpop.permute.xlu0 %595 }
  0xb8   : > { %v614_v12 = vsel %vm265_vm3, %v596_v20, %v3607_v36 }
  0xb9   : > { %433 = vrot.lane.b32.xlu1 %v3591_v22, %s3253_s21  ;;  %431 = vrot.lane.b32.xlu0 %v3595_v25, %s3253_s21  ;;  %v903_v1 = vsel %vm680_vm2, %v3356_v18, %v614_v12 }
  0xba   : > { %995 = vmatprep.subr.bf16.mxu0 %v903_v1 }
  0xbb   : > { %v510_v29 = vpop.permute.xlu1 %509  ;;  %v594_v34 = vpop.permute.xlu0 %593 }
  0xbc   : > { %v613_v15 = vsel %vm265_vm3, %v594_v34, %v596_v20 }
  0xbd   : > { %638 = vrot.lane.b32.xlu1 %v2933_v44, %s3252_s20  ;;  %636 = vrot.lane.b32.xlu0 %v3621_v26, %s3252_s20  ;;  %v899_v18 = vsel %vm680_vm2, %v3366_v19, %v613_v15 }
  0xbe   : > { %996 = vmatpush1.bf16.msra.mxu0 %v899_v18 }
  0xbf   : > { %v539_v12 = vpop.permute.xlu1 %538  ;;  %v3629_v51 = vpop.permute.xlu0 %511 }
  0xc0   : > { %v528_v1 = vsel %vm295_vm1, %v510_v29, %v3629_v51 }
  0xc1   : > { %667 = vrot.lane.b32.xlu1 %v2933_v44, %s3253_s21  ;;  %665 = vrot.lane.b32.xlu0 %v3621_v26, %s3253_s21 }
  0xc3   : > { %v508_v43 = vpop.permute.xlu1 %507  ;;  %v3634_v20 = vpop.permute.xlu0 %540 }
  0xc4   : > { %v557_v34 = vsel %vm325_vm0, %v539_v12, %v3634_v20  ;;  %v527_v62 = vsel %vm295_vm1, %v508_v43, %v510_v29 }
  0xc5   : > { %375 = vrot.lane.b32.xlu1 %v3591_v22, %s3251_s19  ;;  %373 = vrot.lane.b32.xlu0 %v3595_v25, %s3251_s19  ;;  %v867_v19 = vsel %vm680_vm2, %v528_v1, %v557_v34  ;;  %v3652_v22 = vld [vmem:[%s3289_s18 + $0x70] sm:$0xff] }
  0xc6   : > { %997 = vmatprep.subr.bf16.mxu0 %v867_v19  ;;  %v3689_v19 = vld [vmem:[%s3289_s18 + $0x48] sm:$0xff] }
  0xc7   : > { %v481_v15 = vpop.permute.xlu1 %480  ;;  %v537_v18 = vpop.permute.xlu0 %536 }
  0xc8   : > { %v556_v49 = vsel %vm325_vm0, %v537_v18, %v539_v12  ;;  %v2922_v12 = vcombine.low %v3652_v22, %v3652_v22 }
  0xc9   : > { %609 = vrot.lane.b32.xlu1 %v2933_v44, %s3251_s19  ;;  %607 = vrot.lane.b32.xlu0 %v3621_v26, %s3251_s19  ;;  %v863_v52 = vsel %vm680_vm2, %v527_v62, %v556_v49 }
  0xca   : > { %998 = vmatpush1.bf16.msra.mxu0 %v863_v52 }
  0xcb   : > { %v479_v60 = vpop.permute.xlu1 %478  ;;  %v3654_v8 = vpop.permute.xlu0 %482 }
  0xcc   : > { %v498_v1 = vsel %vm265_vm3, %v479_v60, %v481_v15  ;;  %v499_v29 = vsel %vm265_vm3, %v481_v15, %v3654_v8  ;;  %v3671_v60 = vcombine.high %v3545_v57, %v3545_v57 }
  0xcd   : > { %317 = vrot.lane.b32.xlu1 %v3321_v11, %s3253_s21  ;;  %315 = vrot.lane.b32.xlu0 %v3310_v7, %s3253_s21  ;;  %v831_v49 = vsel %vm680_vm2, %v3377_v21, %v499_v29  ;;  %v827_v52 = vsel %vm680_vm2, %v3390_v24, %v498_v1  ;;  %v2911_v1 = vcombine.low %v3689_v19, %v3689_v19 }
  0xce   : > { %5337 = vst [vmem:[#allocation12_spill] sm:$0xff] %v3671_v60  ;;  %999 = vmatprep.subr.bf16.mxu0 %v831_v49  ;;  %v3700_v29 = vcombine.high %v3576_v6, %v3576_v6 }
  0xcf   : > { %v3673_v62 = vpop.permute.xlu1 %396  ;;  %1000 = vmatpush1.bf16.msra.mxu0 %v827_v52  ;;  %v395_v44 = vpop.permute.xlu0 %394 }
  0xd0   : > { %v413_v24 = vsel %vm295_vm1, %v395_v44, %v3673_v62 }
  0xd1   : > { %523 = vrot.lane.b32.xlu1 %v2922_v12, %s3252_s20  ;;  %521 = vrot.lane.b32.xlu0 %v3671_v60, %s3252_s20 }
  0xd3   : > { %v3678_v43 = vpop.permute.xlu1 %425  ;;  %v424_v21 = vpop.permute.xlu0 %423 }
  0xd4   : > { %v442_v57 = vsel %vm325_vm0, %v424_v21, %v3678_v43 }
  0xd5   : > { %552 = vrot.lane.b32.xlu1 %v2922_v12, %s3253_s21  ;;  %550 = vrot.lane.b32.xlu0 %v3671_v60, %s3253_s21  ;;  %v795_v34 = vsel %vm680_vm2, %v413_v24, %v442_v57 }
  0xd6   : > { %1001 = vmatprep.subr.bf16.mxu0 %v795_v34 }
  0xd7   : > { %v3691_v15 = vpop.permute.xlu1 %630  ;;  %v629_v18 = vpop.permute.xlu0 %628 }
  0xd8   : > { %v645_v24 = vsel %vm295_vm1, %v629_v18, %v3691_v15 }
  0xd9   : > { %494 = vrot.lane.b32.xlu1 %v2922_v12, %s3251_s19  ;;  %492 = vrot.lane.b32.xlu0 %v3671_v60, %s3251_s19  ;;  %v644_v12 = vsel %vm295_vm1, %v3569_v0, %v629_v18 }
  0xdb   : > { %v3702_v49 = vpop.permute.xlu1 %659  ;;  %v658_v52 = vpop.permute.xlu0 %657 }
  0xdc   : > { %v674_v57 = vsel %vm325_vm0, %v658_v52, %v3702_v49  ;;  %v673_v34 = vsel %vm325_vm0, %v3578_v9, %v658_v52  ;;  %v2934_v9 = vcombine.high %v3605_v16, %v3605_v16 }
  0xdd   : > { %408 = vrot.lane.b32.xlu1 %v2911_v1, %s3252_s20  ;;  %406 = vrot.lane.b32.xlu0 %v3700_v29, %s3252_s20  ;;  %v947_v6 = vsel %vm680_vm2, %v645_v24, %v674_v57  ;;  %v943_v11 = vsel %vm680_vm2, %v644_v12, %v673_v34 }
  0xde   : > { %1066 = vmatprep.subr.bf16.mxu1 %v947_v6 }
  0xdf   : > { %v422_v60 = vpop.permute.xlu1 %421  ;;  %1067 = vmatpush1.bf16.msra.mxu1 %v943_v11  ;;  %v393_v7 = vpop.permute.xlu0 %392 }
  0xe0   : > { %v441_v63 = vsel %vm325_vm0, %v422_v60, %v424_v21  ;;  %v412_v0 = vsel %vm295_vm1, %v393_v7, %v395_v44 }
  0xe1   : > { %437 = vrot.lane.b32.xlu1 %v2911_v1, %s3253_s21  ;;  %435 = vrot.lane.b32.xlu0 %v3700_v29, %s3253_s21  ;;  %v791_v18 = vsel %vm680_vm2, %v412_v0, %v441_v63  ;;  %v2923_v0 = vcombine.high %v3652_v22, %v3652_v22  ;;  %v2912_v22 = vcombine.high %v3689_v19, %v3689_v19 }
  0xe2   : > { %1002 = vmatpush1.bf16.msra.mxu0 %v791_v18 }
  0xe3   : > { %v3725_v52 = vpop.permute.xlu1 %367  ;;  %v366_v24 = vpop.permute.xlu0 %365 }
  0xe4   : > { %v384_v11 = vsel %vm265_vm3, %v366_v24, %v3725_v52 }
  0xe5   : > { %669 = vrot.lane.b32.xlu1 %v2934_v9, %s3253_s21  ;;  %640 = vrot.lane.b32.xlu0 %v2934_v9, %s3252_s20  ;;  %v759_v7 = vsel %vm680_vm2, %v3408_v28, %v384_v11 }
  0xe6   : > { %1003 = vmatprep.subr.bf16.mxu0 %v759_v7 }
  0xe7   : > { %v3733_v16 = vpop.permute.xlu1 %601  ;;  %v600_v60 = vpop.permute.xlu0 %599 }
  0xe8   : > { %v615_v63 = vsel %vm265_vm3, %v3607_v36, %v600_v60  ;;  %v616_v44 = vsel %vm265_vm3, %v600_v60, %v3733_v16 }
  0xe9   : > { %379 = vrot.lane.b32.xlu1 %v2911_v1, %s3251_s19  ;;  %377 = vrot.lane.b32.xlu0 %v3700_v29, %s3251_s19  ;;  %v911_v21 = vsel %vm680_vm2, %v3421_v31, %v616_v44  ;;  %v907_v28 = vsel %vm680_vm2, %v3354_v17, %v615_v63  ;;  %v297_v17 = vsel %vm295_vm1, %v3528_v53, %v3538_v56 }
  0xea   : > { %1068 = vmatprep.subr.bf16.mxu1 %v911_v21  ;;  %v296_v44 = vsel %vm295_vm1, %v3530_v54, %v3528_v53  ;;  %v3797_v53 = vld [vmem:[%s3289_s18 + $0x120] sm:$0xff]  ;;  %v266_v54 = vsel %vm265_vm3, %v3471_v38, %v3485_v42 }
  0xeb   : > { %v308_v57 = vpop.permute.xlu1 %307  ;;  %1069 = vmatpush1.bf16.msra.mxu1 %v907_v28  ;;  %v364_v12 = vpop.permute.xlu0 %363  ;;  %v3813_v38 = vcombine.low %v3797_v53, %v3797_v53 }
  0xec   : > { %v383_v36 = vsel %vm265_vm3, %v364_v12, %v366_v24  ;;  %v2967_v24 = vld [vmem:[%s3289_s18 + $0x118] sm:$0xff] }
  0xed   : > { %291 = vrot.lane.b32.xlu1 %v3330_v14, %s3252_s20  ;;  %611 = vrot.lane.b32.xlu0 %v2934_v9, %s3251_s19  ;;  %v755_v1 = vsel %vm680_vm2, %v3431_v32, %v383_v36  ;;  %v3780_v63 = vcombine.high %v2967_v24, %v2967_v24 }
  0xee   : > { %1004 = vmatpush1.bf16.msra.mxu0 %v755_v1 }
  0xef   : > { %v514_v31 = vpop.permute.xlu1 %513  ;;  %v3752_v34 = vpop.permute.xlu0 %309 }
  0xf0   : > { %v327_v6 = vsel %vm325_vm0, %v308_v57, %v3752_v34 }
  0xf1   : > { %321 = vrot.lane.b32.xlu1 %v3330_v14, %s3253_s21  ;;  %319 = vrot.lane.b32.xlu0 %v3319_v10, %s3253_s21  ;;  %v723_v32 = vsel %vm680_vm2, %v297_v17, %v327_v6  ;;  %v267_v14 = vsel %vm265_vm3, %v3485_v42, %v3469_v37 }
  0xf2   : > { %1005 = vmatprep.subr.bf16.mxu0 %v723_v32 }
  0xf3   : > { %v543_v9 = vpop.permute.xlu1 %542  ;;  %v3766_v18 = vpop.permute.xlu0 %515 }
  0xf4   : > { %v558_v11 = vsel %vm325_vm0, %v3634_v20, %v543_v9  ;;  %v530_v21 = vsel %vm295_vm1, %v514_v31, %v3766_v18  ;;  %v529_v20 = vsel %vm295_vm1, %v3629_v51, %v514_v31 }
  0xf5   : > { %554 = vrot.lane.b32.xlu1 %v2923_v0, %s3253_s21  ;;  %525 = vrot.lane.b32.xlu0 %v2923_v0, %s3252_s20  ;;  %v871_v51 = vsel %vm680_vm2, %v529_v20, %v558_v11 }
  0xf7   : > { %v306_v7 = vpop.permute.xlu1 %305  ;;  %v3778_v60 = vpop.permute.xlu0 %544 }
  0xf8   : > { %v326_v19 = vsel %vm325_vm0, %v306_v7, %v308_v57  ;;  %v559_v28 = vsel %vm325_vm0, %v543_v9, %v3778_v60  ;;  %v687_v57 = vsel %vm680_vm2, %v3303_v5, %v267_v14  ;;  %v683_v5 = vsel %vm680_vm2, %v3295_v3, %v266_v54 }
  0xf9   : > { %410 = vrot.lane.b32.xlu1 %v2912_v22, %s3252_s20  ;;  %496 = vrot.lane.b32.xlu0 %v2923_v0, %s3251_s19  ;;  %v719_v12 = vsel %vm680_vm2, %v296_v44, %v326_v19  ;;  %v875_v36 = vsel %vm680_vm2, %v530_v21, %v559_v28  ;;  %v3827_v0 = vld [vmem:[%s5304_s1] sm:$0xff]   ;;  %v3835_v3 = vcombine.low %v2967_v24, %v2967_v24  ;;  %v5338_v14 = vmov 0  }
  0xfa   : > { %1006 = vmatpush1.bf16.msra.mxu0 %v719_v12  ;;  %1070 = vmatprep.subr.bf16.mxu1 %v875_v36 }
  0xfb   : > { %v3805_v1 = vpop.permute.xlu1 %486  ;;  %1007 = vmatprep.subr.bf16.mxu0 %v687_v57  ;;  %1071 = vmatpush1.bf16.msra.mxu1 %v871_v51  ;;  %v485_v31 = vpop.permute.xlu0 %484 }
  0xfc   : > { %v500_v17 = vsel %vm265_vm3, %v3654_v8, %v485_v31  ;;  %v501_v6 = vsel %vm265_vm3, %v485_v31, %v3805_v1  ;;  %v2961_v31 = vld [vmem:[%s3289_s18 + $0xf0] sm:$0xff] }
  0xfd   : > { %1948 = vrot.lane.b32.xlu1 %v3780_v63, %s3252_s20  ;;  %439 = vrot.lane.b32.xlu0 %v2912_v22, %s3253_s21  ;;  %v839_v42 = vsel %vm680_vm2, %v3449_v33, %v501_v6  ;;  %v835_v8 = vsel %vm680_vm2, %v3384_v23, %v500_v17 }
  0xfe   : > { %1008 = vmatpush1.bf16.msra.mxu0 %v683_v5  ;;  %1072 = vmatprep.subr.bf16.mxu1 %v839_v42 }
  0xff   : > { %v3829_v32 = vpop.permute.xlu1 %400  ;;  %1073 = vmatpush1.bf16.msra.mxu1 %v835_v8  ;;  %v399_v9 = vpop.permute.xlu0 %398 }
 0x100   : > { %v414_v11 = vsel %vm295_vm1, %v3673_v62, %v399_v9  ;;  %v415_v7 = vsel %vm295_vm1, %v399_v9, %v3829_v32  ;;  %v3858_v62 = vld [vmem:[%s5304_s1 + $0x8] sm:$0xff]  }
 0x101   : > { %1977 = vrot.lane.b32.xlu1 %v3780_v63, %s3253_s21  ;;  %1950 = vrot.lane.b32.xlu0 %v3813_v38, %s3252_s20 }
 0x102   : > { %1026 = vmatmul.mubr.bf16.vlgmr.msra.gmra.mxu0 %v3827_v0 }
 0x103   : > { %v3838_v23 = vpop.permute.xlu1 %429  ;;  %v428_v33 = vpop.permute.xlu0 %427  ;;  %1035 = vmatprep.mubr.bf16.mxu0 %v5338_v14 }
 0x104   : > { %v443_v44 = vsel %vm325_vm0, %v3678_v43, %v428_v33  ;;  %v444_v24 = vsel %vm325_vm0, %v428_v33, %v3838_v23  ;;  %v3903_v33 = vcombine.high %v2961_v31, %v2961_v31 }
 0x105   : > { %1946 = vrot.lane.b32.xlu1 %v3835_v3, %s3252_s20  ;;  %1979 = vrot.lane.b32.xlu0 %v3813_v38, %s3253_s21  ;;  %v803_v21 = vsel %vm680_vm2, %v415_v7, %v444_v24  ;;  %v799_v19 = vsel %vm680_vm2, %v414_v11, %v443_v44  ;;  %v3906_v11 = vld [vmem:[%s3289_s18 + $0xf8] sm:$0xff] }
 0x106   : > { %1074 = vmatprep.subr.bf16.mxu1 %v803_v21  ;;  %v3926_v21 = vcombine.low %v3906_v11, %v3906_v11 }
 0x107   : > { %v3860_v43 = vpop.permute.xlu1 %634  ;;  %1075 = vmatpush1.bf16.msra.mxu1 %v799_v19  ;;  %v633_v28 = vpop.permute.xlu0 %632 }
 0x108   : > { %v646_v36 = vsel %vm295_vm1, %v3691_v15, %v633_v28  ;;  %v647_v54 = vsel %vm295_vm1, %v633_v28, %v3860_v43  ;;  %v299_v28 = vsel %vm295_vm1, %v3536_v55, %v3549_v59 }
 0x109   : > { %381 = vrot.lane.b32.xlu1 %v2912_v22, %s3251_s19  ;;  %1975 = vrot.lane.b32.xlu0 %v3835_v3, %s3253_s21 }
 0x10a   : > { %1036 = vmatmul.mubr.bf16.gmra.mxu0 %v3858_v62 }
 0x10b   : > { %v3866_v20 = vpop.permute.xlu1 %663  ;;  %v662_v12 = vpop.permute.xlu0 %661  ;;  %1045 = vmatprep.mubr.bf16.mxu0 %v5338_v14 }
 0x10c   : > { %v675_v57 = vsel %vm325_vm0, %v3702_v49, %v662_v12  ;;  %v676_v22 = vsel %vm325_vm0, %v662_v12, %v3866_v20  ;;  %v3887_v49 = vld [vmem:[%s5304_s1 + $0x10] sm:$0xff]  }
 0x10d   : > { %1921 = vrot.lane.b32.xlu1 %v3813_v38, %s3251_s19  ;;  %1919 = vrot.lane.b32.xlu0 %v3780_v63, %s3251_s19  ;;  %v955_v51 = vsel %vm680_vm2, %v647_v54, %v676_v22  ;;  %v951_v15 = vsel %vm680_vm2, %v646_v36, %v675_v57  ;;  %v3954_v57 = vcombine.low %v2961_v31, %v2961_v31 }
 0x10e   : > { %1139 = vmatprep.subr.bf16.mxu0 %v955_v51 }
 0x10f   : > { %v3889_v17 = vpop.permute.xlu1 %371  ;;  %1140 = vmatpush1.bf16.msra.mxu0 %v951_v15  ;;  %v370_v6 = vpop.permute.xlu0 %369 }
 0x110   : > { %v385_v5 = vsel %vm265_vm3, %v3725_v52, %v370_v6  ;;  %v386_v42 = vsel %vm265_vm3, %v370_v6, %v3889_v17 }
 0x111   : > { %293 = vrot.lane.b32.xlu1 %v3328_v13, %s3252_s20  ;;  %1917 = vrot.lane.b32.xlu0 %v3835_v3, %s3251_s19  ;;  %v767_v8 = vsel %vm680_vm2, %v3481_v40, %v386_v42  ;;  %v763_v9 = vsel %vm680_vm2, %v3406_v27, %v385_v5 }
 0x112   : > { %1076 = vmatprep.subr.bf16.mxu1 %v767_v8  ;;  %1046 = vmatmul.mubr.bf16.gmra.mxu0 %v3887_v49  ;;  %v2955_v8 = vld [vmem:[%s3289_s18 + $0xc8] sm:$0xff] }
 0x113   : > { %v3909_v52 = vpop.permute.xlu1 %605  ;;  %1077 = vmatpush1.bf16.msra.mxu1 %v763_v9  ;;  %v604_v7 = vpop.permute.xlu0 %603  ;;  %1055 = vmatprep.mubr.bf16.mxu0 %v5338_v14 }
 0x114   : > { %v617_v44 = vsel %vm265_vm3, %v3733_v16, %v604_v7  ;;  %v618_v40 = vsel %vm265_vm3, %v604_v7, %v3909_v52  ;;  %v3931_v16 = vld [vmem:[%s5304_s1 + $0x18] sm:$0xff]  }
 0x115   : > { %1833 = vrot.lane.b32.xlu1 %v3903_v33, %s3252_s20  ;;  %323 = vrot.lane.b32.xlu0 %v3328_v13, %s3253_s21  ;;  %v919_v27 = vsel %vm680_vm2, %v3510_v48, %v618_v40  ;;  %v915_v24 = vsel %vm680_vm2, %v3419_v30, %v617_v44  ;;  %v269_v13 = vsel %vm265_vm3, %v3483_v41, %v3498_v46 }
 0x116   : > { %1141 = vmatprep.subr.bf16.mxu0 %v919_v27  ;;  %v298_v30 = vsel %vm295_vm1, %v3538_v56, %v3536_v55  ;;  %v268_v55 = vsel %vm265_vm3, %v3469_v37, %v3483_v41  ;;  %v695_v51 = vsel %vm680_vm2, %v3301_v4, %v269_v13 }
 0x117   : > { %v3936_v19 = vpop.permute.xlu1 %313  ;;  %1142 = vmatpush1.bf16.msra.mxu0 %v915_v24  ;;  %v312_v48 = vpop.permute.xlu0 %311  ;;  %v691_v37 = vsel %vm680_vm2, %v3293_v2, %v268_v55 }
 0x118   : > { %v328_v12 = vsel %vm325_vm0, %v3752_v34, %v312_v48  ;;  %v329_v36 = vsel %vm325_vm0, %v312_v48, %v3936_v19 }
 0x119   : > { %1862 = vrot.lane.b32.xlu1 %v3903_v33, %s3253_s21  ;;  %1835 = vrot.lane.b32.xlu0 %v3926_v21, %s3252_s20  ;;  %v731_v54 = vsel %vm680_vm2, %v299_v28, %v329_v36  ;;  %v727_v56 = vsel %vm680_vm2, %v298_v30, %v328_v12  ;;  %v4016_v30 = vld [vmem:[%s3289_s18 + $0x128] sm:$0xff] }
 0x11a   : > { %1078 = vmatprep.subr.bf16.mxu1 %v731_v54  ;;  %1056 = vmatmul.mubr.bf16.gmra.mxu0 %v3931_v16  ;;  %v4027_v28 = vcombine.low %v4016_v30, %v4016_v30 }
 0x11b   : > { %v3960_v34 = vpop.permute.xlu1 %519  ;;  %1079 = vmatpush1.bf16.msra.mxu1 %v727_v56  ;;  %v518_v22 = vpop.permute.xlu0 %517  ;;  %1171 = vmatprep.mubr.bf16.mxu0 %v5338_v14 }
 0x11c   : > { %1080 = vmatprep.subr.bf16.mxu1 %v695_v51  ;;  %v531_v4 = vsel %vm295_vm1, %v3766_v18, %v518_v22  ;;  %v532_v31 = vsel %vm295_vm1, %v518_v22, %v3960_v34  ;;  %v3988_v18 = vld [vmem:[%s3289_s18 + $0xd0] sm:$0xff] }
 0x11d   : > { %1831 = vrot.lane.b32.xlu1 %v3954_v57, %s3252_s20  ;;  %1864 = vrot.lane.b32.xlu0 %v3926_v21, %s3253_s21  ;;  %v4001_v40 = vcombine.low %v3988_v18, %v3988_v18 }
 0x11f   : > { %v3971_v41 = vpop.permute.xlu1 %548  ;;  %1081 = vmatpush1.bf16.msra.mxu1 %v691_v37  ;;  %v547_v15 = vpop.permute.xlu0 %546 }
 0x120   : > { %v560_v6 = vsel %vm325_vm0, %v3778_v60, %v547_v15  ;;  %v561_v5 = vsel %vm325_vm0, %v547_v15, %v3971_v41 }
 0x121   : > { %1804 = vrot.lane.b32.xlu1 %v3903_v33, %s3251_s19  ;;  %1860 = vrot.lane.b32.xlu0 %v3954_v57, %s3253_s21  ;;  %v883_v2 = vsel %vm680_vm2, %v532_v31, %v561_v5  ;;  %v879_v42 = vsel %vm680_vm2, %v531_v4, %v560_v6 }
 0x122   : > { %1143 = vmatprep.subr.bf16.mxu0 %v883_v2  ;;  %1099 = vmatmul.mubr.bf16.vlgmr.msra.gmra.mxu1 %v3827_v0 }
 0x123   : > { %v3992_v60 = vpop.permute.xlu1 %490  ;;  %1144 = vmatpush1.bf16.msra.mxu0 %v879_v42  ;;  %v489_v9 = vpop.permute.xlu0 %488  ;;  %1108 = vmatprep.mubr.bf16.mxu1 %v5338_v14 }
 0x124   : > { %v502_v7 = vsel %vm265_vm3, %v3805_v1, %v489_v9  ;;  %v503_v44 = vsel %vm265_vm3, %v489_v9, %v3992_v60  ;;  %v4011_v1 = vcombine.high %v2955_v8, %v2955_v8 }
 0x125   : > { %1802 = vrot.lane.b32.xlu1 %v3954_v57, %s3251_s19  ;;  %1806 = vrot.lane.b32.xlu0 %v3926_v21, %s3251_s19  ;;  %v847_v27 = vsel %vm680_vm2, %v3559_v61, %v503_v44  ;;  %v843_v24 = vsel %vm680_vm2, %v3456_v35, %v502_v7 }
 0x126   : > { %1145 = vmatprep.subr.bf16.mxu0 %v847_v27 }
 0x127   : > { %v4013_v13 = vpop.permute.xlu1 %404  ;;  %1146 = vmatpush1.bf16.msra.mxu0 %v843_v24  ;;  %v403_v48 = vpop.permute.xlu0 %402 }
 0x128   : > { %v416_v12 = vsel %vm295_vm1, %v3829_v32, %v403_v48  ;;  %v417_v36 = vsel %vm295_vm1, %v403_v48, %v4013_v13  ;;  %v4046_v32 = vcombine.high %v3797_v53, %v3797_v53 }
 0x129   : > { %1720 = vrot.lane.b32.xlu1 %v4001_v40, %s3252_s20  ;;  %1718 = vrot.lane.b32.xlu0 %v4011_v1, %s3252_s20 }
 0x12a   : > { %1109 = vmatmul.mubr.bf16.gmra.mxu1 %v3858_v62 }
 0x12b   : > { %v4023_v61 = vpop.permute.xlu1 %433  ;;  %v432_v35 = vpop.permute.xlu0 %431  ;;  %1118 = vmatprep.mubr.bf16.mxu1 %v5338_v14 }
 0x12c   : > { %v445_v54 = vsel %vm325_vm0, %v3838_v23, %v432_v35  ;;  %v446_v56 = vsel %vm325_vm0, %v432_v35, %v4023_v61  ;;  %v2949_v35 = vld [vmem:[%s3289_s18 + $0xa0] sm:$0xff] }
 0x12d   : > { %1749 = vrot.lane.b32.xlu1 %v4001_v40, %s3253_s21  ;;  %1747 = vrot.lane.b32.xlu0 %v4011_v1, %s3253_s21  ;;  %v811_v55 = vsel %vm680_vm2, %v417_v36, %v446_v56  ;;  %v807_v22 = vsel %vm680_vm2, %v416_v12, %v445_v54  ;;  %v300_v54 = vsel %vm295_vm1, %v3549_v59, %v3547_v58  ;;  %v5339_v56 = vld [vmem:[#allocation10_spill] sm:$0xff] }
 0x12e   : > { %1147 = vmatprep.subr.bf16.mxu0 %v811_v55 }
 0x12f   : > { %v4048_v51 = vpop.permute.xlu1 %638  ;;  %1148 = vmatpush1.bf16.msra.mxu0 %v807_v22  ;;  %v637_v23 = vpop.permute.xlu0 %636 }
 0x130   : > { %v648_v53 = vsel %vm295_vm1, %v3860_v43, %v637_v23  ;;  %v649_v4 = vsel %vm295_vm1, %v637_v23, %v4048_v51  ;;  %v4072_v43 = vcombine.low %v2955_v8, %v2955_v8  ;;  %v4126_v23 = vcombine.high %v2949_v35, %v2949_v35 }
 0x131   : > { %1954 = vrot.lane.b32.xlu1 %v4027_v28, %s3252_s20  ;;  %1952 = vrot.lane.b32.xlu0 %v4046_v32, %s3252_s20 }
 0x132   : > { %1119 = vmatmul.mubr.bf16.gmra.mxu1 %v3887_v49 }
 0x133   : > { %v4055_v37 = vpop.permute.xlu1 %667  ;;  %v666_v15 = vpop.permute.xlu0 %665  ;;  %1128 = vmatprep.mubr.bf16.mxu1 %v5338_v14 }
 0x134   : > { %v677_v31 = vsel %vm325_vm0, %v3866_v20, %v666_v15  ;;  %v678_v6 = vsel %vm325_vm0, %v666_v15, %v4055_v37 }
 0x135   : > { %1983 = vrot.lane.b32.xlu1 %v4027_v28, %s3253_s21  ;;  %1981 = vrot.lane.b32.xlu0 %v4046_v32, %s3253_s21  ;;  %v963_v5 = vsel %vm680_vm2, %v649_v4, %v678_v6  ;;  %v959_v2 = vsel %vm680_vm2, %v648_v53, %v677_v31  ;;  %v5340_v4 = vld [vmem:[#allocation2_spill] sm:$0xff] }
 0x136   : > { %1212 = vmatprep.subr.bf16.mxu1 %v963_v5 }
 0x137   : > { %v4074_v42 = vpop.permute.xlu1 %375  ;;  %1213 = vmatpush1.bf16.msra.mxu1 %v959_v2  ;;  %v374_v20 = vpop.permute.xlu0 %373 }
 0x138   : > { %v387_v9 = vsel %vm265_vm3, %v3889_v17, %v374_v20  ;;  %v388_v7 = vsel %vm265_vm3, %v374_v20, %v4074_v42 }
 0x139   : > { %1745 = vrot.lane.b32.xlu1 %v4072_v43, %s3253_s21  ;;  %1716 = vrot.lane.b32.xlu0 %v4072_v43, %s3252_s20  ;;  %v775_v8 = vsel %vm680_vm2, %v3595_v25, %v388_v7  ;;  %v771_v44 = vsel %vm680_vm2, %v3479_v39, %v387_v9 }
 0x13a   : > { %1149 = vmatprep.subr.bf16.mxu0 %v775_v8  ;;  %1129 = vmatmul.mubr.bf16.gmra.mxu1 %v3931_v16 }
 0x13b   : > { %v4089_v17 = vpop.permute.xlu1 %609  ;;  %1150 = vmatpush1.bf16.msra.mxu0 %v771_v44  ;;  %v608_v27 = vpop.permute.xlu0 %607  ;;  %1244 = vmatprep.mubr.bf16.mxu1 %v5338_v14 }
 0x13c   : > { %v619_v24 = vsel %vm265_vm3, %v3909_v52, %v608_v27  ;;  %v620_v48 = vsel %vm265_vm3, %v608_v27, %v4089_v17  ;;  %v271_v52 = vsel %vm265_vm3, %v3496_v45, %v3514_v50 }
 0x13d   : > { %1691 = vrot.lane.b32.xlu1 %v4001_v40, %s3251_s19  ;;  %1689 = vrot.lane.b32.xlu0 %v4011_v1, %s3251_s19  ;;  %v927_v39 = vsel %vm680_vm2, %v3621_v26, %v620_v48  ;;  %v923_v25 = vsel %vm680_vm2, %v3508_v47, %v619_v24  ;;  %v301_v26 = vsel %vm295_vm1, %v3547_v58, %v5339_v56  ;;  %v4129_v58 = vld [vmem:[%s3289_s18 + $0xa8] sm:$0xff]  ;;  %v4169_v24 = vld [vmem:[%s3289_s18 + $0x100] sm:$0xff] }
 0x13e   : > { %1214 = vmatprep.subr.bf16.mxu1 %v927_v39  ;;  %v703_v31 = vsel %vm680_vm2, %v5340_v4, %v271_v52  ;;  %v4144_v6 = vcombine.low %v4129_v58, %v4129_v58 }
 0x13f   : > { %v4108_v12 = vpop.permute.xlu1 %317  ;;  %1215 = vmatpush1.bf16.msra.mxu1 %v923_v25  ;;  %v316_v36 = vpop.permute.xlu0 %315 }
 0x140   : > { %v330_v47 = vsel %vm325_vm0, %v3936_v19, %v316_v36  ;;  %v331_v55 = vsel %vm325_vm0, %v316_v36, %v4108_v12  ;;  %v270_v19 = vsel %vm265_vm3, %v3498_v46, %v3496_v45  ;;  %v5341_v45 = vld [vmem:[#allocation3_spill] sm:$0xff]  ;;  %v5343_v36 = vld [vmem:[#allocation8_spill] sm:$0xff] }
 0x141   : > { %1925 = vrot.lane.b32.xlu1 %v4027_v28, %s3251_s19  ;;  %1923 = vrot.lane.b32.xlu0 %v4046_v32, %s3251_s19  ;;  %v739_v22 = vsel %vm680_vm2, %v301_v26, %v331_v55  ;;  %v735_v59 = vsel %vm680_vm2, %v300_v54, %v330_v47  ;;  %v699_v46 = vsel %vm680_vm2, %v5341_v45, %v270_v19 }
 0x142   : > { %1151 = vmatprep.subr.bf16.mxu0 %v739_v22  ;;  %v4189_v26 = vcombine.low %v4169_v24, %v4169_v24  ;;  %v4197_v55 = vcombine.low %v2949_v35, %v2949_v35 }
 0x143   : > { %v4134_v15 = vpop.permute.xlu1 %523  ;;  %1152 = vmatpush1.bf16.msra.mxu0 %v735_v59  ;;  %v522_v53 = vpop.permute.xlu0 %521 }
 0x144   : > { %1153 = vmatprep.subr.bf16.mxu0 %v703_v31  ;;  %v533_v20 = vsel %vm295_vm1, %v3960_v34, %v522_v53  ;;  %v534_v9 = vsel %vm295_vm1, %v522_v53, %v4134_v15  ;;  %v4166_v34 = vcombine.high %v3906_v11, %v3906_v11  ;;  %v5342_v11 = vld [vmem:[#allocation12_spill] sm:$0xff] }
 0x145   : > { %1603 = vrot.lane.b32.xlu1 %v4126_v23, %s3252_s20  ;;  %1687 = vrot.lane.b32.xlu0 %v4072_v43, %s3251_s19 }
 0x147   : > { %v4148_v5 = vpop.permute.xlu1 %552  ;;  %1154 = vmatpush1.bf16.msra.mxu0 %v699_v46  ;;  %v551_v2 = vpop.permute.xlu0 %550 }
 0x148   : > { %v562_v7 = vsel %vm325_vm0, %v3971_v41, %v551_v2  ;;  %v563_v8 = vsel %vm325_vm0, %v551_v2, %v4148_v5 }
 0x149   : > { %1632 = vrot.lane.b32.xlu1 %v4126_v23, %s3253_s21  ;;  %1605 = vrot.lane.b32.xlu0 %v4144_v6, %s3252_s20  ;;  %v891_v44 = vsel %vm680_vm2, %v534_v9, %v563_v8  ;;  %v887_v27 = vsel %vm680_vm2, %v533_v20, %v562_v7 }
 0x14a   : > { %1216 = vmatprep.subr.bf16.mxu1 %v891_v44  ;;  %1172 = vmatmul.mubr.bf16.vlgmr.msra.gmra.mxu0 %v3827_v0  ;;  %v5344_v44 = vld [vmem:[#allocation11_spill] sm:$0xff] }
 0x14b   : > { %v4172_v41 = vpop.permute.xlu1 %494  ;;  %1217 = vmatpush1.bf16.msra.mxu1 %v887_v27  ;;  %v493_v48 = vpop.permute.xlu0 %492  ;;  %1181 = vmatprep.mubr.bf16.mxu0 %v5338_v14 }
 0x14c   : > { %v504_v39 = vsel %vm265_vm3, %v3992_v60, %v493_v48  ;;  %v505_v25 = vsel %vm265_vm3, %v493_v48, %v4172_v41  ;;  %v3207_v48 = vld [vmem:[%s3289_s18 + $0x98] ss:$0 sps:$4 sm:$0xff]  }
 0x14d   : > { %1837 = vrot.lane.b32.xlu1 %v4166_v34, %s3252_s20  ;;  %1634 = vrot.lane.b32.xlu0 %v4144_v6, %s3253_s21  ;;  %v855_v52 = vsel %vm680_vm2, %v5342_v11, %v505_v25  ;;  %v851_v54 = vsel %vm680_vm2, %v5343_v36, %v504_v39  ;;  %v4244_v39 = vld [vmem:[%s3289_s18 + $0xd8] sm:$0xff]  ;;  %v4261_v36 = vcombine.high %v3988_v18, %v3988_v18 }
 0x14e   : > { %1218 = vmatprep.subr.bf16.mxu1 %v855_v52  ;;  %v4257_v52 = vcombine.low %v4244_v39, %v4244_v39 }
 0x14f   : > { %v4191_v60 = vpop.permute.xlu1 %408  ;;  %1219 = vmatpush1.bf16.msra.mxu1 %v851_v54  ;;  %v407_v47 = vpop.permute.xlu0 %406  ;;  %v5346_v54 = vld [vmem:[#allocation5_spill] sm:$0xff] }
 0x150   : > { %v418_v19 = vsel %vm295_vm1, %v4013_v13, %v407_v47  ;;  %v419_v53 = vsel %vm295_vm1, %v407_v47, %v4191_v60 }
 0x151   : > { %1866 = vrot.lane.b32.xlu1 %v4166_v34, %s3253_s21  ;;  %1839 = vrot.lane.b32.xlu0 %v4189_v26, %s3252_s20 }
 0x152   : > { %1182 = vmatmul.mubr.bf16.gmra.mxu0 %v3858_v62 }
 0x153   : > { %v4200_v22 = vpop.permute.xlu1 %437  ;;  %v436_v59 = vpop.permute.xlu0 %435  ;;  %1191 = vmatprep.mubr.bf16.mxu0 %v5338_v14 }
 0x154   : > { %v447_v4 = vsel %vm325_vm0, %v4023_v61, %v436_v59  ;;  %v448_v35 = vsel %vm325_vm0, %v436_v59, %v4200_v22 }
 0x155   : > { %1601 = vrot.lane.b32.xlu1 %v4197_v55, %s3252_s20  ;;  %1868 = vrot.lane.b32.xlu0 %v4189_v26, %s3253_s21  ;;  %v819_v31 = vsel %vm680_vm2, %v419_v53, %v448_v35  ;;  %v815_v45 = vsel %vm680_vm2, %v418_v19, %v447_v4  ;;  %v5347_v53 = vld [vmem:[#allocation9_spill] sm:$0xff] }
 0x156   : > { %1220 = vmatprep.subr.bf16.mxu1 %v819_v31  ;;  %v302_v4 = vsel %vm295_vm1, %v5339_v56, %v5347_v53 }
 0x157   : > { %v670_v13 = vpop.permute.xlu1 %669  ;;  %1221 = vmatpush1.bf16.msra.mxu1 %v815_v45  ;;  %v641_v46 = vpop.permute.xlu0 %640 }
 0x158   : > { %v679_v61 = vsel %vm325_vm0, %v4055_v37, %v670_v13  ;;  %v650_v2 = vsel %vm295_vm1, %v4048_v51, %v641_v46  ;;  %v4287_v13 = vld [vmem:[%s3289_s18 + $0x130] sm:$0xff] }
 0x159   : > { %1574 = vrot.lane.b32.xlu1 %v4126_v23, %s3251_s19  ;;  %1630 = vrot.lane.b32.xlu0 %v4197_v55, %s3253_s21  ;;  %v967_v20 = vsel %vm680_vm2, %v650_v2, %v679_v61 }
 0x15a   : > { %3083 = vmatprep.subr.bf16.mxu0 %v967_v20  ;;  %1192 = vmatmul.mubr.bf16.gmra.mxu0 %v3887_v49 }
 0x15b   : > { %v4227_v9 = vpop.permute.xlu1 %379  ;;  %3084 = vmatpush3.bf16.msra.mxu0 %v967_v20  ;;  %v378_v37 = vpop.permute.xlu0 %377  ;;  %1201 = vmatprep.mubr.bf16.mxu0 %v5338_v14 }
 0x15c   : > { %v389_v51 = vsel %vm265_vm3, %v4074_v42, %v378_v37  ;;  %v390_v7 = vsel %vm265_vm3, %v378_v37, %v4227_v9 }
 0x15d   : > { %1808 = vrot.lane.b32.xlu1 %v4166_v34, %s3251_s19  ;;  %1576 = vrot.lane.b32.xlu0 %v4144_v6, %s3251_s19  ;;  %v783_v8 = vsel %vm680_vm2, %v3700_v29, %v390_v7  ;;  %v779_v27 = vsel %vm680_vm2, %v5344_v44, %v389_v51  ;;  %v4305_v51 = vcombine.low %v4287_v13, %v4287_v13 }
 0x15e   : > { %1222 = vmatprep.subr.bf16.mxu1 %v783_v8 }
 0x15f   : > { %v4246_v42 = vpop.permute.xlu1 %291  ;;  %1223 = vmatpush1.bf16.msra.mxu1 %v779_v27  ;;  %v612_v25 = vpop.permute.xlu0 %611 }
 0x160   : > { %v621_v11 = vsel %vm265_vm3, %v4089_v17, %v612_v25  ;;  %v5345_v17 = vld [vmem:[#allocation7_spill] sm:$0xff]  ;;  %v303_v18 = vsel %vm295_vm1, %v5347_v53, %v4246_v42 }
 0x161   : > { %1572 = vrot.lane.b32.xlu1 %v4197_v55, %s3251_s19  ;;  %1810 = vrot.lane.b32.xlu0 %v4189_v26, %s3251_s19  ;;  %v931_v29 = vsel %vm680_vm2, %v3207_v48, %v621_v11  ;;  %v273_v47 = vsel %vm265_vm3, %v5346_v54, %v5345_v17 }
 0x162   : > { %3085 = vmatprep.subr.bf16.mxu0 %v931_v29  ;;  %1202 = vmatmul.mubr.bf16.gmra.mxu0 %v3931_v16  ;;  %v711_v2 = vsel %vm680_vm2, %v3319_v10, %v273_v47  ;;  %v4309_v10 = vcombine.high %v4016_v30, %v4016_v30 }
 0x163   : > { %v4267_v59 = vpop.permute.xlu1 %321  ;;  %3086 = vmatpush3.bf16.msra.mxu0 %v931_v29  ;;  %v320_v19 = vpop.permute.xlu0 %319  ;;  %3099 = vmatprep.mubr.bf16.mxu0 %v3827_v0 }
 0x164   : > { %v332_v35 = vsel %vm325_vm0, %v4108_v12, %v320_v19  ;;  %v333_v31 = vsel %vm325_vm0, %v320_v19, %v4267_v59  ;;  %v272_v12 = vsel %vm265_vm3, %v3514_v50, %v5346_v54 }
 0x165   : > { %1724 = vrot.lane.b32.xlu1 %v4257_v52, %s3252_s20  ;;  %1722 = vrot.lane.b32.xlu0 %v4261_v36, %s3252_s20  ;;  %v747_v45 = vsel %vm680_vm2, %v303_v18, %v333_v31  ;;  %v743_v56 = vsel %vm680_vm2, %v302_v4, %v332_v35  ;;  %v4360_v35 = vcombine.high %v4129_v58, %v4129_v58  ;;  %v3215_v31 = vld [vmem:[%s3289_s18 + $0x48] ss:$0 sps:$4 sm:$0xff]  }
 0x166   : > { %1224 = vmatprep.subr.bf16.mxu1 %v747_v45 }
 0x167   : > { %v555_v46 = vpop.permute.xlu1 %554  ;;  %1225 = vmatpush1.bf16.msra.mxu1 %v743_v56  ;;  %v526_v61 = vpop.permute.xlu0 %525 }
 0x168   : > { %v564_v20 = vsel %vm325_vm0, %v4148_v5, %v555_v46  ;;  %v535_v37 = vsel %vm295_vm1, %v4134_v15, %v526_v61  ;;  %1226 = vmatprep.subr.bf16.mxu1 %v711_v2  ;;  %v3212_v5 = vld [vmem:[%s3289_s18 + $0x70] ss:$0 sps:$4 sm:$0xff]  }
 0x169   : > { %1753 = vrot.lane.b32.xlu1 %v4257_v52, %s3253_s21  ;;  %1751 = vrot.lane.b32.xlu0 %v4261_v36, %s3253_s21  ;;  %v895_v50 = vsel %vm680_vm2, %v535_v37, %v564_v20  ;;  %v5348_v15 = vld [vmem:[#allocation4_spill] sm:$0xff]  ;;  %v4374_v20 = vld [vmem:[%s3289_s18 + $0x108] sm:$0xff] }
 0x16a   : > { %3087 = vmatprep.subr.bf16.mxu0 %v895_v50  ;;  %v707_v7 = vsel %vm680_vm2, %v5348_v15, %v272_v12  ;;  %v4390_v15 = vcombine.low %v4374_v20, %v4374_v20 }
 0x16b   : > { %v411_v8 = vpop.permute.xlu1 %410  ;;  %1227 = vmatpush1.bf16.msra.mxu1 %v707_v7  ;;  %3088 = vmatpush3.bf16.msra.mxu0 %v895_v50  ;;  %v497_v44 = vpop.permute.xlu0 %496  ;;  %v4394_v7 = vcombine.high %v4169_v24, %v4169_v24  ;;  %v5349_v24 = vld [vmem:[#allocation6_spill] sm:$0xff] }
 0x16c   : > { %v506_v27 = vsel %vm265_vm3, %v4172_v41, %v497_v44  ;;  %v420_v41 = vsel %vm295_vm1, %v4191_v60, %v411_v8  ;;  %v4339_v60 = vld [vmem:[%s3289_s18 + $0xb0] sm:$0xff] }
 0x16d   : > { %1958 = vrot.lane.b32.xlu1 %v4305_v51, %s3252_s20  ;;  %1956 = vrot.lane.b32.xlu0 %v4309_v10, %s3252_s20  ;;  %v859_v30 = vsel %vm680_vm2, %v3212_v5, %v506_v27  ;;  %v4356_v18 = vcombine.low %v4339_v60, %v4339_v60 }
 0x16e   : > { %3089 = vmatprep.subr.bf16.mxu0 %v859_v30  ;;  %1245 = vmatmul.mubr.bf16.vlgmr.msra.gmra.mxu1 %v3827_v0 }
 0x16f   : > { %v1949_v48 = vpop.permute.xlu1 %1948  ;;  %3090 = vmatpush3.bf16.msra.mxu0 %v859_v30  ;;  %v440_v25 = vpop.permute.xlu0 %439  ;;  %1254 = vmatprep.mubr.bf16.mxu1 %v5338_v14 }
 0x170   : > { %v449_v11 = vsel %vm325_vm0, %v4200_v22, %v440_v25  ;;  %v3218_v25 = vld [vmem:[%s3289_s18 + $0x20] ss:$0 sps:$4 sm:$0xff]  }
 0x171   : > { %1987 = vrot.lane.b32.xlu1 %v4305_v51, %s3253_s21  ;;  %1985 = vrot.lane.b32.xlu0 %v4309_v10, %s3253_s21  ;;  %v823_v0 = vsel %vm680_vm2, %v420_v41, %v449_v11  ;;  %v274_v41 = vsel %vm265_vm3, %v5345_v17, %v5349_v24 }
 0x172   : > { %3091 = vmatprep.subr.bf16.mxu0 %v823_v0 }
 0x173   : > { %v1978_v29 = vpop.permute.xlu1 %1977  ;;  %3092 = vmatpush3.bf16.msra.mxu0 %v823_v0  ;;  %v4332_v54 = vpop.permute.xlu0 %1950 }
 0x174   : > { %v1967_v19 = vsel %vm295_vm1, %v1949_v48, %v4332_v54 }
 0x175   : > { %1695 = vrot.lane.b32.xlu1 %v4257_v52, %s3251_s19  ;;  %1693 = vrot.lane.b32.xlu0 %v4261_v36, %s3251_s19 }
 0x176   : > { %1255 = vmatmul.mubr.bf16.gmra.mxu1 %v3858_v62 }
 0x177   : > { %v1947_v22 = vpop.permute.xlu1 %1946  ;;  %v4342_v47 = vpop.permute.xlu0 %1979  ;;  %1264 = vmatprep.mubr.bf16.mxu1 %v5338_v14 }
 0x178   : > { %v1996_v53 = vsel %vm325_vm0, %v1978_v29, %v4342_v47  ;;  %v1966_v12 = vsel %vm295_vm1, %v1947_v22, %v1949_v48 }
 0x179   : > { %1929 = vrot.lane.b32.xlu1 %v4305_v51, %s3251_s19  ;;  %1927 = vrot.lane.b32.xlu0 %v4309_v10, %s3251_s19  ;;  %v2262_v4 = vsel %vm680_vm2, %v1967_v19, %v1996_v53 }
 0x17a   : > { %2292 = vmatprep.subr.bf16.mxu1 %v2262_v4 }
 0x17b   : > { %v382_v45 = vpop.permute.xlu1 %381  ;;  %v1976_v56 = vpop.permute.xlu0 %1975 }
 0x17c   : > { %v391_v46 = vsel %vm265_vm3, %v4227_v9, %v382_v45  ;;  %v1995_v61 = vsel %vm325_vm0, %v1976_v56, %v1978_v29  ;;  %v4445_v56 = vcombine.high %v4244_v39, %v4244_v39 }
 0x17d   : > { %1609 = vrot.lane.b32.xlu1 %v4356_v18, %s3252_s20  ;;  %1607 = vrot.lane.b32.xlu0 %v4360_v35, %s3252_s20  ;;  %v787_v58 = vsel %vm680_vm2, %v3215_v31, %v391_v46  ;;  %v2258_v2 = vsel %vm680_vm2, %v1966_v12, %v1995_v61 }
 0x17e   : > { %3093 = vmatprep.subr.bf16.mxu0 %v787_v58  ;;  %2293 = vmatpush1.bf16.msra.mxu1 %v2258_v2  ;;  %v4457_v2 = vld [vmem:[%s3289_s18 + $0x138] sm:$0xff] }
 0x17f   : > { %v4376_v37 = vpop.permute.xlu1 %1921  ;;  %3094 = vmatpush3.bf16.msra.mxu0 %v787_v58  ;;  %v1920_v9 = vpop.permute.xlu0 %1919  ;;  %1265 = vmatmul.mubr.bf16.gmra.mxu1 %v3887_v49 }
 0x180   : > { %v1938_v50 = vsel %vm265_vm3, %v1920_v9, %v4376_v37  ;;  %1274 = vmatprep.mubr.bf16.mxu1 %v5338_v14 }
 0x181   : > { %1638 = vrot.lane.b32.xlu1 %v4356_v18, %s3253_s21  ;;  %1636 = vrot.lane.b32.xlu0 %v4360_v35, %s3253_s21  ;;  %v2226_v5 = vsel %vm680_vm2, %v3780_v63, %v1938_v50 }
 0x182   : > { %2294 = vmatprep.subr.bf16.mxu1 %v2226_v5  ;;  %v3015_v5 = vcombine.low %v4457_v2, %v4457_v2 }
 0x183   : > { %v294_v8 = vpop.permute.xlu1 %293  ;;  %v1918_v44 = vpop.permute.xlu0 %1917 }
 0x184   : > { %v1937_v27 = vsel %vm265_vm3, %v1918_v44, %v1920_v9  ;;  %v304_v11 = vsel %vm295_vm1, %v4246_v42, %v294_v8  ;;  %v715_v42 = vsel %vm680_vm2, %v3218_v25, %v274_v41  ;;  %v4498_v41 = vld [vmem:[%s3289_s18 + $0xb8] sm:$0xff] }
 0x185   : > { %1843 = vrot.lane.b32.xlu1 %v4390_v15, %s3252_s20  ;;  %1841 = vrot.lane.b32.xlu0 %v4394_v7, %s3252_s20  ;;  %v2222_v63 = vsel %vm680_vm2, %v3835_v3, %v1937_v27  ;;  %v4476_v27 = vcombine.high %v4287_v13, %v4287_v13 }
 0x186   : > { %2295 = vmatpush1.bf16.msra.mxu1 %v2222_v63 }
 0x187   : > { %v1834_v30 = vpop.permute.xlu1 %1833  ;;  %v324_v48 = vpop.permute.xlu0 %323  ;;  %1275 = vmatmul.mubr.bf16.gmra.mxu1 %v3931_v16 }
 0x188   : > { %v334_v0 = vsel %vm325_vm0, %v4267_v59, %v324_v48  ;;  %2324 = vmatprep.mubr.bf16.mxu1 %v5338_v14  ;;  %v4426_v59 = vld [vmem:[%s3289_s18 + $0xe0] sm:$0xff] }
 0x189   : > { %1872 = vrot.lane.b32.xlu1 %v4390_v15, %s3253_s21  ;;  %1870 = vrot.lane.b32.xlu0 %v4394_v7, %s3253_s21  ;;  %v751_v3 = vsel %vm680_vm2, %v304_v11, %v334_v0  ;;  %v4441_v45 = vcombine.low %v4426_v59, %v4426_v59 }
 0x18a   : > { %3095 = vmatprep.subr.bf16.mxu0 %v751_v3 }
 0x18b   : > { %v1863_v29 = vpop.permute.xlu1 %1862  ;;  %3096 = vmatpush3.bf16.msra.mxu0 %v751_v3  ;;  %v4418_v17 = vpop.permute.xlu0 %1835  ;;  %v4508_v3 = vcombine.low %v4498_v41, %v4498_v41 }
 0x18c   : > { %3097 = vmatprep.subr.bf16.mxu0 %v715_v42  ;;  %v1852_v53 = vsel %vm295_vm1, %v1834_v30, %v4418_v17 }
 0x18d   : > { %1580 = vrot.lane.b32.xlu1 %v4356_v18, %s3251_s19  ;;  %1578 = vrot.lane.b32.xlu0 %v4360_v35, %s3251_s19 }
 0x18f   : > { %v1832_v22 = vpop.permute.xlu1 %1831  ;;  %3098 = vmatpush3.bf16.msra.mxu0 %v715_v42  ;;  %v4428_v19 = vpop.permute.xlu0 %1864 }
 0x190   : > { %v1881_v4 = vsel %vm325_vm0, %v1863_v29, %v4428_v19  ;;  %v1851_v61 = vsel %vm295_vm1, %v1832_v22, %v1834_v30 }
 0x191   : > { %1814 = vrot.lane.b32.xlu1 %v4390_v15, %s3251_s19  ;;  %1812 = vrot.lane.b32.xlu0 %v4394_v7, %s3251_s19  ;;  %v2190_v31 = vsel %vm680_vm2, %v1852_v53, %v1881_v4 }
 0x192   : > { %2296 = vmatprep.subr.bf16.mxu1 %v2190_v31  ;;  %3100 = vmatmul.mubr.bf16.vlgmr.msra.gmra.mxu0 %v3858_v62 }
 0x193   : > { %v1805_v12 = vpop.permute.xlu1 %1804  ;;  %v1861_v46 = vpop.permute.xlu0 %1860  ;;  %3103 = vmatprep.mubr.bf16.mxu0 %v3887_v49 }
 0x194   : > { %v1880_v58 = vsel %vm325_vm0, %v1861_v46, %v1863_v29 }
 0x195   : > { %1728 = vrot.lane.b32.xlu1 %v4441_v45, %s3252_s20  ;;  %1726 = vrot.lane.b32.xlu0 %v4445_v56, %s3252_s20  ;;  %v2186_v39 = vsel %vm680_vm2, %v1851_v61, %v1880_v58 }
 0x196   : > { %2297 = vmatpush1.bf16.msra.mxu1 %v2186_v39  ;;  %v4535_v39 = vld [vmem:[%s3289_s18 + $0x110] sm:$0xff] }
 0x197   : > { %v1803_v62 = vpop.permute.xlu1 %1802  ;;  %v4459_v9 = vpop.permute.xlu0 %1806 }
 0x198   : > { %v1822_v49 = vsel %vm265_vm3, %v1803_v62, %v1805_v12  ;;  %v1823_v50 = vsel %vm265_vm3, %v1805_v12, %v4459_v9 }
 0x199   : > { %1757 = vrot.lane.b32.xlu1 %v4441_v45, %s3253_s21  ;;  %1755 = vrot.lane.b32.xlu0 %v4445_v56, %s3253_s21  ;;  %v2154_v8 = vsel %vm680_vm2, %v3903_v33, %v1823_v50  ;;  %v2150_v44 = vsel %vm680_vm2, %v3954_v57, %v1822_v49 }
 0x19a   : > { %2298 = vmatprep.subr.bf16.mxu1 %v2154_v8  ;;  %3104 = vmatmul.mubr.bf16.gmra.mxu0 %v3931_v16  ;;  %v4551_v8 = vcombine.high %v4374_v20, %v4374_v20 }
 0x19b   : > { %v4479_v63 = vpop.permute.xlu1 %1720  ;;  %2299 = vmatpush1.bf16.msra.mxu1 %v2150_v44  ;;  %v1719_v30 = vpop.permute.xlu0 %1718  ;;  %2397 = vmatprep.mubr.bf16.mxu0 %v5338_v14 }
 0x19c   : > { %v1737_v13 = vsel %vm295_vm1, %v1719_v30, %v4479_v63 }
 0x19d   : > { %1962 = vrot.lane.b32.xlu1 %v3015_v5, %s3252_s20  ;;  %1960 = vrot.lane.b32.xlu0 %v4476_v27, %s3252_s20 }
 0x19f   : > { %v4485_v33 = vpop.permute.xlu1 %1749  ;;  %v1748_v57 = vpop.permute.xlu0 %1747 }
 0x1a0   : > { %v1766_v16 = vsel %vm325_vm0, %v1748_v57, %v4485_v33 }
 0x1a1   : > { %1991 = vrot.lane.b32.xlu1 %v3015_v5, %s3253_s21  ;;  %1989 = vrot.lane.b32.xlu0 %v4476_v27, %s3253_s21  ;;  %v2118_v48 = vsel %vm680_vm2, %v1737_v13, %v1766_v16 }
 0x1a2   : > { %2300 = vmatprep.subr.bf16.mxu1 %v2118_v48 }
 0x1a3   : > { %v4495_v25 = vpop.permute.xlu1 %1954  ;;  %v1953_v24 = vpop.permute.xlu0 %1952 }
 0x1a4   : > { %v1968_v29 = vsel %vm295_vm1, %v4332_v54, %v1953_v24  ;;  %v1969_v42 = vsel %vm295_vm1, %v1953_v24, %v4495_v25  ;;  %v4525_v54 = vcombine.high %v4339_v60, %v4339_v60 }
 0x1a5   : > { %1699 = vrot.lane.b32.xlu1 %v4441_v45, %s3251_s19  ;;  %1697 = vrot.lane.b32.xlu0 %v4445_v56, %s3251_s19 }
 0x1a7   : > { %v4504_v11 = vpop.permute.xlu1 %1983  ;;  %v1982_v0 = vpop.permute.xlu0 %1981 }
 0x1a8   : > { %v1997_v22 = vsel %vm325_vm0, %v4342_v47, %v1982_v0  ;;  %v1998_v53 = vsel %vm325_vm0, %v1982_v0, %v4504_v11 }
 0x1a9   : > { %1933 = vrot.lane.b32.xlu1 %v3015_v5, %s3251_s19  ;;  %1931 = vrot.lane.b32.xlu0 %v4476_v27, %s3251_s19  ;;  %v2270_v4 = vsel %vm680_vm2, %v1969_v42, %v1998_v53  ;;  %v2266_v31 = vsel %vm680_vm2, %v1968_v29, %v1997_v22  ;;  %v3004_v5 = vcombine.low %v4535_v39, %v4535_v39 }
 0x1aa   : > { %2365 = vmatprep.subr.bf16.mxu0 %v2270_v4 }
 0x1ab   : > { %v1746_v12 = vpop.permute.xlu1 %1745  ;;  %2366 = vmatpush1.bf16.msra.mxu0 %v2266_v31  ;;  %v1717_v47 = vpop.permute.xlu0 %1716  ;;  %v4595_v31 = vcombine.high %v4426_v59, %v4426_v59 }
 0x1ac   : > { %v1765_v46 = vsel %vm325_vm0, %v1746_v12, %v1748_v57  ;;  %v1736_v61 = vsel %vm295_vm1, %v1717_v47, %v1719_v30 }
 0x1ad   : > { %1613 = vrot.lane.b32.xlu1 %v4508_v3, %s3252_s20  ;;  %1611 = vrot.lane.b32.xlu0 %v4525_v54, %s3252_s20  ;;  %v2114_v58 = vsel %vm680_vm2, %v1736_v61, %v1765_v46 }
 0x1ae   : > { %2301 = vmatpush1.bf16.msra.mxu1 %v2114_v58 }
 0x1af   : > { %v4537_v60 = vpop.permute.xlu1 %1691  ;;  %v1690_v62 = vpop.permute.xlu0 %1689 }
 0x1b0   : > { %v1708_v49 = vsel %vm265_vm3, %v1690_v62, %v4537_v60 }
 0x1b1   : > { %1642 = vrot.lane.b32.xlu1 %v4508_v3, %s3253_s21  ;;  %1640 = vrot.lane.b32.xlu0 %v4525_v54, %s3253_s21  ;;  %v2082_v50 = vsel %vm680_vm2, %v4011_v1, %v1708_v49 }
 0x1b2   : > { %2302 = vmatprep.subr.bf16.mxu1 %v2082_v50 }
 0x1b3   : > { %v4553_v44 = vpop.permute.xlu1 %1925  ;;  %v1924_v30 = vpop.permute.xlu0 %1923 }
 0x1b4   : > { %v1939_v57 = vsel %vm265_vm3, %v4376_v37, %v1924_v30  ;;  %v1940_v13 = vsel %vm265_vm3, %v1924_v30, %v4553_v44 }
 0x1b5   : > { %1847 = vrot.lane.b32.xlu1 %v3004_v5, %s3252_s20  ;;  %1845 = vrot.lane.b32.xlu0 %v4551_v8, %s3252_s20  ;;  %v2234_v1 = vsel %vm680_vm2, %v4046_v32, %v1940_v13  ;;  %v2230_v20 = vsel %vm680_vm2, %v3813_v38, %v1939_v57  ;;  %v4579_v38 = vld [vmem:[%s3289_s18 + $0xe8] sm:$0xff] }
 0x1b6   : > { %2367 = vmatprep.subr.bf16.mxu0 %v2234_v1  ;;  %v2993_v4 = vcombine.low %v4579_v38, %v4579_v38 }
 0x1b7   : > { %v1604_v16 = vpop.permute.xlu1 %1603  ;;  %2368 = vmatpush1.bf16.msra.mxu0 %v2230_v20  ;;  %v1688_v48 = vpop.permute.xlu0 %1687 }
 0x1b8   : > { %v1707_v37 = vsel %vm265_vm3, %v1688_v48, %v1690_v62 }
 0x1b9   : > { %1876 = vrot.lane.b32.xlu1 %v3004_v5, %s3253_s21  ;;  %1874 = vrot.lane.b32.xlu0 %v4551_v8, %s3253_s21  ;;  %v2078_v24 = vsel %vm680_vm2, %v4072_v43, %v1707_v37  ;;  %v4635_v37 = vcombine.high %v4498_v41, %v4498_v41 }
 0x1ba   : > { %2303 = vmatpush1.bf16.msra.mxu1 %v2078_v24  ;;  %v4638_v24 = vld [vmem:[%s3289_s18 + $0xc0] sm:$0xff] }
 0x1bb   : > { %v1633_v0 = vpop.permute.xlu1 %1632  ;;  %v4572_v32 = vpop.permute.xlu0 %1605 }
 0x1bc   : > { %v1622_v22 = vsel %vm295_vm1, %v1604_v16, %v4572_v32 }
 0x1bd   : > { %1584 = vrot.lane.b32.xlu1 %v4508_v3, %s3251_s19  ;;  %1582 = vrot.lane.b32.xlu0 %v4525_v54, %s3251_s19 }
 0x1bf   : > { %v1838_v29 = vpop.permute.xlu1 %1837  ;;  %v4581_v42 = vpop.permute.xlu0 %1634 }
 0x1c0   : > { %v1651_v43 = vsel %vm325_vm0, %v1633_v0, %v4581_v42  ;;  %v1853_v49 = vsel %vm295_vm1, %v4418_v17, %v1838_v29 }
 0x1c1   : > { %1818 = vrot.lane.b32.xlu1 %v3004_v5, %s3251_s19  ;;  %1816 = vrot.lane.b32.xlu0 %v4551_v8, %s3251_s19  ;;  %v2046_v53 = vsel %vm680_vm2, %v1622_v22, %v1651_v43 }
 0x1c2   : > { %2304 = vmatprep.subr.bf16.mxu1 %v2046_v53 }
 0x1c3   : > { %v1867_v12 = vpop.permute.xlu1 %1866  ;;  %v4597_v47 = vpop.permute.xlu0 %1839 }
 0x1c4   : > { %v1882_v46 = vsel %vm325_vm0, %v4428_v19, %v1867_v12  ;;  %v1854_v62 = vsel %vm295_vm1, %v1838_v29, %v4597_v47  ;;  %v3016_v19 = vcombine.high %v4457_v2, %v4457_v2 }
 0x1c5   : > { %1732 = vrot.lane.b32.xlu1 %v2993_v4, %s3252_s20  ;;  %1730 = vrot.lane.b32.xlu0 %v4595_v31, %s3252_s20  ;;  %v2194_v5 = vsel %vm680_vm2, %v1853_v49, %v1882_v46 }
 0x1c7   : > { %v1602_v61 = vpop.permute.xlu1 %1601  ;;  %v4604_v58 = vpop.permute.xlu0 %1868 }
 0x1c8   : > { %v1883_v59 = vsel %vm325_vm0, %v1867_v12, %v4604_v58  ;;  %v1621_v13 = vsel %vm295_vm1, %v1602_v61, %v1604_v16 }
 0x1c9   : > { %1761 = vrot.lane.b32.xlu1 %v2993_v4, %s3253_s21  ;;  %1759 = vrot.lane.b32.xlu0 %v4595_v31, %s3253_s21  ;;  %v2198_v50 = vsel %vm680_vm2, %v1854_v62, %v1883_v59 }
 0x1ca   : > { %2369 = vmatprep.subr.bf16.mxu0 %v2198_v50 }
 0x1cb   : > { %v1575_v30 = vpop.permute.xlu1 %1574  ;;  %2370 = vmatpush1.bf16.msra.mxu0 %v2194_v5  ;;  %v1631_v57 = vpop.permute.xlu0 %1630 }
 0x1cc   : > { %v1650_v17 = vsel %vm325_vm0, %v1631_v57, %v1633_v0 }
 0x1cd   : > { %1993 = vrot.lane.b32.xlu1 %v3016_v19, %s3253_s21  ;;  %1964 = vrot.lane.b32.xlu0 %v3016_v19, %s3252_s20  ;;  %v2042_v1 = vsel %vm680_vm2, %v1621_v13, %v1650_v17 }
 0x1ce   : > { %2305 = vmatpush1.bf16.msra.mxu1 %v2042_v1 }
 0x1cf   : > { %v1809_v20 = vpop.permute.xlu1 %1808  ;;  %v4624_v2 = vpop.permute.xlu0 %1576 }
 0x1d0   : > { %v1593_v48 = vsel %vm265_vm3, %v1575_v30, %v4624_v2  ;;  %v1824_v0 = vsel %vm265_vm3, %v4459_v9, %v1809_v20  ;;  %v2982_v9 = vcombine.low %v4638_v24, %v4638_v24 }
 0x1d1   : > { %1703 = vrot.lane.b32.xlu1 %v2993_v4, %s3251_s19  ;;  %1701 = vrot.lane.b32.xlu0 %v4595_v31, %s3251_s19  ;;  %v2010_v16 = vsel %vm680_vm2, %v4126_v23, %v1593_v48  ;;  %v2158_v4 = vsel %vm680_vm2, %v3926_v21, %v1824_v0 }
 0x1d2   : > { %2306 = vmatprep.subr.bf16.mxu1 %v2010_v16 }
 0x1d3   : > { %v1573_v29 = vpop.permute.xlu1 %1572  ;;  %v4642_v22 = vpop.permute.xlu0 %1810 }
 0x1d4   : > { %v1592_v43 = vsel %vm265_vm3, %v1573_v29, %v1575_v30  ;;  %v1825_v53 = vsel %vm265_vm3, %v1809_v20, %v4642_v22 }
 0x1d5   : > { %1615 = vrot.lane.b32.xlu1 %v4635_v37, %s3252_s20  ;;  %1935 = vrot.lane.b32.xlu0 %v3016_v19, %s3251_s19  ;;  %v2006_v23 = vsel %vm680_vm2, %v4197_v55, %v1592_v43  ;;  %v2162_v41 = vsel %vm680_vm2, %v4166_v34, %v1825_v53  ;;  %v3005_v34 = vcombine.high %v4535_v39, %v4535_v39  ;;  %v4668_v55 = vld [vmem:[%s5304_s1] sm:$0xff]  }
 0x1d6   : > { %2307 = vmatpush1.bf16.msra.mxu1 %v2006_v23  ;;  %2371 = vmatprep.subr.bf16.mxu0 %v2162_v41  ;;  %v2983_v23 = vcombine.high %v4638_v24, %v4638_v24 }
 0x1d7   : > { %v4658_v12 = vpop.permute.xlu1 %1724  ;;  %2372 = vmatpush1.bf16.msra.mxu0 %v2158_v4  ;;  %v1723_v46 = vpop.permute.xlu0 %1722 }
 0x1d8   : > { %v1738_v62 = vsel %vm295_vm1, %v4479_v63, %v1723_v46  ;;  %v1739_v59 = vsel %vm295_vm1, %v1723_v46, %v4658_v12 }
 0x1d9   : > { %1644 = vrot.lane.b32.xlu1 %v4635_v37, %s3253_s21  ;;  %1617 = vrot.lane.b32.xlu0 %v2982_v9, %s3252_s20 }
 0x1da   : > { %2325 = vmatmul.mubr.bf16.vlgmr.msra.gmra.mxu1 %v4668_v55 }
 0x1db   : > { %v4671_v21 = vpop.permute.xlu1 %1753  ;;  %v1752_v61 = vpop.permute.xlu0 %1751  ;;  %2334 = vmatprep.mubr.bf16.mxu1 %v5338_v14 }
 0x1dc   : > { %v1767_v39 = vsel %vm325_vm0, %v4485_v33, %v1752_v61  ;;  %v1768_v49 = vsel %vm325_vm0, %v1752_v61, %v4671_v21  ;;  %v4694_v33 = vld [vmem:[%s5304_s1 + $0x8] sm:$0xff]  }
 0x1dd   : > { %1849 = vrot.lane.b32.xlu1 %v3005_v34, %s3252_s20  ;;  %1646 = vrot.lane.b32.xlu0 %v2982_v9, %s3253_s21  ;;  %v2126_v50 = vsel %vm680_vm2, %v1739_v59, %v1768_v49  ;;  %v2122_v19 = vsel %vm680_vm2, %v1738_v62, %v1767_v39 }
 0x1de   : > { %2373 = vmatprep.subr.bf16.mxu0 %v2126_v50 }
 0x1df   : > { %v4686_v5 = vpop.permute.xlu1 %1958  ;;  %2374 = vmatpush1.bf16.msra.mxu0 %v2122_v19  ;;  %v1957_v63 = vpop.permute.xlu0 %1956 }
 0x1e0   : > { %v1970_v13 = vsel %vm295_vm1, %v4495_v25, %v1957_v63  ;;  %v1971_v17 = vsel %vm295_vm1, %v1957_v63, %v4686_v5  ;;  %v2994_v25 = vcombine.high %v4579_v38, %v4579_v38 }
 0x1e1   : > { %1586 = vrot.lane.b32.xlu1 %v4635_v37, %s3251_s19  ;;  %1878 = vrot.lane.b32.xlu0 %v3005_v34, %s3253_s21 }
 0x1e2   : > { %2335 = vmatmul.mubr.bf16.gmra.mxu1 %v4694_v33 }
 0x1e3   : > { %v4697_v30 = vpop.permute.xlu1 %1987  ;;  %v1986_v57 = vpop.permute.xlu0 %1985  ;;  %2344 = vmatprep.mubr.bf16.mxu1 %v5338_v14 }
 0x1e4   : > { %v1999_v1 = vsel %vm325_vm0, %v4504_v11, %v1986_v57  ;;  %v2000_v20 = vsel %vm325_vm0, %v1986_v57, %v4697_v30  ;;  %v4776_v57 = vpop.f32.mrf.mxu0 }
 0x1e5   : > { %1820 = vrot.lane.b32.xlu1 %v3005_v34, %s3251_s19  ;;  %1588 = vrot.lane.b32.xlu0 %v2982_v9, %s3251_s19  ;;  %v2278_v48 = vsel %vm680_vm2, %v1971_v17, %v2000_v20  ;;  %v2274_v16 = vsel %vm680_vm2, %v1970_v13, %v1999_v1  ;;  %v4778_v13 = vpop.f32.mrf.mxu1 }
 0x1e6   : > { %2438 = vmatprep.subr.bf16.mxu1 %v2278_v48  ;;  %v4782_v1 = vpop.f32.mrf.mxu0 }
 0x1e7   : > { %v4714_v0 = vpop.permute.xlu1 %1695  ;;  %2439 = vmatpush1.bf16.msra.mxu1 %v2274_v16  ;;  %v1694_v29 = vpop.permute.xlu0 %1693 }
 0x1e8   : > { %v1709_v11 = vsel %vm265_vm3, %v4537_v60, %v1694_v29  ;;  %v1710_v43 = vsel %vm265_vm3, %v1694_v29, %v4714_v0  ;;  %v4731_v60 = vld [vmem:[%s5304_s1 + $0x10] sm:$0xff]   ;;  %v4786_v20 = vpop.f32.mrf.mxu0 }
 0x1e9   : > { %1763 = vrot.lane.b32.xlu1 %v2994_v25, %s3253_s21  ;;  %1734 = vrot.lane.b32.xlu0 %v2994_v25, %s3252_s20  ;;  %v2090_v53 = vsel %vm680_vm2, %v4261_v36, %v1710_v43  ;;  %v2086_v38 = vsel %vm680_vm2, %v4001_v40, %v1709_v11  ;;  %5350 = vst [vmem:[#allocation10_spill] sm:$0xff] %v4731_v60  ;;  %5352 = vst [vmem:[#allocation3_spill] sm:$0xff] %v4786_v20 }
 0x1ea   : > { %2375 = vmatprep.subr.bf16.mxu0 %v2090_v53  ;;  %2345 = vmatmul.mubr.bf16.gmra.mxu1 %v4731_v60 }
 0x1eb   : > { %v4734_v41 = vpop.permute.xlu1 %1929  ;;  %2376 = vmatpush1.bf16.msra.mxu0 %v2086_v38  ;;  %v1928_v9 = vpop.permute.xlu0 %1927  ;;  %2354 = vmatprep.mubr.bf16.mxu1 %v5338_v14 }
 0x1ec   : > { %v1941_v40 = vsel %vm265_vm3, %v4553_v44, %v1928_v9  ;;  %v1942_v36 = vsel %vm265_vm3, %v1928_v9, %v4734_v41  ;;  %v189_v44 = vld [vmem:[%s5305_s2 + $0x8] sm:$0xff]  ;;  %v4800_v38 = vpop.f32.mrf.mxu0 }
 0x1ed   : > { %1619 = vrot.lane.b32.xlu1 %v2983_v23, %s3252_s20  ;;  %1705 = vrot.lane.b32.xlu0 %v2994_v25, %s3251_s19  ;;  %v2242_v24 = vsel %vm680_vm2, %v4309_v10, %v1942_v36  ;;  %v2238_v4 = vsel %vm680_vm2, %v4027_v28, %v1941_v40  ;;  %v188_v10 = vld [vmem:[%s5305_s2] sm:$0xff]  ;;  %v4760_v28 = vld [vmem:[%s5304_s1 + $0x18] sm:$0xff]   ;;  %5353 = vst [vmem:[#allocation12_spill] sm:$0xff] %v4800_v38 }
 0x1ee   : > { %2440 = vmatprep.subr.bf16.mxu1 %v2242_v24  ;;  %5351 = vst [vmem:[#allocation2_spill] sm:$0xff] %v4760_v28  ;;  %v4806_v36 = vpop.f32.mrf.mxu0 }
 0x1ef   : > { %v4747_v46 = vpop.permute.xlu1 %1609  ;;  %2441 = vmatpush1.bf16.msra.mxu1 %v2238_v4  ;;  %v1608_v34 = vpop.permute.xlu0 %1607 }
 0x1f0   : > { %v1623_v59 = vsel %vm295_vm1, %v4572_v32, %v1608_v34  ;;  %v1624_v39 = vsel %vm295_vm1, %v1608_v34, %v4747_v46 }
 0x1f1   : > { %1590 = vrot.lane.b32.xlu1 %v2983_v23, %s3251_s19  ;;  %1648 = vrot.lane.b32.xlu0 %v2983_v23, %s3253_s21  ;;  %s5250_s19 = scalar_lea.vmem %s5306_s3, %s3132_s17 }
 0x1f2   : > { %2355 = vmatmul.mubr.bf16.gmra.mxu1 %v4760_v28 }
 0x1f3   : > { %v4763_v61 = vpop.permute.xlu1 %1638  ;;  %v1637_v62 = vpop.permute.xlu0 %1636  ;;  %2470 = vmatprep.mubr.bf16.mxu1 %v5338_v14 }
 0x1f4   : > { %v1652_v49 = vsel %vm325_vm0, %v4581_v42, %v1637_v62  ;;  %v1653_v50 = vsel %vm325_vm0, %v1637_v62, %v4763_v61  ;;  %v4784_v42 = vpop.f32.mrf.mxu1 }
 0x1f5   : > { %v2054_v19 = vsel %vm680_vm2, %v1624_v39, %v1653_v50  ;;  %v2050_v63 = vsel %vm680_vm2, %v1623_v59, %v1652_v49  ;;  %1411 = vperm.xlu1 %3146, %v189_v44   ;;  %1406 = vperm.xlu0 %3145, %v188_v10   ;;  %v4818_v10 = vpop.f32.mrf.mxu0 }
 0x1f6   : > { %2377 = vmatprep.subr.bf16.mxu0 %v2054_v19  ;;  %v4788_v48 = vpop.f32.mrf.mxu1 }
 0x1f7   : > { %v4780_v32 = vpop.permute.xlu1 %1843  ;;  %2378 = vmatpush1.bf16.msra.mxu0 %v2050_v63  ;;  %v1842_v17 = vpop.permute.xlu0 %1841 }
 0x1f8   : > { %v1855_v29 = vsel %vm295_vm1, %v4597_v47, %v1842_v17  ;;  %v1856_v11 = vsel %vm295_vm1, %v1842_v17, %v4780_v32  ;;  %v4802_v23 = vpop.f32.mrf.mxu1  ;;  %v4826_v49 = vpop.f32.mrf.mxu0 }
 0x1f9   : > { %5354 = vst [vmem:[#allocation8_spill] sm:$0xff] %v4826_v49 }
 0x1fa   : > { %v4808_v47 = vpop.f32.mrf.mxu1  ;;  %v4838_v17 = vpop.f32.mrf.mxu0 }
 0x1fb   : > { %v4790_v16 = vpop.permute.xlu1 %1872  ;;  %v1871_v25 = vpop.permute.xlu0 %1870  ;;  %5355 = vst [vmem:[#allocation11_spill] sm:$0xff] %v4838_v17 }
 0x1fc   : > { %v1884_v43 = vsel %vm325_vm0, %v4604_v58, %v1871_v25  ;;  %v1885_v53 = vsel %vm325_vm0, %v1871_v25, %v4790_v16  ;;  %v4828_v50 = vpop.f32.mrf.mxu1 }
 0x1fd   : > { %v2206_v9 = vsel %vm680_vm2, %v1856_v11, %v1885_v53  ;;  %v2202_v40 = vsel %vm680_vm2, %v1855_v29, %v1884_v43  ;;  %v4847_v43 = vpop.f32.mrf.mxu0 }
 0x1fe   : > { %2442 = vmatprep.subr.bf16.mxu1 %v2206_v9 }
 0x1ff   : > { %v4810_v24 = vpop.permute.xlu1 %1580  ;;  %2443 = vmatpush1.bf16.msra.mxu1 %v2202_v40  ;;  %v1579_v58 = vpop.permute.xlu0 %1578 }
 0x200   : > { %v1594_v34 = vsel %vm265_vm3, %v4624_v2, %v1579_v58  ;;  %v1595_v44 = vsel %vm265_vm3, %v1579_v58, %v4810_v24 }
 0x201   : > { %v2018_v62 = vsel %vm680_vm2, %v4360_v35, %v1595_v44  ;;  %v2014_v59 = vsel %vm680_vm2, %v4144_v6, %v1594_v34 }
 0x202   : > { %2379 = vmatprep.subr.bf16.mxu0 %v2018_v62 }
 0x203   : > { %v4830_v2 = vpop.permute.xlu1 %1814  ;;  %2380 = vmatpush1.bf16.msra.mxu0 %v2014_v59  ;;  %v1813_v19 = vpop.permute.xlu0 %1812 }
 0x204   : > { %v1826_v35 = vsel %vm265_vm3, %v4642_v22, %v1813_v19  ;;  %v1827_v6 = vsel %vm265_vm3, %v1813_v19, %v4830_v2  ;;  %v4849_v22 = vpop.f32.mrf.mxu1 }
 0x205   : > { %v2170_v25 = vsel %vm680_vm2, %v4394_v7, %v1827_v6  ;;  %v2166_v29 = vsel %vm680_vm2, %v4189_v26, %v1826_v35  ;;  %v4854_v7 = vpop.f32.mrf.mxu0 }
 0x206   : > { %2444 = vmatprep.subr.bf16.mxu1 %v2170_v25  ;;  %2398 = vmatmul.mubr.bf16.vlgmr.msra.gmra.mxu0 %v4668_v55  ;;  %v4858_v26 = vpop.f32.mrf.mxu1 }
 0x207   : > { %v4851_v53 = vpop.permute.xlu1 %1728  ;;  %2445 = vmatpush1.bf16.msra.mxu1 %v2166_v29  ;;  %v1727_v9 = vpop.permute.xlu0 %1726  ;;  %2407 = vmatprep.mubr.bf16.mxu0 %v5338_v14 }
 0x208   : > { %v4856_v40 = vpop.f32.mrf.mxu0  ;;  %v1740_v44 = vsel %vm295_vm1, %v4658_v12, %v1727_v9  ;;  %v1741_v62 = vsel %vm295_vm1, %v1727_v9, %v4851_v53  ;;  %v4877_v12 = vpop.f32.mrf.mxu1 }
 0x20a   : > { %v4870_v35 = vpop.f32.mrf.mxu0 }
 0x20b   : > { %v4860_v58 = vpop.permute.xlu1 %1757  ;;  %v1756_v34 = vpop.permute.xlu0 %1755 }
 0x20c   : > { %v1769_v59 = vsel %vm325_vm0, %v4671_v21, %v1756_v34  ;;  %v1770_v19 = vsel %vm325_vm0, %v1756_v34, %v4860_v58  ;;  %v4875_v29 = vpop.f32.mrf.mxu0 }
 0x20d   : > { %v2134_v6 = vsel %vm680_vm2, %v1741_v62, %v1770_v19  ;;  %v2130_v25 = vsel %vm680_vm2, %v1740_v44, %v1769_v59  ;;  %v4886_v62 = vpop.f32.mrf.mxu1 }
 0x20e   : > { %2446 = vmatprep.subr.bf16.mxu1 %v2134_v6  ;;  %2408 = vmatmul.mubr.bf16.gmra.mxu0 %v4694_v33  ;;  %v4882_v34 = vpop.f32.mrf.mxu0 }
 0x20f   : > { %v4879_v9 = vpop.permute.xlu1 %1962  ;;  %2447 = vmatpush1.bf16.msra.mxu1 %v2130_v25  ;;  %v1961_v21 = vpop.permute.xlu0 %1960  ;;  %2417 = vmatprep.mubr.bf16.mxu0 %v5338_v14 }
 0x210   : > { %v4884_v11 = vpop.f32.mrf.mxu0  ;;  %v1972_v19 = vsel %vm295_vm1, %v4686_v5, %v1961_v21  ;;  %v1973_v6 = vsel %vm295_vm1, %v1961_v21, %v4879_v9  ;;  %v4905_v5 = vpop.f32.mrf.mxu1 }
 0x212   : > { %v4898_v39 = vpop.f32.mrf.mxu0 }
 0x213   : > { %v4888_v44 = vpop.permute.xlu1 %1991  ;;  %v1990_v59 = vpop.permute.xlu0 %1989 }
 0x214   : > { %v2001_v25 = vsel %vm325_vm0, %v4697_v30, %v1990_v59  ;;  %v2002_v63 = vsel %vm325_vm0, %v1990_v59, %v4888_v44  ;;  %v4903_v38 = vpop.f32.mrf.mxu0 }
 0x215   : > { %v2286_v4 = vsel %vm680_vm2, %v1973_v6, %v2002_v63  ;;  %v2282_v17 = vsel %vm680_vm2, %v1972_v19, %v2001_v25  ;;  %5356 = vst [vmem:[#allocation7_spill] sm:$0xff] %v4903_v38  ;;  %v4920_v25 = vpop.f32.mrf.mxu1 }
 0x216   : > { %2511 = vmatprep.subr.bf16.mxu0 %v2286_v4  ;;  %2418 = vmatmul.mubr.bf16.gmra.mxu0 %v4731_v60  ;;  %v4914_v19 = vpop.f32.mrf.mxu0  ;;  %5358 = vst [vmem:[#allocation9_spill] sm:$0xff] %v4920_v25 }
 0x217   : > { %v4907_v21 = vpop.permute.xlu1 %1699  ;;  %2512 = vmatpush1.bf16.msra.mxu0 %v2282_v17  ;;  %v1698_v30 = vpop.permute.xlu0 %1697  ;;  %2427 = vmatprep.mubr.bf16.mxu0 %v5338_v14  ;;  %5357 = vst [vmem:[#allocation5_spill] sm:$0xff] %v4914_v19 }
 0x218   : > { %v1711_v59 = vsel %vm265_vm3, %v4714_v0, %v1698_v30  ;;  %v1712_v63 = vsel %vm265_vm3, %v1698_v30, %v4907_v21  ;;  %v4928_v20 = vpop.f32.mrf.mxu0 }
 0x219   : > { %v2098_v4 = vsel %vm680_vm2, %v4445_v56, %v1712_v63  ;;  %v2094_v6 = vsel %vm680_vm2, %v4257_v52, %v1711_v59  ;;  %5359 = vst [vmem:[#allocation4_spill] sm:$0xff] %v4928_v20  ;;  %v4935_v59 = vpop.f32.mrf.mxu1 }
 0x21a   : > { %2448 = vmatprep.subr.bf16.mxu1 %v2098_v4 }
 0x21b   : > { %v4922_v17 = vpop.permute.xlu1 %1933  ;;  %2449 = vmatpush1.bf16.msra.mxu1 %v2094_v6  ;;  %v1932_v49 = vpop.permute.xlu0 %1931 }
 0x21c   : > { %v1943_v0 = vsel %vm265_vm3, %v4734_v41, %v1932_v49  ;;  %v1944_v30 = vsel %vm265_vm3, %v1932_v49, %v4922_v17  ;;  %v4940_v49 = vpop.f32.mrf.mxu0  ;;  %v4942_v4 = vpop.f32.mrf.mxu1 }
 0x21d   : > { %v2250_v56 = vsel %vm680_vm2, %v4476_v27, %v1944_v30  ;;  %v2246_v52 = vsel %vm680_vm2, %v4305_v51, %v1943_v0  ;;  %5360 = vst [vmem:[#allocation6_spill] sm:$0xff] %v4940_v49 }
 0x21e   : > { %2513 = vmatprep.subr.bf16.mxu0 %v2250_v56  ;;  %2428 = vmatmul.mubr.bf16.gmra.mxu0 %v4760_v28  ;;  %v4958_v19 = vpop.f32.mrf.mxu1 }
 0x21f   : > { %v4937_v63 = vpop.permute.xlu1 %1613  ;;  %2514 = vmatpush1.bf16.msra.mxu0 %v2246_v52  ;;  %v1612_v41 = vpop.permute.xlu0 %1611  ;;  %2543 = vmatprep.mubr.bf16.mxu0 %v5338_v14 }
 0x220   : > { %v1625_v51 = vsel %vm295_vm1, %v4747_v46, %v1612_v41  ;;  %v1626_v0 = vsel %vm295_vm1, %v1612_v41, %v4937_v63  ;;  %v4954_v52 = vpop.f32.mrf.mxu0  ;;  %v4964_v25 = vpop.f32.mrf.mxu1 }
 0x221   : > { %5361 = vst [vmem:[#allocation13_spill] sm:$0xff] %v4954_v52  ;;  %5363 = vst [vmem:[#allocation15_spill] sm:$0xff] %v4964_v25 }
 0x222   : > { %v4962_v41 = vpop.f32.mrf.mxu0 }
 0x223   : > { %v4944_v6 = vpop.permute.xlu1 %1642  ;;  %v1641_v27 = vpop.permute.xlu0 %1640  ;;  %5362 = vst [vmem:[#allocation14_spill] sm:$0xff] %v4962_v41 }
 0x224   : > { %v1654_v30 = vsel %vm325_vm0, %v4763_v61, %v1641_v27  ;;  %v1655_v56 = vsel %vm325_vm0, %v1641_v27, %v4944_v6 }
 0x225   : > { %v2062_v49 = vsel %vm680_vm2, %v1626_v0, %v1655_v56  ;;  %v2058_v20 = vsel %vm680_vm2, %v1625_v51, %v1654_v30  ;;  %v4976_v0 = vpop.f32.mrf.mxu0 }
 0x226   : > { %2450 = vmatprep.subr.bf16.mxu1 %v2062_v49  ;;  %5364 = vst [vmem:[#allocation16_spill] sm:$0xff] %v4976_v0 }
 0x227   : > { %v4960_v38 = vpop.permute.xlu1 %1847  ;;  %2451 = vmatpush1.bf16.msra.mxu1 %v2058_v20  ;;  %v1846_v46 = vpop.permute.xlu0 %1845 }
 0x228   : > { %v1857_v52 = vsel %vm295_vm1, %v4780_v32, %v1846_v46  ;;  %v1858_v51 = vsel %vm295_vm1, %v1846_v46, %v4960_v38 }
 0x22b   : > { %v4966_v61 = vpop.permute.xlu1 %1876  ;;  %v1875_v27 = vpop.permute.xlu0 %1874 }
 0x22c   : > { %v1886_v49 = vsel %vm325_vm0, %v4790_v16, %v1875_v27  ;;  %v1887_v20 = vsel %vm325_vm0, %v1875_v27, %v4966_v61  ;;  %v4988_v27 = vpop.f32.mrf.mxu0 }
 0x22d   : > { %v2214_v30 = vsel %vm680_vm2, %v1858_v51, %v1887_v20  ;;  %v2210_v56 = vsel %vm680_vm2, %v1857_v52, %v1886_v49 }
 0x22e   : > { %2515 = vmatprep.subr.bf16.mxu0 %v2214_v30  ;;  %v4980_v41 = vpop.f32.mrf.mxu1 }
 0x22f   : > { %5365 = vst [vmem:[#allocation17_spill] sm:$0xff] %v4980_v41  ;;  %v4982_v25 = vpop.permute.xlu1 %1584  ;;  %2516 = vmatpush1.bf16.msra.mxu0 %v2210_v56  ;;  %v1583_v32 = vpop.permute.xlu0 %1582 }
 0x230   : > { %v1596_v46 = vsel %vm265_vm3, %v4810_v24, %v1583_v32  ;;  %v1597_v16 = vsel %vm265_vm3, %v1583_v32, %v4982_v25  ;;  %v4990_v0 = vpop.f32.mrf.mxu1  ;;  %v5002_v56 = vpop.f32.mrf.mxu0 }
 0x231   : > { %5366 = vst [vmem:[#allocation18_spill] sm:$0xff] %v4990_v0  ;;  %v2026_v52 = vsel %vm680_vm2, %v4525_v54, %v1597_v16  ;;  %v2022_v51 = vsel %vm680_vm2, %v4356_v18, %v1596_v46 }
 0x232   : > { %2452 = vmatprep.subr.bf16.mxu1 %v2026_v52  ;;  %v5004_v32 = vpop.f32.mrf.mxu1  ;;  %v5014_v16 = vpop.f32.mrf.mxu0 }
 0x233   : > { %v4996_v49 = vpop.permute.xlu1 %1818  ;;  %2453 = vmatpush1.bf16.msra.mxu1 %v2022_v51  ;;  %v1817_v20 = vpop.permute.xlu0 %1816  ;;  %5367 = vst [vmem:[#allocation19_spill] sm:$0xff] %v5004_v32 }
 0x234   : > { %v1828_v24 = vsel %vm265_vm3, %v4830_v2, %v1817_v20  ;;  %v1829_v30 = vsel %vm265_vm3, %v1817_v20, %v4996_v49  ;;  %v5016_v52 = vpop.f32.mrf.mxu1 }
 0x235   : > { %v2178_v54 = vsel %vm680_vm2, %v4551_v8, %v1829_v30  ;;  %v2174_v18 = vsel %vm680_vm2, %v4390_v15, %v1828_v24  ;;  %5368 = vst [vmem:[#allocation20_spill] sm:$0xff] %v5016_v52 }
 0x236   : > { %2471 = vmatmul.mubr.bf16.vlgmr.msra.gmra.mxu1 %v4668_v55  ;;  %2517 = vmatprep.subr.bf16.mxu0 %v2178_v54  ;;  %v5028_v54 = vpop.f32.mrf.mxu0 }
 0x237   : > { %v5011_v46 = vpop.permute.xlu1 %1732  ;;  %2518 = vmatpush1.bf16.msra.mxu0 %v2174_v18  ;;  %v1731_v2 = vpop.permute.xlu0 %1730  ;;  %2480 = vmatprep.mubr.bf16.mxu1 %v5338_v14 }
 0x238   : > { %v1742_v8 = vsel %vm295_vm1, %v4851_v53, %v1731_v2  ;;  %v1743_v15 = vsel %vm295_vm1, %v1731_v2, %v5011_v46  ;;  %v5030_v18 = vpop.f32.mrf.mxu1  ;;  %v5040_v0 = vpop.f32.mrf.mxu0 }
 0x239   : > { %5369 = vst [vmem:[#allocation21_spill] sm:$0xff] %v5030_v18  ;;  %5370 = vst [vmem:[#allocation22_spill] sm:$0xff] %v5040_v0 }
 0x23b   : > { %v5018_v51 = vpop.permute.xlu1 %1761  ;;  %v1760_v20 = vpop.permute.xlu0 %1759 }
 0x23c   : > { %v1771_v24 = vsel %vm325_vm0, %v4860_v58, %v1760_v20  ;;  %v1772_v30 = vsel %vm325_vm0, %v1760_v20, %v5018_v51 }
 0x23d   : > { %v2142_v52 = vsel %vm680_vm2, %v1743_v15, %v1772_v30  ;;  %v2138_v32 = vsel %vm680_vm2, %v1742_v8, %v1771_v24  ;;  %v5042_v15 = vpop.f32.mrf.mxu1  ;;  %v5051_v30 = vpop.f32.mrf.mxu0 }
 0x23e   : > { %2481 = vmatmul.mubr.bf16.gmra.mxu1 %v4694_v33  ;;  %2519 = vmatprep.subr.bf16.mxu0 %v2142_v52  ;;  %5371 = vst [vmem:[#allocation23_spill] sm:$0xff] %v5042_v15 }
 0x23f   : > { %v1994_v53 = vpop.permute.xlu1 %1993  ;;  %2520 = vmatpush1.bf16.msra.mxu0 %v2138_v32  ;;  %v1965_v2 = vpop.permute.xlu0 %1964  ;;  %2490 = vmatprep.mubr.bf16.mxu1 %v5338_v14 }
 0x240   : > { %v2003_v58 = vsel %vm325_vm0, %v4888_v44, %v1994_v53  ;;  %v1974_v20 = vsel %vm295_vm1, %v4879_v9, %v1965_v2  ;;  %v5053_v9 = vpop.f32.mrf.mxu1 }
 0x241   : > { %v2290_v8 = vsel %vm680_vm2, %v1974_v20, %v2003_v58  ;;  %5372 = vst [vmem:[#allocation24_spill] sm:$0xff] %v5053_v9  ;;  %v3235_v58 = vld [vmem:[%s3289_s18 + $0x138] ss:$0 sps:$4 sm:$0xff]  }
 0x242   : > { %3107 = vmatprep.subr.bf16.mxu1 %v2290_v8  ;;  %v5066_v9 = vpop.f32.mrf.mxu1 }
 0x243   : > { %v5045_v52 = vpop.permute.xlu1 %1703  ;;  %3108 = vmatpush3.bf16.msra.mxu1 %v2290_v8  ;;  %v1702_v32 = vpop.permute.xlu0 %1701  ;;  %5373 = vst [vmem:[#allocation25_spill] sm:$0xff] %v5066_v9 }
 0x244   : > { %v1713_v24 = vsel %vm265_vm3, %v4907_v21, %v1702_v32  ;;  %v1714_v44 = vsel %vm265_vm3, %v1702_v32, %v5045_v52  ;;  %v5064_v32 = vpop.f32.mrf.mxu0 }
 0x245   : > { %v2106_v53 = vsel %vm680_vm2, %v4595_v31, %v1714_v44  ;;  %v2102_v2 = vsel %vm680_vm2, %v4441_v45, %v1713_v24 }
 0x246   : > { %2491 = vmatmul.mubr.bf16.gmra.mxu1 %v4731_v60  ;;  %2521 = vmatprep.subr.bf16.mxu0 %v2106_v53  ;;  %v5071_v44 = vpop.f32.mrf.mxu0  ;;  %v5073_v53 = vpop.f32.mrf.mxu1 }
 0x247   : > { %v1616_v20 = vpop.permute.xlu1 %1615  ;;  %2522 = vmatpush1.bf16.msra.mxu0 %v2102_v2  ;;  %v1936_v21 = vpop.permute.xlu0 %1935  ;;  %2500 = vmatprep.mubr.bf16.mxu1 %v5338_v14  ;;  %5374 = vst [vmem:[#allocation26_spill] sm:$0xff] %v5073_v53 }
 0x248   : > { %v1945_v8 = vsel %vm265_vm3, %v4922_v17, %v1936_v21  ;;  %v5087_v60 = vpop.f32.mrf.mxu1 }
 0x249   : > { %v2254_v31 = vsel %vm680_vm2, %v3235_v58, %v1945_v8  ;;  %5375 = vst [vmem:[#allocation27_spill] sm:$0xff] %v5087_v60 }
 0x24a   : > { %3109 = vmatprep.subr.bf16.mxu1 %v2254_v31  ;;  %v5099_v60 = vpop.f32.mrf.mxu1 }
 0x24b   : > { %v1645_v45 = vpop.permute.xlu1 %1644  ;;  %3110 = vmatpush3.bf16.msra.mxu1 %v2254_v31  ;;  %v5069_v24 = vpop.permute.xlu0 %1617 }
 0x24c   : > { %v1656_v17 = vsel %vm325_vm0, %v4944_v6, %v1645_v45  ;;  %v1628_v58 = vsel %vm295_vm1, %v1616_v20, %v5069_v24  ;;  %v5085_v31 = vpop.f32.mrf.mxu0 }
 0x24e   : > { %2501 = vmatmul.mubr.bf16.gmra.mxu1 %v4760_v28  ;;  %v1627_v28 = vsel %vm295_vm1, %v4937_v63, %v1616_v20  ;;  %v3236_v20 = vld [vmem:[%s3289_s18 + $0x110] ss:$0 sps:$4 sm:$0xff]  }
 0x24f   : > { %v1850_v2 = vpop.permute.xlu1 %1849  ;;  %v5078_v21 = vpop.permute.xlu0 %1646  ;;  %3123 = vmatprep.mubr.bf16.mxu1 %v4668_v55  ;;  %v2066_v53 = vsel %vm680_vm2, %v1627_v28, %v1656_v17 }
 0x250   : > { %v1657_v8 = vsel %vm325_vm0, %v1645_v45, %v5078_v21  ;;  %v1859_v45 = vsel %vm295_vm1, %v4960_v38, %v1850_v2 }
 0x251   : > { %v2070_v6 = vsel %vm680_vm2, %v1628_v58, %v1657_v8 }
 0x252   : > { %2523 = vmatprep.subr.bf16.mxu0 %v2070_v6  ;;  %v5093_v9 = vpop.f32.mrf.mxu0 }
 0x253   : > { %v1587_v15 = vpop.permute.xlu1 %1586  ;;  %2524 = vmatpush1.bf16.msra.mxu0 %v2066_v53  ;;  %v1879_v41 = vpop.permute.xlu0 %1878 }
 0x254   : > { %v1888_v18 = vsel %vm325_vm0, %v4966_v61, %v1879_v41  ;;  %v5101_v0 = vpop.f32.mrf.mxu0  ;;  %v1598_v53 = vsel %vm265_vm3, %v4982_v25, %v1587_v15  ;;  %v5112_v61 = vpop.f32.mrf.mxu1 }
 0x255   : > { %v2218_v63 = vsel %vm680_vm2, %v1859_v45, %v1888_v18  ;;  %v2030_v25 = vsel %vm680_vm2, %v4508_v3, %v1598_v53 }
 0x256   : > { %3111 = vmatprep.subr.bf16.mxu1 %v2218_v63  ;;  %v5105_v28 = vpop.f32.mrf.mxu0 }
 0x257   : > { %v1821_v17 = vpop.permute.xlu1 %1820  ;;  %3112 = vmatpush3.bf16.msra.mxu1 %v2218_v63  ;;  %v1589_v58 = vpop.permute.xlu0 %1588 }
 0x258   : > { %v1830_v38 = vsel %vm265_vm3, %v4996_v49, %v1821_v17  ;;  %v1599_v41 = vsel %vm265_vm3, %v1587_v15, %v1589_v58  ;;  %v5117_v8 = vpop.f32.mrf.mxu0 }
 0x259   : > { %v2034_v18 = vsel %vm680_vm2, %v4635_v37, %v1599_v41  ;;  %v2182_v2 = vsel %vm680_vm2, %v3236_v20, %v1830_v38  ;;  %v5125_v37 = vpop.f32.mrf.mxu1  ;;  %v3237_v20 = vld [vmem:[%s3289_s18 + $0xe8] ss:$0 sps:$4 sm:$0xff]  }
 0x25a   : > { %2525 = vmatprep.subr.bf16.mxu0 %v2034_v18  ;;  %3113 = vmatprep.subr.bf16.mxu1 %v2182_v2  ;;  %v5129_v17 = vpop.f32.mrf.mxu0  ;;  %v1369_v18 = vmax.f32 %v4854_v7, %v4882_v34 }
 0x25b   : > { %v1764_v6 = vpop.permute.xlu1 %1763  ;;  %2526 = vmatpush1.bf16.msra.mxu0 %v2030_v25  ;;  %3114 = vmatpush3.bf16.msra.mxu1 %v2182_v2  ;;  %v1735_v49 = vpop.permute.xlu0 %1734  ;;  %v1370_v2 = vmax.f32 %v4877_v12, %v4935_v59 }
 0x25c   : > { %v1773_v15 = vsel %vm325_vm0, %v5018_v51, %v1764_v6  ;;  %v1744_v45 = vsel %vm295_vm1, %v5011_v46, %v1735_v49  ;;  %v1352_v46 = vmax.f32 %v4778_v13, %v4808_v47  ;;  %v5137_v38 = vpop.f32.mrf.mxu1  ;;  %v5146_v25 = vpop.f32.mrf.mxu0  ;;  %v1371_v13 = vmax.f32 %v4886_v62, %v4942_v4  ;;  %v3238_v49 = vld [vmem:[%s3289_s18 + $0xc0] ss:$0 sps:$4 sm:$0xff]  }
 0x25d   : > { %v2146_v63 = vsel %vm680_vm2, %v1744_v45, %v1773_v15  ;;  %v5376_v62 = vmax.f32 %v4776_v57, %v4806_v36  ;;  %v5378_v36 = vld [vmem:[#allocation15_spill] sm:$0xff]  ;;  %v5380_v15 = vld [vmem:[#allocation13_spill] sm:$0xff] }
 0x25e   : > { %2544 = vmatmul.mubr.bf16.vlgmr.msra.gmra.mxu0 %v4668_v55  ;;  %3115 = vmatprep.subr.bf16.mxu1 %v2146_v63  ;;  %v1368_v55 = vmax.f32 %v4847_v43, %v4875_v29  ;;  %v1361_v43 = vmax.f32 %v4788_v48, %v4849_v22  ;;  %v5377_v48 = vmax.f32 %v4782_v1, %v4818_v10  ;;  %v5379_v10 = vld [vmem:[#allocation9_spill] sm:$0xff]  ;;  %v5381_v45 = vld [vmem:[#allocation7_spill] sm:$0xff] }
 0x25f   : > { %v1620_v3 = vpop.permute.xlu1 %1619  ;;  %3116 = vmatpush3.bf16.msra.mxu1 %v2146_v63  ;;  %v1706_v53 = vpop.permute.xlu0 %1705  ;;  %2553 = vmatprep.mubr.bf16.mxu0 %v5338_v14  ;;  %v1388_v4 = vmax.f32 %v1352_v46, %v1370_v2  ;;  %v1378_v1 = vmax.f32 %v4870_v35, %v4898_v39  ;;  %v1354_v63 = vmax.f32 %v5381_v45, %v5380_v15  ;;  %v5398_v15 = vld [vmem:[#allocation3_spill] sm:$0xff]  ;;  %v5399_v45 = vld [vmem:[#allocation8_spill] sm:$0xff] }
 0x260   : > { %v1715_v51 = vsel %vm265_vm3, %v5045_v52, %v1706_v53  ;;  %v1353_v52 = vmax.f32 %v4784_v42, %v4828_v50  ;;  %v1629_v7 = vsel %vm295_vm1, %v5069_v24, %v1620_v3  ;;  %v1362_v42 = vmax.f32 %v4802_v23, %v4858_v26  ;;  %v1280_v50 = vpop.f32.mrf.mxu1  ;;  %v3106_v24 = vpop.f32.mrf.mxu0  ;;  %v5384_v3 = vld [vmem:[#allocation16_spill] sm:$0xff]  ;;  %v5386_v53 = vld [vmem:[#allocation6_spill] sm:$0xff] }
 0x261   : > { %v2110_v41 = vsel %vm680_vm2, %v3237_v20, %v1715_v51  ;;  %v5166_v59 = vmax.f32 %v5376_v62, %v1368_v55  ;;  %v5171_v22 = vmax.f32 %v5377_v48, %v1369_v18  ;;  %v1377_v23 = vmax.f32 %v4856_v40, %v4884_v11  ;;  %v5382_v11 = vld [vmem:[#allocation14_spill] sm:$0xff]  ;;  %v5383_v40 = vld [vmem:[#allocation5_spill] sm:$0xff] }
 0x262   : > { %3117 = vmatprep.subr.bf16.mxu1 %v2110_v41  ;;  %v1389_v26 = vmax.f32 %v1353_v52, %v1371_v13  ;;  %v1355_v20 = vmax.f32 %v5383_v40, %v5382_v11  ;;  %v1364_v51 = vmax.f32 %v5386_v53, %v4988_v27  ;;  %v1282_v46 = vpop.f32.mrf.mxu1  ;;  %v1372_v39 = vmax.f32 %v5002_v56, %v5051_v30  ;;  %v5387_v55 = vld [vmem:[#allocation22_spill] sm:$0xff]  ;;  %v1338_v2 = vpop.f32.mrf.mxu0  ;;  %v5388_v52 = vld [vmem:[#allocation21_spill] sm:$0xff]  ;;  %v5395_v30 = vld [vmem:[#allocation20_spill] sm:$0xff] }
 0x263   : > { %v1591_v47 = vpop.permute.xlu1 %1590  ;;  %3118 = vmatpush3.bf16.msra.mxu1 %v2110_v41  ;;  %v1649_v6 = vpop.permute.xlu0 %1648  ;;  %v1373_v35 = vmax.f32 %v5014_v16, %v5064_v32  ;;  %v1381_v41 = vmax.f32 %v5028_v54, %v5071_v44  ;;  %v1382_v18 = vmax.f32 %v5387_v55, %v5085_v31  ;;  %v5389_v13 = vld [vmem:[#allocation17_spill] sm:$0xff]  ;;  %v5396_v16 = vld [vmem:[#allocation26_spill] sm:$0xff]  ;;  %v5397_v32 = vld [vmem:[#allocation27_spill] sm:$0xff]  ;;  %v1383_v31 = vmax.f32 %v5099_v60, %v1280_v50 }
 0x264   : > { %v1600_v29 = vsel %vm265_vm3, %v1589_v58, %v1591_v47  ;;  %v1658_v12 = vsel %vm325_vm0, %v5078_v21, %v1649_v6  ;;  %v1379_v21 = vmax.f32 %v4905_v5, %v4958_v19  ;;  %v1380_v58 = vmax.f32 %v5379_v10, %v5378_v36  ;;  %v5385_v5 = vld [vmem:[#allocation4_spill] sm:$0xff]  ;;  %v5390_v6 = vld [vmem:[#allocation23_spill] sm:$0xff]  ;;  %v5394_v56 = vld [vmem:[#allocation25_spill] sm:$0xff] }
 0x265   : > { %v2074_v34 = vsel %vm680_vm2, %v1629_v7, %v1658_v12  ;;  %v2038_v57 = vsel %vm680_vm2, %v3238_v49, %v1600_v29  ;;  %v1363_v19 = vmax.f32 %v5385_v5, %v5384_v3  ;;  %v1356_v47 = vmax.f32 %v5389_v13, %v5388_v52  ;;  %v5391_v49 = vld [vmem:[#allocation18_spill] sm:$0xff]  ;;  %v5392_v7 = vld [vmem:[#allocation24_spill] sm:$0xff]  ;;  %v5393_v29 = vld [vmem:[#allocation19_spill] sm:$0xff] }
 0x266   : > { %2554 = vmatmul.mubr.bf16.gmra.mxu0 %v4694_v33  ;;  %3119 = vmatprep.subr.bf16.mxu1 %v2074_v34  ;;  %v1357_v27 = vmax.f32 %v5391_v49, %v5390_v6  ;;  %v1365_v12 = vmax.f32 %v5393_v29, %v5392_v7  ;;  %v1374_v54 = vmax.f32 %v5396_v16, %v5125_v37  ;;  %v5401_v60 = vld [vmem:[#allocation10_spill] sm:$0xff] }
 0x267   : > { %3120 = vmatpush3.bf16.msra.mxu1 %v2074_v34  ;;  %2563 = vmatprep.mubr.bf16.mxu0 %v5338_v14  ;;  %v1366_v34 = vmax.f32 %v5395_v30, %v5394_v56  ;;  %v1375_v44 = vmax.f32 %v5397_v32, %v5137_v38  ;;  %v1384_v62 = vmax.f32 %v5112_v61, %v1282_v46  ;;  %v5405_v6 = vld [vmem:[#allocation2_spill] sm:$0xff] }
 0x268   : > { %3121 = vmatprep.subr.bf16.mxu1 %v2038_v57  ;;  %v1358_v48 = vmax.f32 %v5101_v0, %v5093_v9  ;;  %v1367_v36 = vmax.f32 %v5117_v8, %v5105_v28  ;;  %v1376_v10 = vmax.f32 %v5146_v25, %v5129_v17  ;;  %v5400_v37 = vmax.f32 %v5398_v15, %v5399_v45  ;;  %v5402_v28 = vld [vmem:[#allocation12_spill] sm:$0xff]  ;;  %v5403_v8 = vld [vmem:[#allocation11_spill] sm:$0xff] }
 0x269   : > { %v1397_v40 = vmax.f32 %v1361_v43, %v1379_v21  ;;  %v1398_v38 = vmax.f32 %v1362_v42, %v1380_v58  ;;  %v1390_v3 = vmax.f32 %v1354_v63, %v1372_v39  ;;  %v1391_v61 = vmax.f32 %v1355_v20, %v1373_v35 }
 0x26a   : > { %v1395_v11 = vmax.f32 %v5400_v37, %v1377_v23  ;;  %v1399_v0 = vmax.f32 %v1363_v19, %v1381_v41  ;;  %v1400_v9 = vmax.f32 %v1364_v51, %v1382_v18  ;;  %v5404_v17 = vmax.f32 %v5402_v28, %v5403_v8 }
 0x26b   : > { %3122 = vmatpush3.bf16.msra.mxu1 %v2038_v57  ;;  %v1385_v57 = vmax.f32 %v1338_v2, %v3106_v24  ;;  %v1392_v50 = vmax.f32 %v1356_v47, %v1374_v54  ;;  %v1393_v43 = vmax.f32 %v1357_v27, %v1375_v44  ;;  %v1401_v23 = vmax.f32 %v1365_v12, %v1383_v31 }
 0x26c   : > { %v1396_v25 = vmax.f32 %v5404_v17, %v1378_v1  ;;  %v1394_v21 = vmax.f32 %v1358_v48, %v1376_v10 }
 0x26d   : > { %v1403_v58 = vmax.f32 %v1367_v36, %v1385_v57 }
 0x26e   : > { %2564 = vmatmul.mubr.bf16.gmra.mxu0 %v5401_v60  ;;  %3124 = vmatmul.mubr.bf16.vlgmr.msra.gmra.mxu1 %v4694_v33  ;;  %v1402_v33 = vmax.f32 %v1366_v34, %v1384_v62 }
 0x26f   : > { %2573 = vmatprep.mubr.bf16.mxu0 %v5338_v14  ;;  %3127 = vmatprep.mubr.bf16.mxu1 %v5401_v60 }
 0x270   : > { %v5230_v42 = vpop.permute.xlu1 %1411  ;;  %v5232_v24 = vpop.permute.xlu0 %1406 }
 0x271   : > { %v1416_v63 = vadd.f32 %v5232_v24, %v1388_v4  ;;  %v1417_v14 = vadd.f32 %v5232_v24, %v1389_v26  ;;  %v1425_v20 = vadd.f32 %v5230_v42, %v1397_v40  ;;  %v1426_v5 = vadd.f32 %v5230_v42, %v1398_v38 }
 0x272   : > { %v1418_v1 = vadd.f32 %v5232_v24, %v1390_v3  ;;  %v1419_v19 = vadd.f32 %v5232_v24, %v1391_v61  ;;  %v1427_v53 = vadd.f32 %v5230_v42, %v1399_v0  ;;  %v1428_v51 = vadd.f32 %v5230_v42, %v1400_v9 }
 0x273   : > { %v1434_v46 = vmax.f32 %v1416_v63, 0.0  ;;  %v1435_v39 = vmax.f32 %v1417_v14, 0.0  ;;  %v1443_v35 = vmax.f32 %v1425_v20, 0.0  ;;  %v1444_v41 = vmax.f32 %v1426_v5, 0.0 }
 0x274   : > { %v1436_v4 = vmax.f32 %v1418_v1, 0.0  ;;  %v1437_v55 = vmax.f32 %v1419_v19, 0.0  ;;  %v1445_v26 = vmax.f32 %v1427_v53, 0.0  ;;  %v1446_v18 = vmax.f32 %v1428_v51, 0.0 }
 0x275   : > { %v3040_v2 = vpack.c.bf16 %v1435_v39, %v1434_v46  ;;  %v3045_v52 = vpack.c.bf16 %v1444_v41, %v1443_v35  ;;  %v1420_v13 = vadd.f32 %v5232_v24, %v1392_v50  ;;  %v1421_v47 = vadd.f32 %v5232_v24, %v1393_v43 }
 0x276   : > { %2574 = vmatmul.mubr.bf16.gmra.mxu0 %v5405_v6  ;;  %3128 = vmatmul.mubr.bf16.gmra.mxu1 %v5405_v6  ;;  %v3041_v49 = vpack.c.bf16 %v1437_v55, %v1436_v4  ;;  %v3046_v27 = vpack.c.bf16 %v1446_v18, %v1445_v26  ;;  %v1429_v7 = vadd.f32 %v5230_v42, %v1401_v23 }
 0x277   : > { %1507 = vst [vmem:[%s5250_s19 + $0x8] sm:$0xff] %v3040_v2  ;;  %1512 = vst [vmem:[%s5250_s19 + $0x2c] sm:$0xff] %v3045_v52  ;;  %v1438_v29 = vmax.f32 %v1420_v13, 0.0  ;;  %v1439_v12 = vmax.f32 %v1421_v47, 0.0  ;;  %v1430_v56 = vadd.f32 %v5230_v42, %v1402_v33  ;;  %v1422_v30 = vadd.f32 %v5232_v24, %v1394_v21 }
 0x278   : > { %1508 = vst [vmem:[%s5250_s19 + $0x10] sm:$0xff] %v3041_v49  ;;  %1513 = vst [vmem:[%s5250_s19 + $0x34] sm:$0xff] %v3046_v27  ;;  %v1447_v34 = vmax.f32 %v1429_v7, 0.0  ;;  %v1431_v16 = vadd.f32 %v5230_v42, %v1403_v58  ;;  %v1414_v54 = vadd.f32 %v5232_v24, %v5166_v59  ;;  %v1415_v32 = vadd.f32 %v5232_v24, %v5171_v22 }
 0x279   : > { %v3042_v44 = vpack.c.bf16 %v1439_v12, %v1438_v29  ;;  %v1448_v31 = vmax.f32 %v1430_v56, 0.0  ;;  %v1440_v62 = vmax.f32 %v1422_v30, 0.0  ;;  %v1423_v48 = vadd.f32 %v5230_v42, %v1395_v11 }
 0x27a   : > { %v1449_v36 = vmax.f32 %v1431_v16, 0.0  ;;  %v1432_v10 = vmax.f32 %v1414_v54, 0.0  ;;  %v1433_v57 = vmax.f32 %v1415_v32, 0.0  ;;  %v1424_v15 = vadd.f32 %v5230_v42, %v1396_v25 }
 0x27b   : > { %1509 = vst [vmem:[%s5250_s19 + $0x18] sm:$0xff] %v3042_v44  ;;  %v3047_v59 = vpack.c.bf16 %v1448_v31, %v1447_v34  ;;  %v3043_v45 = vpack.c.bf16 %v1440_v62, %v1440_v62  ;;  %v1441_v37 = vmax.f32 %v1423_v48, 0.0 }
 0x27c   : > { %v3048_v22 = vpack.c.bf16 %v1449_v36, %v1449_v36  ;;  %v3039_v40 = vpack.c.bf16 %v1433_v57, %v1432_v10  ;;  %v1442_v38 = vmax.f32 %v1424_v15, 0.0 }
 0x27d   : > { %1514 = vst [vmem:[%s5250_s19 + $0x3c] sm:$0xff] %v3047_v59  ;;  %1510 = vst [vmem:[%s5250_s19 + $0x20] sm:$0xf] %v3043_v45 }
 0x27e   : > { %1515 = vst [vmem:[%s5250_s19 + $0x44] sm:$0xf] %v3048_v22  ;;  %1506 = vst [vmem:[%s5250_s19] sm:$0xff] %v3039_v40  ;;  %v3044_v3 = vpack.c.bf16 %v1442_v38, %v1441_v37 }
 0x280   : > { %1511 = vst [vmem:[%s5250_s19 + $0x24] sm:$0xff] %v3044_v3 }
 0x29a   : > { %v2326_v11 = vpop.f32.mrf.mxu1 }
 0x29c   : > { %v2328_v60 = vpop.f32.mrf.mxu1 }
 0x29e   : > { %v2330_v61 = vpop.f32.mrf.mxu1 }
 0x2a0   : > { %v2332_v0 = vpop.f32.mrf.mxu1 }
 0x2a2   : > { %v2336_v9 = vpop.f32.mrf.mxu1 }
 0x2a3   : > { %v2649_v33 = vmax.f32 %v2326_v11, %v2336_v9 }
 0x2a4   : > { %v2338_v28 = vpop.f32.mrf.mxu1 }
 0x2a5   : > { %v2650_v58 = vmax.f32 %v2328_v60, %v2338_v28 }
 0x2a6   : > { %v2340_v8 = vpop.f32.mrf.mxu1 }
 0x2a7   : > { %v2658_v20 = vmax.f32 %v2330_v61, %v2340_v8 }
 0x2a8   : > { %v2342_v17 = vpop.f32.mrf.mxu1 }
 0x2a9   : > { %v2659_v53 = vmax.f32 %v2332_v0, %v2342_v17 }
 0x2aa   : > { %v2346_v25 = vpop.f32.mrf.mxu1 }
 0x2ac   : > { %v2348_v50 = vpop.f32.mrf.mxu1 }
 0x2ae   : > { %v2350_v43 = vpop.f32.mrf.mxu1 }
 0x2b0   : > { %v2352_v23 = vpop.f32.mrf.mxu1 }
 0x2b2   : > { %v2356_v21 = vpop.f32.mrf.mxu1 }
 0x2b3   : > { %v2667_v63 = vmax.f32 %v2346_v25, %v2356_v21 }
 0x2b4   : > { %v2358_v14 = vpop.f32.mrf.mxu1 }
 0x2b5   : > { %v2685_v5 = vmax.f32 %v2649_v33, %v2667_v63  ;;  %v2668_v1 = vmax.f32 %v2348_v50, %v2358_v14 }
 0x2b6   : > { %v2360_v19 = vpop.f32.mrf.mxu1 }
 0x2b7   : > { %v2703_v51 = vadd.f32 %v2685_v5, %v5232_v24  ;;  %v2686_v46 = vmax.f32 %v2650_v58, %v2668_v1  ;;  %v2676_v39 = vmax.f32 %v2350_v43, %v2360_v19 }
 0x2b8   : > { %v2362_v35 = vpop.f32.mrf.mxu1 }
 0x2b9   : > { %v2721_v41 = vmax.f32 %v2703_v51, 0.0  ;;  %v2704_v4 = vadd.f32 %v2686_v46, %v5232_v24  ;;  %v2694_v55 = vmax.f32 %v2658_v20, %v2676_v39  ;;  %v2677_v26 = vmax.f32 %v2352_v23, %v2362_v35 }
 0x2bb   : > { %v2722_v18 = vmax.f32 %v2704_v4, 0.0  ;;  %v2712_v2 = vadd.f32 %v2694_v55, %v5230_v42  ;;  %v2695_v52 = vmax.f32 %v2659_v53, %v2677_v26 }
 0x2bd   : > { %v3049_v13 = vpack.c.bf16 %v2722_v18, %v2721_v41  ;;  %v2730_v47 = vmax.f32 %v2712_v2, 0.0  ;;  %v2713_v6 = vadd.f32 %v2695_v52, %v5230_v42 }
 0x2bf   : > { %3027 = vst [vmem:[%s5250_s19 + $0x48] sm:$0xff] %v3049_v13  ;;  %v2731_v49 = vmax.f32 %v2713_v6, 0.0 }
 0x2c1   : > { %v3054_v27 = vpack.c.bf16 %v2731_v49, %v2730_v47 }
 0x2c3   : > { %3032 = vst [vmem:[%s5250_s19 + $0x6c] sm:$0xff] %v3054_v27 }
 0x2c6   : > { %v2399_v7 = vpop.f32.mrf.mxu0 }
 0x2c8   : > { %v2401_v29 = vpop.f32.mrf.mxu0 }
 0x2ca   : > { %v2403_v12 = vpop.f32.mrf.mxu0 }
 0x2cc   : > { %v2405_v56 = vpop.f32.mrf.mxu0 }
 0x2ce   : > { %v2409_v30 = vpop.f32.mrf.mxu0 }
 0x2cf   : > { %v2651_v48 = vmax.f32 %v2399_v7, %v2409_v30 }
 0x2d0   : > { %v2411_v34 = vpop.f32.mrf.mxu0 }
 0x2d1   : > { %v2652_v10 = vmax.f32 %v2401_v29, %v2411_v34 }
 0x2d2   : > { %v2413_v16 = vpop.f32.mrf.mxu0 }
 0x2d3   : > { %v2660_v59 = vmax.f32 %v2403_v12, %v2413_v16 }
 0x2d4   : > { %v2415_v54 = vpop.f32.mrf.mxu0 }
 0x2d5   : > { %v2661_v40 = vmax.f32 %v2405_v56, %v2415_v54 }
 0x2d6   : > { %v2419_v32 = vpop.f32.mrf.mxu0 }
 0x2d8   : > { %v2421_v44 = vpop.f32.mrf.mxu0 }
 0x2da   : > { %v2423_v31 = vpop.f32.mrf.mxu0 }
 0x2dc   : > { %v2425_v62 = vpop.f32.mrf.mxu0 }
 0x2de   : > { %v2429_v36 = vpop.f32.mrf.mxu0 }
 0x2df   : > { %v2669_v57 = vmax.f32 %v2419_v32, %v2429_v36 }
 0x2e0   : > { %v2431_v15 = vpop.f32.mrf.mxu0 }
 0x2e1   : > { %v2687_v45 = vmax.f32 %v2651_v48, %v2669_v57  ;;  %v2670_v37 = vmax.f32 %v2421_v44, %v2431_v15 }
 0x2e2   : > { %v2433_v22 = vpop.f32.mrf.mxu0 }
 0x2e3   : > { %v2705_v38 = vadd.f32 %v2687_v45, %v5232_v24  ;;  %v2688_v3 = vmax.f32 %v2652_v10, %v2670_v37  ;;  %v2678_v11 = vmax.f32 %v2423_v31, %v2433_v22 }
 0x2e4   : > { %v2435_v60 = vpop.f32.mrf.mxu0 }
 0x2e5   : > { %v2723_v61 = vmax.f32 %v2705_v38, 0.0  ;;  %v2706_v0 = vadd.f32 %v2688_v3, %v5232_v24  ;;  %v2696_v9 = vmax.f32 %v2660_v59, %v2678_v11  ;;  %v2679_v28 = vmax.f32 %v2425_v62, %v2435_v60 }
 0x2e7   : > { %v2724_v8 = vmax.f32 %v2706_v0, 0.0  ;;  %v2714_v17 = vadd.f32 %v2696_v9, %v5230_v42  ;;  %v2697_v25 = vmax.f32 %v2661_v40, %v2679_v28 }
 0x2e9   : > { %v3050_v50 = vpack.c.bf16 %v2724_v8, %v2723_v61  ;;  %v2732_v43 = vmax.f32 %v2714_v17, 0.0  ;;  %v2715_v23 = vadd.f32 %v2697_v25, %v5230_v42 }
 0x2eb   : > { %3028 = vst [vmem:[%s5250_s19 + $0x50] sm:$0xff] %v3050_v50  ;;  %v2733_v33 = vmax.f32 %v2715_v23, 0.0 }
 0x2ed   : > { %v3055_v21 = vpack.c.bf16 %v2733_v33, %v2732_v43 }
 0x2ef   : > { %3033 = vst [vmem:[%s5250_s19 + $0x74] sm:$0xff] %v3055_v21 }
 0x2f6   : > { %v2472_v58 = vpop.f32.mrf.mxu1 }
 0x2f8   : > { %v2474_v63 = vpop.f32.mrf.mxu1 }
 0x2fa   : > { %v2476_v14 = vpop.f32.mrf.mxu1 }
 0x2fc   : > { %v2478_v20 = vpop.f32.mrf.mxu1 }
 0x2fe   : > { %v2482_v5 = vpop.f32.mrf.mxu1 }
 0x2ff   : > { %v2653_v41 = vmax.f32 %v2472_v58, %v2482_v5 }
 0x300   : > { %v2484_v1 = vpop.f32.mrf.mxu1 }
 0x301   : > { %v2654_v18 = vmax.f32 %v2474_v63, %v2484_v1 }
 0x302   : > { %v2486_v19 = vpop.f32.mrf.mxu1 }
 0x303   : > { %v2662_v47 = vmax.f32 %v2476_v14, %v2486_v19 }
 0x304   : > { %v2488_v53 = vpop.f32.mrf.mxu1 }
 0x305   : > { %v2663_v29 = vmax.f32 %v2478_v20, %v2488_v53 }
 0x306   : > { %v2492_v51 = vpop.f32.mrf.mxu1 }
 0x308   : > { %v2494_v46 = vpop.f32.mrf.mxu1 }
 0x30a   : > { %v2496_v39 = vpop.f32.mrf.mxu1 }
 0x30c   : > { %v2498_v35 = vpop.f32.mrf.mxu1 }
 0x30e   : > { %v2502_v4 = vpop.f32.mrf.mxu1 }
 0x30f   : > { %v2671_v55 = vmax.f32 %v2492_v51, %v2502_v4 }
 0x310   : > { %v2504_v26 = vpop.f32.mrf.mxu1 }
 0x311   : > { %v2689_v2 = vmax.f32 %v2653_v41, %v2671_v55  ;;  %v2672_v52 = vmax.f32 %v2494_v46, %v2504_v26 }
 0x312   : > { %v2506_v13 = vpop.f32.mrf.mxu1 }
 0x313   : > { %v2707_v6 = vadd.f32 %v2689_v2, %v5232_v24  ;;  %v2690_v49 = vmax.f32 %v2654_v18, %v2672_v52  ;;  %v2680_v27 = vmax.f32 %v2496_v39, %v2506_v13 }
 0x314   : > { %v2508_v7 = vpop.f32.mrf.mxu1 }
 0x315   : > { %v2708_v12 = vadd.f32 %v2690_v49, %v5232_v24  ;;  %v2698_v56 = vmax.f32 %v2662_v47, %v2680_v27  ;;  %v2681_v30 = vmax.f32 %v2498_v35, %v2508_v7  ;;  %v2725_v34 = vmax.f32 %v2707_v6, 0.0 }
 0x317   : > { %v2726_v16 = vmax.f32 %v2708_v12, 0.0  ;;  %v2716_v54 = vadd.f32 %v2698_v56, %v5230_v42  ;;  %v2699_v32 = vmax.f32 %v2663_v29, %v2681_v30 }
 0x319   : > { %v3051_v44 = vpack.c.bf16 %v2726_v16, %v2725_v34  ;;  %v2717_v31 = vadd.f32 %v2699_v32, %v5230_v42  ;;  %v2734_v62 = vmax.f32 %v2716_v54, 0.0 }
 0x31b   : > { %3029 = vst [vmem:[%s5250_s19 + $0x58] sm:$0xff] %v3051_v44  ;;  %v2735_v48 = vmax.f32 %v2717_v31, 0.0 }
 0x31d   : > { %v3056_v36 = vpack.c.bf16 %v2735_v48, %v2734_v62 }
 0x31e   : > { %v2545_v10 = vpop.f32.mrf.mxu0 }
 0x31f   : > { %3034 = vst [vmem:[%s5250_s19 + $0x7c] sm:$0xff] %v3056_v36 }
 0x320   : > { %v2547_v57 = vpop.f32.mrf.mxu0 }
 0x322   : > { %v2549_v15 = vpop.f32.mrf.mxu0 }
 0x324   : > { %v2551_v59 = vpop.f32.mrf.mxu0 }
 0x326   : > { %v2555_v45 = vpop.f32.mrf.mxu0 }
 0x327   : > { %v2655_v25 = vmax.f32 %v2545_v10, %v2555_v45 }
 0x328   : > { %v2557_v37 = vpop.f32.mrf.mxu0 }
 0x329   : > { %v2656_v43 = vmax.f32 %v2547_v57, %v2557_v37 }
 0x32a   : > { %v2559_v22 = vpop.f32.mrf.mxu0 }
 0x32b   : > { %v2664_v20 = vmax.f32 %v2549_v15, %v2559_v22 }
 0x32c   : > { %v2561_v40 = vpop.f32.mrf.mxu0 }
 0x32d   : > { %v2665_v26 = vmax.f32 %v2551_v59, %v2561_v40 }
 0x32e   : > { %v2565_v38 = vpop.f32.mrf.mxu0  ;;  %v3125_v3 = vpop.f32.mrf.mxu1 }
 0x330   : > { %v2567_v11 = vpop.f32.mrf.mxu0  ;;  %v2618_v60 = vpop.f32.mrf.mxu1 }
 0x331   : > { %v2657_v21 = vmax.f32 %v2618_v60, %v3125_v3 }
 0x332   : > { %v2569_v61 = vpop.f32.mrf.mxu0  ;;  %v3126_v0 = vpop.f32.mrf.mxu1 }
 0x334   : > { %v2571_v9 = vpop.f32.mrf.mxu0  ;;  %v2621_v28 = vpop.f32.mrf.mxu1 }
 0x335   : > { %v2666_v18 = vmax.f32 %v2621_v28, %v3126_v0 }
 0x336   : > { %v2575_v8 = vpop.f32.mrf.mxu0  ;;  %v3129_v17 = vpop.f32.mrf.mxu1 }
 0x337   : > { %v2673_v50 = vmax.f32 %v2565_v38, %v2575_v8 }
 0x338   : > { %v2577_v23 = vpop.f32.mrf.mxu0  ;;  %v2634_v33 = vpop.f32.mrf.mxu1 }
 0x339   : > { %v2691_v58 = vmax.f32 %v2655_v25, %v2673_v50  ;;  %v2674_v63 = vmax.f32 %v2567_v11, %v2577_v23  ;;  %v2675_v14 = vmax.f32 %v2634_v33, %v3129_v17 }
 0x33a   : > { %v2579_v5 = vpop.f32.mrf.mxu0  ;;  %v3130_v1 = vpop.f32.mrf.mxu1 }
 0x33b   : > { %v2709_v19 = vadd.f32 %v2691_v58, %v5232_v24  ;;  %v2692_v53 = vmax.f32 %v2656_v43, %v2674_v63  ;;  %v2693_v51 = vmax.f32 %v2657_v21, %v2675_v14  ;;  %v2682_v46 = vmax.f32 %v2569_v61, %v2579_v5 }
 0x33c   : > { %v2581_v39 = vpop.f32.mrf.mxu0  ;;  %v2637_v35 = vpop.f32.mrf.mxu1 }
 0x33d   : > { %v2710_v41 = vadd.f32 %v2692_v53, %v5232_v24  ;;  %v2711_v4 = vadd.f32 %v2693_v51, %v5232_v24  ;;  %v2700_v55 = vmax.f32 %v2664_v20, %v2682_v46  ;;  %v2683_v2 = vmax.f32 %v2571_v9, %v2581_v39 }
 0x33e   : > { %v2684_v52 = vmax.f32 %v2637_v35, %v3130_v1  ;;  %v2727_v13 = vmax.f32 %v2709_v19, 0.0 }
 0x33f   : > { %v2728_v47 = vmax.f32 %v2710_v41, 0.0  ;;  %v2729_v6 = vmax.f32 %v2711_v4, 0.0  ;;  %v2718_v49 = vadd.f32 %v2700_v55, %v5230_v42  ;;  %v2701_v27 = vmax.f32 %v2665_v26, %v2683_v2 }
 0x340   : > { %v2702_v7 = vmax.f32 %v2666_v18, %v2684_v52 }
 0x341   : > { %v3052_v29 = vpack.c.bf16 %v2728_v47, %v2727_v13  ;;  %v3053_v12 = vpack.c.bf16 %v2729_v6, %v2729_v6  ;;  %v2719_v24 = vadd.f32 %v2701_v27, %v5230_v42  ;;  %v2736_v30 = vmax.f32 %v2718_v49, 0.0 }
 0x342   : > { %v2720_v56 = vadd.f32 %v2702_v7, %v5230_v42 }
 0x343   : > { %3030 = vst [vmem:[%s5250_s19 + $0x60] sm:$0xff] %v3052_v29  ;;  %3031 = vst [vmem:[%s5250_s19 + $0x68] sm:$0xf] %v3053_v12  ;;  %v2737_v34 = vmax.f32 %v2719_v24, 0.0 }
 0x344   : > { %v2738_v16 = vmax.f32 %v2720_v56, 0.0 }
 0x345   : > { %v3057_v54 = vpack.c.bf16 %v2737_v34, %v2736_v30 }
 0x346   : > { %v3058_v32 = vpack.c.bf16 %v2738_v16, %v2738_v16 }
 0x347   : > { %3035 = vst [vmem:[%s5250_s19 + $0x84] sm:$0xff] %v3057_v54 }
 0x348   : > { %3036 = vst [vmem:[%s5250_s19 + $0x8c] sm:$0xf] %v3058_v32 }
 0x349 PF: > { %s13_s12 = sadd.s32 1, %s3249_s12  }
 0x34a   : > { %p10_p4 = scmp.ge.s32.totalorder %s13_s12, 4  }
 0x34c   :  { %12 = sbr.rel (!%p10_p4) target bundleno = 1 (0x1), region = 70 }

// kernel: galaxy_zoo_regressor.4
= control target key start
LH: loop header
LB: loop body
LE: loop exit
PB: predicated region body
PF: predicated region fallthrough
CT: control target
= control target key end

     0   :  { %s2003_s12 = smov 0   ;;  %s2715_s0 = inlined_call_operand.vmem [shape: bf16[4,4,16,432], index: 0, kind: input, shape index: {}]   ;;  %s2716_s1 = inlined_call_operand.vmem [shape: bf16[128,256], index: 1, kind: input, shape index: {}]   ;;  %s2717_s2 = inlined_call_operand.vmem [shape: f32[32,1], index: 2, kind: input, shape index: {}]   ;;  %s2718_s3 = inlined_call_operand.vmem [shape: bf16[4,32,384], index: 3, kind: output, shape index: {}]  }
   0x1 LB: > { %s1581_s13 = sadd.s32 4294967295, %s1977_s12   ;;  %p1585_p0 = scmp.ge.s32.totalorder %s1977_s12, 1  ;;  %s1977_s12 = sphi %s2003_s12, %s13_s12  }
   0x2   : > { %p139_p1 = scmp.lt.s32.totalorder %s1977_s12, 3 }
   0x4   : > { %p140_p2 = pnand %p1585_p0, %p139_p1 }
   0x5   : > { %s1586_s14 = sshll.u32 (!%p140_p2), %s1581_s13, 1  ;;  %s1979_s19 = smov (!%p140_p2), 103  }
   0x6   : > { %143 = sbr.rel (%p140_p2) target bundleno = 588 (0x24c), region = 32  ;;  %p166_p3 = scmp.lt.s32.totalorder (!%p140_p2), %s1586_s14, 3 }
   0x7   : > { %s1980_s20 = smov (!%p140_p2), 104   ;;  %s1981_s21 = smov (!%p140_p2), 127  }
   0xb   : > { %s2720_s14 = smov (!%p166_p3, %s1586_s14), 3  ;;  %v2085_v12 = vld [vmem:[%s2716_s1 + $0x4] ss:$8 sps:$4 sm:$0xff]   ;;  %vm289_vm0 = vcmask 842752   ;;  %vm274_vm1 = vcmask 850944   ;;  %vm259_vm2 = vcmask 1039360  }
   0xc   : > { %s1715_s15 = sshll.u32 %s2720_s14, 7  ;;  %719 = vmatprep.mubr.bf16.mxu1 %v2085_v12  ;;  %606 = vmatprep.mubr.bf16.mxu0 %v2085_v12 }
   0xd   : > { %s2017_s18 = scalar_lea.vmem %s2715_s0, %s1715_s15 }
   0xe   : > { %v1891_v0 = vld [vmem:[%s2017_s18 + $0x68] ss:$16 sps:$4 sm:$0xff]   ;;  %v2021_v1 = vld [vmem:[%s2017_s18 + $0x24] ss:$16 sps:$4 sm:$0xff]   ;;  %v1895_v2 = vld [vmem:[%s2017_s18 + $0x6c] ss:$16 sps:$4 sm:$0xff]  }
   0xf   : > { %484 = vrot.lane.b32.xlu1 %v1891_v0, %s1979_s19  ;;  %350 = vrot.lane.b32.xlu0 %v2021_v1, %s1979_s19  ;;  %v1896_v3 = vld [vmem:[%s2017_s18 + $0x28] ss:$16 sps:$4 sm:$0xff]   ;;  %v1898_v4 = vld [vmem:[%s2017_s18 + $0x2c] ss:$16 sps:$4 sm:$0xff]  }
  0x10   : > { %v2032_v5 = vld [vmem:[%s2017_s18 + $0x20] ss:$16 sps:$4 sm:$0xff]   ;;  %v1900_v6 = vld [vmem:[%s2017_s18 + $0x8] ss:$16 sps:$4 sm:$0xff]   ;;  %v2055_v7 = vld [vmem:[%s2017_s18 + $0x4] ss:$16 sps:$4 sm:$0xff]  }
  0x11   : > { %v1904_v8 = vld [vmem:[%s2017_s18 + $0x4c] ss:$16 sps:$4 sm:$0xff]   ;;  %v1906_v9 = vld [vmem:[%s2017_s18 + $0x48] ss:$16 sps:$4 sm:$0xff]   ;;  %v2066_v11 = vld [vmem:[%s2017_s18] ss:$16 sps:$4 sm:$0xff]  }
  0x12   : > { %v1907_v10 = vld [vmem:[%s2017_s18 + $0xc] ss:$16 sps:$4 sm:$0xff]   ;;  %v2093_v13 = vld [vmem:[%s2017_s18 + $0xa4] ss:$16 sps:$4 sm:$0xff]   ;;  %v2103_v15 = vld [vmem:[%s2017_s18 + $0x60] ss:$16 sps:$4 sm:$0xff]  }
  0x13   : > { %486 = vrot.lane.b32.xlu1 %v1895_v2, %s1979_s19  ;;  %352 = vrot.lane.b32.xlu0 %v1896_v3, %s1979_s19  ;;  %v2098_v14 = vld [vmem:[%s2017_s18 + $0x64] ss:$16 sps:$4 sm:$0xff]   ;;  %v1914_v16 = vld [vmem:[%s2017_s18 + $0xa8] ss:$16 sps:$4 sm:$0xff]  }
  0x14   : > { %v2112_v17 = vld [vmem:[%s2017_s18 + $0xa0] ss:$16 sps:$4 sm:$0xff]   ;;  %v2132_v18 = vld [vmem:[%s2017_s18 + $0x44] ss:$16 sps:$4 sm:$0xff]   ;;  %v1919_v19 = vld [vmem:[%s2017_s18 + $0x88] ss:$16 sps:$4 sm:$0xff]  }
  0x15   : > { %v2141_v20 = vld [vmem:[%s2017_s18 + $0x84] ss:$16 sps:$4 sm:$0xff]   ;;  %v2145_v21 = vld [vmem:[%s2017_s18 + $0x80] ss:$16 sps:$4 sm:$0xff]   ;;  %v1925_v36 = vld [vmem:[%s2017_s18 + $0xe8] ss:$16 sps:$4 sm:$0xff]  }
  0x16   : > { %v2150_v22 = vld [vmem:[%s2017_s18 + $0x40] ss:$16 sps:$4 sm:$0xff]   ;;  %v2184_v37 = vld [vmem:[%s2017_s18 + $0xe4] ss:$16 sps:$4 sm:$0xff]   ;;  %v1935_v54 = vld [vmem:[%s2017_s18 + $0x68] ss:$16 sps:$4 sm:$0xff]  }
  0x17   : > { %354 = vrot.lane.b32.xlu1 %v1898_v4, %s1979_s19  ;;  %348 = vrot.lane.b32.xlu0 %v2032_v5, %s1979_s19  ;;  %v2194_v41 = vld [vmem:[%s2017_s18 + $0xe0] ss:$16 sps:$4 sm:$0xff]   ;;  %v2212_v52 = vld [vmem:[%s2017_s18 + $0xc4] ss:$16 sps:$4 sm:$0xff]  }
  0x18   : > { %v2222_v58 = vld [vmem:[%s2017_s18 + $0xc0] ss:$16 sps:$4 sm:$0xff]   ;;  %v1936_v59 = vld [vmem:[%s2017_s18 + $0x28] ss:$16 sps:$4 sm:$0xff]  }
  0x19   : > { %v1933_v60 = vld [vmem:[%s2017_s18 + $0xc8] ss:$16 sps:$4 sm:$0xff]  }
  0x1b   : > { %338 = vrot.lane.b32.xlu1 %v1896_v3, %s1980_s20  ;;  %336 = vrot.lane.b32.xlu0 %v2021_v1, %s1980_s20 }
  0x1f   : > { %472 = vrot.lane.b32.xlu1 %v1895_v2, %s1980_s20  ;;  %470 = vrot.lane.b32.xlu0 %v1891_v0, %s1980_s20 }
  0x23   : > { %340 = vrot.lane.b32.xlu1 %v1898_v4, %s1980_s20  ;;  %334 = vrot.lane.b32.xlu0 %v2032_v5, %s1980_s20 }
  0x27   : > { %324 = vrot.lane.b32.xlu1 %v1896_v3, %s1981_s21  ;;  %322 = vrot.lane.b32.xlu0 %v2021_v1, %s1981_s21 }
  0x2b   : > { %458 = vrot.lane.b32.xlu1 %v1895_v2, %s1981_s21  ;;  %456 = vrot.lane.b32.xlu0 %v1891_v0, %s1981_s21 }
  0x2f   : > { %326 = vrot.lane.b32.xlu1 %v1898_v4, %s1981_s21  ;;  %320 = vrot.lane.b32.xlu0 %v2032_v5, %s1981_s21 }
  0x33   : > { %285 = vrot.lane.b32.xlu1 %v1900_v6, %s1979_s19  ;;  %283 = vrot.lane.b32.xlu0 %v2055_v7, %s1979_s19 }
  0x37   : > { %420 = vrot.lane.b32.xlu1 %v1904_v8, %s1979_s19  ;;  %418 = vrot.lane.b32.xlu0 %v1906_v9, %s1979_s19 }
  0x3b   : > { %287 = vrot.lane.b32.xlu1 %v1907_v10, %s1979_s19  ;;  %281 = vrot.lane.b32.xlu0 %v2066_v11, %s1979_s19 }
  0x3f   : > { %270 = vrot.lane.b32.xlu1 %v1900_v6, %s1980_s20  ;;  %268 = vrot.lane.b32.xlu0 %v2055_v7, %s1980_s20 }
  0x43   : > { %406 = vrot.lane.b32.xlu1 %v1904_v8, %s1980_s20  ;;  %404 = vrot.lane.b32.xlu0 %v1906_v9, %s1980_s20 }
  0x47   : > { %272 = vrot.lane.b32.xlu1 %v1907_v10, %s1980_s20  ;;  %266 = vrot.lane.b32.xlu0 %v2066_v11, %s1980_s20 }
  0x4b   : > { %255 = vrot.lane.b32.xlu1 %v1900_v6, %s1981_s21  ;;  %253 = vrot.lane.b32.xlu0 %v2055_v7, %s1981_s21 }
  0x4f   : > { %392 = vrot.lane.b32.xlu1 %v1904_v8, %s1981_s21  ;;  %390 = vrot.lane.b32.xlu0 %v1906_v9, %s1981_s21 }
  0x53   : > { %257 = vrot.lane.b32.xlu1 %v1907_v10, %s1981_s21  ;;  %251 = vrot.lane.b32.xlu0 %v2066_v11, %s1981_s21 }
  0x57   : > { %1060 = vrot.lane.b32.xlu1 %v2093_v13, %s1979_s19  ;;  %482 = vrot.lane.b32.xlu0 %v2098_v14, %s1979_s19 }
  0x5b   : > { %480 = vrot.lane.b32.xlu1 %v2103_v15, %s1979_s19  ;;  %1062 = vrot.lane.b32.xlu0 %v1914_v16, %s1979_s19 }
  0x5f   : > { %468 = vrot.lane.b32.xlu1 %v2098_v14, %s1980_s20  ;;  %1058 = vrot.lane.b32.xlu0 %v2112_v17, %s1979_s19 }
  0x63   : > { %1048 = vrot.lane.b32.xlu1 %v1914_v16, %s1980_s20  ;;  %1046 = vrot.lane.b32.xlu0 %v2093_v13, %s1980_s20 }
  0x67   : > { %1044 = vrot.lane.b32.xlu1 %v2112_v17, %s1980_s20  ;;  %466 = vrot.lane.b32.xlu0 %v2103_v15, %s1980_s20 }
  0x6b   : > { %1032 = vrot.lane.b32.xlu1 %v2093_v13, %s1981_s21  ;;  %454 = vrot.lane.b32.xlu0 %v2098_v14, %s1981_s21 }
  0x6f   : > { %452 = vrot.lane.b32.xlu1 %v2103_v15, %s1981_s21  ;;  %1034 = vrot.lane.b32.xlu0 %v1914_v16, %s1981_s21  ;;  %v1937_v16 = vld [vmem:[%s2017_s18 + $0xac] ss:$16 sps:$4 sm:$0xff]  }
  0x73   : > { %416 = vrot.lane.b32.xlu1 %v2132_v18, %s1979_s19  ;;  %1030 = vrot.lane.b32.xlu0 %v2112_v17, %s1981_s21 }
  0x77   : > { %996 = vrot.lane.b32.xlu1 %v1919_v19, %s1979_s19  ;;  %994 = vrot.lane.b32.xlu0 %v2141_v20, %s1979_s19 }
  0x7b   : > { %992 = vrot.lane.b32.xlu1 %v2145_v21, %s1979_s19  ;;  %414 = vrot.lane.b32.xlu0 %v2150_v22, %s1979_s19 }
  0x7f   : > { %980 = vrot.lane.b32.xlu1 %v2141_v20, %s1980_s20  ;;  %402 = vrot.lane.b32.xlu0 %v2132_v18, %s1980_s20 }
  0x81   : > { %v2160_v23 = vpop.permute.xlu1 %484  ;;  %v351_v24 = vpop.permute.xlu0 %350 }
  0x83   : > { %400 = vrot.lane.b32.xlu1 %v2150_v22, %s1980_s20  ;;  %982 = vrot.lane.b32.xlu0 %v1919_v19, %s1980_s20 }
  0x85   : > { %v487_v25 = vpop.permute.xlu1 %486  ;;  %v353_v26 = vpop.permute.xlu0 %352 }
  0x86   : > { %v490_v27 = vsel %vm289_vm0, %v2160_v23, %v487_v25  ;;  %v357_v28 = vsel %vm289_vm0, %v351_v24, %v353_v26 }
  0x87   : > { %1732 = vmatprep.subr.bf16.mxu1 %v490_v27  ;;  %388 = vrot.lane.b32.xlu1 %v2132_v18, %s1981_s21 }
  0x88   : > { %574 = vmatprep.subr.bf16.mxu0 %v357_v28  ;;  %978 = vrot.lane.b32.xlu0 %v2145_v21, %s1980_s20 }
  0x89   : > { %v355_v29 = vpop.permute.xlu1 %354  ;;  %v349_v30 = vpop.permute.xlu0 %348 }
  0x8a   : > { %v358_v31 = vsel %vm289_vm0, %v353_v26, %v355_v29  ;;  %v356_v32 = vsel %vm289_vm0, %v349_v30, %v351_v24 }
  0x8b   : > { %1733 = vmatpush3.bf16.msra.mxu1 %v358_v31  ;;  %968 = vrot.lane.b32.xlu1 %v1919_v19, %s1981_s21  ;;  %v1938_v19 = vld [vmem:[%s2017_s18 + $0xec] ss:$16 sps:$4 sm:$0xff]  }
  0x8c   : > { %575 = vmatpush1.bf16.msra.mxu0 %v356_v32  ;;  %966 = vrot.lane.b32.xlu0 %v2141_v20, %s1981_s21 }
  0x8d   : > { %v339_v33 = vpop.permute.xlu1 %338  ;;  %v337_v34 = vpop.permute.xlu0 %336 }
  0x8e   : > { %v343_v35 = vsel %vm274_vm1, %v337_v34, %v339_v33 }
  0x8f   : > { %964 = vrot.lane.b32.xlu1 %v2145_v21, %s1981_s21  ;;  %576 = vmatprep.subr.bf16.mxu0 %v343_v35  ;;  %v1940_v35 = vld [vmem:[%s2017_s18 + $0xcc] ss:$16 sps:$4 sm:$0xff]  }
  0x90   : > { %386 = vrot.lane.b32.xlu0 %v2150_v22, %s1981_s21 }
  0x91   : > { %v473_v38 = vpop.permute.xlu1 %472  ;;  %v2186_v39 = vpop.permute.xlu0 %470 }
  0x92   : > { %v476_v40 = vsel %vm274_vm1, %v2186_v39, %v473_v38 }
  0x93   : > { %1194 = vrot.lane.b32.xlu1 %v1925_v36, %s1979_s19  ;;  %1734 = vmatprep.subr.bf16.mxu1 %v476_v40 }
  0x94   : > { %1192 = vrot.lane.b32.xlu0 %v2184_v37, %s1979_s19 }
  0x95   : > { %v341_v42 = vpop.permute.xlu1 %340  ;;  %v335_v43 = vpop.permute.xlu0 %334 }
  0x96   : > { %v344_v44 = vsel %vm274_vm1, %v339_v33, %v341_v42  ;;  %v342_v45 = vsel %vm274_vm1, %v335_v43, %v337_v34  ;;  %v1939_v34 = vld [vmem:[%s2017_s18 + $0x8c] ss:$16 sps:$4 sm:$0xff]   ;;  %v1941_v43 = vld [vmem:[%s2017_s18 + $0x48] ss:$16 sps:$4 sm:$0xff]  }
  0x97   : > { %1735 = vmatpush3.bf16.msra.mxu1 %v344_v44  ;;  %1178 = vrot.lane.b32.xlu1 %v2184_v37, %s1980_s20 }
  0x98   : > { %577 = vmatpush1.bf16.msra.mxu0 %v342_v45  ;;  %1190 = vrot.lane.b32.xlu0 %v2194_v41, %s1979_s19 }
  0x99   : > { %v325_v46 = vpop.permute.xlu1 %324  ;;  %v323_v47 = vpop.permute.xlu0 %322 }
  0x9a   : > { %v329_v48 = vsel %vm259_vm2, %v323_v47, %v325_v46 }
  0x9b   : > { %1176 = vrot.lane.b32.xlu1 %v2194_v41, %s1980_s20  ;;  %578 = vmatprep.subr.bf16.mxu0 %v329_v48 }
  0x9c   : > { %1180 = vrot.lane.b32.xlu0 %v1925_v36, %s1980_s20 }
  0x9d   : > { %v459_v49 = vpop.permute.xlu1 %458  ;;  %v2206_v50 = vpop.permute.xlu0 %456 }
  0x9e   : > { %v462_v51 = vsel %vm259_vm2, %v2206_v50, %v459_v49 }
  0x9f   : > { %1166 = vrot.lane.b32.xlu1 %v1925_v36, %s1981_s21  ;;  %1736 = vmatprep.subr.bf16.mxu1 %v462_v51  ;;  %v2284_v51 = vld [vmem:[%s2716_s1] ss:$8 sps:$4 sm:$0xff]  }
  0xa0   : > { %1164 = vrot.lane.b32.xlu0 %v2184_v37, %s1981_s21 }
  0xa1   : > { %v327_v53 = vpop.permute.xlu1 %326  ;;  %v321_v55 = vpop.permute.xlu0 %320 }
  0xa2   : > { %v330_v56 = vsel %vm259_vm2, %v325_v46, %v327_v53  ;;  %v328_v57 = vsel %vm259_vm2, %v321_v55, %v323_v47  ;;  %v1942_v47 = vld [vmem:[%s2017_s18 + $0x8] ss:$16 sps:$4 sm:$0xff]   ;;  %v1982_v55 = vmov 0  }
  0xa3   : > { %1737 = vmatpush3.bf16.msra.mxu1 %v330_v56  ;;  %1126 = vrot.lane.b32.xlu1 %v2212_v52, %s1979_s19 }
  0xa4   : > { %579 = vmatpush1.bf16.msra.mxu0 %v328_v57  ;;  %1162 = vrot.lane.b32.xlu0 %v2194_v41, %s1981_s21 }
  0xa5   : > { %v286_v61 = vpop.permute.xlu1 %285  ;;  %580 = vmatprep.subr.bf16.mxu0 %v2021_v1  ;;  %1738 = vmatprep.subr.bf16.mxu1 %v1935_v54  ;;  %v284_v62 = vpop.permute.xlu0 %283  ;;  %v2292_v54 = vld [vmem:[%s2716_s1 + $0x14] ss:$8 sps:$4 sm:$0xff]  }
  0xa6   : > { %v291_v63 = vsel %vm289_vm0, %v284_v62, %v286_v61  ;;  %1890 = vset.pattern.permute.xlu1 %v1982_v55  ;;  %1889 = vset.pattern.permute.xlu0 %v1982_v55 }
  0xa7   : > { %1124 = vrot.lane.b32.xlu1 %v2222_v58, %s1979_s19  ;;  %1739 = vmatpush3.bf16.msra.mxu1 %v1936_v59 }
  0xa8   : > { %581 = vmatpush1.bf16.msra.mxu0 %v2032_v5  ;;  %1128 = vrot.lane.b32.xlu0 %v1933_v60, %s1979_s19 }
  0xa9   : > { %582 = vmatprep.subr.bf16.mxu0 %v291_v63  ;;  %v421_v0 = vpop.permute.xlu1 %420  ;;  %v2234_v2 = vpop.permute.xlu0 %418  ;;  %v2314_v63 = vld [vmem:[%s2716_s1 + $0x10] ss:$8 sps:$4 sm:$0xff]  }
  0xaa   : > { %v424_v1 = vsel %vm289_vm0, %v2234_v2, %v421_v0 }
  0xab   : > { %1114 = vrot.lane.b32.xlu1 %v1933_v60, %s1980_s20  ;;  %1740 = vmatprep.subr.bf16.mxu1 %v424_v1  ;;  %v2320_v1 = vld [vmem:[%s2716_s1 + $0x24] ss:$8 sps:$4 sm:$0xff]  }
  0xac   : > { %1112 = vrot.lane.b32.xlu0 %v2212_v52, %s1980_s20 }
  0xad   : > { %v288_v3 = vpop.permute.xlu1 %287  ;;  %v282_v4 = vpop.permute.xlu0 %281 }
  0xae   : > { %v292_v5 = vsel %vm289_vm0, %v286_v61, %v288_v3  ;;  %v290_v6 = vsel %vm289_vm0, %v282_v4, %v284_v62  ;;  %v198_v3 = vld [vmem:[%s2717_s2 + $0x10] sm:$0xff] }
  0xaf   : > { %1098 = vrot.lane.b32.xlu1 %v2212_v52, %s1981_s21  ;;  %1741 = vmatpush3.bf16.msra.mxu1 %v292_v5 }
  0xb0   : > { %1110 = vrot.lane.b32.xlu0 %v2222_v58, %s1980_s20  ;;  %583 = vmatpush1.bf16.msra.mxu0 %v290_v6  ;;  %v199_v6 = vld [vmem:[%s2717_s2 + $0x18] sm:$0xff] }
  0xb1   : > { %v271_v8 = vpop.permute.xlu1 %270  ;;  %v269_v9 = vpop.permute.xlu0 %268 }
  0xb2   : > { %v276_v10 = vsel %vm274_vm1, %v269_v9, %v271_v8 }
  0xb3   : > { %1096 = vrot.lane.b32.xlu1 %v2222_v58, %s1981_s21  ;;  %584 = vmatprep.subr.bf16.mxu0 %v276_v10 }
  0xb4   : > { %1100 = vrot.lane.b32.xlu0 %v1933_v60, %s1981_s21 }
  0xb5   : > { %v407_v24 = vpop.permute.xlu1 %406  ;;  %v2253_v25 = vpop.permute.xlu0 %404 }
  0xb6   : > { %v410_v26 = vsel %vm274_vm1, %v2253_v25, %v407_v24  ;;  %v2344_v24 = vld [vmem:[%s2716_s1 + $0x34] ss:$8 sps:$4 sm:$0xff]  }
  0xb7   : > { %1064 = vrot.lane.b32.xlu1 %v1937_v16, %s1979_s19  ;;  %1742 = vmatprep.subr.bf16.mxu1 %v410_v26 }
  0xb8   : > { %1196 = vrot.lane.b32.xlu0 %v1938_v19, %s1979_s19 }
  0xb9   : > { %v273_v27 = vpop.permute.xlu1 %272  ;;  %v267_v28 = vpop.permute.xlu0 %266 }
  0xba   : > { %v277_v29 = vsel %vm274_vm1, %v271_v8, %v273_v27  ;;  %v275_v30 = vsel %vm274_vm1, %v267_v28, %v269_v9 }
  0xbb   : > { %1050 = vrot.lane.b32.xlu1 %v1937_v16, %s1980_s20  ;;  %1743 = vmatpush3.bf16.msra.mxu1 %v277_v29 }
  0xbc   : > { %1182 = vrot.lane.b32.xlu0 %v1938_v19, %s1980_s20  ;;  %585 = vmatpush1.bf16.msra.mxu0 %v275_v30 }
  0xbd   : > { %v256_v31 = vpop.permute.xlu1 %255  ;;  %v254_v32 = vpop.permute.xlu0 %253 }
  0xbe   : > { %v261_v33 = vsel %vm259_vm2, %v254_v32, %v256_v31 }
  0xbf   : > { %1036 = vrot.lane.b32.xlu1 %v1937_v16, %s1981_s21  ;;  %586 = vmatprep.subr.bf16.mxu0 %v261_v33  ;;  %v2338_v16 = vld [vmem:[%s2716_s1 + $0x20] ss:$8 sps:$4 sm:$0xff]  }
  0xc0   : > { %1168 = vrot.lane.b32.xlu0 %v1938_v19, %s1981_s21 }
  0xc1   : > { %v393_v36 = vpop.permute.xlu1 %392  ;;  %v2268_v38 = vpop.permute.xlu0 %390 }
  0xc2   : > { %v396_v40 = vsel %vm259_vm2, %v2268_v38, %v393_v36 }
  0xc3   : > { %998 = vrot.lane.b32.xlu1 %v1939_v34, %s1979_s19  ;;  %1744 = vmatprep.subr.bf16.mxu1 %v396_v40 }
  0xc4   : > { %1130 = vrot.lane.b32.xlu0 %v1940_v35, %s1979_s19 }
  0xc5   : > { %v258_v42 = vpop.permute.xlu1 %257  ;;  %v252_v44 = vpop.permute.xlu0 %251 }
  0xc6   : > { %v262_v45 = vsel %vm259_vm2, %v256_v31, %v258_v42  ;;  %v260_v46 = vsel %vm259_vm2, %v252_v44, %v254_v32  ;;  %v2356_v32 = vld [vmem:[%s2716_s1 + $0x30] ss:$8 sps:$4 sm:$0xff]  }
  0xc7   : > { %984 = vrot.lane.b32.xlu1 %v1939_v34, %s1980_s20  ;;  %1745 = vmatpush3.bf16.msra.mxu1 %v262_v45 }
  0xc8   : > { %1116 = vrot.lane.b32.xlu0 %v1940_v35, %s1980_s20  ;;  %587 = vmatpush1.bf16.msra.mxu0 %v260_v46 }
  0xc9   : > { %v1061_v48 = vpop.permute.xlu1 %1060  ;;  %588 = vmatprep.subr.bf16.mxu0 %v2055_v7  ;;  %1746 = vmatprep.subr.bf16.mxu1 %v1941_v43  ;;  %v483_v49 = vpop.permute.xlu0 %482  ;;  %v2378_v43 = vld [vmem:[%s2716_s1 + $0x40] ss:$8 sps:$4 sm:$0xff]  }
  0xca   : > { %v489_v53 = vsel %vm289_vm0, %v483_v49, %v2160_v23  ;;  %v196_v23 = vld [vmem:[%s2717_s2] sm:$0xff] }
  0xcb   : > { %970 = vrot.lane.b32.xlu1 %v1939_v34, %s1981_s21  ;;  %1747 = vmatpush3.bf16.msra.mxu1 %v1942_v47 }
  0xcc   : > { %1102 = vrot.lane.b32.xlu0 %v1940_v35, %s1981_s21  ;;  %589 = vmatpush1.bf16.msra.mxu0 %v2066_v11  ;;  %v197_v11 = vld [vmem:[%s2717_s2 + $0x8] sm:$0xff] }
  0xcd   : > { %590 = vmatprep.subr.bf16.mxu0 %v489_v53  ;;  %v481_v7 = vpop.permute.xlu1 %480  ;;  %v2296_v56 = vpop.permute.xlu0 %1062  ;;  %v2402_v53 = vld [vmem:[%s2716_s1 + $0x64] ss:$8 sps:$4 sm:$0xff]  }
  0xce   : > { %v488_v57 = vsel %vm289_vm0, %v481_v7, %v483_v49  ;;  %720 = vmatmul.mubr.bf16.vlgmr.msra.gmra.mxu1 %v2284_v51  ;;  %v1067_v59 = vsel %vm289_vm0, %v1061_v48, %v2296_v56  ;;  %v2395_v49 = vld [vmem:[%s2716_s1 + $0x50] ss:$8 sps:$4 sm:$0xff]  }
  0xcf   : > { %727 = vmatprep.mubr.bf16.mxu1 %v2292_v54  ;;  %1204 = vmatprep.subr.bf16.mxu1 %v1067_v59 }
  0xd0   : > { %591 = vmatpush2.bf16.msra.mxu0 %v488_v57  ;;  %827 = vperm.xlu1 %1890, %v197_v11  }
  0xd1   : > { %v469_v60 = vpop.permute.xlu1 %468  ;;  %822 = vperm.xlu0 %1889, %v196_v23   ;;  %v1059_v61 = vpop.permute.xlu0 %1058 }
  0xd2   : > { %v475_v62 = vsel %vm274_vm1, %v469_v60, %v2186_v39  ;;  %v1066_v0 = vsel %vm289_vm0, %v1059_v61, %v1061_v48 }
  0xd3   : > { %592 = vmatprep.subr.bf16.mxu0 %v475_v62  ;;  %1205 = vmatpush1.bf16.msra.mxu1 %v1066_v0  ;;  %v2422_v62 = vld [vmem:[%s2716_s1 + $0x74] ss:$8 sps:$4 sm:$0xff]  }
  0xd4   : > { %832 = vperm.xlu1 %1890, %v198_v3  }
  0xd5   : > { %v2325_v4 = vpop.permute.xlu1 %1048  ;;  %v1047_v39 = vpop.permute.xlu0 %1046  ;;  %837 = vperm.xlu0 %1889, %v199_v6  }
  0xd6   : > { %728 = vmatmul.mubr.bf16.gmra.mxu1 %v2314_v63  ;;  %v1053_v5 = vsel %vm274_vm1, %v1047_v39, %v2325_v4 }
  0xd7   : > { %735 = vmatprep.mubr.bf16.mxu1 %v2320_v1  ;;  %1206 = vmatprep.subr.bf16.mxu1 %v1053_v5 }
  0xd9   : > { %v1045_v8 = vpop.permute.xlu1 %1044  ;;  %v467_v10 = vpop.permute.xlu0 %466 }
  0xda   : > { %v1052_v9 = vsel %vm274_vm1, %v1045_v8, %v1047_v39  ;;  %v474_v19 = vsel %vm274_vm1, %v467_v10, %v469_v60  ;;  %v2416_v60 = vld [vmem:[%s2716_s1 + $0x60] ss:$8 sps:$4 sm:$0xff]   ;;  %v2434_v8 = vld [vmem:[%s2716_s1 + $0x70] ss:$8 sps:$4 sm:$0xff]  }
  0xdb   : > { %1207 = vmatpush1.bf16.msra.mxu1 %v1052_v9  ;;  %593 = vmatpush2.bf16.msra.mxu0 %v474_v19 }
  0xdd   : > { %v1033_v26 = vpop.permute.xlu1 %1032  ;;  %v455_v27 = vpop.permute.xlu0 %454 }
  0xde   : > { %736 = vmatmul.mubr.bf16.gmra.mxu1 %v2338_v16  ;;  %v461_v28 = vsel %vm259_vm2, %v455_v27, %v2206_v50  ;;  %v2363_v50 = vld [vmem:[%s2716_s1 + $0x44] ss:$8 sps:$4 sm:$0xff]  }
  0xdf   : > { %743 = vmatprep.mubr.bf16.mxu1 %v2344_v24  ;;  %594 = vmatprep.subr.bf16.mxu0 %v461_v28 }
  0xe1   : > { %v453_v29 = vpop.permute.xlu1 %452  ;;  %v2350_v30 = vpop.permute.xlu0 %1034 }
  0xe2   : > { %v460_v31 = vsel %vm259_vm2, %v453_v29, %v455_v27  ;;  %v1039_v33 = vsel %vm259_vm2, %v1033_v26, %v2350_v30 }
  0xe3   : > { %595 = vmatpush2.bf16.msra.mxu0 %v460_v31  ;;  %1208 = vmatprep.subr.bf16.mxu1 %v1039_v33 }
  0xe4   : > { %596 = vmatprep.subr.bf16.mxu0 %v2098_v14 }
  0xe5   : > { %v417_v34 = vpop.permute.xlu1 %416  ;;  %v1031_v35 = vpop.permute.xlu0 %1030 }
  0xe6   : > { %v423_v36 = vsel %vm289_vm0, %v417_v34, %v2234_v2  ;;  %744 = vmatmul.mubr.bf16.gmra.mxu1 %v2356_v32  ;;  %v1038_v40 = vsel %vm259_vm2, %v1031_v35, %v1033_v26 }
  0xe7   : > { %597 = vmatpush2.bf16.msra.mxu0 %v2103_v15  ;;  %751 = vmatprep.mubr.bf16.mxu1 %v2363_v50  ;;  %v2385_v15 = vld [vmem:[%s2716_s1 + $0x54] ss:$8 sps:$4 sm:$0xff]  }
  0xe8   : > { %1209 = vmatpush1.bf16.msra.mxu1 %v1038_v40  ;;  %598 = vmatprep.subr.bf16.mxu0 %v423_v36 }
  0xe9   : > { %v2372_v42 = vpop.permute.xlu1 %996  ;;  %1210 = vmatprep.subr.bf16.mxu1 %v2093_v13  ;;  %v995_v14 = vpop.permute.xlu0 %994 }
  0xea   : > { %v1001_v2 = vsel %vm289_vm0, %v995_v14, %v2372_v42 }
  0xec   : > { %1211 = vmatpush1.bf16.msra.mxu1 %v2112_v17 }
  0xed   : > { %1212 = vmatprep.subr.bf16.mxu1 %v1001_v2  ;;  %v993_v44 = vpop.permute.xlu1 %992  ;;  %v415_v45 = vpop.permute.xlu0 %414 }
  0xee   : > { %v1000_v13 = vsel %vm289_vm0, %v993_v44, %v995_v14  ;;  %752 = vmatmul.mubr.bf16.gmra.mxu1 %v2378_v43  ;;  %v422_v46 = vsel %vm289_vm0, %v415_v45, %v417_v34 }
  0xef   : > { %759 = vmatprep.mubr.bf16.mxu1 %v2385_v15  ;;  %599 = vmatpush2.bf16.msra.mxu0 %v422_v46 }
  0xf0   : > { %1213 = vmatpush1.bf16.msra.mxu1 %v1000_v13 }
  0xf1   : > { %v981_v47 = vpop.permute.xlu1 %980  ;;  %v403_v48 = vpop.permute.xlu0 %402 }
  0xf2   : > { %v409_v17 = vsel %vm274_vm1, %v403_v48, %v2253_v25 }
  0xf3   : > { %600 = vmatprep.subr.bf16.mxu0 %v409_v17 }
  0xf5   : > { %v401_v7 = vpop.permute.xlu1 %400  ;;  %v2404_v55 = vpop.permute.xlu0 %982 }
  0xf6   : > { %v408_v57 = vsel %vm274_vm1, %v401_v7, %v403_v48  ;;  %760 = vmatmul.mubr.bf16.gmra.mxu1 %v2395_v49  ;;  %v987_v23 = vsel %vm274_vm1, %v981_v47, %v2404_v55 }
  0xf7   : > { %601 = vmatpush2.bf16.msra.mxu0 %v408_v57  ;;  %767 = vmatprep.mubr.bf16.mxu1 %v2402_v53 }
  0xf8   : > { %1214 = vmatprep.subr.bf16.mxu1 %v987_v23 }
  0xf9   : > { %v389_v25 = vpop.permute.xlu1 %388 }
  0xfa   : > { %v979_v59 = vpop.permute.xlu0 %978  ;;  %v395_v11 = vsel %vm259_vm2, %v389_v25, %v2268_v38 }
  0xfb   : > { %v986_v61 = vsel %vm274_vm1, %v979_v59, %v981_v47  ;;  %602 = vmatprep.subr.bf16.mxu0 %v395_v11 }
  0xfc   : > { %1215 = vmatpush1.bf16.msra.mxu1 %v986_v61 }
  0xfd   : > { %v2424_v0 = vpop.permute.xlu1 %968 }
  0xfe   : > { %v967_v3 = vpop.permute.xlu0 %966  ;;  %768 = vmatmul.mubr.bf16.gmra.mxu1 %v2416_v60 }
  0xff   : > { %v973_v38 = vsel %vm259_vm2, %v967_v3, %v2424_v0  ;;  %775 = vmatprep.mubr.bf16.mxu1 %v2422_v62 }
 0x100   : > { %1216 = vmatprep.subr.bf16.mxu1 %v973_v38 }
 0x101   : > { %v965_v39 = vpop.permute.xlu1 %964 }
 0x102   : > { %v972_v5 = vsel %vm259_vm2, %v965_v39, %v967_v3  ;;  %v387_v6 = vpop.permute.xlu0 %386 }
 0x103   : > { %v394_v9 = vsel %vm259_vm2, %v387_v6, %v389_v25  ;;  %1217 = vmatpush1.bf16.msra.mxu1 %v972_v5  ;;  %v1967_v6 = vld [vmem:[%s2017_s18 + $0xe8] ss:$16 sps:$4 sm:$0xff]  }
 0x104   : > { %603 = vmatpush2.bf16.msra.mxu0 %v394_v9  ;;  %1218 = vmatprep.subr.bf16.mxu1 %v2141_v20 }
 0x105   : > { %v2438_v10 = vpop.permute.xlu1 %1194  ;;  %604 = vmatprep.subr.bf16.mxu0 %v2132_v18 }
 0x106   : > { %v1193_v19 = vpop.permute.xlu0 %1192  ;;  %776 = vmatmul.mubr.bf16.gmra.mxu1 %v2434_v8 }
 0x107   : > { %1219 = vmatpush1.bf16.msra.mxu1 %v2145_v21  ;;  %v1199_v26 = vsel %vm289_vm0, %v1193_v19, %v2438_v10  ;;  %1236 = vmatprep.mubr.bf16.mxu1 %v2085_v12 }
 0x108   : > { %605 = vmatpush2.bf16.msra.mxu0 %v2150_v22  ;;  %1220 = vmatprep.subr.bf16.mxu1 %v1199_v26 }
 0x109   : > { %v1179_v27 = vpop.permute.xlu1 %1178 }
 0x10a   : > { %v1191_v28 = vpop.permute.xlu0 %1190 }
 0x10b   : > { %v1198_v20 = vsel %vm289_vm0, %v1191_v28, %v1193_v19  ;;  %607 = vmatmul.mubr.bf16.vlgmr.msra.gmra.mxu0 %v2284_v51 }
 0x10c   : > { %1221 = vmatpush2.bf16.msra.mxu1 %v1198_v20  ;;  %616 = vmatprep.mubr.bf16.mxu0 %v2292_v54 }
 0x10d   : > { %v1177_v18 = vpop.permute.xlu1 %1176 }
 0x10e   : > { %v1184_v21 = vsel %vm274_vm1, %v1177_v18, %v1179_v27  ;;  %v1181_v29 = vpop.permute.xlu0 %1180 }
 0x10f   : > { %v1185_v31 = vsel %vm274_vm1, %v1179_v27, %v1181_v29 }
 0x110   : > { %1222 = vmatprep.subr.bf16.mxu1 %v1185_v31  ;;  %v1969_v31 = vld [vmem:[%s2017_s18 + $0xc8] ss:$16 sps:$4 sm:$0xff]  }
 0x111   : > { %1223 = vmatpush2.bf16.msra.mxu1 %v1184_v21  ;;  %v2452_v33 = vpop.permute.xlu1 %1166 }
 0x112   : > { %v1165_v22 = vpop.permute.xlu0 %1164 }
 0x113   : > { %617 = vmatmul.mubr.bf16.gmra.mxu0 %v2314_v63  ;;  %v1171_v34 = vsel %vm259_vm2, %v1165_v22, %v2452_v33 }
 0x114   : > { %1224 = vmatprep.subr.bf16.mxu1 %v1171_v34  ;;  %626 = vmatprep.mubr.bf16.mxu0 %v2320_v1 }
 0x115   : > { %v1127_v35 = vpop.permute.xlu1 %1126 }
 0x116   : > { %v1163_v36 = vpop.permute.xlu0 %1162 }
 0x117   : > { %v1170_v40 = vsel %vm259_vm2, %v1163_v36, %v1165_v22 }
 0x118   : > { %1225 = vmatpush2.bf16.msra.mxu1 %v1170_v40 }
 0x119   : > { %v1125_v14 = vpop.permute.xlu1 %1124  ;;  %1226 = vmatprep.subr.bf16.mxu1 %v2184_v37 }
 0x11a   : > { %v2460_v2 = vpop.permute.xlu0 %1128  ;;  %v1132_v46 = vsel %vm289_vm0, %v1125_v14, %v1127_v35 }
 0x11b   : > { %627 = vmatmul.mubr.bf16.gmra.mxu0 %v2338_v16  ;;  %v1133_v44 = vsel %vm289_vm0, %v1127_v35, %v2460_v2 }
 0x11c   : > { %1227 = vmatpush2.bf16.msra.mxu1 %v2194_v41  ;;  %636 = vmatprep.mubr.bf16.mxu0 %v2344_v24 }
 0x11d   : > { %1228 = vmatprep.subr.bf16.mxu1 %v1133_v44  ;;  %v2467_v13 = vpop.permute.xlu1 %1114 }
 0x11e   : > { %v1113_v45 = vpop.permute.xlu0 %1112 }
 0x11f   : > { %v1119_v37 = vsel %vm274_vm1, %v1113_v45, %v2467_v13 }
 0x120   : > { %1229 = vmatpush2.bf16.msra.mxu1 %v1132_v46 }
 0x121   : > { %1230 = vmatprep.subr.bf16.mxu1 %v1119_v37  ;;  %v1099_v47 = vpop.permute.xlu1 %1098 }
 0x122   : > { %v1111_v48 = vpop.permute.xlu0 %1110 }
 0x123   : > { %v1118_v17 = vsel %vm274_vm1, %v1111_v48, %v1113_v45  ;;  %637 = vmatmul.mubr.bf16.gmra.mxu0 %v2356_v32 }
 0x124   : > { %1231 = vmatpush2.bf16.msra.mxu1 %v1118_v17  ;;  %646 = vmatprep.mubr.bf16.mxu0 %v2363_v50 }
 0x125   : > { %v1097_v41 = vpop.permute.xlu1 %1096 }
 0x126   : > { %v1104_v7 = vsel %vm259_vm2, %v1097_v41, %v1099_v47  ;;  %v2476_v57 = vpop.permute.xlu0 %1100 }
 0x127   : > { %v1105_v23 = vsel %vm259_vm2, %v1099_v47, %v2476_v57 }
 0x128   : > { %1232 = vmatprep.subr.bf16.mxu1 %v1105_v23 }
 0x129   : > { %1233 = vmatpush2.bf16.msra.mxu1 %v1104_v7  ;;  %v1065_v25 = vpop.permute.xlu1 %1064 }
 0x12a   : > { %v1068_v59 = vsel %vm289_vm0, %v2296_v56, %v1065_v25  ;;  %v1197_v11 = vpop.permute.xlu0 %1196  ;;  %1234 = vmatprep.subr.bf16.mxu1 %v2212_v52 }
 0x12b   : > { %647 = vmatmul.mubr.bf16.gmra.mxu0 %v2378_v43  ;;  %v1200_v61 = vsel %vm289_vm0, %v2438_v10, %v1197_v11  ;;  %v1968_v10 = vld [vmem:[%s2017_s18 + $0xa8] ss:$16 sps:$4 sm:$0xff]  }
 0x12c   : > { %1796 = vmatprep.subr.bf16.mxu0 %v1200_v61  ;;  %656 = vmatprep.mubr.bf16.mxu0 %v2385_v15 }
 0x12d   : > { %1235 = vmatpush2.bf16.msra.mxu1 %v2222_v58  ;;  %1797 = vmatpush3.bf16.msra.mxu0 %v1068_v59  ;;  %v1051_v3 = vpop.permute.xlu1 %1050 }
 0x12e   : > { %v1054_v38 = vsel %vm274_vm1, %v2325_v4, %v1051_v3  ;;  %1860 = vmatprep.subr.bf16.mxu1 %v1200_v61  ;;  %v1183_v56 = vpop.permute.xlu0 %1182 }
 0x12f   : > { %v1186_v52 = vsel %vm274_vm1, %v1181_v29, %v1183_v56 }
 0x130   : > { %1237 = vmatmul.mubr.bf16.vlgmr.msra.gmra.mxu1 %v2284_v51  ;;  %1798 = vmatprep.subr.bf16.mxu0 %v1186_v52 }
 0x131   : > { %1868 = vmatpush3.bf16.msra.mxu1 %v1068_v59  ;;  %1799 = vmatpush3.bf16.msra.mxu0 %v1054_v38  ;;  %v1037_v39 = vpop.permute.xlu1 %1036 }
 0x132   : > { %v1040_v58 = vsel %vm259_vm2, %v2350_v30, %v1037_v39  ;;  %1861 = vmatprep.subr.bf16.mxu1 %v1186_v52  ;;  %v1169_v5 = vpop.permute.xlu0 %1168  ;;  %1246 = vmatprep.mubr.bf16.mxu1 %v2292_v54 }
 0x133   : > { %657 = vmatmul.mubr.bf16.gmra.mxu0 %v2395_v49  ;;  %v1172_v4 = vsel %vm259_vm2, %v2452_v33, %v1169_v5 }
 0x134   : > { %1800 = vmatprep.subr.bf16.mxu0 %v1172_v4  ;;  %666 = vmatprep.mubr.bf16.mxu0 %v2402_v53 }
 0x135   : > { %1869 = vmatpush3.bf16.msra.mxu1 %v1054_v38  ;;  %1801 = vmatpush3.bf16.msra.mxu0 %v1040_v58  ;;  %v999_v9 = vpop.permute.xlu1 %998 }
 0x136   : > { %1862 = vmatprep.subr.bf16.mxu1 %v1172_v4  ;;  %v1131_v19 = vpop.permute.xlu0 %1130  ;;  %1802 = vmatprep.subr.bf16.mxu0 %v1967_v6  ;;  %v1002_v28 = vsel %vm289_vm0, %v2372_v42, %v999_v9 }
 0x137   : > { %v1134_v30 = vsel %vm289_vm0, %v2460_v2, %v1131_v19 }
 0x138   : > { %1247 = vmatmul.mubr.bf16.gmra.mxu1 %v2314_v63 }
 0x139   : > { %1870 = vmatpush3.bf16.msra.mxu1 %v1040_v58  ;;  %1803 = vmatpush3.bf16.msra.mxu0 %v1968_v10  ;;  %v985_v27 = vpop.permute.xlu1 %984 }
 0x13a   : > { %1804 = vmatprep.subr.bf16.mxu0 %v1134_v30  ;;  %v1117_v26 = vpop.permute.xlu0 %1116  ;;  %1863 = vmatprep.subr.bf16.mxu1 %v1967_v6  ;;  %v988_v21 = vsel %vm274_vm1, %v2404_v55, %v985_v27  ;;  %v1970_v55 = vld [vmem:[%s2017_s18 + $0x88] ss:$16 sps:$4 sm:$0xff]   ;;  %s1876_s18 = smul.u32 48, %s2720_s14 }
 0x13b   : > { %667 = vmatmul.mubr.bf16.gmra.mxu0 %v2416_v60  ;;  %1256 = vmatprep.mubr.bf16.mxu1 %v2320_v1  ;;  %v1120_v20 = vsel %vm274_vm1, %v2467_v13, %v1117_v26 }
 0x13c   : > { %676 = vmatprep.mubr.bf16.mxu0 %v2422_v62  ;;  %s2556_s15 = scalar_lea.vmem %s2718_s3, %s1876_s18 }
 0x13d   : > { %1871 = vmatpush3.bf16.msra.mxu1 %v1968_v10  ;;  %1805 = vmatpush3.bf16.msra.mxu0 %v1002_v28  ;;  %v971_v29 = vpop.permute.xlu1 %970 }
 0x13e   : > { %1864 = vmatprep.subr.bf16.mxu1 %v1134_v30  ;;  %1806 = vmatprep.subr.bf16.mxu0 %v1120_v20  ;;  %v1103_v18 = vpop.permute.xlu0 %1102  ;;  %v974_v33 = vsel %vm259_vm2, %v2424_v0, %v971_v29 }
 0x13f   : > { %v1106_v42 = vsel %vm259_vm2, %v2476_v57, %v1103_v18 }
 0x140   : > { %1257 = vmatmul.mubr.bf16.gmra.mxu1 %v2338_v16 }
 0x141   : > { %1872 = vmatpush3.bf16.msra.mxu1 %v1002_v28  ;;  %1807 = vmatpush3.bf16.msra.mxu0 %v988_v21 }
 0x142   : > { %1865 = vmatprep.subr.bf16.mxu1 %v1120_v20  ;;  %1808 = vmatprep.subr.bf16.mxu0 %v1106_v42 }
 0x143   : > { %677 = vmatmul.mubr.bf16.gmra.mxu0 %v2434_v8  ;;  %1266 = vmatprep.mubr.bf16.mxu1 %v2344_v24 }
 0x144   : > { %1349 = vmatprep.mubr.bf16.mxu0 %v2085_v12 }
 0x145   : > { %1873 = vmatpush3.bf16.msra.mxu1 %v988_v21  ;;  %1809 = vmatpush3.bf16.msra.mxu0 %v974_v33 }
 0x146   : > { %1866 = vmatprep.subr.bf16.mxu1 %v1106_v42  ;;  %1810 = vmatprep.subr.bf16.mxu0 %v1969_v31 }
 0x148   : > { %1267 = vmatmul.mubr.bf16.gmra.mxu1 %v2356_v32 }
 0x149   : > { %1874 = vmatpush3.bf16.msra.mxu1 %v974_v33  ;;  %1811 = vmatpush3.bf16.msra.mxu0 %v1970_v55 }
 0x14a   : > { %1276 = vmatprep.mubr.bf16.mxu1 %v2363_v50  ;;  %1867 = vmatprep.subr.bf16.mxu1 %v1969_v31 }
 0x14b   : > { %v2549_v52 = vpop.permute.xlu1 %827 }
 0x14c   : > { %1350 = vmatmul.mubr.bf16.vlgmr.msra.gmra.mxu0 %v2284_v51  ;;  %v2547_v59 = vpop.permute.xlu0 %822 }
 0x14d   : > { %1357 = vmatprep.mubr.bf16.mxu0 %v2292_v54  ;;  %1875 = vmatpush3.bf16.msra.mxu1 %v1970_v55 }
 0x14f   : > { %v2559_v33 = vpop.permute.xlu1 %832 }
 0x150   : > { %1277 = vmatmul.mubr.bf16.gmra.mxu1 %v2378_v43 }
 0x151   : > { %1286 = vmatprep.mubr.bf16.mxu1 %v2385_v15 }
 0x154   : > { %1358 = vmatmul.mubr.bf16.gmra.mxu0 %v2314_v63 }
 0x155   : > { %1365 = vmatprep.mubr.bf16.mxu0 %v2320_v1 }
 0x158   : > { %1287 = vmatmul.mubr.bf16.gmra.mxu1 %v2395_v49 }
 0x159   : > { %1296 = vmatprep.mubr.bf16.mxu1 %v2402_v53 }
 0x15c   : > { %1366 = vmatmul.mubr.bf16.gmra.mxu0 %v2338_v16 }
 0x15d   : > { %1373 = vmatprep.mubr.bf16.mxu0 %v2344_v24 }
 0x160   : > { %1297 = vmatmul.mubr.bf16.gmra.mxu1 %v2416_v60 }
 0x161   : > { %1306 = vmatprep.mubr.bf16.mxu1 %v2422_v62 }
 0x164   : > { %1374 = vmatmul.mubr.bf16.gmra.mxu0 %v2356_v32 }
 0x165   : > { %1381 = vmatprep.mubr.bf16.mxu0 %v2363_v50 }
 0x168   : > { %1307 = vmatmul.mubr.bf16.gmra.mxu1 %v2434_v8 }
 0x169   : > { %1397 = vmatprep.mubr.bf16.mxu1 %v2402_v53 }
 0x16c   : > { %1382 = vmatmul.mubr.bf16.gmra.mxu0 %v2378_v43 }
 0x16d   : > { %1389 = vmatprep.mubr.bf16.mxu0 %v2385_v15 }
 0x170   : > { %1398 = vmatmul.mubr.bf16.vlgmr.msra.gmra.mxu1 %v2416_v60 }
 0x171   : > { %1405 = vmatprep.mubr.bf16.mxu1 %v2422_v62 }
 0x174   : > { %1390 = vmatmul.mubr.bf16.gmra.mxu0 %v2395_v49 }
 0x178   : > { %1406 = vmatmul.mubr.bf16.gmra.mxu1 %v2434_v8 }
 0x18e   : > { %v1748_v12 = vpop.f32.mrf.mxu1 }
 0x190   : > { %v1749_v51 = vpop.f32.mrf.mxu1 }
 0x191   : > { %v1750_v13 = vadd.f32 %v1749_v51, %v1748_v12 }
 0x192   : > { %v1751_v54 = vpop.f32.mrf.mxu1 }
 0x194   : > { %v1752_v63 = vpop.f32.mrf.mxu1 }
 0x195   : > { %v1753_v48 = vadd.f32 %v1752_v63, %v1751_v54 }
 0x196   : > { %v1754_v1 = vpop.f32.mrf.mxu1 }
 0x198   : > { %v1755_v16 = vpop.f32.mrf.mxu1 }
 0x199   : > { %v1756_v3 = vadd.f32 %v1755_v16, %v1754_v1 }
 0x19a   : > { %v1757_v24 = vpop.f32.mrf.mxu1 }
 0x19c   : > { %v1758_v32 = vpop.f32.mrf.mxu1 }
 0x19d   : > { %v1759_v30 = vadd.f32 %v1758_v32, %v1757_v24 }
 0x19e   : > { %v1760_v50 = vpop.f32.mrf.mxu1 }
 0x1a0   : > { %v1761_v43 = vpop.f32.mrf.mxu1 }
 0x1a1   : > { %v1762_v45 = vadd.f32 %v1761_v43, %v1760_v50  ;;  %v2563_v50 = vpop.permute.xlu0 %837 }
 0x1a2   : > { %v1763_v53 = vpop.f32.mrf.mxu1 }
 0x1a3   : > { %v786_v41 = vmax.f32 %v1750_v13, %v1762_v45 }
 0x1a4   : > { %v1764_v15 = vpop.f32.mrf.mxu1 }
 0x1a5   : > { %v1765_v7 = vadd.f32 %v1764_v15, %v1763_v53 }
 0x1a6   : > { %v1766_v0 = vpop.f32.mrf.mxu1 }
 0x1a7   : > { %v789_v39 = vmax.f32 %v1753_v48, %v1765_v7 }
 0x1a8   : > { %v1767_v60 = vpop.f32.mrf.mxu1 }
 0x1a9   : > { %v1768_v38 = vadd.f32 %v1767_v60, %v1766_v0 }
 0x1aa   : > { %v1769_v22 = vpop.f32.mrf.mxu1 }
 0x1ab   : > { %v792_v26 = vmax.f32 %v1756_v3, %v1768_v38 }
 0x1ac   : > { %v1770_v62 = vpop.f32.mrf.mxu1 }
 0x1ad   : > { %v1771_v27 = vadd.f32 %v1770_v62, %v1769_v22 }
 0x1ae   : > { %v1772_v34 = vpop.f32.mrf.mxu1 }
 0x1af   : > { %v795_v63 = vmax.f32 %v1759_v30, %v1771_v27 }
 0x1b0   : > { %v1773_v49 = vpop.f32.mrf.mxu1 }
 0x1b1   : > { %v1774_v46 = vadd.f32 %v1773_v49, %v1772_v34 }
 0x1b2   : > { %v1775_v35 = vpop.f32.mrf.mxu1 }
 0x1b4   : > { %v1776_v8 = vpop.f32.mrf.mxu1 }
 0x1b5   : > { %v1777_v57 = vadd.f32 %v1776_v8, %v1775_v35 }
 0x1b6   : > { %v1778_v36 = vpop.f32.mrf.mxu1 }
 0x1b8   : > { %v1779_v40 = vpop.f32.mrf.mxu1 }
 0x1b9   : > { %v1780_v58 = vadd.f32 %v1779_v40, %v1778_v36 }
 0x1ba   : > { %v1781_v14 = vpop.f32.mrf.mxu1 }
 0x1bc   : > { %v1782_v2 = vpop.f32.mrf.mxu1 }
 0x1bd   : > { %v1783_v20 = vadd.f32 %v1782_v2, %v1781_v14 }
 0x1be   : > { %v1784_v44 = vpop.f32.mrf.mxu1 }
 0x1c0   : > { %v1785_v37 = vpop.f32.mrf.mxu1 }
 0x1c1   : > { %v1786_v47 = vadd.f32 %v1785_v37, %v1784_v44 }
 0x1c2   : > { %v1787_v17 = vpop.f32.mrf.mxu1 }
 0x1c3   : > { %v798_v23 = vmax.f32 %v1774_v46, %v1786_v47 }
 0x1c4   : > { %v1788_v25 = vpop.f32.mrf.mxu1 }
 0x1c5   : > { %v810_v11 = vmax.f32 %v786_v41, %v798_v23  ;;  %v1789_v61 = vadd.f32 %v1788_v25, %v1787_v17 }
 0x1c6   : > { %v1790_v56 = vpop.f32.mrf.mxu1 }
 0x1c7   : > { %v801_v5 = vmax.f32 %v1777_v57, %v1789_v61  ;;  %v842_v6 = vadd.f32 %v2547_v59, %v810_v11 }
 0x1c8   : > { %v1791_v4 = vpop.f32.mrf.mxu1 }
 0x1c9   : > { %v813_v9 = vmax.f32 %v789_v39, %v801_v5  ;;  %v1792_v10 = vadd.f32 %v1791_v4, %v1790_v56  ;;  %v854_v19 = vmax.f32 %v842_v6, 0.0 }
 0x1ca   : > { %v1793_v28 = vpop.f32.mrf.mxu1 }
 0x1cb   : > { %v608_v18 = vpop.f32.mrf.mxu0  ;;  %v804_v21 = vmax.f32 %v1780_v58, %v1792_v10  ;;  %v845_v29 = vadd.f32 %v2549_v52, %v813_v9  ;;  %v1717_v42 = vpack.c.bf16 %v854_v19, %v854_v19 }
 0x1cc   : > { %v1794_v31 = vpop.f32.mrf.mxu1 }
 0x1cd   : > { %v610_v55 = vpop.f32.mrf.mxu0  ;;  %v816_v12 = vmax.f32 %v792_v26, %v804_v21  ;;  %v857_v51 = vmax.f32 %v845_v29, 0.0  ;;  %v1795_v54 = vadd.f32 %v1794_v31, %v1793_v28  ;;  %905 = vst [vmem:[%s2556_s15 + $0x8] sm:$0xf] %v1717_v42 }
 0x1cf   : > { %v612_v1 = vpop.f32.mrf.mxu0  ;;  %v1719_v16 = vpack.c.bf16 %v857_v51, %v857_v51  ;;  %v807_v24 = vmax.f32 %v1783_v20, %v1795_v54  ;;  %v848_v32 = vadd.f32 %v2559_v33, %v816_v12 }
 0x1d1   : > { %v2565_v43 = vpop.f32.mrf.mxu0  ;;  %v819_v53 = vmax.f32 %v795_v63, %v807_v24  ;;  %v860_v15 = vmax.f32 %v848_v32, 0.0  ;;  %907 = vst [vmem:[%s2556_s15 + $0x14] sm:$0xf] %v1719_v16 }
 0x1d3   : > { %v2568_v0 = vpop.f32.mrf.mxu0  ;;  %v1721_v60 = vpack.c.bf16 %v860_v15, %v860_v15  ;;  %v851_v22 = vadd.f32 %v2563_v50, %v819_v53 }
 0x1d5   : > { %v2571_v62 = vpop.f32.mrf.mxu0  ;;  %909 = vst [vmem:[%s2556_s15 + $0x20] sm:$0xf] %v1721_v60  ;;  %v863_v34 = vmax.f32 %v851_v22, 0.0 }
 0x1d7   : > { %v2574_v49 = vpop.f32.mrf.mxu0  ;;  %v1723_v35 = vpack.c.bf16 %v863_v34, %v863_v34 }
 0x1d9   : > { %v2576_v8 = vpop.f32.mrf.mxu0  ;;  %911 = vst [vmem:[%s2556_s15 + $0x2c] sm:$0xf] %v1723_v35 }
 0x1db   : > { %v628_v36 = vpop.f32.mrf.mxu0 }
 0x1dc   : > { %v784_v58 = vmax.f32 %v608_v18, %v628_v36 }
 0x1dd   : > { %v630_v40 = vpop.f32.mrf.mxu0 }
 0x1de   : > { %v785_v9 = vmax.f32 %v610_v55, %v630_v40 }
 0x1df   : > { %v632_v14 = vpop.f32.mrf.mxu0 }
 0x1e0   : > { %v787_v27 = vmax.f32 %v612_v1, %v632_v14 }
 0x1e1   : > { %v634_v2 = vpop.f32.mrf.mxu0 }
 0x1e2   : > { %v788_v18 = vmax.f32 %v2565_v43, %v634_v2 }
 0x1e3   : > { %v638_v44 = vpop.f32.mrf.mxu0 }
 0x1e4   : > { %v790_v54 = vmax.f32 %v2568_v0, %v638_v44 }
 0x1e5   : > { %v640_v13 = vpop.f32.mrf.mxu0 }
 0x1e6   : > { %v791_v36 = vmax.f32 %v2571_v62, %v640_v13 }
 0x1e7   : > { %v2579_v45 = vpop.f32.mrf.mxu0 }
 0x1e8   : > { %v793_v14 = vmax.f32 %v2574_v49, %v2579_v45 }
 0x1e9   : > { %v2581_v46 = vpop.f32.mrf.mxu0 }
 0x1eb   : > { %v648_v37 = vpop.f32.mrf.mxu0 }
 0x1ed   : > { %v650_v47 = vpop.f32.mrf.mxu0 }
 0x1ef   : > { %v652_v48 = vpop.f32.mrf.mxu0 }
 0x1f0   : > { %v2583_v17 = vpop.f32.mrf.mxu1 }
 0x1f1   : > { %v654_v41 = vpop.f32.mrf.mxu0 }
 0x1f2   : > { %v2585_v7 = vpop.f32.mrf.mxu1 }
 0x1f3   : > { %v658_v57 = vpop.f32.mrf.mxu0 }
 0x1f4   : > { %v2587_v23 = vpop.f32.mrf.mxu1 }
 0x1f5   : > { %v660_v25 = vpop.f32.mrf.mxu0 }
 0x1f6   : > { %v2589_v11 = vpop.f32.mrf.mxu1 }
 0x1f7   : > { %v662_v61 = vpop.f32.mrf.mxu0 }
 0x1f8   : > { %v2591_v3 = vpop.f32.mrf.mxu1 }
 0x1f9   : > { %v664_v38 = vpop.f32.mrf.mxu0 }
 0x1fa   : > { %v2593_v56 = vpop.f32.mrf.mxu1 }
 0x1fb   : > { %v668_v39 = vpop.f32.mrf.mxu0 }
 0x1fc   : > { %v796_v5 = vmax.f32 %v648_v37, %v668_v39  ;;  %v2595_v6 = vpop.f32.mrf.mxu1  ;;  %v794_v39 = vmax.f32 %v2576_v8, %v2581_v46 }
 0x1fd   : > { %v670_v4 = vpop.f32.mrf.mxu0 }
 0x1fe   : > { %v808_v10 = vmax.f32 %v784_v58, %v796_v5  ;;  %v797_v19 = vmax.f32 %v650_v47, %v670_v4  ;;  %v2597_v30 = vpop.f32.mrf.mxu1 }
 0x1ff   : > { %v672_v26 = vpop.f32.mrf.mxu0 }
 0x200   : > { %v840_v28 = vadd.f32 %v2547_v59, %v808_v10  ;;  %v809_v20 = vmax.f32 %v785_v9, %v797_v19  ;;  %v799_v21 = vmax.f32 %v652_v48, %v672_v26  ;;  %v2600_v29 = vpop.f32.mrf.mxu1 }
 0x201   : > { %v674_v42 = vpop.f32.mrf.mxu0 }
 0x202   : > { %v841_v31 = vadd.f32 %v2547_v59, %v809_v20  ;;  %v811_v12 = vmax.f32 %v787_v27, %v799_v21  ;;  %v800_v51 = vmax.f32 %v654_v41, %v674_v42  ;;  %v2604_v55 = vpop.f32.mrf.mxu1  ;;  %v852_v63 = vmax.f32 %v840_v28, 0.0 }
 0x203   : > { %v678_v1 = vpop.f32.mrf.mxu0 }
 0x204   : > { %v853_v16 = vmax.f32 %v841_v31, 0.0  ;;  %v843_v24 = vadd.f32 %v2549_v52, %v811_v12  ;;  %v812_v32 = vmax.f32 %v788_v18, %v800_v51  ;;  %v802_v53 = vmax.f32 %v658_v57, %v678_v1  ;;  %v2608_v15 = vpop.f32.mrf.mxu1 }
 0x205   : > { %v680_v60 = vpop.f32.mrf.mxu0 }
 0x206   : > { %v1716_v43 = vpack.c.bf16 %v853_v16, %v852_v63  ;;  %v844_v22 = vadd.f32 %v2549_v52, %v812_v32  ;;  %v814_v34 = vmax.f32 %v790_v54, %v802_v53  ;;  %v2611_v35 = vpop.f32.mrf.mxu1  ;;  %v803_v0 = vmax.f32 %v660_v25, %v680_v60 }
 0x207   : > { %v682_v40 = vpop.f32.mrf.mxu0  ;;  %v855_v2 = vmax.f32 %v843_v24, 0.0 }
 0x208   : > { %904 = vst [vmem:[%s2556_s15] sm:$0xff] %v1716_v43  ;;  %v856_v44 = vmax.f32 %v844_v22, 0.0  ;;  %v805_v37 = vmax.f32 %v662_v61, %v682_v40  ;;  %v2617_v47 = vpop.f32.mrf.mxu1  ;;  %v846_v48 = vadd.f32 %v2559_v33, %v814_v34  ;;  %v815_v41 = vmax.f32 %v791_v36, %v803_v0 }
 0x209   : > { %v684_v57 = vpop.f32.mrf.mxu0  ;;  %v1414_v36 = vmax.f32 %v2583_v17, %v2600_v29 }
 0x20a   : > { %v1718_v62 = vpack.c.bf16 %v856_v44, %v855_v2  ;;  %v817_v13 = vmax.f32 %v793_v14, %v805_v37  ;;  %v806_v25 = vmax.f32 %v664_v38, %v684_v57  ;;  %v2622_v58 = vpop.f32.mrf.mxu1  ;;  %v847_v49 = vadd.f32 %v2559_v33, %v815_v41 }
 0x20b   : > { %v858_v9 = vmax.f32 %v846_v48, 0.0  ;;  %v1415_v2 = vmax.f32 %v2585_v7, %v2604_v55  ;;  %v1417_v57 = vmax.f32 %v2587_v23, %v2608_v15 }
 0x20c   : > { %906 = vst [vmem:[%s2556_s15 + $0xc] sm:$0xff] %v1718_v62  ;;  %v849_v45 = vadd.f32 %v2563_v50, %v817_v13  ;;  %v818_v61 = vmax.f32 %v794_v39, %v806_v25  ;;  %v2627_v5 = vpop.f32.mrf.mxu1  ;;  %v2629_v4 = vpop.f32.mrf.mxu0  ;;  %v859_v10 = vmax.f32 %v847_v49, 0.0  ;;  %v1418_v25 = vmax.f32 %v2589_v11, %v2611_v35 }
 0x20e   : > { %v850_v8 = vadd.f32 %v2563_v50, %v818_v61  ;;  %v2632_v46 = vpop.f32.mrf.mxu1  ;;  %v2634_v38 = vpop.f32.mrf.mxu0  ;;  %v1720_v19 = vpack.c.bf16 %v859_v10, %v858_v9  ;;  %v861_v26 = vmax.f32 %v849_v45, 0.0  ;;  %v1420_v45 = vmax.f32 %v2591_v3, %v2617_v47 }
 0x20f   : > { %v1421_v3 = vmax.f32 %v2593_v56, %v2622_v58 }
 0x210   : > { %v862_v27 = vmax.f32 %v850_v8, 0.0  ;;  %v1278_v28 = vpop.f32.mrf.mxu1  ;;  %v2636_v20 = vpop.f32.mrf.mxu0  ;;  %908 = vst [vmem:[%s2556_s15 + $0x18] sm:$0xff] %v1720_v19 }
 0x212   : > { %v1722_v21 = vpack.c.bf16 %v862_v27, %v861_v26  ;;  %v1280_v42 = vpop.f32.mrf.mxu1  ;;  %v2639_v18 = vpop.f32.mrf.mxu0 }
 0x214   : > { %910 = vst [vmem:[%s2556_s15 + $0x24] sm:$0xff] %v1722_v21  ;;  %v1282_v31 = vpop.f32.mrf.mxu1  ;;  %v2642_v12 = vpop.f32.mrf.mxu0 }
 0x216   : > { %v1284_v51 = vpop.f32.mrf.mxu1  ;;  %v2644_v54 = vpop.f32.mrf.mxu0 }
 0x218   : > { %v1288_v63 = vpop.f32.mrf.mxu1  ;;  %v2646_v1 = vpop.f32.mrf.mxu0 }
 0x21a   : > { %v1290_v16 = vpop.f32.mrf.mxu1  ;;  %v2648_v24 = vpop.f32.mrf.mxu0 }
 0x21c   : > { %v1292_v32 = vpop.f32.mrf.mxu1  ;;  %v1824_v53 = vpop.f32.mrf.mxu0 }
 0x21e   : > { %v1294_v60 = vpop.f32.mrf.mxu1  ;;  %v1825_v43 = vpop.f32.mrf.mxu0 }
 0x220   : > { %v1298_v22 = vpop.f32.mrf.mxu1  ;;  %v2650_v34 = vpop.f32.mrf.mxu0 }
 0x221   : > { %v1426_v0 = vmax.f32 %v1278_v28, %v1298_v22 }
 0x222   : > { %v1300_v40 = vpop.f32.mrf.mxu1  ;;  %v2654_v14 = vpop.f32.mrf.mxu0 }
 0x223   : > { %v1438_v44 = vmax.f32 %v1414_v36, %v1426_v0  ;;  %v1427_v37 = vmax.f32 %v1280_v42, %v1300_v40 }
 0x224   : > { %v1302_v48 = vpop.f32.mrf.mxu1  ;;  %v2658_v41 = vpop.f32.mrf.mxu0 }
 0x225   : > { %v1450_v39 = vadd.f32 %v1438_v44, %v2547_v59  ;;  %v1439_v62 = vmax.f32 %v1415_v2, %v1427_v37  ;;  %v1429_v13 = vmax.f32 %v1282_v31, %v1302_v48  ;;  %v1423_v31 = vmax.f32 %v2595_v6, %v2627_v5 }
 0x226   : > { %v1304_v17 = vpop.f32.mrf.mxu1  ;;  %v2663_v29 = vpop.f32.mrf.mxu0  ;;  %v1424_v44 = vmax.f32 %v2597_v30, %v2632_v46  ;;  %v1826_v37 = vadd.f32 %v1825_v43, %v1824_v53 }
 0x227   : > { %v1451_v7 = vadd.f32 %v1439_v62, %v2547_v59  ;;  %v1441_v55 = vmax.f32 %v1417_v57, %v1429_v13  ;;  %v1430_v49 = vmax.f32 %v1284_v51, %v1304_v17  ;;  %v1462_v61 = vmax.f32 %v1450_v39, 0.0 }
 0x228   : > { %v1308_v9 = vpop.f32.mrf.mxu1  ;;  %v2670_v23 = vpop.f32.mrf.mxu0  ;;  %v1814_v39 = vadd.f32 %v2634_v38, %v2629_v4  ;;  %v1817_v38 = vadd.f32 %v2639_v18, %v2636_v20  ;;  %v1820_v20 = vadd.f32 %v2644_v54, %v2642_v12 }
 0x229   : > { %v1463_v15 = vmax.f32 %v1451_v7, 0.0  ;;  %v1453_v10 = vadd.f32 %v1441_v55, %v2549_v52  ;;  %v1442_v8 = vmax.f32 %v1418_v25, %v1430_v49  ;;  %v1432_v19 = vmax.f32 %v1288_v63, %v1308_v9 }
 0x22a   : > { %v1310_v26 = vpop.f32.mrf.mxu1  ;;  %v2673_v27 = vpop.f32.mrf.mxu0  ;;  %v1416_v43 = vmax.f32 %v1814_v39, %v1826_v37  ;;  %v1829_v49 = vadd.f32 %v2654_v14, %v2650_v34 }
 0x22b   : > { %v1724_v11 = vpack.c.bf16 %v1463_v15, %v1462_v61  ;;  %v1454_v35 = vadd.f32 %v1442_v8, %v2549_v52  ;;  %v1444_v28 = vmax.f32 %v1420_v45, %v1432_v19  ;;  %v1433_v47 = vmax.f32 %v1290_v16, %v1310_v26 }
 0x22c   : > { %v1312_v21 = vpop.f32.mrf.mxu1  ;;  %v1836_v42 = vpop.f32.mrf.mxu0  ;;  %v1465_v51 = vmax.f32 %v1453_v10, 0.0  ;;  %v1419_v34 = vmax.f32 %v1817_v38, %v1829_v49 }
 0x22d   : > { %1705 = vst [vmem:[%s2556_s15 + $0x30] sm:$0xff] %v1724_v11  ;;  %v1466_v63 = vmax.f32 %v1454_v35, 0.0  ;;  %v1435_v22 = vmax.f32 %v1292_v32, %v1312_v21  ;;  %v1456_v36 = vadd.f32 %v1444_v28, %v2559_v33  ;;  %v1445_v0 = vmax.f32 %v1421_v3, %v1433_v47 }
 0x22e   : > { %v1314_v40 = vpop.f32.mrf.mxu1  ;;  %v1837_v2 = vpop.f32.mrf.mxu0  ;;  %v1832_v11 = vadd.f32 %v2663_v29, %v2658_v41  ;;  %v1835_v41 = vadd.f32 %v2673_v27, %v2670_v23 }
 0x22f   : > { %v1726_v56 = vpack.c.bf16 %v1466_v63, %v1465_v51  ;;  %v1447_v58 = vmax.f32 %v1423_v31, %v1435_v22  ;;  %v1436_v16 = vmax.f32 %v1294_v60, %v1314_v40  ;;  %v1457_v48 = vadd.f32 %v1445_v0, %v2559_v33 }
 0x230   : > { %v1848_v6 = vpop.f32.mrf.mxu1  ;;  %v1839_v5 = vpop.f32.mrf.mxu0  ;;  %v1468_v62 = vmax.f32 %v1456_v36, 0.0  ;;  %v1838_v60 = vadd.f32 %v1837_v2, %v1836_v42  ;;  %v1422_v51 = vmax.f32 %v1820_v20, %v1832_v11  ;;  %v1823_v0 = vadd.f32 %v2648_v24, %v2646_v1 }
 0x231   : > { %1707 = vst [vmem:[%s2556_s15 + $0x3c] sm:$0xff] %v1726_v56  ;;  %v1459_v57 = vadd.f32 %v1447_v58, %v2563_v50  ;;  %v1448_v32 = vmax.f32 %v1424_v44, %v1436_v16  ;;  %v1469_v13 = vmax.f32 %v1457_v48, 0.0 }
 0x232   : > { %v1849_v17 = vpop.f32.mrf.mxu1  ;;  %v1840_v30 = vpop.f32.mrf.mxu0  ;;  %v1425_v56 = vmax.f32 %v1823_v0, %v1835_v41 }
 0x233   : > { %v1460_v46 = vadd.f32 %v1448_v32, %v2563_v50  ;;  %v1850_v53 = vadd.f32 %v1849_v17, %v1848_v6  ;;  %v1728_v25 = vpack.c.bf16 %v1469_v13, %v1468_v62  ;;  %v1471_v45 = vmax.f32 %v1459_v57, 0.0 }
 0x234   : > { %v1851_v7 = vpop.f32.mrf.mxu1  ;;  %v1842_v55 = vpop.f32.mrf.mxu0  ;;  %v1841_v19 = vadd.f32 %v1840_v30, %v1839_v5 }
 0x235   : > { %v1472_v61 = vmax.f32 %v1460_v46, 0.0  ;;  %v1428_v4 = vmax.f32 %v1838_v60, %v1850_v53  ;;  %1709 = vst [vmem:[%s2556_s15 + $0x48] sm:$0xff] %v1728_v25 }
 0x236   : > { %v1852_v9 = vpop.f32.mrf.mxu1  ;;  %v1843_v15 = vpop.f32.mrf.mxu0 }
 0x237   : > { %v1730_v10 = vpack.c.bf16 %v1472_v61, %v1471_v45  ;;  %v1440_v8 = vmax.f32 %v1416_v43, %v1428_v4  ;;  %v1853_v26 = vadd.f32 %v1852_v9, %v1851_v7  ;;  %v1844_v42 = vadd.f32 %v1843_v15, %v1842_v55 }
 0x238   : > { %v1854_v35 = vpop.f32.mrf.mxu1  ;;  %v1845_v28 = vpop.f32.mrf.mxu0 }
 0x239   : > { %1711 = vst [vmem:[%s2556_s15 + $0x54] sm:$0xff] %v1730_v10  ;;  %v1452_v14 = vadd.f32 %v1440_v8, %v2547_v59  ;;  %v1431_v3 = vmax.f32 %v1841_v19, %v1853_v26 }
 0x23a   : > { %v1855_v18 = vpop.f32.mrf.mxu1  ;;  %v1846_v22 = vpop.f32.mrf.mxu0 }
 0x23b   : > { %v1464_v47 = vmax.f32 %v1452_v14, 0.0  ;;  %v1443_v21 = vmax.f32 %v1419_v34, %v1431_v3  ;;  %v1856_v31 = vadd.f32 %v1855_v18, %v1854_v35  ;;  %v1847_v2 = vadd.f32 %v1846_v22, %v1845_v28 }
 0x23c   : > { %v1857_v63 = vpop.f32.mrf.mxu1 }
 0x23d   : > { %v1725_v29 = vpack.c.bf16 %v1464_v47, %v1464_v47  ;;  %v1455_v59 = vadd.f32 %v1443_v21, %v2549_v52  ;;  %v1434_v36 = vmax.f32 %v1844_v42, %v1856_v31 }
 0x23e   : > { %v1858_v12 = vpop.f32.mrf.mxu1 }
 0x23f   : > { %1706 = vst [vmem:[%s2556_s15 + $0x38] sm:$0xf] %v1725_v29  ;;  %v1467_v54 = vmax.f32 %v1455_v59, 0.0  ;;  %v1446_v40 = vmax.f32 %v1422_v51, %v1434_v36  ;;  %v1859_v44 = vadd.f32 %v1858_v12, %v1857_v63 }
 0x241   : > { %v1727_v58 = vpack.c.bf16 %v1467_v54, %v1467_v54  ;;  %v1458_v16 = vadd.f32 %v1446_v40, %v2559_v33  ;;  %v1437_v23 = vmax.f32 %v1847_v2, %v1859_v44 }
 0x243   : > { %1708 = vst [vmem:[%s2556_s15 + $0x44] sm:$0xf] %v1727_v58  ;;  %v1470_v27 = vmax.f32 %v1458_v16, 0.0  ;;  %v1449_v52 = vmax.f32 %v1425_v56, %v1437_v23 }
 0x245   : > { %v1729_v37 = vpack.c.bf16 %v1470_v27, %v1470_v27  ;;  %v1461_v48 = vadd.f32 %v1449_v52, %v2563_v50 }
 0x247   : > { %1710 = vst [vmem:[%s2556_s15 + $0x50] sm:$0xf] %v1729_v37  ;;  %v1473_v1 = vmax.f32 %v1461_v48, 0.0 }
 0x249   : > { %v1731_v24 = vpack.c.bf16 %v1473_v1, %v1473_v1 }
 0x24b   : > { %1712 = vst [vmem:[%s2556_s15 + $0x5c] sm:$0xf] %v1731_v24 }
 0x24c PF: > { %s13_s12 = sadd.s32 1, %s1977_s12  }
 0x24d   : > { %p10_p4 = scmp.ge.s32.totalorder %s13_s12, 4  }
 0x24f   :  { %12 = sbr.rel (!%p10_p4) target bundleno = 1 (0x1), region = 70 }

// kernel: galaxy_zoo_regressor.5
= control target key start
LH: loop header
LB: loop body
LE: loop exit
PB: predicated region body
PF: predicated region fallthrough
CT: control target
= control target key end

     0   :  { %vm7648_vm0 = vmmov 0   ;;  %vm5701_vm1 = vcmask 523264   ;;  %s9359_s1 = inlined_call_operand.vmem [shape: bf16[8192,64], index: 1, kind: input, shape index: {}]   ;;  %s9360_s0 = inlined_call_operand.vmem [shape: bf16[8,8192], index: 0, kind: input, shape index: {}]   ;;  %s9361_s2 = inlined_call_operand.vmem [shape: f32[1,64], index: 2, kind: input, shape index: {}]   ;;  %s9362_s3 = inlined_call_operand.vmem [shape: bf16[64,128], index: 3, kind: input, shape index: {}]   ;;  %s9363_s4 = inlined_call_operand.vmem [shape: f32[1,128], index: 4, kind: input, shape index: {}]   ;;  %s9364_s5 = inlined_call_operand.vmem [shape: f32[8,128], index: 5, kind: output, shape index: {}]  }
   0x1   :  { %v7063_v0 = vld [vmem:[%s9359_s1 + $0x78] sm:$0xff]   ;;  %v7067_v4 = vld [vmem:[%s9359_s1 + $0x70] sm:$0xff]   ;;  %v7071_v8 = vld [vmem:[%s9359_s1 + $0x68] sm:$0xff]  }
   0x2   :  { %v7064_v1 = vld [vmem:[%s9359_s1 + $0xf8] sm:$0xff]   ;;  %6340 = vmatprep.subr.bf16.mxu0 %v7063_v0  ;;  %v7068_v5 = vld [vmem:[%s9359_s1 + $0xf0] sm:$0xff]   ;;  %v7072_v9 = vld [vmem:[%s9359_s1 + $0xe8] sm:$0xff]  }
   0x3   :  { %v7065_v2 = vld [vmem:[%s9359_s1 + $0x38] sm:$0xff]   ;;  %6362 = vmatprep.subr.bf16.mxu1 %v7064_v1  ;;  %v7069_v6 = vld [vmem:[%s9359_s1 + $0x30] sm:$0xff]   ;;  %v7073_v10 = vld [vmem:[%s9359_s1 + $0x28] sm:$0xff]  }
   0x4   :  { %v7066_v3 = vld [vmem:[%s9359_s1 + $0xb8] sm:$0xff]   ;;  %6341 = vmatpush3.bf16.msra.mxu0 %v7065_v2  ;;  %v7070_v7 = vld [vmem:[%s9359_s1 + $0xb0] sm:$0xff]   ;;  %v7074_v11 = vld [vmem:[%s9359_s1 + $0xa8] sm:$0xff]  }
   0x5   :  { %6363 = vmatpush3.bf16.msra.mxu1 %v7066_v3  ;;  %6342 = vmatprep.subr.bf16.mxu0 %v7067_v4  ;;  %v7075_v12 = vld [vmem:[%s9359_s1 + $0x60] sm:$0xff]   ;;  %v7079_v16 = vld [vmem:[%s9359_s1 + $0x58] sm:$0xff]   ;;  %v7083_v20 = vld [vmem:[%s9359_s1 + $0x50] sm:$0xff]  }
   0x6   :  { %6364 = vmatprep.subr.bf16.mxu1 %v7068_v5  ;;  %v7076_v13 = vld [vmem:[%s9359_s1 + $0xe0] sm:$0xff]   ;;  %v7080_v17 = vld [vmem:[%s9359_s1 + $0xd8] sm:$0xff]   ;;  %v7084_v21 = vld [vmem:[%s9359_s1 + $0xd0] sm:$0xff]  }
   0x7   :  { %v7077_v14 = vld [vmem:[%s9359_s1 + $0x20] sm:$0xff]   ;;  %v7081_v18 = vld [vmem:[%s9359_s1 + $0x18] sm:$0xff]   ;;  %v7085_v22 = vld [vmem:[%s9359_s1 + $0x10] sm:$0xff]  }
   0x8   :  { %6343 = vmatpush3.bf16.msra.mxu0 %v7069_v6  ;;  %v7078_v15 = vld [vmem:[%s9359_s1 + $0xa0] sm:$0xff]   ;;  %v7082_v19 = vld [vmem:[%s9359_s1 + $0x98] sm:$0xff]   ;;  %v7086_v23 = vld [vmem:[%s9359_s1 + $0x90] sm:$0xff]  }
   0x9   :  { %6365 = vmatpush3.bf16.msra.mxu1 %v7070_v7  ;;  %6344 = vmatprep.subr.bf16.mxu0 %v7071_v8  ;;  %v7087_v24 = vld [vmem:[%s9359_s1 + $0x48] sm:$0xff]   ;;  %v7091_v28 = vld [vmem:[%s9359_s1 + $0x40] sm:$0xff]   ;;  %v7099_v38 = vld [vmem:[%s9359_s1 + $0x178] sm:$0xff]  }
   0xa   :  { %6366 = vmatprep.subr.bf16.mxu1 %v7072_v9  ;;  %v7088_v25 = vld [vmem:[%s9359_s1 + $0xc8] sm:$0xff]   ;;  %v7092_v29 = vld [vmem:[%s9359_s1 + $0xc0] sm:$0xff]   ;;  %v7100_v39 = vld [vmem:[%s9359_s1 + $0x1f8] sm:$0xff]  }
   0xb   :  { %v7089_v26 = vld [vmem:[%s9359_s1 + $0x8] sm:$0xff]   ;;  %v7093_v30 = vld [vmem:[%s9359_s1] sm:$0xff]   ;;  %v7101_v40 = vld [vmem:[%s9359_s1 + $0x138] sm:$0xff]  }
   0xc   :  { %6345 = vmatpush3.bf16.msra.mxu0 %v7073_v10  ;;  %v7090_v27 = vld [vmem:[%s9359_s1 + $0x88] sm:$0xff]   ;;  %v7094_v31 = vld [vmem:[%s9359_s1 + $0x80] sm:$0xff]   ;;  %v7102_v41 = vld [vmem:[%s9359_s1 + $0x1b8] sm:$0xff]  }
   0xd   :  { %6367 = vmatpush3.bf16.msra.mxu1 %v7074_v11  ;;  %6346 = vmatprep.subr.bf16.mxu0 %v7075_v12  ;;  %v21_v32 = vld [vmem:[%s9360_s0] sm:$0xff]  ;;  %v22_v33 = vld [vmem:[%s9360_s0 + $0x8] sm:$0xff]  ;;  %v7103_v42 = vld [vmem:[%s9359_s1 + $0x170] sm:$0xff]  }
   0xe   :  { %6368 = vmatprep.subr.bf16.mxu1 %v7076_v13  ;;  %v5757_v34 = vcombine.low %v21_v32, %v21_v32  ;;  %v5758_v35 = vcombine.high %v21_v32, %v21_v32  ;;  %v5759_v36 = vcombine.low %v22_v33, %v22_v33  ;;  %v5760_v37 = vcombine.high %v22_v33, %v22_v33  ;;  %v7104_v43 = vld [vmem:[%s9359_s1 + $0x1f0] sm:$0xff]   ;;  %v7107_v46 = vld [vmem:[%s9359_s1 + $0x168] sm:$0xff]   ;;  %v7111_v50 = vld [vmem:[%s9359_s1 + $0x160] sm:$0xff]  }
   0xf   :  { %v7105_v44 = vld [vmem:[%s9359_s1 + $0x130] sm:$0xff]   ;;  %v7108_v47 = vld [vmem:[%s9359_s1 + $0x1e8] sm:$0xff]   ;;  %v7112_v51 = vld [vmem:[%s9359_s1 + $0x1e0] sm:$0xff]  }
  0x10   :  { %6347 = vmatpush3.bf16.msra.mxu0 %v7077_v14  ;;  %4412 = vmatprep.mubr.bf16.mxu0 %v5758_v35  ;;  %v7106_v45 = vld [vmem:[%s9359_s1 + $0x1b0] sm:$0xff]   ;;  %v7109_v48 = vld [vmem:[%s9359_s1 + $0x128] sm:$0xff]   ;;  %v7113_v52 = vld [vmem:[%s9359_s1 + $0x120] sm:$0xff]  }
  0x11   :  { %6369 = vmatpush3.bf16.msra.mxu1 %v7078_v15  ;;  %6348 = vmatprep.subr.bf16.mxu0 %v7079_v16  ;;  %v7110_v49 = vld [vmem:[%s9359_s1 + $0x1a8] sm:$0xff]   ;;  %v7114_v53 = vld [vmem:[%s9359_s1 + $0x1a0] sm:$0xff]   ;;  %v7115_v54 = vld [vmem:[%s9359_s1 + $0x158] sm:$0xff]  }
  0x12   :  { %6370 = vmatprep.subr.bf16.mxu1 %v7080_v17  ;;  %4452 = vmatprep.mubr.bf16.mxu1 %v5760_v37  ;;  %v7116_v55 = vld [vmem:[%s9359_s1 + $0x1d8] sm:$0xff]   ;;  %v7119_v58 = vld [vmem:[%s9359_s1 + $0x150] sm:$0xff]   ;;  %v7123_v62 = vld [vmem:[%s9359_s1 + $0x148] sm:$0xff]  }
  0x13   :  { %v7117_v56 = vld [vmem:[%s9359_s1 + $0x118] sm:$0xff]   ;;  %v7120_v59 = vld [vmem:[%s9359_s1 + $0x1d0] sm:$0xff]   ;;  %v7124_v63 = vld [vmem:[%s9359_s1 + $0x1c8] sm:$0xff]  }
  0x14   :  { %6349 = vmatpush3.bf16.msra.mxu0 %v7081_v18  ;;  %v7118_v57 = vld [vmem:[%s9359_s1 + $0x198] sm:$0xff]   ;;  %v7121_v60 = vld [vmem:[%s9359_s1 + $0x110] sm:$0xff]   ;;  %v7125_v0 = vld [vmem:[%s9359_s1 + $0x108] sm:$0xff]  }
  0x15   :  { %6371 = vmatpush3.bf16.msra.mxu1 %v7082_v19  ;;  %6350 = vmatprep.subr.bf16.mxu0 %v7083_v20  ;;  %v7122_v61 = vld [vmem:[%s9359_s1 + $0x190] sm:$0xff]   ;;  %v7126_v1 = vld [vmem:[%s9359_s1 + $0x188] sm:$0xff]   ;;  %v7127_v2 = vld [vmem:[%s9359_s1 + $0x140] sm:$0xff]  }
  0x16   :  { %6372 = vmatprep.subr.bf16.mxu1 %v7084_v21  ;;  %v7128_v3 = vld [vmem:[%s9359_s1 + $0x1c0] sm:$0xff]   ;;  %v23_v6 = vld [vmem:[%s9360_s0 + $0x10] sm:$0xff]  ;;  %v24_v9 = vld [vmem:[%s9360_s0 + $0x18] sm:$0xff] }
  0x17   :  { %v7129_v4 = vld [vmem:[%s9359_s1 + $0x100] sm:$0xff]   ;;  %v5761_v7 = vcombine.low %v23_v6, %v23_v6  ;;  %v5762_v8 = vcombine.high %v23_v6, %v23_v6  ;;  %v5763_v10 = vcombine.low %v24_v9, %v24_v9  ;;  %v5764_v11 = vcombine.high %v24_v9, %v24_v9  ;;  %v7135_v12 = vld [vmem:[%s9359_s1 + $0x278] sm:$0xff]   ;;  %v7139_v16 = vld [vmem:[%s9359_s1 + $0x270] sm:$0xff]  }
  0x18   :  { %6351 = vmatpush3.bf16.msra.mxu0 %v7085_v22  ;;  %v7130_v5 = vld [vmem:[%s9359_s1 + $0x180] sm:$0xff]   ;;  %v7136_v13 = vld [vmem:[%s9359_s1 + $0x2f8] sm:$0xff]   ;;  %v7140_v17 = vld [vmem:[%s9359_s1 + $0x2f0] sm:$0xff]  }
  0x19   :  { %6373 = vmatpush3.bf16.msra.mxu1 %v7086_v23  ;;  %6352 = vmatprep.subr.bf16.mxu0 %v7087_v24  ;;  %v7137_v14 = vld [vmem:[%s9359_s1 + $0x238] sm:$0xff]   ;;  %v7141_v18 = vld [vmem:[%s9359_s1 + $0x230] sm:$0xff]   ;;  %v7143_v20 = vld [vmem:[%s9359_s1 + $0x268] sm:$0xff]  }
  0x1a   :  { %6374 = vmatprep.subr.bf16.mxu1 %v7088_v25  ;;  %v7138_v15 = vld [vmem:[%s9359_s1 + $0x2b8] sm:$0xff]   ;;  %v7142_v19 = vld [vmem:[%s9359_s1 + $0x2b0] sm:$0xff]   ;;  %v7144_v21 = vld [vmem:[%s9359_s1 + $0x2e8] sm:$0xff]  }
  0x1b   :  { %v7145_v22 = vld [vmem:[%s9359_s1 + $0x228] sm:$0xff]   ;;  %v7147_v24 = vld [vmem:[%s9359_s1 + $0x260] sm:$0xff]   ;;  %v7155_v32 = vld [vmem:[%s9359_s1 + $0x250] sm:$0xff]  }
  0x1c   :  { %6353 = vmatpush3.bf16.msra.mxu0 %v7089_v26  ;;  %v7146_v23 = vld [vmem:[%s9359_s1 + $0x2a8] sm:$0xff]   ;;  %v7148_v25 = vld [vmem:[%s9359_s1 + $0x2e0] sm:$0xff]   ;;  %v7156_v33 = vld [vmem:[%s9359_s1 + $0x2d0] sm:$0xff]  }
  0x1d   :  { %6375 = vmatpush3.bf16.msra.mxu1 %v7090_v27  ;;  %6354 = vmatprep.subr.bf16.mxu0 %v7091_v28  ;;  %v7149_v26 = vld [vmem:[%s9359_s1 + $0x220] sm:$0xff]   ;;  %v7151_v28 = vld [vmem:[%s9359_s1 + $0x258] sm:$0xff]   ;;  %v7158_v35 = vld [vmem:[%s9359_s1 + $0x290] sm:$0xff]  }
  0x1e   :  { %6376 = vmatprep.subr.bf16.mxu1 %v7092_v29  ;;  %v7150_v27 = vld [vmem:[%s9359_s1 + $0x2a0] sm:$0xff]   ;;  %v7152_v29 = vld [vmem:[%s9359_s1 + $0x2d8] sm:$0xff]   ;;  %v7160_v37 = vld [vmem:[%s9359_s1 + $0x2c8] sm:$0xff]  }
  0x1f   :  { %v7191_v6 = vld [vmem:[%s9359_s1 + $0x350] sm:$0xff]  }
  0x20   :  { %6355 = vmatpush3.bf16.msra.mxu0 %v7093_v30  ;;  %v7153_v30 = vld [vmem:[%s9359_s1 + $0x218] sm:$0xff]   ;;  %v7194_v9 = vld [vmem:[%s9359_s1 + $0x390] sm:$0xff]  }
  0x21   :  { %6377 = vmatpush3.bf16.msra.mxu1 %v7094_v31  ;;  %6384 = vmatprep.subr.bf16.mxu0 %v7099_v38  ;;  %v7154_v31 = vld [vmem:[%s9359_s1 + $0x298] sm:$0xff]   ;;  %v7161_v38 = vld [vmem:[%s9359_s1 + $0x208] sm:$0xff]  }
  0x22   :  { %6406 = vmatprep.subr.bf16.mxu1 %v7100_v39  ;;  %v7162_v39 = vld [vmem:[%s9359_s1 + $0x288] sm:$0xff]  }
  0x23   :  { %4413 = vmatmul.mubr.bf16.vlgmr.msra.gmra.mxu0 %v5757_v34  ;;  %v7157_v34 = vld [vmem:[%s9359_s1 + $0x210] sm:$0xff]  }
  0x24   :  { %4453 = vmatmul.mubr.bf16.vlgmr.msra.gmra.mxu1 %v5759_v36  ;;  %6385 = vmatpush3.bf16.msra.mxu0 %v7101_v40  ;;  %v7159_v36 = vld [vmem:[%s9359_s1 + $0x248] sm:$0xff]   ;;  %v7163_v40 = vld [vmem:[%s9359_s1 + $0x240] sm:$0xff]  }
  0x25   :  { %6407 = vmatpush3.bf16.msra.mxu1 %v7102_v41  ;;  %6386 = vmatprep.subr.bf16.mxu0 %v7103_v42  ;;  %v7164_v41 = vld [vmem:[%s9359_s1 + $0x2c0] sm:$0xff]  }
  0x26   :  { %6408 = vmatprep.subr.bf16.mxu1 %v7104_v43  ;;  %4492 = vmatprep.mubr.bf16.mxu0 %v5762_v8  ;;  %v7165_v42 = vld [vmem:[%s9359_s1 + $0x200] sm:$0xff]   ;;  %v7193_v8 = vld [vmem:[%s9359_s1 + $0x310] sm:$0xff]  }
  0x27   :  { %4532 = vmatprep.mubr.bf16.mxu1 %v5764_v11  ;;  %v7166_v43 = vld [vmem:[%s9359_s1 + $0x280] sm:$0xff]   ;;  %v7196_v11 = vld [vmem:[%s9359_s1 + $0x3c8] sm:$0xff]  }
  0x28   :  { %6387 = vmatpush3.bf16.msra.mxu0 %v7105_v44  ;;  %v25_v44 = vld [vmem:[%s9360_s0 + $0x20] sm:$0xff] }
  0x29   :  { %6409 = vmatpush3.bf16.msra.mxu1 %v7106_v45  ;;  %6388 = vmatprep.subr.bf16.mxu0 %v7107_v46  ;;  %v26_v45 = vld [vmem:[%s9360_s0 + $0x28] sm:$0xff]  ;;  %v5765_v46 = vcombine.low %v25_v44, %v25_v44 }
  0x2a   :  { %6410 = vmatprep.subr.bf16.mxu1 %v7108_v47  ;;  %v5766_v47 = vcombine.high %v25_v44, %v25_v44  ;;  %v7227_v44 = vld [vmem:[%s9359_s1 + $0x450] sm:$0xff]  }
  0x2c   :  { %6389 = vmatpush3.bf16.msra.mxu0 %v7109_v48  ;;  %v5767_v48 = vcombine.low %v26_v45, %v26_v45 }
  0x2d   :  { %6411 = vmatpush3.bf16.msra.mxu1 %v7110_v49  ;;  %6390 = vmatprep.subr.bf16.mxu0 %v7111_v50  ;;  %v5768_v49 = vcombine.high %v26_v45, %v26_v45  ;;  %v7171_v50 = vld [vmem:[%s9359_s1 + $0x378] sm:$0xff]   ;;  %v7228_v45 = vld [vmem:[%s9359_s1 + $0x4d0] sm:$0xff]  }
  0x2e   :  { %6412 = vmatprep.subr.bf16.mxu1 %v7112_v51  ;;  %v7172_v51 = vld [vmem:[%s9359_s1 + $0x3f8] sm:$0xff]  }
  0x30   :  { %6391 = vmatpush3.bf16.msra.mxu0 %v7113_v52  ;;  %v7173_v52 = vld [vmem:[%s9359_s1 + $0x338] sm:$0xff]  }
  0x31   :  { %6413 = vmatpush3.bf16.msra.mxu1 %v7114_v53  ;;  %6392 = vmatprep.subr.bf16.mxu0 %v7115_v54  ;;  %v7174_v53 = vld [vmem:[%s9359_s1 + $0x3b8] sm:$0xff]   ;;  %v7175_v54 = vld [vmem:[%s9359_s1 + $0x370] sm:$0xff]  }
  0x32   :  { %6414 = vmatprep.subr.bf16.mxu1 %v7116_v55  ;;  %v7176_v55 = vld [vmem:[%s9359_s1 + $0x3f0] sm:$0xff]  }
  0x34   :  { %6393 = vmatpush3.bf16.msra.mxu0 %v7117_v56  ;;  %v7177_v56 = vld [vmem:[%s9359_s1 + $0x330] sm:$0xff]  }
  0x35   :  { %6415 = vmatpush3.bf16.msra.mxu1 %v7118_v57  ;;  %6394 = vmatprep.subr.bf16.mxu0 %v7119_v58  ;;  %v7178_v57 = vld [vmem:[%s9359_s1 + $0x3b0] sm:$0xff]   ;;  %v7179_v58 = vld [vmem:[%s9359_s1 + $0x368] sm:$0xff]  }
  0x36   :  { %6416 = vmatprep.subr.bf16.mxu1 %v7120_v59  ;;  %v7180_v59 = vld [vmem:[%s9359_s1 + $0x3e8] sm:$0xff]  }
  0x38   :  { %6395 = vmatpush3.bf16.msra.mxu0 %v7121_v60  ;;  %v7181_v60 = vld [vmem:[%s9359_s1 + $0x328] sm:$0xff]  }
  0x39   :  { %6417 = vmatpush3.bf16.msra.mxu1 %v7122_v61  ;;  %6396 = vmatprep.subr.bf16.mxu0 %v7123_v62  ;;  %v7182_v61 = vld [vmem:[%s9359_s1 + $0x3a8] sm:$0xff]   ;;  %v7183_v62 = vld [vmem:[%s9359_s1 + $0x360] sm:$0xff]  }
  0x3a   :  { %6418 = vmatprep.subr.bf16.mxu1 %v7124_v63  ;;  %v7184_v63 = vld [vmem:[%s9359_s1 + $0x3e0] sm:$0xff]  }
  0x3c   :  { %6397 = vmatpush3.bf16.msra.mxu0 %v7125_v0  ;;  %v7185_v0 = vld [vmem:[%s9359_s1 + $0x320] sm:$0xff]  }
  0x3d   :  { %6419 = vmatpush3.bf16.msra.mxu1 %v7126_v1  ;;  %6398 = vmatprep.subr.bf16.mxu0 %v7127_v2  ;;  %v7186_v1 = vld [vmem:[%s9359_s1 + $0x3a0] sm:$0xff]   ;;  %v7187_v2 = vld [vmem:[%s9359_s1 + $0x358] sm:$0xff]  }
  0x3e   :  { %6420 = vmatprep.subr.bf16.mxu1 %v7128_v3  ;;  %v7188_v3 = vld [vmem:[%s9359_s1 + $0x3d8] sm:$0xff]  }
  0x40   :  { %6399 = vmatpush3.bf16.msra.mxu0 %v7129_v4  ;;  %v7189_v4 = vld [vmem:[%s9359_s1 + $0x318] sm:$0xff]  }
  0x41   :  { %6421 = vmatpush3.bf16.msra.mxu1 %v7130_v5  ;;  %6428 = vmatprep.subr.bf16.mxu0 %v7135_v12  ;;  %v7190_v5 = vld [vmem:[%s9359_s1 + $0x398] sm:$0xff]   ;;  %v7197_v12 = vld [vmem:[%s9359_s1 + $0x308] sm:$0xff]  }
  0x42   :  { %6450 = vmatprep.subr.bf16.mxu1 %v7136_v13  ;;  %v7198_v13 = vld [vmem:[%s9359_s1 + $0x388] sm:$0xff]  }
  0x43   :  { %4493 = vmatmul.mubr.bf16.vlgmr.msra.gmra.mxu0 %v5761_v7  ;;  %v7192_v7 = vld [vmem:[%s9359_s1 + $0x3d0] sm:$0xff]  }
  0x44   :  { %4533 = vmatmul.mubr.bf16.vlgmr.msra.gmra.mxu1 %v5763_v10  ;;  %6429 = vmatpush3.bf16.msra.mxu0 %v7137_v14  ;;  %v7195_v10 = vld [vmem:[%s9359_s1 + $0x348] sm:$0xff]   ;;  %v7199_v14 = vld [vmem:[%s9359_s1 + $0x340] sm:$0xff]  }
  0x45   :  { %6451 = vmatpush3.bf16.msra.mxu1 %v7138_v15  ;;  %6430 = vmatprep.subr.bf16.mxu0 %v7139_v16  ;;  %v7200_v15 = vld [vmem:[%s9359_s1 + $0x3c0] sm:$0xff]  }
  0x46   :  { %6452 = vmatprep.subr.bf16.mxu1 %v7140_v17  ;;  %4572 = vmatprep.mubr.bf16.mxu0 %v5766_v47  ;;  %v7201_v16 = vld [vmem:[%s9359_s1 + $0x300] sm:$0xff]   ;;  %v7230_v47 = vld [vmem:[%s9359_s1 + $0x490] sm:$0xff]  }
  0x47   :  { %4612 = vmatprep.mubr.bf16.mxu1 %v5768_v49  ;;  %v7202_v17 = vld [vmem:[%s9359_s1 + $0x380] sm:$0xff]   ;;  %v7232_v49 = vld [vmem:[%s9359_s1 + $0x4c8] sm:$0xff]  }
  0x48   :  { %6431 = vmatpush3.bf16.msra.mxu0 %v7141_v18  ;;  %v27_v18 = vld [vmem:[%s9360_s0 + $0x30] sm:$0xff] }
  0x49   :  { %6453 = vmatpush3.bf16.msra.mxu1 %v7142_v19  ;;  %6432 = vmatprep.subr.bf16.mxu0 %v7143_v20  ;;  %v28_v19 = vld [vmem:[%s9360_s0 + $0x38] sm:$0xff]  ;;  %v5769_v20 = vcombine.low %v27_v18, %v27_v18 }
  0x4a   :  { %6454 = vmatprep.subr.bf16.mxu1 %v7144_v21  ;;  %v5770_v21 = vcombine.high %v27_v18, %v27_v18  ;;  %v7263_v18 = vld [vmem:[%s9359_s1 + $0x550] sm:$0xff]  }
  0x4c   :  { %6433 = vmatpush3.bf16.msra.mxu0 %v7145_v22  ;;  %v5771_v22 = vcombine.low %v28_v19, %v28_v19 }
  0x4d   :  { %6455 = vmatpush3.bf16.msra.mxu1 %v7146_v23  ;;  %6434 = vmatprep.subr.bf16.mxu0 %v7147_v24  ;;  %v7207_v23 = vld [vmem:[%s9359_s1 + $0x478] sm:$0xff]   ;;  %v5772_v24 = vcombine.high %v28_v19, %v28_v19  ;;  %v7264_v19 = vld [vmem:[%s9359_s1 + $0x5d0] sm:$0xff]  }
  0x4e   :  { %6456 = vmatprep.subr.bf16.mxu1 %v7148_v25  ;;  %v7208_v25 = vld [vmem:[%s9359_s1 + $0x4f8] sm:$0xff]  }
  0x50   :  { %6435 = vmatpush3.bf16.msra.mxu0 %v7149_v26  ;;  %v7209_v26 = vld [vmem:[%s9359_s1 + $0x438] sm:$0xff]  }
  0x51   :  { %6457 = vmatpush3.bf16.msra.mxu1 %v7150_v27  ;;  %6436 = vmatprep.subr.bf16.mxu0 %v7151_v28  ;;  %v7210_v27 = vld [vmem:[%s9359_s1 + $0x4b8] sm:$0xff]   ;;  %v7211_v28 = vld [vmem:[%s9359_s1 + $0x470] sm:$0xff]  }
  0x52   :  { %6458 = vmatprep.subr.bf16.mxu1 %v7152_v29  ;;  %v7212_v29 = vld [vmem:[%s9359_s1 + $0x4f0] sm:$0xff]  }
  0x54   :  { %6437 = vmatpush3.bf16.msra.mxu0 %v7153_v30  ;;  %v7213_v30 = vld [vmem:[%s9359_s1 + $0x430] sm:$0xff]  }
  0x55   :  { %6459 = vmatpush3.bf16.msra.mxu1 %v7154_v31  ;;  %6438 = vmatprep.subr.bf16.mxu0 %v7155_v32  ;;  %v7214_v31 = vld [vmem:[%s9359_s1 + $0x4b0] sm:$0xff]   ;;  %v7215_v32 = vld [vmem:[%s9359_s1 + $0x468] sm:$0xff]  }
  0x56   :  { %6460 = vmatprep.subr.bf16.mxu1 %v7156_v33  ;;  %v7216_v33 = vld [vmem:[%s9359_s1 + $0x4e8] sm:$0xff]  }
  0x58   :  { %6439 = vmatpush3.bf16.msra.mxu0 %v7157_v34  ;;  %v7217_v34 = vld [vmem:[%s9359_s1 + $0x428] sm:$0xff]  }
  0x59   :  { %6461 = vmatpush3.bf16.msra.mxu1 %v7158_v35  ;;  %6440 = vmatprep.subr.bf16.mxu0 %v7159_v36  ;;  %v7218_v35 = vld [vmem:[%s9359_s1 + $0x4a8] sm:$0xff]   ;;  %v7219_v36 = vld [vmem:[%s9359_s1 + $0x460] sm:$0xff]  }
  0x5a   :  { %6462 = vmatprep.subr.bf16.mxu1 %v7160_v37  ;;  %v7220_v37 = vld [vmem:[%s9359_s1 + $0x4e0] sm:$0xff]  }
  0x5c   :  { %6441 = vmatpush3.bf16.msra.mxu0 %v7161_v38  ;;  %v7221_v38 = vld [vmem:[%s9359_s1 + $0x420] sm:$0xff]  }
  0x5d   :  { %6463 = vmatpush3.bf16.msra.mxu1 %v7162_v39  ;;  %6442 = vmatprep.subr.bf16.mxu0 %v7163_v40  ;;  %v7222_v39 = vld [vmem:[%s9359_s1 + $0x4a0] sm:$0xff]   ;;  %v7223_v40 = vld [vmem:[%s9359_s1 + $0x458] sm:$0xff]  }
  0x5e   :  { %6464 = vmatprep.subr.bf16.mxu1 %v7164_v41  ;;  %v7224_v41 = vld [vmem:[%s9359_s1 + $0x4d8] sm:$0xff]  }
  0x60   :  { %6443 = vmatpush3.bf16.msra.mxu0 %v7165_v42  ;;  %v7225_v42 = vld [vmem:[%s9359_s1 + $0x418] sm:$0xff]  }
  0x61   :  { %6465 = vmatpush3.bf16.msra.mxu1 %v7166_v43  ;;  %6472 = vmatprep.subr.bf16.mxu0 %v7171_v50  ;;  %v7226_v43 = vld [vmem:[%s9359_s1 + $0x498] sm:$0xff]   ;;  %v7233_v50 = vld [vmem:[%s9359_s1 + $0x408] sm:$0xff]  }
  0x62   :  { %6494 = vmatprep.subr.bf16.mxu1 %v7172_v51  ;;  %v7234_v51 = vld [vmem:[%s9359_s1 + $0x488] sm:$0xff]  }
  0x63   :  { %4573 = vmatmul.mubr.bf16.vlgmr.msra.gmra.mxu0 %v5765_v46  ;;  %v7229_v46 = vld [vmem:[%s9359_s1 + $0x410] sm:$0xff]  }
  0x64   :  { %4613 = vmatmul.mubr.bf16.vlgmr.msra.gmra.mxu1 %v5767_v48  ;;  %6473 = vmatpush3.bf16.msra.mxu0 %v7173_v52  ;;  %v7231_v48 = vld [vmem:[%s9359_s1 + $0x448] sm:$0xff]   ;;  %v7235_v52 = vld [vmem:[%s9359_s1 + $0x440] sm:$0xff]  }
  0x65   :  { %6495 = vmatpush3.bf16.msra.mxu1 %v7174_v53  ;;  %6474 = vmatprep.subr.bf16.mxu0 %v7175_v54  ;;  %v7236_v53 = vld [vmem:[%s9359_s1 + $0x4c0] sm:$0xff]  }
  0x66   :  { %6496 = vmatprep.subr.bf16.mxu1 %v7176_v55  ;;  %4652 = vmatprep.mubr.bf16.mxu0 %v5770_v21  ;;  %v7237_v54 = vld [vmem:[%s9359_s1 + $0x400] sm:$0xff]   ;;  %v7266_v21 = vld [vmem:[%s9359_s1 + $0x590] sm:$0xff]  }
  0x67   :  { %4692 = vmatprep.mubr.bf16.mxu1 %v5772_v24  ;;  %v7238_v55 = vld [vmem:[%s9359_s1 + $0x480] sm:$0xff]   ;;  %v7269_v24 = vld [vmem:[%s9359_s1 + $0x508] sm:$0xff]  }
  0x68   :  { %6475 = vmatpush3.bf16.msra.mxu0 %v7177_v56  ;;  %v29_v56 = vld [vmem:[%s9360_s0 + $0x40] sm:$0xff] }
  0x69   :  { %6497 = vmatpush3.bf16.msra.mxu1 %v7178_v57  ;;  %6476 = vmatprep.subr.bf16.mxu0 %v7179_v58  ;;  %v5773_v57 = vcombine.low %v29_v56, %v29_v56  ;;  %v5774_v58 = vcombine.high %v29_v56, %v29_v56  ;;  %v7299_v56 = vld [vmem:[%s9359_s1 + $0x650] sm:$0xff]  }
  0x6a   :  { %6498 = vmatprep.subr.bf16.mxu1 %v7180_v59  ;;  %v30_v59 = vld [vmem:[%s9360_s0 + $0x48] sm:$0xff] }
  0x6c   :  { %6477 = vmatpush3.bf16.msra.mxu0 %v7181_v60  ;;  %v5775_v60 = vcombine.low %v30_v59, %v30_v59 }
  0x6d   :  { %6499 = vmatpush3.bf16.msra.mxu1 %v7182_v61  ;;  %6478 = vmatprep.subr.bf16.mxu0 %v7183_v62  ;;  %v5776_v61 = vcombine.high %v30_v59, %v30_v59  ;;  %v7243_v62 = vld [vmem:[%s9359_s1 + $0x578] sm:$0xff]   ;;  %v7302_v59 = vld [vmem:[%s9359_s1 + $0x690] sm:$0xff]  }
  0x6e   :  { %6500 = vmatprep.subr.bf16.mxu1 %v7184_v63  ;;  %v7244_v63 = vld [vmem:[%s9359_s1 + $0x5f8] sm:$0xff]  }
  0x70   :  { %6479 = vmatpush3.bf16.msra.mxu0 %v7185_v0  ;;  %v7245_v0 = vld [vmem:[%s9359_s1 + $0x538] sm:$0xff]  }
  0x71   :  { %6501 = vmatpush3.bf16.msra.mxu1 %v7186_v1  ;;  %6480 = vmatprep.subr.bf16.mxu0 %v7187_v2  ;;  %v7246_v1 = vld [vmem:[%s9359_s1 + $0x5b8] sm:$0xff]   ;;  %v7247_v2 = vld [vmem:[%s9359_s1 + $0x570] sm:$0xff]  }
  0x72   :  { %6502 = vmatprep.subr.bf16.mxu1 %v7188_v3  ;;  %v7248_v3 = vld [vmem:[%s9359_s1 + $0x5f0] sm:$0xff]  }
  0x74   :  { %6481 = vmatpush3.bf16.msra.mxu0 %v7189_v4  ;;  %v7249_v4 = vld [vmem:[%s9359_s1 + $0x530] sm:$0xff]  }
  0x75   :  { %6503 = vmatpush3.bf16.msra.mxu1 %v7190_v5  ;;  %6482 = vmatprep.subr.bf16.mxu0 %v7191_v6  ;;  %v7250_v5 = vld [vmem:[%s9359_s1 + $0x5b0] sm:$0xff]   ;;  %v7251_v6 = vld [vmem:[%s9359_s1 + $0x568] sm:$0xff]  }
  0x76   :  { %6504 = vmatprep.subr.bf16.mxu1 %v7192_v7  ;;  %v7252_v7 = vld [vmem:[%s9359_s1 + $0x5e8] sm:$0xff]  }
  0x78   :  { %6483 = vmatpush3.bf16.msra.mxu0 %v7193_v8  ;;  %v7253_v8 = vld [vmem:[%s9359_s1 + $0x528] sm:$0xff]  }
  0x79   :  { %6505 = vmatpush3.bf16.msra.mxu1 %v7194_v9  ;;  %6484 = vmatprep.subr.bf16.mxu0 %v7195_v10  ;;  %v7254_v9 = vld [vmem:[%s9359_s1 + $0x5a8] sm:$0xff]   ;;  %v7255_v10 = vld [vmem:[%s9359_s1 + $0x560] sm:$0xff]  }
  0x7a   :  { %6506 = vmatprep.subr.bf16.mxu1 %v7196_v11  ;;  %v7256_v11 = vld [vmem:[%s9359_s1 + $0x5e0] sm:$0xff]  }
  0x7c   :  { %6485 = vmatpush3.bf16.msra.mxu0 %v7197_v12  ;;  %v7257_v12 = vld [vmem:[%s9359_s1 + $0x520] sm:$0xff]  }
  0x7d   :  { %6507 = vmatpush3.bf16.msra.mxu1 %v7198_v13  ;;  %6486 = vmatprep.subr.bf16.mxu0 %v7199_v14  ;;  %v7258_v13 = vld [vmem:[%s9359_s1 + $0x5a0] sm:$0xff]   ;;  %v7259_v14 = vld [vmem:[%s9359_s1 + $0x558] sm:$0xff]  }
  0x7e   :  { %6508 = vmatprep.subr.bf16.mxu1 %v7200_v15  ;;  %v7260_v15 = vld [vmem:[%s9359_s1 + $0x5d8] sm:$0xff]  }
  0x80   :  { %6487 = vmatpush3.bf16.msra.mxu0 %v7201_v16  ;;  %v7261_v16 = vld [vmem:[%s9359_s1 + $0x518] sm:$0xff]  }
  0x81   :  { %6509 = vmatpush3.bf16.msra.mxu1 %v7202_v17  ;;  %6516 = vmatprep.subr.bf16.mxu0 %v7207_v23  ;;  %v7262_v17 = vld [vmem:[%s9359_s1 + $0x598] sm:$0xff]   ;;  %v7268_v23 = vld [vmem:[%s9359_s1 + $0x5c8] sm:$0xff]  }
  0x82   :  { %6538 = vmatprep.subr.bf16.mxu1 %v7208_v25  ;;  %v7270_v25 = vld [vmem:[%s9359_s1 + $0x588] sm:$0xff]  }
  0x83   :  { %4653 = vmatmul.mubr.bf16.vlgmr.msra.gmra.mxu0 %v5769_v20  ;;  %v7265_v20 = vld [vmem:[%s9359_s1 + $0x510] sm:$0xff]  }
  0x84   :  { %4693 = vmatmul.mubr.bf16.vlgmr.msra.gmra.mxu1 %v5771_v22  ;;  %6517 = vmatpush3.bf16.msra.mxu0 %v7209_v26  ;;  %v7267_v22 = vld [vmem:[%s9359_s1 + $0x548] sm:$0xff]   ;;  %v7271_v26 = vld [vmem:[%s9359_s1 + $0x540] sm:$0xff]  }
  0x85   :  { %6539 = vmatpush3.bf16.msra.mxu1 %v7210_v27  ;;  %6518 = vmatprep.subr.bf16.mxu0 %v7211_v28  ;;  %v7272_v27 = vld [vmem:[%s9359_s1 + $0x5c0] sm:$0xff]  }
  0x86   :  { %6540 = vmatprep.subr.bf16.mxu1 %v7212_v29  ;;  %4732 = vmatprep.mubr.bf16.mxu0 %v5774_v58  ;;  %v7273_v28 = vld [vmem:[%s9359_s1 + $0x500] sm:$0xff]   ;;  %v7301_v58 = vld [vmem:[%s9359_s1 + $0x610] sm:$0xff]  }
  0x87   :  { %4772 = vmatprep.mubr.bf16.mxu1 %v5776_v61  ;;  %v7274_v29 = vld [vmem:[%s9359_s1 + $0x580] sm:$0xff]   ;;  %v7304_v61 = vld [vmem:[%s9359_s1 + $0x6c8] sm:$0xff]  }
  0x88   :  { %6519 = vmatpush3.bf16.msra.mxu0 %v7213_v30  ;;  %v31_v30 = vld [vmem:[%s9360_s0 + $0x50] sm:$0xff] }
  0x89   :  { %6541 = vmatpush3.bf16.msra.mxu1 %v7214_v31  ;;  %6520 = vmatprep.subr.bf16.mxu0 %v7215_v32  ;;  %v32_v31 = vld [vmem:[%s9360_s0 + $0x58] sm:$0xff]  ;;  %v5777_v32 = vcombine.low %v31_v30, %v31_v30 }
  0x8a   :  { %6542 = vmatprep.subr.bf16.mxu1 %v7216_v33  ;;  %v5778_v33 = vcombine.high %v31_v30, %v31_v30  ;;  %v7322_v30 = vld [vmem:[%s9359_s1 + $0x7b0] sm:$0xff]  }
  0x8c   :  { %6521 = vmatpush3.bf16.msra.mxu0 %v7217_v34  ;;  %v5779_v34 = vcombine.low %v32_v31, %v32_v31 }
  0x8d   :  { %6543 = vmatpush3.bf16.msra.mxu1 %v7218_v35  ;;  %6522 = vmatprep.subr.bf16.mxu0 %v7219_v36  ;;  %v5780_v35 = vcombine.high %v32_v31, %v32_v31  ;;  %v7279_v36 = vld [vmem:[%s9359_s1 + $0x678] sm:$0xff]   ;;  %v7323_v31 = vld [vmem:[%s9359_s1 + $0x768] sm:$0xff]  }
  0x8e   :  { %6544 = vmatprep.subr.bf16.mxu1 %v7220_v37  ;;  %v7280_v37 = vld [vmem:[%s9359_s1 + $0x6f8] sm:$0xff]  }
  0x90   :  { %6523 = vmatpush3.bf16.msra.mxu0 %v7221_v38  ;;  %v7281_v38 = vld [vmem:[%s9359_s1 + $0x638] sm:$0xff]  }
  0x91   :  { %6545 = vmatpush3.bf16.msra.mxu1 %v7222_v39  ;;  %6524 = vmatprep.subr.bf16.mxu0 %v7223_v40  ;;  %v7282_v39 = vld [vmem:[%s9359_s1 + $0x6b8] sm:$0xff]   ;;  %v7283_v40 = vld [vmem:[%s9359_s1 + $0x670] sm:$0xff]  }
  0x92   :  { %6546 = vmatprep.subr.bf16.mxu1 %v7224_v41  ;;  %v7284_v41 = vld [vmem:[%s9359_s1 + $0x6f0] sm:$0xff]  }
  0x94   :  { %6525 = vmatpush3.bf16.msra.mxu0 %v7225_v42  ;;  %v7285_v42 = vld [vmem:[%s9359_s1 + $0x630] sm:$0xff]  }
  0x95   :  { %6547 = vmatpush3.bf16.msra.mxu1 %v7226_v43  ;;  %6526 = vmatprep.subr.bf16.mxu0 %v7227_v44  ;;  %v7286_v43 = vld [vmem:[%s9359_s1 + $0x6b0] sm:$0xff]   ;;  %v7287_v44 = vld [vmem:[%s9359_s1 + $0x668] sm:$0xff]  }
  0x96   :  { %6548 = vmatprep.subr.bf16.mxu1 %v7228_v45  ;;  %v7288_v45 = vld [vmem:[%s9359_s1 + $0x6e8] sm:$0xff]  }
  0x98   :  { %6527 = vmatpush3.bf16.msra.mxu0 %v7229_v46  ;;  %v7289_v46 = vld [vmem:[%s9359_s1 + $0x628] sm:$0xff]  }
  0x99   :  { %6549 = vmatpush3.bf16.msra.mxu1 %v7230_v47  ;;  %6528 = vmatprep.subr.bf16.mxu0 %v7231_v48  ;;  %v7290_v47 = vld [vmem:[%s9359_s1 + $0x6a8] sm:$0xff]   ;;  %v7291_v48 = vld [vmem:[%s9359_s1 + $0x660] sm:$0xff]  }
  0x9a   :  { %6550 = vmatprep.subr.bf16.mxu1 %v7232_v49  ;;  %v7292_v49 = vld [vmem:[%s9359_s1 + $0x6e0] sm:$0xff]  }
  0x9c   :  { %6529 = vmatpush3.bf16.msra.mxu0 %v7233_v50  ;;  %v7293_v50 = vld [vmem:[%s9359_s1 + $0x620] sm:$0xff]  }
  0x9d   :  { %6551 = vmatpush3.bf16.msra.mxu1 %v7234_v51  ;;  %6530 = vmatprep.subr.bf16.mxu0 %v7235_v52  ;;  %v7294_v51 = vld [vmem:[%s9359_s1 + $0x6a0] sm:$0xff]   ;;  %v7295_v52 = vld [vmem:[%s9359_s1 + $0x658] sm:$0xff]  }
  0x9e   :  { %6552 = vmatprep.subr.bf16.mxu1 %v7236_v53  ;;  %v7296_v53 = vld [vmem:[%s9359_s1 + $0x6d8] sm:$0xff]  }
  0xa0   :  { %6531 = vmatpush3.bf16.msra.mxu0 %v7237_v54  ;;  %v7297_v54 = vld [vmem:[%s9359_s1 + $0x618] sm:$0xff]  }
  0xa1   :  { %6553 = vmatpush3.bf16.msra.mxu1 %v7238_v55  ;;  %6560 = vmatprep.subr.bf16.mxu0 %v7243_v62  ;;  %v7298_v55 = vld [vmem:[%s9359_s1 + $0x698] sm:$0xff]   ;;  %v7305_v62 = vld [vmem:[%s9359_s1 + $0x608] sm:$0xff]  }
  0xa2   :  { %6582 = vmatprep.subr.bf16.mxu1 %v7244_v63  ;;  %v7306_v63 = vld [vmem:[%s9359_s1 + $0x688] sm:$0xff]  }
  0xa3   :  { %4733 = vmatmul.mubr.bf16.vlgmr.msra.gmra.mxu0 %v5773_v57  ;;  %v7300_v57 = vld [vmem:[%s9359_s1 + $0x6d0] sm:$0xff]  }
  0xa4   :  { %4773 = vmatmul.mubr.bf16.vlgmr.msra.gmra.mxu1 %v5775_v60  ;;  %6561 = vmatpush3.bf16.msra.mxu0 %v7245_v0  ;;  %v7303_v60 = vld [vmem:[%s9359_s1 + $0x648] sm:$0xff]   ;;  %v7307_v0 = vld [vmem:[%s9359_s1 + $0x640] sm:$0xff]  }
  0xa5   :  { %6583 = vmatpush3.bf16.msra.mxu1 %v7246_v1  ;;  %6562 = vmatprep.subr.bf16.mxu0 %v7247_v2  ;;  %v7308_v1 = vld [vmem:[%s9359_s1 + $0x6c0] sm:$0xff]  }
  0xa6   :  { %6584 = vmatprep.subr.bf16.mxu1 %v7248_v3  ;;  %4812 = vmatprep.mubr.bf16.mxu0 %v5778_v33  ;;  %v7309_v2 = vld [vmem:[%s9359_s1 + $0x600] sm:$0xff]   ;;  %v7325_v33 = vld [vmem:[%s9359_s1 + $0x728] sm:$0xff]  }
  0xa7   :  { %4852 = vmatprep.mubr.bf16.mxu1 %v5780_v35  ;;  %v7310_v3 = vld [vmem:[%s9359_s1 + $0x680] sm:$0xff]  }
  0xa8   :  { %6563 = vmatpush3.bf16.msra.mxu0 %v7249_v4  ;;  %v33_v4 = vld [vmem:[%s9360_s0 + $0x60] sm:$0xff] }
  0xa9   :  { %6585 = vmatpush3.bf16.msra.mxu1 %v7250_v5  ;;  %6564 = vmatprep.subr.bf16.mxu0 %v7251_v6  ;;  %v34_v5 = vld [vmem:[%s9360_s0 + $0x68] sm:$0xff]  ;;  %v7327_v35 = vld [vmem:[%s9359_s1 + $0x760] sm:$0xff]  }
  0xaa   :  { %6586 = vmatprep.subr.bf16.mxu1 %v7252_v7 }
  0xac   :  { %6565 = vmatpush3.bf16.msra.mxu0 %v7253_v8  ;;  %v5781_v8 = vcombine.low %v33_v4, %v33_v4 }
  0xad   :  { %6587 = vmatpush3.bf16.msra.mxu1 %v7254_v9  ;;  %6566 = vmatprep.subr.bf16.mxu0 %v7255_v10  ;;  %v5782_v9 = vcombine.high %v33_v4, %v33_v4  ;;  %v5783_v10 = vcombine.low %v34_v5, %v34_v5 }
  0xae   :  { %6588 = vmatprep.subr.bf16.mxu1 %v7256_v11  ;;  %v7315_v11 = vld [vmem:[%s9359_s1 + $0x778] sm:$0xff]  }
  0xb0   :  { %6567 = vmatpush3.bf16.msra.mxu0 %v7257_v12  ;;  %v5784_v12 = vcombine.high %v34_v5, %v34_v5 }
  0xb1   :  { %6589 = vmatpush3.bf16.msra.mxu1 %v7258_v13  ;;  %6568 = vmatprep.subr.bf16.mxu0 %v7259_v14  ;;  %v7316_v13 = vld [vmem:[%s9359_s1 + $0x7f8] sm:$0xff]  }
  0xb2   :  { %6590 = vmatprep.subr.bf16.mxu1 %v7260_v15 }
  0xb4   :  { %6569 = vmatpush3.bf16.msra.mxu0 %v7261_v16  ;;  %v7317_v16 = vld [vmem:[%s9359_s1 + $0x738] sm:$0xff]  }
  0xb5   :  { %6591 = vmatpush3.bf16.msra.mxu1 %v7262_v17  ;;  %6570 = vmatprep.subr.bf16.mxu0 %v7263_v18 }
  0xb6   :  { %6592 = vmatprep.subr.bf16.mxu1 %v7264_v19  ;;  %v7318_v19 = vld [vmem:[%s9359_s1 + $0x7b8] sm:$0xff]  }
  0xb8   :  { %6571 = vmatpush3.bf16.msra.mxu0 %v7265_v20  ;;  %v5756_v20 = vld [vmem:[%s9361_s2] ss:$0 sm:$0xff] }
  0xb9   :  { %6593 = vmatpush3.bf16.msra.mxu1 %v7266_v21  ;;  %6572 = vmatprep.subr.bf16.mxu0 %v7267_v22 }
  0xba   :  { %6594 = vmatprep.subr.bf16.mxu1 %v7268_v23 }
  0xbc   :  { %6573 = vmatpush3.bf16.msra.mxu0 %v7269_v24  ;;  %v7319_v24 = vld [vmem:[%s9359_s1 + $0x770] sm:$0xff]  }
  0xbd   :  { %6595 = vmatpush3.bf16.msra.mxu1 %v7270_v25  ;;  %6574 = vmatprep.subr.bf16.mxu0 %v7271_v26  ;;  %v7320_v25 = vld [vmem:[%s9359_s1 + $0x7f0] sm:$0xff]  }
  0xbe   :  { %6596 = vmatprep.subr.bf16.mxu1 %v7272_v27 }
  0xc0   :  { %6575 = vmatpush3.bf16.msra.mxu0 %v7273_v28 }
  0xc1   :  { %6597 = vmatpush3.bf16.msra.mxu1 %v7274_v29  ;;  %6604 = vmatprep.subr.bf16.mxu0 %v7279_v36  ;;  %v7321_v29 = vld [vmem:[%s9359_s1 + $0x730] sm:$0xff]   ;;  %v7328_v36 = vld [vmem:[%s9359_s1 + $0x7e0] sm:$0xff]  }
  0xc2   :  { %6626 = vmatprep.subr.bf16.mxu1 %v7280_v37  ;;  %v7329_v37 = vld [vmem:[%s9359_s1 + $0x720] sm:$0xff]  }
  0xc3   :  { %4813 = vmatmul.mubr.bf16.vlgmr.msra.gmra.mxu0 %v5777_v32  ;;  %v7324_v32 = vld [vmem:[%s9359_s1 + $0x7e8] sm:$0xff]  }
  0xc4   :  { %4853 = vmatmul.mubr.bf16.vlgmr.msra.gmra.mxu1 %v5779_v34  ;;  %6605 = vmatpush3.bf16.msra.mxu0 %v7281_v38  ;;  %v7326_v34 = vld [vmem:[%s9359_s1 + $0x7a8] sm:$0xff]   ;;  %v7330_v38 = vld [vmem:[%s9359_s1 + $0x7a0] sm:$0xff]  }
  0xc5   :  { %6627 = vmatpush3.bf16.msra.mxu1 %v7282_v39  ;;  %6606 = vmatprep.subr.bf16.mxu0 %v7283_v40  ;;  %v7331_v39 = vld [vmem:[%s9359_s1 + $0x758] sm:$0xff]  }
  0xc6   :  { %6628 = vmatprep.subr.bf16.mxu1 %v7284_v41  ;;  %4892 = vmatprep.mubr.bf16.mxu0 %v5782_v9  ;;  %v7332_v40 = vld [vmem:[%s9359_s1 + $0x7d8] sm:$0xff]  }
  0xc7   :  { %4932 = vmatprep.mubr.bf16.mxu1 %v5784_v12  ;;  %v7333_v41 = vld [vmem:[%s9359_s1 + $0x718] sm:$0xff]  }
  0xc8   :  { %6607 = vmatpush3.bf16.msra.mxu0 %v7285_v42  ;;  %v7334_v42 = vld [vmem:[%s9359_s1 + $0x798] sm:$0xff]  }
  0xc9   :  { %6629 = vmatpush3.bf16.msra.mxu1 %v7286_v43  ;;  %6608 = vmatprep.subr.bf16.mxu0 %v7287_v44  ;;  %v7335_v43 = vld [vmem:[%s9359_s1 + $0x750] sm:$0xff]  }
  0xca   :  { %6630 = vmatprep.subr.bf16.mxu1 %v7288_v45  ;;  %v7336_v44 = vld [vmem:[%s9359_s1 + $0x7d0] sm:$0xff]  }
  0xcb   :  { %v7337_v45 = vld [vmem:[%s9359_s1 + $0x710] sm:$0xff]  }
  0xcc   :  { %6609 = vmatpush3.bf16.msra.mxu0 %v7289_v46  ;;  %v7338_v46 = vld [vmem:[%s9359_s1 + $0x790] sm:$0xff]  }
  0xcd   :  { %6631 = vmatpush3.bf16.msra.mxu1 %v7290_v47  ;;  %6610 = vmatprep.subr.bf16.mxu0 %v7291_v48  ;;  %v7339_v47 = vld [vmem:[%s9359_s1 + $0x748] sm:$0xff]  }
  0xce   :  { %6632 = vmatprep.subr.bf16.mxu1 %v7292_v49  ;;  %v7340_v48 = vld [vmem:[%s9359_s1 + $0x7c8] sm:$0xff]  }
  0xcf   :  { %v7341_v49 = vld [vmem:[%s9359_s1 + $0x708] sm:$0xff]  }
  0xd0   :  { %6611 = vmatpush3.bf16.msra.mxu0 %v7293_v50  ;;  %v7342_v50 = vld [vmem:[%s9359_s1 + $0x788] sm:$0xff]  }
  0xd1   :  { %6633 = vmatpush3.bf16.msra.mxu1 %v7294_v51  ;;  %6612 = vmatprep.subr.bf16.mxu0 %v7295_v52  ;;  %v7343_v51 = vld [vmem:[%s9359_s1 + $0x740] sm:$0xff]  }
  0xd2   :  { %6634 = vmatprep.subr.bf16.mxu1 %v7296_v53  ;;  %v7344_v52 = vld [vmem:[%s9359_s1 + $0x7c0] sm:$0xff]  }
  0xd3   :  { %v7345_v53 = vld [vmem:[%s9359_s1 + $0x700] sm:$0xff]  }
  0xd4   :  { %6613 = vmatpush3.bf16.msra.mxu0 %v7297_v54  ;;  %v7346_v54 = vld [vmem:[%s9359_s1 + $0x780] sm:$0xff]  }
  0xd5   :  { %6635 = vmatpush3.bf16.msra.mxu1 %v7298_v55  ;;  %6614 = vmatprep.subr.bf16.mxu0 %v7299_v56  ;;  %v35_v55 = vld [vmem:[%s9360_s0 + $0x70] sm:$0xff]  ;;  %v36_v56 = vld [vmem:[%s9360_s0 + $0x78] sm:$0xff] }
  0xd6   :  { %6636 = vmatprep.subr.bf16.mxu1 %v7300_v57 }
  0xd8   :  { %6615 = vmatpush3.bf16.msra.mxu0 %v7301_v58 }
  0xd9   :  { %6637 = vmatpush3.bf16.msra.mxu1 %v7302_v59  ;;  %6616 = vmatprep.subr.bf16.mxu0 %v7303_v60  ;;  %v5785_v59 = vcombine.low %v35_v55, %v35_v55  ;;  %v5786_v60 = vcombine.high %v35_v55, %v35_v55 }
  0xda   :  { %6638 = vmatprep.subr.bf16.mxu1 %v7304_v61  ;;  %v5787_v61 = vcombine.low %v36_v56, %v36_v56 }
  0xdc   :  { %6617 = vmatpush3.bf16.msra.mxu0 %v7305_v62  ;;  %v7351_v62 = vld [vmem:[%s9359_s1 + $0x878] sm:$0xff]  }
  0xdd   :  { %6639 = vmatpush3.bf16.msra.mxu1 %v7306_v63  ;;  %6618 = vmatprep.subr.bf16.mxu0 %v7307_v0  ;;  %v5788_v63 = vcombine.high %v36_v56, %v36_v56  ;;  %v7352_v0 = vld [vmem:[%s9359_s1 + $0x8f8] sm:$0xff]  }
  0xde   :  { %6640 = vmatprep.subr.bf16.mxu1 %v7308_v1 }
  0xe0   :  { %6619 = vmatpush3.bf16.msra.mxu0 %v7309_v2 }
  0xe1   :  { %6641 = vmatpush3.bf16.msra.mxu1 %v7310_v3  ;;  %6648 = vmatprep.subr.bf16.mxu0 %v7315_v11  ;;  %v7353_v3 = vld [vmem:[%s9359_s1 + $0x838] sm:$0xff]   ;;  %v7356_v11 = vld [vmem:[%s9359_s1 + $0x8f0] sm:$0xff]  }
  0xe2   :  { %6670 = vmatprep.subr.bf16.mxu1 %v7316_v13 }
  0xe3   :  { %v6356_v6 = vpop.f32.mrf.mxu0  ;;  %4893 = vmatmul.mubr.bf16.vlgmr.msra.gmra.mxu0 %v5781_v8 }
  0xe4   :  { %v6378_v7 = vpop.f32.mrf.mxu1  ;;  %4933 = vmatmul.mubr.bf16.vlgmr.msra.gmra.mxu1 %v5783_v10  ;;  %6649 = vmatpush3.bf16.msra.mxu0 %v7317_v16  ;;  %v7355_v10 = vld [vmem:[%s9359_s1 + $0x870] sm:$0xff]  }
  0xe5   :  { %v6357_v14 = vpop.f32.mrf.mxu0  ;;  %6671 = vmatpush3.bf16.msra.mxu1 %v7318_v19  ;;  %6650 = vmatprep.subr.bf16.mxu0 %v7319_v24  ;;  %v7358_v16 = vld [vmem:[%s9359_s1 + $0x8b0] sm:$0xff]   ;;  %v7361_v19 = vld [vmem:[%s9359_s1 + $0x828] sm:$0xff]   ;;  %v7366_v24 = vld [vmem:[%s9359_s1 + $0x8a0] sm:$0xff]  }
  0xe6   :  { %v6379_v15 = vpop.f32.mrf.mxu1  ;;  %v6358_v17 = vadd.f32 %v6357_v14, %v6356_v6  ;;  %6672 = vmatprep.subr.bf16.mxu1 %v7320_v25  ;;  %4972 = vmatprep.mubr.bf16.mxu0 %v5786_v60  ;;  %v7354_v6 = vld [vmem:[%s9359_s1 + $0x8b8] sm:$0xff]   ;;  %v7391_v60 = vld [vmem:[%s9359_s1 + $0x970] sm:$0xff]  }
  0xe7   :  { %v6380_v18 = vadd.f32 %v6379_v15, %v6378_v7  ;;  %v6359_v21 = vpop.f32.mrf.mxu0  ;;  %5012 = vmatprep.mubr.bf16.mxu1 %v5788_v63  ;;  %v7357_v15 = vld [vmem:[%s9359_s1 + $0x830] sm:$0xff]   ;;  %v7367_v25 = vld [vmem:[%s9359_s1 + $0x858] sm:$0xff]  }
  0xe8   :  { %v6381_v22 = vpop.f32.mrf.mxu1  ;;  %v4415_v23 = vadd.f32 %v6358_v17, %v5756_v20  ;;  %6651 = vmatpush3.bf16.msra.mxu0 %v7321_v29  ;;  %v7359_v17 = vld [vmem:[%s9359_s1 + $0x868] sm:$0xff]   ;;  %v7363_v21 = vld [vmem:[%s9359_s1 + $0x860] sm:$0xff]   ;;  %v7371_v29 = vld [vmem:[%s9359_s1 + $0x850] sm:$0xff]  }
  0xe9   :  { %v6360_v26 = vpop.f32.mrf.mxu0  ;;  %6673 = vmatpush3.bf16.msra.mxu1 %v7322_v30  ;;  %6652 = vmatprep.subr.bf16.mxu0 %v7323_v31  ;;  %v7362_v20 = vld [vmem:[%s9359_s1 + $0x8a8] sm:$0xff]   ;;  %v7364_v22 = vld [vmem:[%s9359_s1 + $0x8e0] sm:$0xff]   ;;  %v7372_v30 = vld [vmem:[%s9359_s1 + $0x8d0] sm:$0xff]  }
  0xea   :  { %v6382_v27 = vpop.f32.mrf.mxu1  ;;  %v8414_v28 = vadd.f32 %v6380_v18, %v4415_v23  ;;  %6674 = vmatprep.subr.bf16.mxu1 %v7324_v32  ;;  %v7360_v18 = vld [vmem:[%s9359_s1 + $0x8e8] sm:$0xff]   ;;  %v7365_v23 = vld [vmem:[%s9359_s1 + $0x820] sm:$0xff]   ;;  %v7368_v26 = vld [vmem:[%s9359_s1 + $0x8d8] sm:$0xff]  }
  0xeb   :  { %v7369_v27 = vld [vmem:[%s9359_s1 + $0x818] sm:$0xff]   ;;  %v7373_v31 = vld [vmem:[%s9359_s1 + $0x810] sm:$0xff]  }
  0xec   :  { %6653 = vmatpush3.bf16.msra.mxu0 %v7325_v33  ;;  %v7374_v32 = vld [vmem:[%s9359_s1 + $0x890] sm:$0xff]   ;;  %v7375_v33 = vld [vmem:[%s9359_s1 + $0x848] sm:$0xff]  }
  0xed   :  { %6675 = vmatpush3.bf16.msra.mxu1 %v7326_v34  ;;  %6654 = vmatprep.subr.bf16.mxu0 %v7327_v35  ;;  %v7376_v34 = vld [vmem:[%s9359_s1 + $0x8c8] sm:$0xff]   ;;  %v7392_v63 = vld [vmem:[%s9359_s1 + $0x9f0] sm:$0xff]  }
  0xee   :  { %6676 = vmatprep.subr.bf16.mxu1 %v7328_v36  ;;  %v7377_v35 = vld [vmem:[%s9359_s1 + $0x808] sm:$0xff]  }
  0xef   :  { %v7378_v36 = vld [vmem:[%s9359_s1 + $0x888] sm:$0xff]  }
  0xf0   :  { %6655 = vmatpush3.bf16.msra.mxu0 %v7329_v37  ;;  %v7379_v37 = vld [vmem:[%s9359_s1 + $0x840] sm:$0xff]  }
  0xf1   :  { %6677 = vmatpush3.bf16.msra.mxu1 %v7330_v38  ;;  %6656 = vmatprep.subr.bf16.mxu0 %v7331_v39  ;;  %v7380_v38 = vld [vmem:[%s9359_s1 + $0x8c0] sm:$0xff]  }
  0xf2   :  { %6678 = vmatprep.subr.bf16.mxu1 %v7332_v40  ;;  %v7381_v39 = vld [vmem:[%s9359_s1 + $0x800] sm:$0xff]  }
  0xf3   :  { %v7382_v40 = vld [vmem:[%s9359_s1 + $0x880] sm:$0xff]  }
  0xf4   :  { %6657 = vmatpush3.bf16.msra.mxu0 %v7333_v41  ;;  %v37_v41 = vld [vmem:[%s9360_s0 + $0x80] sm:$0xff] }
  0xf5   :  { %6679 = vmatpush3.bf16.msra.mxu1 %v7334_v42  ;;  %6658 = vmatprep.subr.bf16.mxu0 %v7335_v43  ;;  %v5789_v43 = vcombine.low %v37_v41, %v37_v41 }
  0xf6   :  { %6680 = vmatprep.subr.bf16.mxu1 %v7336_v44  ;;  %v5790_v44 = vcombine.high %v37_v41, %v37_v41  ;;  %v7426_v41 = vld [vmem:[%s9359_s1 + $0xab8] sm:$0xff]  }
  0xf8   :  { %6659 = vmatpush3.bf16.msra.mxu0 %v7337_v45  ;;  %v38_v45 = vld [vmem:[%s9360_s0 + $0x88] sm:$0xff] }
  0xf9   :  { %6681 = vmatpush3.bf16.msra.mxu1 %v7338_v46  ;;  %6660 = vmatprep.subr.bf16.mxu0 %v7339_v47  ;;  %v5791_v47 = vcombine.low %v38_v45, %v38_v45 }
  0xfa   :  { %6682 = vmatprep.subr.bf16.mxu1 %v7340_v48  ;;  %v5792_v48 = vcombine.high %v38_v45, %v38_v45 }
  0xfc   :  { %6661 = vmatpush3.bf16.msra.mxu0 %v7341_v49  ;;  %v7387_v49 = vld [vmem:[%s9359_s1 + $0x978] sm:$0xff]  }
  0xfd   :  { %6683 = vmatpush3.bf16.msra.mxu1 %v7342_v50  ;;  %6662 = vmatprep.subr.bf16.mxu0 %v7343_v51  ;;  %v7388_v51 = vld [vmem:[%s9359_s1 + $0x9f8] sm:$0xff]  }
  0xfe   :  { %6684 = vmatprep.subr.bf16.mxu1 %v7344_v52 }
 0x100   :  { %6663 = vmatpush3.bf16.msra.mxu0 %v7345_v53 }
 0x101   :  { %6685 = vmatpush3.bf16.msra.mxu1 %v7346_v54  ;;  %6692 = vmatprep.subr.bf16.mxu0 %v7351_v62  ;;  %v7389_v54 = vld [vmem:[%s9359_s1 + $0x938] sm:$0xff]  }
 0x102   :  { %6714 = vmatprep.subr.bf16.mxu1 %v7352_v0 }
 0x103   :  { %v6400_v57 = vpop.f32.mrf.mxu0  ;;  %4973 = vmatmul.mubr.bf16.vlgmr.msra.gmra.mxu0 %v5785_v59 }
 0x104   :  { %v6422_v58 = vpop.f32.mrf.mxu1  ;;  %5013 = vmatmul.mubr.bf16.vlgmr.msra.gmra.mxu1 %v5787_v61  ;;  %6693 = vmatpush3.bf16.msra.mxu0 %v7353_v3  ;;  %v7395_v3 = vld [vmem:[%s9359_s1 + $0x968] sm:$0xff]  }
 0x105   :  { %v6401_v1 = vpop.f32.mrf.mxu0  ;;  %6715 = vmatpush3.bf16.msra.mxu1 %v7354_v6  ;;  %6694 = vmatprep.subr.bf16.mxu0 %v7355_v10  ;;  %v7398_v6 = vld [vmem:[%s9359_s1 + $0x9a8] sm:$0xff]   ;;  %v7402_v10 = vld [vmem:[%s9359_s1 + $0x9a0] sm:$0xff]  }
 0x106   :  { %v6423_v2 = vpop.f32.mrf.mxu1  ;;  %v6402_v4 = vadd.f32 %v6401_v1, %v6400_v57  ;;  %6716 = vmatprep.subr.bf16.mxu1 %v7356_v11  ;;  %5052 = vmatprep.mubr.bf16.mxu0 %v5790_v44  ;;  %v7390_v57 = vld [vmem:[%s9359_s1 + $0x9b8] sm:$0xff]   ;;  %v7393_v1 = vld [vmem:[%s9359_s1 + $0x930] sm:$0xff]  }
 0x107   :  { %v6424_v5 = vadd.f32 %v6423_v2, %v6422_v58  ;;  %v6403_v7 = vpop.f32.mrf.mxu0  ;;  %5092 = vmatprep.mubr.bf16.mxu1 %v5792_v48  ;;  %v7394_v2 = vld [vmem:[%s9359_s1 + $0x9b0] sm:$0xff]   ;;  %v7403_v11 = vld [vmem:[%s9359_s1 + $0x958] sm:$0xff]  }
 0x108   :  { %v6425_v8 = vpop.f32.mrf.mxu1  ;;  %v4495_v9 = vadd.f32 %v6402_v4, %v8414_v28  ;;  %6695 = vmatpush3.bf16.msra.mxu0 %v7357_v15  ;;  %v7370_v28 = vld [vmem:[%s9359_s1 + $0x898] sm:$0xff]   ;;  %v7396_v4 = vld [vmem:[%s9359_s1 + $0x9e8] sm:$0xff]   ;;  %v7399_v7 = vld [vmem:[%s9359_s1 + $0x960] sm:$0xff]  }
 0x109   :  { %v6404_v12 = vpop.f32.mrf.mxu0  ;;  %6717 = vmatpush3.bf16.msra.mxu1 %v7358_v16  ;;  %6696 = vmatprep.subr.bf16.mxu0 %v7359_v17  ;;  %v7400_v8 = vld [vmem:[%s9359_s1 + $0x9e0] sm:$0xff]   ;;  %v7407_v15 = vld [vmem:[%s9359_s1 + $0x950] sm:$0xff]  }
 0x10a   :  { %v6426_v13 = vpop.f32.mrf.mxu1  ;;  %v8519_v14 = vadd.f32 %v6424_v5, %v4495_v9  ;;  %6718 = vmatprep.subr.bf16.mxu1 %v7360_v18  ;;  %v7397_v5 = vld [vmem:[%s9359_s1 + $0x928] sm:$0xff]   ;;  %v7401_v9 = vld [vmem:[%s9359_s1 + $0x920] sm:$0xff]   ;;  %v7404_v12 = vld [vmem:[%s9359_s1 + $0x9d8] sm:$0xff]  }
 0x10b   :  { %v7405_v13 = vld [vmem:[%s9359_s1 + $0x918] sm:$0xff]   ;;  %v7408_v16 = vld [vmem:[%s9359_s1 + $0x9d0] sm:$0xff]  }
 0x10c   :  { %6697 = vmatpush3.bf16.msra.mxu0 %v7361_v19  ;;  %v7409_v17 = vld [vmem:[%s9359_s1 + $0x910] sm:$0xff]   ;;  %v7411_v19 = vld [vmem:[%s9359_s1 + $0x948] sm:$0xff]  }
 0x10d   :  { %6719 = vmatpush3.bf16.msra.mxu1 %v7362_v20  ;;  %6698 = vmatprep.subr.bf16.mxu0 %v7363_v21  ;;  %v7410_v18 = vld [vmem:[%s9359_s1 + $0x990] sm:$0xff]   ;;  %v7412_v20 = vld [vmem:[%s9359_s1 + $0x9c8] sm:$0xff]  }
 0x10e   :  { %6720 = vmatprep.subr.bf16.mxu1 %v7364_v22  ;;  %v7413_v21 = vld [vmem:[%s9359_s1 + $0x908] sm:$0xff]  }
 0x10f   :  { %v7414_v22 = vld [vmem:[%s9359_s1 + $0x988] sm:$0xff]  }
 0x110   :  { %6699 = vmatpush3.bf16.msra.mxu0 %v7365_v23  ;;  %v7415_v23 = vld [vmem:[%s9359_s1 + $0x940] sm:$0xff]  }
 0x111   :  { %6721 = vmatpush3.bf16.msra.mxu1 %v7366_v24  ;;  %6700 = vmatprep.subr.bf16.mxu0 %v7367_v25  ;;  %v7416_v24 = vld [vmem:[%s9359_s1 + $0x9c0] sm:$0xff]  }
 0x112   :  { %6722 = vmatprep.subr.bf16.mxu1 %v7368_v26  ;;  %v7417_v25 = vld [vmem:[%s9359_s1 + $0x900] sm:$0xff]  }
 0x113   :  { %v7418_v26 = vld [vmem:[%s9359_s1 + $0x980] sm:$0xff]  }
 0x114   :  { %6701 = vmatpush3.bf16.msra.mxu0 %v7369_v27  ;;  %v39_v27 = vld [vmem:[%s9360_s0 + $0x90] sm:$0xff] }
 0x115   :  { %6723 = vmatpush3.bf16.msra.mxu1 %v7370_v28  ;;  %6702 = vmatprep.subr.bf16.mxu0 %v7371_v29  ;;  %v40_v28 = vld [vmem:[%s9360_s0 + $0x98] sm:$0xff] }
 0x116   :  { %6724 = vmatprep.subr.bf16.mxu1 %v7372_v30  ;;  %v5793_v30 = vcombine.low %v39_v27, %v39_v27 }
 0x118   :  { %6703 = vmatpush3.bf16.msra.mxu0 %v7373_v31  ;;  %v5794_v31 = vcombine.high %v39_v27, %v39_v27 }
 0x119   :  { %6725 = vmatpush3.bf16.msra.mxu1 %v7374_v32  ;;  %6704 = vmatprep.subr.bf16.mxu0 %v7375_v33  ;;  %v5795_v32 = vcombine.low %v40_v28, %v40_v28  ;;  %v5796_v33 = vcombine.high %v40_v28, %v40_v28  ;;  %v7462_v28 = vld [vmem:[%s9359_s1 + $0xbb8] sm:$0xff]  }
 0x11a   :  { %6726 = vmatprep.subr.bf16.mxu1 %v7376_v34 }
 0x11c   :  { %6705 = vmatpush3.bf16.msra.mxu0 %v7377_v35  ;;  %v7423_v35 = vld [vmem:[%s9359_s1 + $0xa78] sm:$0xff]  }
 0x11d   :  { %6727 = vmatpush3.bf16.msra.mxu1 %v7378_v36  ;;  %6706 = vmatprep.subr.bf16.mxu0 %v7379_v37  ;;  %v7424_v36 = vld [vmem:[%s9359_s1 + $0xaf8] sm:$0xff]  }
 0x11e   :  { %6728 = vmatprep.subr.bf16.mxu1 %v7380_v38  ;;  %v7425_v38 = vld [vmem:[%s9359_s1 + $0xa38] sm:$0xff]  }
 0x120   :  { %6707 = vmatpush3.bf16.msra.mxu0 %v7381_v39 }
 0x121   :  { %6729 = vmatpush3.bf16.msra.mxu1 %v7382_v40  ;;  %6736 = vmatprep.subr.bf16.mxu0 %v7387_v49 }
 0x122   :  { %6758 = vmatprep.subr.bf16.mxu1 %v7388_v51 }
 0x123   :  { %v6444_v42 = vpop.f32.mrf.mxu0  ;;  %5053 = vmatmul.mubr.bf16.vlgmr.msra.gmra.mxu0 %v5789_v43 }
 0x124   :  { %v6466_v46 = vpop.f32.mrf.mxu1  ;;  %5093 = vmatmul.mubr.bf16.vlgmr.msra.gmra.mxu1 %v5791_v47  ;;  %6737 = vmatpush3.bf16.msra.mxu0 %v7389_v54  ;;  %v7428_v47 = vld [vmem:[%s9359_s1 + $0xaf0] sm:$0xff]   ;;  %v7432_v54 = vld [vmem:[%s9359_s1 + $0xae8] sm:$0xff]  }
 0x125   :  { %v6445_v50 = vpop.f32.mrf.mxu0  ;;  %6759 = vmatpush3.bf16.msra.mxu1 %v7390_v57  ;;  %6738 = vmatprep.subr.bf16.mxu0 %v7391_v60  ;;  %v7435_v57 = vld [vmem:[%s9359_s1 + $0xa60] sm:$0xff]  }
 0x126   :  { %v6446_v52 = vadd.f32 %v6445_v50, %v6444_v42  ;;  %v6467_v53 = vpop.f32.mrf.mxu1  ;;  %6760 = vmatprep.subr.bf16.mxu1 %v7392_v63  ;;  %5132 = vmatprep.mubr.bf16.mxu0 %v5794_v31  ;;  %v7429_v50 = vld [vmem:[%s9359_s1 + $0xa30] sm:$0xff]   ;;  %v7438_v60 = vld [vmem:[%s9359_s1 + $0xaa0] sm:$0xff]   ;;  %v7441_v63 = vld [vmem:[%s9359_s1 + $0xa18] sm:$0xff]  }
 0x127   :  { %v6468_v55 = vadd.f32 %v6467_v53, %v6466_v46  ;;  %v6447_v56 = vpop.f32.mrf.mxu0  ;;  %5172 = vmatprep.mubr.bf16.mxu1 %v5796_v33  ;;  %v7427_v46 = vld [vmem:[%s9359_s1 + $0xa70] sm:$0xff]   ;;  %v7431_v53 = vld [vmem:[%s9359_s1 + $0xa68] sm:$0xff]  }
 0x128   :  { %v4575_v58 = vadd.f32 %v6446_v52, %v8519_v14  ;;  %v6469_v59 = vpop.f32.mrf.mxu1  ;;  %6739 = vmatpush3.bf16.msra.mxu0 %v7393_v1  ;;  %v7406_v14 = vld [vmem:[%s9359_s1 + $0x998] sm:$0xff]   ;;  %v7430_v52 = vld [vmem:[%s9359_s1 + $0xab0] sm:$0xff]   ;;  %v7434_v56 = vld [vmem:[%s9359_s1 + $0xaa8] sm:$0xff]  }
 0x129   :  { %v6448_v61 = vpop.f32.mrf.mxu0  ;;  %6761 = vmatpush3.bf16.msra.mxu1 %v7394_v2  ;;  %6740 = vmatprep.subr.bf16.mxu0 %v7395_v3  ;;  %v7437_v59 = vld [vmem:[%s9359_s1 + $0xa20] sm:$0xff]   ;;  %v7443_v1 = vld [vmem:[%s9359_s1 + $0xa50] sm:$0xff]  }
 0x12a   :  { %v8621_v62 = vadd.f32 %v6468_v55, %v4575_v58  ;;  %v6470_v0 = vpop.f32.mrf.mxu1  ;;  %6762 = vmatprep.subr.bf16.mxu1 %v7396_v4  ;;  %v7433_v55 = vld [vmem:[%s9359_s1 + $0xa28] sm:$0xff]   ;;  %v7436_v58 = vld [vmem:[%s9359_s1 + $0xae0] sm:$0xff]   ;;  %v7439_v61 = vld [vmem:[%s9359_s1 + $0xa58] sm:$0xff]  }
 0x12b   :  { %v7442_v0 = vld [vmem:[%s9359_s1 + $0xa98] sm:$0xff]   ;;  %v7444_v2 = vld [vmem:[%s9359_s1 + $0xad0] sm:$0xff]  }
 0x12c   :  { %6741 = vmatpush3.bf16.msra.mxu0 %v7397_v5  ;;  %v7445_v3 = vld [vmem:[%s9359_s1 + $0xa10] sm:$0xff]   ;;  %v7447_v5 = vld [vmem:[%s9359_s1 + $0xa48] sm:$0xff]  }
 0x12d   :  { %6763 = vmatpush3.bf16.msra.mxu1 %v7398_v6  ;;  %6742 = vmatprep.subr.bf16.mxu0 %v7399_v7  ;;  %v7446_v4 = vld [vmem:[%s9359_s1 + $0xa90] sm:$0xff]   ;;  %v7448_v6 = vld [vmem:[%s9359_s1 + $0xac8] sm:$0xff]  }
 0x12e   :  { %6764 = vmatprep.subr.bf16.mxu1 %v7400_v8  ;;  %v7449_v7 = vld [vmem:[%s9359_s1 + $0xa08] sm:$0xff]   ;;  %v7464_v33 = vld [vmem:[%s9359_s1 + $0xbf0] sm:$0xff]  }
 0x12f   :  { %v7450_v8 = vld [vmem:[%s9359_s1 + $0xa88] sm:$0xff]  }
 0x130   :  { %6743 = vmatpush3.bf16.msra.mxu0 %v7401_v9  ;;  %v7451_v9 = vld [vmem:[%s9359_s1 + $0xa40] sm:$0xff]  }
 0x131   :  { %6765 = vmatpush3.bf16.msra.mxu1 %v7402_v10  ;;  %6744 = vmatprep.subr.bf16.mxu0 %v7403_v11  ;;  %v7452_v10 = vld [vmem:[%s9359_s1 + $0xac0] sm:$0xff]  }
 0x132   :  { %6766 = vmatprep.subr.bf16.mxu1 %v7404_v12  ;;  %v7453_v11 = vld [vmem:[%s9359_s1 + $0xa00] sm:$0xff]  }
 0x133   :  { %v7454_v12 = vld [vmem:[%s9359_s1 + $0xa80] sm:$0xff]  }
 0x134   :  { %6745 = vmatpush3.bf16.msra.mxu0 %v7405_v13  ;;  %v41_v13 = vld [vmem:[%s9360_s0 + $0xa0] sm:$0xff] }
 0x135   :  { %6767 = vmatpush3.bf16.msra.mxu1 %v7406_v14  ;;  %6746 = vmatprep.subr.bf16.mxu0 %v7407_v15  ;;  %v42_v14 = vld [vmem:[%s9360_s0 + $0xa8] sm:$0xff] }
 0x136   :  { %6768 = vmatprep.subr.bf16.mxu1 %v7408_v16 }
 0x138   :  { %6747 = vmatpush3.bf16.msra.mxu0 %v7409_v17  ;;  %v5797_v17 = vcombine.low %v41_v13, %v41_v13 }
 0x139   :  { %6769 = vmatpush3.bf16.msra.mxu1 %v7410_v18  ;;  %6748 = vmatprep.subr.bf16.mxu0 %v7411_v19  ;;  %v5798_v18 = vcombine.high %v41_v13, %v41_v13  ;;  %v5799_v19 = vcombine.low %v42_v14, %v42_v14 }
 0x13a   :  { %6770 = vmatprep.subr.bf16.mxu1 %v7412_v20  ;;  %v7459_v20 = vld [vmem:[%s9359_s1 + $0xb78] sm:$0xff]  }
 0x13c   :  { %6749 = vmatpush3.bf16.msra.mxu0 %v7413_v21  ;;  %v5800_v21 = vcombine.high %v42_v14, %v42_v14 }
 0x13d   :  { %6771 = vmatpush3.bf16.msra.mxu1 %v7414_v22  ;;  %6750 = vmatprep.subr.bf16.mxu0 %v7415_v23  ;;  %v7460_v22 = vld [vmem:[%s9359_s1 + $0xbf8] sm:$0xff]  }
 0x13e   :  { %6772 = vmatprep.subr.bf16.mxu1 %v7416_v24 }
 0x140   :  { %6751 = vmatpush3.bf16.msra.mxu0 %v7417_v25  ;;  %v7461_v25 = vld [vmem:[%s9359_s1 + $0xb38] sm:$0xff]  }
 0x141   :  { %6773 = vmatpush3.bf16.msra.mxu1 %v7418_v26  ;;  %6780 = vmatprep.subr.bf16.mxu0 %v7423_v35 }
 0x142   :  { %6802 = vmatprep.subr.bf16.mxu1 %v7424_v36 }
 0x143   :  { %v6488_v29 = vpop.f32.mrf.mxu0  ;;  %5133 = vmatmul.mubr.bf16.vlgmr.msra.gmra.mxu0 %v5793_v30 }
 0x144   :  { %v6510_v34 = vpop.f32.mrf.mxu1  ;;  %5173 = vmatmul.mubr.bf16.vlgmr.msra.gmra.mxu1 %v5795_v32  ;;  %6781 = vmatpush3.bf16.msra.mxu0 %v7425_v38  ;;  %v7463_v32 = vld [vmem:[%s9359_s1 + $0xb70] sm:$0xff]  }
 0x145   :  { %v6489_v37 = vpop.f32.mrf.mxu0  ;;  %6803 = vmatpush3.bf16.msra.mxu1 %v7426_v41  ;;  %6782 = vmatprep.subr.bf16.mxu0 %v7427_v46  ;;  %v7466_v38 = vld [vmem:[%s9359_s1 + $0xbb0] sm:$0xff]   ;;  %v7469_v41 = vld [vmem:[%s9359_s1 + $0xb28] sm:$0xff]   ;;  %v7474_v46 = vld [vmem:[%s9359_s1 + $0xba0] sm:$0xff]  }
 0x146   :  { %v6490_v39 = vadd.f32 %v6489_v37, %v6488_v29  ;;  %v6511_v40 = vpop.f32.mrf.mxu1  ;;  %6804 = vmatprep.subr.bf16.mxu1 %v7428_v47  ;;  %5212 = vmatprep.mubr.bf16.mxu0 %v5798_v18  ;;  %v7465_v37 = vld [vmem:[%s9359_s1 + $0xb30] sm:$0xff]   ;;  %v7475_v47 = vld [vmem:[%s9359_s1 + $0xb58] sm:$0xff]  }
 0x147   :  { %v6512_v42 = vadd.f32 %v6511_v40, %v6510_v34  ;;  %v6491_v43 = vpop.f32.mrf.mxu0  ;;  %5252 = vmatprep.mubr.bf16.mxu1 %v5800_v21  ;;  %v7468_v40 = vld [vmem:[%s9359_s1 + $0xbe8] sm:$0xff]   ;;  %v7499_v18 = vld [vmem:[%s9359_s1 + $0xc70] sm:$0xff]  }
 0x148   :  { %v4655_v44 = vadd.f32 %v6490_v39, %v8621_v62  ;;  %v6513_v45 = vpop.f32.mrf.mxu1  ;;  %6783 = vmatpush3.bf16.msra.mxu0 %v7429_v50  ;;  %v7440_v62 = vld [vmem:[%s9359_s1 + $0xad8] sm:$0xff]   ;;  %v7467_v39 = vld [vmem:[%s9359_s1 + $0xb68] sm:$0xff]   ;;  %v7471_v43 = vld [vmem:[%s9359_s1 + $0xb60] sm:$0xff]  }
 0x149   :  { %v6492_v48 = vpop.f32.mrf.mxu0  ;;  %6805 = vmatpush3.bf16.msra.mxu1 %v7430_v52  ;;  %6784 = vmatprep.subr.bf16.mxu0 %v7431_v53  ;;  %v7473_v45 = vld [vmem:[%s9359_s1 + $0xb20] sm:$0xff]   ;;  %v7478_v50 = vld [vmem:[%s9359_s1 + $0xb98] sm:$0xff]   ;;  %v7480_v52 = vld [vmem:[%s9359_s1 + $0xbd0] sm:$0xff]  }
 0x14a   :  { %v8729_v49 = vadd.f32 %v6512_v42, %v4655_v44  ;;  %v6514_v51 = vpop.f32.mrf.mxu1  ;;  %6806 = vmatprep.subr.bf16.mxu1 %v7432_v54  ;;  %v7470_v42 = vld [vmem:[%s9359_s1 + $0xba8] sm:$0xff]   ;;  %v7472_v44 = vld [vmem:[%s9359_s1 + $0xbe0] sm:$0xff]   ;;  %v7476_v48 = vld [vmem:[%s9359_s1 + $0xbd8] sm:$0xff]  }
 0x14b   :  { %v7479_v51 = vld [vmem:[%s9359_s1 + $0xb50] sm:$0xff]  }
 0x14c   :  { %6785 = vmatpush3.bf16.msra.mxu0 %v7433_v55  ;;  %v7481_v53 = vld [vmem:[%s9359_s1 + $0xb10] sm:$0xff]   ;;  %v7483_v55 = vld [vmem:[%s9359_s1 + $0xb48] sm:$0xff]  }
 0x14d   :  { %6807 = vmatpush3.bf16.msra.mxu1 %v7434_v56  ;;  %6786 = vmatprep.subr.bf16.mxu0 %v7435_v57  ;;  %v7482_v54 = vld [vmem:[%s9359_s1 + $0xb90] sm:$0xff]   ;;  %v7484_v56 = vld [vmem:[%s9359_s1 + $0xbc8] sm:$0xff]  }
 0x14e   :  { %6808 = vmatprep.subr.bf16.mxu1 %v7436_v58  ;;  %v7485_v57 = vld [vmem:[%s9359_s1 + $0xb08] sm:$0xff]   ;;  %v7500_v21 = vld [vmem:[%s9359_s1 + $0xcf0] sm:$0xff]  }
 0x14f   :  { %v7486_v58 = vld [vmem:[%s9359_s1 + $0xb88] sm:$0xff]  }
 0x150   :  { %6787 = vmatpush3.bf16.msra.mxu0 %v7437_v59  ;;  %v7487_v59 = vld [vmem:[%s9359_s1 + $0xb40] sm:$0xff]  }
 0x151   :  { %6809 = vmatpush3.bf16.msra.mxu1 %v7438_v60  ;;  %6788 = vmatprep.subr.bf16.mxu0 %v7439_v61  ;;  %v7488_v60 = vld [vmem:[%s9359_s1 + $0xbc0] sm:$0xff]  }
 0x152   :  { %6810 = vmatprep.subr.bf16.mxu1 %v7440_v62  ;;  %v7489_v61 = vld [vmem:[%s9359_s1 + $0xb00] sm:$0xff]  }
 0x153   :  { %v7490_v62 = vld [vmem:[%s9359_s1 + $0xb80] sm:$0xff]  }
 0x154   :  { %6789 = vmatpush3.bf16.msra.mxu0 %v7441_v63  ;;  %v43_v63 = vld [vmem:[%s9360_s0 + $0xb0] sm:$0xff] }
 0x155   :  { %6811 = vmatpush3.bf16.msra.mxu1 %v7442_v0  ;;  %6790 = vmatprep.subr.bf16.mxu0 %v7443_v1  ;;  %v5801_v1 = vcombine.low %v43_v63, %v43_v63 }
 0x156   :  { %6812 = vmatprep.subr.bf16.mxu1 %v7444_v2  ;;  %v5802_v2 = vcombine.high %v43_v63, %v43_v63  ;;  %v7534_v63 = vld [vmem:[%s9359_s1 + $0xdb8] sm:$0xff]  }
 0x158   :  { %6791 = vmatpush3.bf16.msra.mxu0 %v7445_v3  ;;  %v44_v3 = vld [vmem:[%s9360_s0 + $0xb8] sm:$0xff] }
 0x159   :  { %6813 = vmatpush3.bf16.msra.mxu1 %v7446_v4  ;;  %6792 = vmatprep.subr.bf16.mxu0 %v7447_v5  ;;  %v5803_v5 = vcombine.low %v44_v3, %v44_v3 }
 0x15a   :  { %6814 = vmatprep.subr.bf16.mxu1 %v7448_v6  ;;  %v5804_v6 = vcombine.high %v44_v3, %v44_v3 }
 0x15c   :  { %6793 = vmatpush3.bf16.msra.mxu0 %v7449_v7  ;;  %v7495_v7 = vld [vmem:[%s9359_s1 + $0xc78] sm:$0xff]  }
 0x15d   :  { %6815 = vmatpush3.bf16.msra.mxu1 %v7450_v8  ;;  %6794 = vmatprep.subr.bf16.mxu0 %v7451_v9  ;;  %v7496_v9 = vld [vmem:[%s9359_s1 + $0xcf8] sm:$0xff]  }
 0x15e   :  { %6816 = vmatprep.subr.bf16.mxu1 %v7452_v10 }
 0x160   :  { %6795 = vmatpush3.bf16.msra.mxu0 %v7453_v11 }
 0x161   :  { %6817 = vmatpush3.bf16.msra.mxu1 %v7454_v12  ;;  %6824 = vmatprep.subr.bf16.mxu0 %v7459_v20  ;;  %v7497_v12 = vld [vmem:[%s9359_s1 + $0xc38] sm:$0xff]  }
 0x162   :  { %6846 = vmatprep.subr.bf16.mxu1 %v7460_v22 }
 0x163   :  { %v6532_v15 = vpop.f32.mrf.mxu0  ;;  %5213 = vmatmul.mubr.bf16.vlgmr.msra.gmra.mxu0 %v5797_v17 }
 0x164   :  { %v6554_v16 = vpop.f32.mrf.mxu1  ;;  %5253 = vmatmul.mubr.bf16.vlgmr.msra.gmra.mxu1 %v5799_v19  ;;  %6825 = vmatpush3.bf16.msra.mxu0 %v7461_v25  ;;  %v7503_v25 = vld [vmem:[%s9359_s1 + $0xc68] sm:$0xff]  }
 0x165   :  { %v6533_v23 = vpop.f32.mrf.mxu0  ;;  %6847 = vmatpush3.bf16.msra.mxu1 %v7462_v28  ;;  %6826 = vmatprep.subr.bf16.mxu0 %v7463_v32  ;;  %v7506_v28 = vld [vmem:[%s9359_s1 + $0xca8] sm:$0xff]   ;;  %v7510_v32 = vld [vmem:[%s9359_s1 + $0xca0] sm:$0xff]  }
 0x166   :  { %v6555_v24 = vpop.f32.mrf.mxu1  ;;  %v6534_v26 = vadd.f32 %v6533_v23, %v6532_v15  ;;  %6848 = vmatprep.subr.bf16.mxu1 %v7464_v33  ;;  %5292 = vmatprep.mubr.bf16.mxu0 %v5802_v2  ;;  %v7498_v15 = vld [vmem:[%s9359_s1 + $0xcb8] sm:$0xff]   ;;  %v7501_v23 = vld [vmem:[%s9359_s1 + $0xc30] sm:$0xff]  }
 0x167   :  { %v6556_v27 = vadd.f32 %v6555_v24, %v6554_v16  ;;  %v6535_v29 = vpop.f32.mrf.mxu0  ;;  %5332 = vmatprep.mubr.bf16.mxu1 %v5804_v6  ;;  %v7502_v24 = vld [vmem:[%s9359_s1 + $0xcb0] sm:$0xff]   ;;  %v7511_v33 = vld [vmem:[%s9359_s1 + $0xc58] sm:$0xff]  }
 0x168   :  { %v6557_v30 = vpop.f32.mrf.mxu1  ;;  %v4735_v31 = vadd.f32 %v6534_v26, %v8729_v49  ;;  %6827 = vmatpush3.bf16.msra.mxu0 %v7465_v37  ;;  %v7477_v49 = vld [vmem:[%s9359_s1 + $0xb18] sm:$0xff]   ;;  %v7504_v26 = vld [vmem:[%s9359_s1 + $0xce8] sm:$0xff]   ;;  %v7507_v29 = vld [vmem:[%s9359_s1 + $0xc60] sm:$0xff]  }
 0x169   :  { %v6536_v34 = vpop.f32.mrf.mxu0  ;;  %6849 = vmatpush3.bf16.msra.mxu1 %v7466_v38  ;;  %6828 = vmatprep.subr.bf16.mxu0 %v7467_v39  ;;  %v7508_v30 = vld [vmem:[%s9359_s1 + $0xce0] sm:$0xff]   ;;  %v7515_v37 = vld [vmem:[%s9359_s1 + $0xc50] sm:$0xff]  }
 0x16a   :  { %v6558_v35 = vpop.f32.mrf.mxu1  ;;  %v8834_v36 = vadd.f32 %v6556_v27, %v4735_v31  ;;  %6850 = vmatprep.subr.bf16.mxu1 %v7468_v40  ;;  %v7505_v27 = vld [vmem:[%s9359_s1 + $0xc28] sm:$0xff]   ;;  %v7509_v31 = vld [vmem:[%s9359_s1 + $0xc20] sm:$0xff]   ;;  %v7512_v34 = vld [vmem:[%s9359_s1 + $0xcd8] sm:$0xff]  }
 0x16b   :  { %v7513_v35 = vld [vmem:[%s9359_s1 + $0xc18] sm:$0xff]   ;;  %v7516_v38 = vld [vmem:[%s9359_s1 + $0xcd0] sm:$0xff]  }
 0x16c   :  { %6829 = vmatpush3.bf16.msra.mxu0 %v7469_v41  ;;  %v7517_v39 = vld [vmem:[%s9359_s1 + $0xc10] sm:$0xff]   ;;  %v7519_v41 = vld [vmem:[%s9359_s1 + $0xc48] sm:$0xff]  }
 0x16d   :  { %6851 = vmatpush3.bf16.msra.mxu1 %v7470_v42  ;;  %6830 = vmatprep.subr.bf16.mxu0 %v7471_v43  ;;  %v7518_v40 = vld [vmem:[%s9359_s1 + $0xc90] sm:$0xff]   ;;  %v7520_v42 = vld [vmem:[%s9359_s1 + $0xcc8] sm:$0xff]  }
 0x16e   :  { %6852 = vmatprep.subr.bf16.mxu1 %v7472_v44  ;;  %v7521_v43 = vld [vmem:[%s9359_s1 + $0xc08] sm:$0xff]  }
 0x16f   :  { %v7522_v44 = vld [vmem:[%s9359_s1 + $0xc88] sm:$0xff]  }
 0x170   :  { %6831 = vmatpush3.bf16.msra.mxu0 %v7473_v45  ;;  %v7523_v45 = vld [vmem:[%s9359_s1 + $0xc40] sm:$0xff]  }
 0x171   :  { %6853 = vmatpush3.bf16.msra.mxu1 %v7474_v46  ;;  %6832 = vmatprep.subr.bf16.mxu0 %v7475_v47  ;;  %v7524_v46 = vld [vmem:[%s9359_s1 + $0xcc0] sm:$0xff]  }
 0x172   :  { %6854 = vmatprep.subr.bf16.mxu1 %v7476_v48  ;;  %v7525_v47 = vld [vmem:[%s9359_s1 + $0xc00] sm:$0xff]  }
 0x173   :  { %v7526_v48 = vld [vmem:[%s9359_s1 + $0xc80] sm:$0xff]  }
 0x174   :  { %6833 = vmatpush3.bf16.msra.mxu0 %v7477_v49  ;;  %v45_v49 = vld [vmem:[%s9360_s0 + $0xc0] sm:$0xff] }
 0x175   :  { %6855 = vmatpush3.bf16.msra.mxu1 %v7478_v50  ;;  %6834 = vmatprep.subr.bf16.mxu0 %v7479_v51  ;;  %v46_v50 = vld [vmem:[%s9360_s0 + $0xc8] sm:$0xff] }
 0x176   :  { %6856 = vmatprep.subr.bf16.mxu1 %v7480_v52  ;;  %v5805_v52 = vcombine.low %v45_v49, %v45_v49 }
 0x178   :  { %6835 = vmatpush3.bf16.msra.mxu0 %v7481_v53  ;;  %v5806_v53 = vcombine.high %v45_v49, %v45_v49  ;;  %v7570_v49 = vld [vmem:[%s9359_s1 + $0xeb8] sm:$0xff]  }
 0x179   :  { %6857 = vmatpush3.bf16.msra.mxu1 %v7482_v54  ;;  %6836 = vmatprep.subr.bf16.mxu0 %v7483_v55  ;;  %v5807_v54 = vcombine.low %v46_v50, %v46_v50  ;;  %v5808_v55 = vcombine.high %v46_v50, %v46_v50 }
 0x17a   :  { %6858 = vmatprep.subr.bf16.mxu1 %v7484_v56 }
 0x17c   :  { %6837 = vmatpush3.bf16.msra.mxu0 %v7485_v57  ;;  %v7531_v57 = vld [vmem:[%s9359_s1 + $0xd78] sm:$0xff]  }
 0x17d   :  { %6859 = vmatpush3.bf16.msra.mxu1 %v7486_v58  ;;  %6838 = vmatprep.subr.bf16.mxu0 %v7487_v59  ;;  %v7532_v58 = vld [vmem:[%s9359_s1 + $0xdf8] sm:$0xff]  }
 0x17e   :  { %6860 = vmatprep.subr.bf16.mxu1 %v7488_v60  ;;  %v7533_v60 = vld [vmem:[%s9359_s1 + $0xd38] sm:$0xff]  }
 0x180   :  { %6839 = vmatpush3.bf16.msra.mxu0 %v7489_v61 }
 0x181   :  { %6861 = vmatpush3.bf16.msra.mxu1 %v7490_v62  ;;  %6868 = vmatprep.subr.bf16.mxu0 %v7495_v7 }
 0x182   :  { %6890 = vmatprep.subr.bf16.mxu1 %v7496_v9 }
 0x183   :  { %v6576_v0 = vpop.f32.mrf.mxu0  ;;  %5293 = vmatmul.mubr.bf16.vlgmr.msra.gmra.mxu0 %v5801_v1 }
 0x184   :  { %v6598_v4 = vpop.f32.mrf.mxu1  ;;  %5333 = vmatmul.mubr.bf16.vlgmr.msra.gmra.mxu1 %v5803_v5  ;;  %6869 = vmatpush3.bf16.msra.mxu0 %v7497_v12  ;;  %v7536_v5 = vld [vmem:[%s9359_s1 + $0xdf0] sm:$0xff]   ;;  %v7540_v12 = vld [vmem:[%s9359_s1 + $0xde8] sm:$0xff]  }
 0x185   :  { %v6577_v8 = vpop.f32.mrf.mxu0  ;;  %6891 = vmatpush3.bf16.msra.mxu1 %v7498_v15  ;;  %6870 = vmatprep.subr.bf16.mxu0 %v7499_v18  ;;  %v7543_v15 = vld [vmem:[%s9359_s1 + $0xd60] sm:$0xff]  }
 0x186   :  { %v6578_v10 = vadd.f32 %v6577_v8, %v6576_v0  ;;  %v6599_v11 = vpop.f32.mrf.mxu1  ;;  %6892 = vmatprep.subr.bf16.mxu1 %v7500_v21  ;;  %5372 = vmatprep.mubr.bf16.mxu0 %v5806_v53  ;;  %v7537_v8 = vld [vmem:[%s9359_s1 + $0xd30] sm:$0xff]   ;;  %v7546_v18 = vld [vmem:[%s9359_s1 + $0xda0] sm:$0xff]   ;;  %v7549_v21 = vld [vmem:[%s9359_s1 + $0xd18] sm:$0xff]  }
 0x187   :  { %v6600_v13 = vadd.f32 %v6599_v11, %v6598_v4  ;;  %v6579_v14 = vpop.f32.mrf.mxu0  ;;  %5412 = vmatprep.mubr.bf16.mxu1 %v5808_v55  ;;  %v7535_v4 = vld [vmem:[%s9359_s1 + $0xd70] sm:$0xff]   ;;  %v7539_v11 = vld [vmem:[%s9359_s1 + $0xd68] sm:$0xff]  }
 0x188   :  { %v4815_v16 = vadd.f32 %v6578_v10, %v8834_v36  ;;  %v6601_v17 = vpop.f32.mrf.mxu1  ;;  %6871 = vmatpush3.bf16.msra.mxu0 %v7501_v23  ;;  %v7514_v36 = vld [vmem:[%s9359_s1 + $0xc98] sm:$0xff]   ;;  %v7538_v10 = vld [vmem:[%s9359_s1 + $0xdb0] sm:$0xff]   ;;  %v7542_v14 = vld [vmem:[%s9359_s1 + $0xda8] sm:$0xff]  }
 0x189   :  { %v6580_v19 = vpop.f32.mrf.mxu0  ;;  %6893 = vmatpush3.bf16.msra.mxu1 %v7502_v24  ;;  %6872 = vmatprep.subr.bf16.mxu0 %v7503_v25  ;;  %v7545_v17 = vld [vmem:[%s9359_s1 + $0xd20] sm:$0xff]   ;;  %v7551_v23 = vld [vmem:[%s9359_s1 + $0xd50] sm:$0xff]  }
 0x18a   :  { %v8936_v20 = vadd.f32 %v6600_v13, %v4815_v16  ;;  %v6602_v22 = vpop.f32.mrf.mxu1  ;;  %6894 = vmatprep.subr.bf16.mxu1 %v7504_v26  ;;  %v7541_v13 = vld [vmem:[%s9359_s1 + $0xd28] sm:$0xff]   ;;  %v7544_v16 = vld [vmem:[%s9359_s1 + $0xde0] sm:$0xff]   ;;  %v7547_v19 = vld [vmem:[%s9359_s1 + $0xd58] sm:$0xff]  }
 0x18b   :  { %v7550_v22 = vld [vmem:[%s9359_s1 + $0xd98] sm:$0xff]   ;;  %v7552_v24 = vld [vmem:[%s9359_s1 + $0xdd0] sm:$0xff]  }
 0x18c   :  { %6873 = vmatpush3.bf16.msra.mxu0 %v7505_v27  ;;  %v7553_v25 = vld [vmem:[%s9359_s1 + $0xd10] sm:$0xff]   ;;  %v7555_v27 = vld [vmem:[%s9359_s1 + $0xd48] sm:$0xff]  }
 0x18d   :  { %6895 = vmatpush3.bf16.msra.mxu1 %v7506_v28  ;;  %6874 = vmatprep.subr.bf16.mxu0 %v7507_v29  ;;  %v7554_v26 = vld [vmem:[%s9359_s1 + $0xd90] sm:$0xff]   ;;  %v7556_v28 = vld [vmem:[%s9359_s1 + $0xdc8] sm:$0xff]  }
 0x18e   :  { %6896 = vmatprep.subr.bf16.mxu1 %v7508_v30  ;;  %v7557_v29 = vld [vmem:[%s9359_s1 + $0xd08] sm:$0xff]   ;;  %v7572_v55 = vld [vmem:[%s9359_s1 + $0xef0] sm:$0xff]  }
 0x18f   :  { %v7558_v30 = vld [vmem:[%s9359_s1 + $0xd88] sm:$0xff]  }
 0x190   :  { %6875 = vmatpush3.bf16.msra.mxu0 %v7509_v31  ;;  %v7559_v31 = vld [vmem:[%s9359_s1 + $0xd40] sm:$0xff]  }
 0x191   :  { %6897 = vmatpush3.bf16.msra.mxu1 %v7510_v32  ;;  %6876 = vmatprep.subr.bf16.mxu0 %v7511_v33  ;;  %v7560_v32 = vld [vmem:[%s9359_s1 + $0xdc0] sm:$0xff]  }
 0x192   :  { %6898 = vmatprep.subr.bf16.mxu1 %v7512_v34  ;;  %v7561_v33 = vld [vmem:[%s9359_s1 + $0xd00] sm:$0xff]  }
 0x193   :  { %v7562_v34 = vld [vmem:[%s9359_s1 + $0xd80] sm:$0xff]  }
 0x194   :  { %6877 = vmatpush3.bf16.msra.mxu0 %v7513_v35  ;;  %v47_v35 = vld [vmem:[%s9360_s0 + $0xd0] sm:$0xff] }
 0x195   :  { %6899 = vmatpush3.bf16.msra.mxu1 %v7514_v36  ;;  %6878 = vmatprep.subr.bf16.mxu0 %v7515_v37  ;;  %v48_v36 = vld [vmem:[%s9360_s0 + $0xd8] sm:$0xff] }
 0x196   :  { %6900 = vmatprep.subr.bf16.mxu1 %v7516_v38  ;;  %v5809_v38 = vcombine.low %v47_v35, %v47_v35 }
 0x198   :  { %6879 = vmatpush3.bf16.msra.mxu0 %v7517_v39  ;;  %v5810_v39 = vcombine.high %v47_v35, %v47_v35 }
 0x199   :  { %6901 = vmatpush3.bf16.msra.mxu1 %v7518_v40  ;;  %6880 = vmatprep.subr.bf16.mxu0 %v7519_v41  ;;  %v5811_v40 = vcombine.low %v48_v36, %v48_v36 }
 0x19a   :  { %6902 = vmatprep.subr.bf16.mxu1 %v7520_v42  ;;  %v7567_v42 = vld [vmem:[%s9359_s1 + $0xe78] sm:$0xff]  }
 0x19c   :  { %6881 = vmatpush3.bf16.msra.mxu0 %v7521_v43  ;;  %v5812_v43 = vcombine.high %v48_v36, %v48_v36  ;;  %v7606_v36 = vld [vmem:[%s9359_s1 + $0xfb8] sm:$0xff]  }
 0x19d   :  { %6903 = vmatpush3.bf16.msra.mxu1 %v7522_v44  ;;  %6882 = vmatprep.subr.bf16.mxu0 %v7523_v45  ;;  %v7568_v44 = vld [vmem:[%s9359_s1 + $0xef8] sm:$0xff]  }
 0x19e   :  { %6904 = vmatprep.subr.bf16.mxu1 %v7524_v46  ;;  %v7569_v46 = vld [vmem:[%s9359_s1 + $0xe38] sm:$0xff]  }
 0x1a0   :  { %6883 = vmatpush3.bf16.msra.mxu0 %v7525_v47 }
 0x1a1   :  { %6905 = vmatpush3.bf16.msra.mxu1 %v7526_v48  ;;  %6912 = vmatprep.subr.bf16.mxu0 %v7531_v57 }
 0x1a2   :  { %6934 = vmatprep.subr.bf16.mxu1 %v7532_v58  ;;  %v7573_v58 = vld [vmem:[%s9359_s1 + $0xe30] sm:$0xff]  }
 0x1a3   :  { %v6620_v51 = vpop.f32.mrf.mxu0  ;;  %5373 = vmatmul.mubr.bf16.vlgmr.msra.gmra.mxu0 %v5805_v52 }
 0x1a4   :  { %v6642_v56 = vpop.f32.mrf.mxu1  ;;  %5413 = vmatmul.mubr.bf16.vlgmr.msra.gmra.mxu1 %v5807_v54  ;;  %6913 = vmatpush3.bf16.msra.mxu0 %v7533_v60  ;;  %v7571_v54 = vld [vmem:[%s9359_s1 + $0xe70] sm:$0xff]  }
 0x1a5   :  { %v6621_v59 = vpop.f32.mrf.mxu0  ;;  %6935 = vmatpush3.bf16.msra.mxu1 %v7534_v63  ;;  %6914 = vmatprep.subr.bf16.mxu0 %v7535_v4  ;;  %v7574_v60 = vld [vmem:[%s9359_s1 + $0xeb0] sm:$0xff]   ;;  %v7577_v63 = vld [vmem:[%s9359_s1 + $0xe28] sm:$0xff]   ;;  %v7582_v4 = vld [vmem:[%s9359_s1 + $0xea0] sm:$0xff]  }
 0x1a6   :  { %v6622_v61 = vadd.f32 %v6621_v59, %v6620_v51  ;;  %v6643_v62 = vpop.f32.mrf.mxu1  ;;  %6936 = vmatprep.subr.bf16.mxu1 %v7536_v5  ;;  %5452 = vmatprep.mubr.bf16.mxu0 %v5810_v39  ;;  %v7583_v5 = vld [vmem:[%s9359_s1 + $0xe58] sm:$0xff]  }
 0x1a7   :  { %v6644_v0 = vadd.f32 %v6643_v62, %v6642_v56  ;;  %v6623_v1 = vpop.f32.mrf.mxu0  ;;  %5492 = vmatprep.mubr.bf16.mxu1 %v5812_v43  ;;  %v7576_v62 = vld [vmem:[%s9359_s1 + $0xee8] sm:$0xff]  }
 0x1a8   :  { %v4895_v2 = vadd.f32 %v6622_v61, %v8936_v20  ;;  %v6645_v3 = vpop.f32.mrf.mxu1  ;;  %6915 = vmatpush3.bf16.msra.mxu0 %v7537_v8  ;;  %v7548_v20 = vld [vmem:[%s9359_s1 + $0xdd8] sm:$0xff]   ;;  %v7575_v61 = vld [vmem:[%s9359_s1 + $0xe68] sm:$0xff]   ;;  %v7579_v1 = vld [vmem:[%s9359_s1 + $0xe60] sm:$0xff]  }
 0x1a9   :  { %v6624_v6 = vpop.f32.mrf.mxu0  ;;  %6937 = vmatpush3.bf16.msra.mxu1 %v7538_v10  ;;  %6916 = vmatprep.subr.bf16.mxu0 %v7539_v11  ;;  %v7581_v3 = vld [vmem:[%s9359_s1 + $0xe20] sm:$0xff]   ;;  %v7586_v8 = vld [vmem:[%s9359_s1 + $0xe98] sm:$0xff]   ;;  %v7588_v10 = vld [vmem:[%s9359_s1 + $0xed0] sm:$0xff]  }
 0x1aa   :  { %v9044_v7 = vadd.f32 %v6644_v0, %v4895_v2  ;;  %v6646_v9 = vpop.f32.mrf.mxu1  ;;  %6938 = vmatprep.subr.bf16.mxu1 %v7540_v12  ;;  %v7578_v0 = vld [vmem:[%s9359_s1 + $0xea8] sm:$0xff]   ;;  %v7580_v2 = vld [vmem:[%s9359_s1 + $0xee0] sm:$0xff]   ;;  %v7584_v6 = vld [vmem:[%s9359_s1 + $0xed8] sm:$0xff]  }
 0x1ab   :  { %v7587_v9 = vld [vmem:[%s9359_s1 + $0xe50] sm:$0xff]  }
 0x1ac   :  { %6917 = vmatpush3.bf16.msra.mxu0 %v7541_v13  ;;  %v7589_v11 = vld [vmem:[%s9359_s1 + $0xe10] sm:$0xff]   ;;  %v7591_v13 = vld [vmem:[%s9359_s1 + $0xe48] sm:$0xff]  }
 0x1ad   :  { %6939 = vmatpush3.bf16.msra.mxu1 %v7542_v14  ;;  %6918 = vmatprep.subr.bf16.mxu0 %v7543_v15  ;;  %v7590_v12 = vld [vmem:[%s9359_s1 + $0xe90] sm:$0xff]   ;;  %v7592_v14 = vld [vmem:[%s9359_s1 + $0xec8] sm:$0xff]  }
 0x1ae   :  { %6940 = vmatprep.subr.bf16.mxu1 %v7544_v16  ;;  %v7593_v15 = vld [vmem:[%s9359_s1 + $0xe08] sm:$0xff]  }
 0x1af   :  { %v7594_v16 = vld [vmem:[%s9359_s1 + $0xe88] sm:$0xff]  }
 0x1b0   :  { %6919 = vmatpush3.bf16.msra.mxu0 %v7545_v17  ;;  %v7595_v17 = vld [vmem:[%s9359_s1 + $0xe40] sm:$0xff]  }
 0x1b1   :  { %6941 = vmatpush3.bf16.msra.mxu1 %v7546_v18  ;;  %6920 = vmatprep.subr.bf16.mxu0 %v7547_v19  ;;  %v7596_v18 = vld [vmem:[%s9359_s1 + $0xec0] sm:$0xff]  }
 0x1b2   :  { %6942 = vmatprep.subr.bf16.mxu1 %v7548_v20  ;;  %v7597_v19 = vld [vmem:[%s9359_s1 + $0xe00] sm:$0xff]  }
 0x1b3   :  { %v7598_v20 = vld [vmem:[%s9359_s1 + $0xe80] sm:$0xff]  }
 0x1b4   :  { %6921 = vmatpush3.bf16.msra.mxu0 %v7549_v21  ;;  %v49_v21 = vld [vmem:[%s9360_s0 + $0xe0] sm:$0xff] }
 0x1b5   :  { %6943 = vmatpush3.bf16.msra.mxu1 %v7550_v22  ;;  %6922 = vmatprep.subr.bf16.mxu0 %v7551_v23  ;;  %v5813_v22 = vcombine.low %v49_v21, %v49_v21  ;;  %v5814_v23 = vcombine.high %v49_v21, %v49_v21 }
 0x1b6   :  { %6944 = vmatprep.subr.bf16.mxu1 %v7552_v24  ;;  %v50_v24 = vld [vmem:[%s9360_s0 + $0xe8] sm:$0xff] }
 0x1b8   :  { %6923 = vmatpush3.bf16.msra.mxu0 %v7553_v25 }
 0x1b9   :  { %6945 = vmatpush3.bf16.msra.mxu1 %v7554_v26  ;;  %6924 = vmatprep.subr.bf16.mxu0 %v7555_v27  ;;  %v5815_v27 = vcombine.low %v50_v24, %v50_v24 }
 0x1ba   :  { %6946 = vmatprep.subr.bf16.mxu1 %v7556_v28  ;;  %v5816_v28 = vcombine.high %v50_v24, %v50_v24 }
 0x1bc   :  { %6925 = vmatpush3.bf16.msra.mxu0 %v7557_v29  ;;  %v7603_v29 = vld [vmem:[%s9359_s1 + $0xf78] sm:$0xff]  }
 0x1bd   :  { %6947 = vmatpush3.bf16.msra.mxu1 %v7558_v30  ;;  %6926 = vmatprep.subr.bf16.mxu0 %v7559_v31  ;;  %v7604_v30 = vld [vmem:[%s9359_s1 + $0xff8] sm:$0xff]  }
 0x1be   :  { %6948 = vmatprep.subr.bf16.mxu1 %v7560_v32 }
 0x1c0   :  { %6927 = vmatpush3.bf16.msra.mxu0 %v7561_v33  ;;  %v7605_v33 = vld [vmem:[%s9359_s1 + $0xf38] sm:$0xff]  }
 0x1c1   :  { %6949 = vmatpush3.bf16.msra.mxu1 %v7562_v34  ;;  %6956 = vmatprep.subr.bf16.mxu0 %v7567_v42 }
 0x1c2   :  { %6978 = vmatprep.subr.bf16.mxu1 %v7568_v44 }
 0x1c3   :  { %v6664_v37 = vpop.f32.mrf.mxu0  ;;  %5453 = vmatmul.mubr.bf16.vlgmr.msra.gmra.mxu0 %v5809_v38 }
 0x1c4   :  { %v6686_v41 = vpop.f32.mrf.mxu1  ;;  %5493 = vmatmul.mubr.bf16.vlgmr.msra.gmra.mxu1 %v5811_v40  ;;  %6957 = vmatpush3.bf16.msra.mxu0 %v7569_v46  ;;  %v7607_v40 = vld [vmem:[%s9359_s1 + $0xf70] sm:$0xff]  }
 0x1c5   :  { %v6665_v45 = vpop.f32.mrf.mxu0  ;;  %6979 = vmatpush3.bf16.msra.mxu1 %v7570_v49  ;;  %6958 = vmatprep.subr.bf16.mxu0 %v7571_v54  ;;  %v7610_v46 = vld [vmem:[%s9359_s1 + $0xfb0] sm:$0xff]   ;;  %v7613_v49 = vld [vmem:[%s9359_s1 + $0xf28] sm:$0xff]   ;;  %v7618_v54 = vld [vmem:[%s9359_s1 + $0xfa0] sm:$0xff]  }
 0x1c6   :  { %v6666_v47 = vadd.f32 %v6665_v45, %v6664_v37  ;;  %v6687_v48 = vpop.f32.mrf.mxu1  ;;  %6980 = vmatprep.subr.bf16.mxu1 %v7572_v55  ;;  %5532 = vmatprep.mubr.bf16.mxu0 %v5814_v23  ;;  %v7609_v45 = vld [vmem:[%s9359_s1 + $0xf30] sm:$0xff]   ;;  %v7619_v55 = vld [vmem:[%s9359_s1 + $0xf58] sm:$0xff]  }
 0x1c7   :  { %v6688_v50 = vadd.f32 %v6687_v48, %v6686_v41  ;;  %v6667_v51 = vpop.f32.mrf.mxu0  ;;  %5572 = vmatprep.mubr.bf16.mxu1 %v5816_v28  ;;  %v7608_v41 = vld [vmem:[%s9359_s1 + $0xff0] sm:$0xff]   ;;  %v7612_v48 = vld [vmem:[%s9359_s1 + $0xfe8] sm:$0xff]  }
 0x1c8   :  { %v4975_v52 = vadd.f32 %v6666_v47, %v9044_v7  ;;  %v6689_v53 = vpop.f32.mrf.mxu1  ;;  %6959 = vmatpush3.bf16.msra.mxu0 %v7573_v58  ;;  %v7585_v7 = vld [vmem:[%s9359_s1 + $0xe18] sm:$0xff]   ;;  %v7611_v47 = vld [vmem:[%s9359_s1 + $0xf68] sm:$0xff]   ;;  %v7615_v51 = vld [vmem:[%s9359_s1 + $0xf60] sm:$0xff]  }
 0x1c9   :  { %v6668_v56 = vpop.f32.mrf.mxu0  ;;  %6981 = vmatpush3.bf16.msra.mxu1 %v7574_v60  ;;  %6960 = vmatprep.subr.bf16.mxu0 %v7575_v61  ;;  %v7617_v53 = vld [vmem:[%s9359_s1 + $0xf20] sm:$0xff]   ;;  %v7622_v58 = vld [vmem:[%s9359_s1 + $0xf98] sm:$0xff]   ;;  %v7624_v60 = vld [vmem:[%s9359_s1 + $0xfd0] sm:$0xff]  }
 0x1ca   :  { %v9149_v57 = vadd.f32 %v6688_v50, %v4975_v52  ;;  %v6690_v59 = vpop.f32.mrf.mxu1  ;;  %6982 = vmatprep.subr.bf16.mxu1 %v7576_v62  ;;  %v7614_v50 = vld [vmem:[%s9359_s1 + $0xfa8] sm:$0xff]   ;;  %v7616_v52 = vld [vmem:[%s9359_s1 + $0xfe0] sm:$0xff]   ;;  %v7620_v56 = vld [vmem:[%s9359_s1 + $0xfd8] sm:$0xff]  }
 0x1cb   :  { %v7623_v59 = vld [vmem:[%s9359_s1 + $0xf50] sm:$0xff]  }
 0x1cc   :  { %6961 = vmatpush3.bf16.msra.mxu0 %v7577_v63  ;;  %v7625_v61 = vld [vmem:[%s9359_s1 + $0xf10] sm:$0xff]   ;;  %v7627_v63 = vld [vmem:[%s9359_s1 + $0xf48] sm:$0xff]  }
 0x1cd   :  { %6983 = vmatpush3.bf16.msra.mxu1 %v7578_v0  ;;  %6962 = vmatprep.subr.bf16.mxu0 %v7579_v1  ;;  %v7626_v62 = vld [vmem:[%s9359_s1 + $0xf90] sm:$0xff]   ;;  %v7628_v0 = vld [vmem:[%s9359_s1 + $0xfc8] sm:$0xff]  }
 0x1ce   :  { %6984 = vmatprep.subr.bf16.mxu1 %v7580_v2  ;;  %v7629_v1 = vld [vmem:[%s9359_s1 + $0xf08] sm:$0xff]  }
 0x1cf   :  { %v7630_v2 = vld [vmem:[%s9359_s1 + $0xf88] sm:$0xff]  }
 0x1d0   :  { %6963 = vmatpush3.bf16.msra.mxu0 %v7581_v3  ;;  %v7631_v3 = vld [vmem:[%s9359_s1 + $0xf40] sm:$0xff]  }
 0x1d1   :  { %6985 = vmatpush3.bf16.msra.mxu1 %v7582_v4  ;;  %6964 = vmatprep.subr.bf16.mxu0 %v7583_v5  ;;  %v7632_v4 = vld [vmem:[%s9359_s1 + $0xfc0] sm:$0xff]  }
 0x1d2   :  { %6986 = vmatprep.subr.bf16.mxu1 %v7584_v6  ;;  %v7633_v5 = vld [vmem:[%s9359_s1 + $0xf00] sm:$0xff]  }
 0x1d3   :  { %v7634_v6 = vld [vmem:[%s9359_s1 + $0xf80] sm:$0xff]  }
 0x1d4   :  { %6965 = vmatpush3.bf16.msra.mxu0 %v7585_v7  ;;  %v51_v7 = vld [vmem:[%s9360_s0 + $0xf0] sm:$0xff] }
 0x1d5   :  { %6987 = vmatpush3.bf16.msra.mxu1 %v7586_v8  ;;  %6966 = vmatprep.subr.bf16.mxu0 %v7587_v9  ;;  %v52_v8 = vld [vmem:[%s9360_s0 + $0xf8] sm:$0xff] }
 0x1d6   :  { %6988 = vmatprep.subr.bf16.mxu1 %v7588_v10  ;;  %v5817_v10 = vcombine.low %v51_v7, %v51_v7 }
 0x1d8   :  { %6967 = vmatpush3.bf16.msra.mxu0 %v7589_v11  ;;  %v5818_v11 = vcombine.high %v51_v7, %v51_v7 }
 0x1d9   :  { %6989 = vmatpush3.bf16.msra.mxu1 %v7590_v12  ;;  %6968 = vmatprep.subr.bf16.mxu0 %v7591_v13  ;;  %v5819_v12 = vcombine.low %v52_v8, %v52_v8  ;;  %v5820_v13 = vcombine.high %v52_v8, %v52_v8 }
 0x1da   :  { %6990 = vmatprep.subr.bf16.mxu1 %v7592_v14 }
 0x1dc   :  { %6969 = vmatpush3.bf16.msra.mxu0 %v7593_v15 }
 0x1dd   :  { %6991 = vmatpush3.bf16.msra.mxu1 %v7594_v16  ;;  %6970 = vmatprep.subr.bf16.mxu0 %v7595_v17 }
 0x1de   :  { %6992 = vmatprep.subr.bf16.mxu1 %v7596_v18 }
 0x1e0   :  { %6971 = vmatpush3.bf16.msra.mxu0 %v7597_v19 }
 0x1e1   :  { %6993 = vmatpush3.bf16.msra.mxu1 %v7598_v20  ;;  %7000 = vmatprep.subr.bf16.mxu0 %v7603_v29 }
 0x1e2   :  { %7022 = vmatprep.subr.bf16.mxu1 %v7604_v30 }
 0x1e3   :  { %v6708_v25 = vpop.f32.mrf.mxu0  ;;  %5533 = vmatmul.mubr.bf16.vlgmr.msra.gmra.mxu0 %v5813_v22 }
 0x1e4   :  { %v6730_v26 = vpop.f32.mrf.mxu1  ;;  %5573 = vmatmul.mubr.bf16.vlgmr.msra.gmra.mxu1 %v5815_v27  ;;  %7001 = vmatpush3.bf16.msra.mxu0 %v7605_v33 }
 0x1e5   :  { %v6709_v31 = vpop.f32.mrf.mxu0  ;;  %7023 = vmatpush3.bf16.msra.mxu1 %v7606_v36  ;;  %7002 = vmatprep.subr.bf16.mxu0 %v7607_v40 }
 0x1e6   :  { %v6731_v32 = vpop.f32.mrf.mxu1  ;;  %v6710_v34 = vadd.f32 %v6709_v31, %v6708_v25  ;;  %7024 = vmatprep.subr.bf16.mxu1 %v7608_v41  ;;  %5612 = vmatprep.mubr.bf16.mxu0 %v5818_v11 }
 0x1e7   :  { %v6732_v35 = vadd.f32 %v6731_v32, %v6730_v26  ;;  %v6711_v37 = vpop.f32.mrf.mxu0  ;;  %5652 = vmatprep.mubr.bf16.mxu1 %v5820_v13 }
 0x1e8   :  { %v6733_v38 = vpop.f32.mrf.mxu1  ;;  %v5055_v39 = vadd.f32 %v6710_v34, %v9149_v57  ;;  %7003 = vmatpush3.bf16.msra.mxu0 %v7609_v45  ;;  %v7621_v57 = vld [vmem:[%s9359_s1 + $0xf18] sm:$0xff]   ;;  %v7647_v37 = vmov 0.0   ;;  %v7640_v45 = vld [vmem:[%s9362_s3 + $0x10] sm:$0xff]  }
 0x1e9   :  { %v6712_v42 = vpop.f32.mrf.mxu0  ;;  %7025 = vmatpush3.bf16.msra.mxu1 %v7610_v46  ;;  %7004 = vmatprep.subr.bf16.mxu0 %v7611_v47  ;;  %v7639_v38 = vld [vmem:[%s9362_s3 + $0x18] sm:$0xff]  }
 0x1ea   :  { %v6734_v43 = vpop.f32.mrf.mxu1  ;;  %v9254_v44 = vadd.f32 %v6732_v35, %v5055_v39  ;;  %7026 = vmatprep.subr.bf16.mxu1 %v7612_v48 }
 0x1ec   :  { %7005 = vmatpush3.bf16.msra.mxu0 %v7613_v49 }
 0x1ed   :  { %7027 = vmatpush3.bf16.msra.mxu1 %v7614_v50  ;;  %7006 = vmatprep.subr.bf16.mxu0 %v7615_v51 }
 0x1ee   :  { %7028 = vmatprep.subr.bf16.mxu1 %v7616_v52  ;;  %v7641_v52 = vld [vmem:[%s9362_s3 + $0x8] sm:$0xff]  }
 0x1f0   :  { %7007 = vmatpush3.bf16.msra.mxu0 %v7617_v53  ;;  %v7642_v53 = vld [vmem:[%s9362_s3] sm:$0xff]  }
 0x1f1   :  { %7029 = vmatpush3.bf16.msra.mxu1 %v7618_v54  ;;  %7008 = vmatprep.subr.bf16.mxu0 %v7619_v55 }
 0x1f2   :  { %7030 = vmatprep.subr.bf16.mxu1 %v7620_v56 }
 0x1f4   :  { %7009 = vmatpush3.bf16.msra.mxu0 %v7621_v57 }
 0x1f5   :  { %7031 = vmatpush3.bf16.msra.mxu1 %v7622_v58  ;;  %7010 = vmatprep.subr.bf16.mxu0 %v7623_v59 }
 0x1f6   :  { %7032 = vmatprep.subr.bf16.mxu1 %v7624_v60 }
 0x1f8   :  { %7011 = vmatpush3.bf16.msra.mxu0 %v7625_v61 }
 0x1f9   :  { %7033 = vmatpush3.bf16.msra.mxu1 %v7626_v62  ;;  %7012 = vmatprep.subr.bf16.mxu0 %v7627_v63 }
 0x1fa   :  { %7034 = vmatprep.subr.bf16.mxu1 %v7628_v0 }
 0x1fc   :  { %7013 = vmatpush3.bf16.msra.mxu0 %v7629_v1 }
 0x1fd   :  { %7035 = vmatpush3.bf16.msra.mxu1 %v7630_v2  ;;  %7014 = vmatprep.subr.bf16.mxu0 %v7631_v3 }
 0x1fe   :  { %7036 = vmatprep.subr.bf16.mxu1 %v7632_v4 }
 0x200   :  { %7015 = vmatpush3.bf16.msra.mxu0 %v7633_v5 }
 0x201   :  { %7037 = vmatpush3.bf16.msra.mxu1 %v7634_v6  ;;  %7049 = vmatprep.subr.bf16.mxu0 %v7647_v37 }
 0x203   :  { %v6752_v9 = vpop.f32.mrf.mxu0  ;;  %5613 = vmatmul.mubr.bf16.vlgmr.msra.gmra.mxu0 %v5817_v10 }
 0x204   :  { %v6774_v14 = vpop.f32.mrf.mxu1  ;;  %5653 = vmatmul.mubr.bf16.vlgmr.msra.gmra.mxu1 %v5819_v12  ;;  %7050 = vmatpush3.bf16.msra.mxu0 %v7639_v38 }
 0x205   :  { %v6753_v15 = vpop.f32.mrf.mxu0  ;;  %7051 = vmatprep.subr.bf16.mxu0 %v7647_v37  ;;  %7057 = vmatprep.mubr.msk.bf16.mxu0 %vm7648_vm0, %v7647_v37 }
 0x206   :  { %v6754_v16 = vadd.f32 %v6753_v15, %v6752_v9  ;;  %v6775_v17 = vpop.f32.mrf.mxu1 }
 0x207   :  { %v6776_v18 = vadd.f32 %v6775_v17, %v6774_v14  ;;  %v6755_v19 = vpop.f32.mrf.mxu0 }
 0x208   :  { %v5135_v20 = vadd.f32 %v6754_v16, %v9254_v44  ;;  %v6777_v21 = vpop.f32.mrf.mxu1  ;;  %7052 = vmatpush3.bf16.msra.mxu0 %v7640_v45 }
 0x209   :  { %v6756_v22 = vpop.f32.mrf.mxu0  ;;  %7053 = vmatprep.subr.bf16.mxu0 %v7647_v37 }
 0x20a   :  { %v5175_v23 = vadd.f32 %v6776_v18, %v5135_v20  ;;  %v6778_v24 = vpop.f32.mrf.mxu1 }
 0x20c   :  { %7054 = vmatpush3.bf16.msra.mxu0 %v7641_v52 }
 0x20d   :  { %7055 = vmatprep.subr.bf16.mxu0 %v7647_v37 }
 0x210   :  { %7056 = vmatpush3.bf16.msra.mxu0 %v7642_v53 }
 0x223   :  { %v6796_v25 = vpop.f32.mrf.mxu0 }
 0x224   :  { %v6818_v26 = vpop.f32.mrf.mxu1 }
 0x225   :  { %v6797_v27 = vpop.f32.mrf.mxu0 }
 0x226   :  { %v6798_v28 = vadd.f32 %v6797_v27, %v6796_v25  ;;  %v6819_v29 = vpop.f32.mrf.mxu1 }
 0x227   :  { %v6820_v30 = vadd.f32 %v6819_v29, %v6818_v26  ;;  %v6799_v31 = vpop.f32.mrf.mxu0 }
 0x228   :  { %v5215_v32 = vadd.f32 %v6798_v28, %v5175_v23  ;;  %v6821_v33 = vpop.f32.mrf.mxu1 }
 0x229   :  { %v6800_v34 = vpop.f32.mrf.mxu0 }
 0x22a   :  { %v5255_v35 = vadd.f32 %v6820_v30, %v5215_v32  ;;  %v6822_v36 = vpop.f32.mrf.mxu1 }
 0x243   :  { %v6840_v39 = vpop.f32.mrf.mxu0 }
 0x244   :  { %v6862_v40 = vpop.f32.mrf.mxu1 }
 0x245   :  { %v6841_v41 = vpop.f32.mrf.mxu0 }
 0x246   :  { %v6863_v42 = vpop.f32.mrf.mxu1  ;;  %v6842_v43 = vadd.f32 %v6841_v41, %v6840_v39 }
 0x247   :  { %v6864_v44 = vadd.f32 %v6863_v42, %v6862_v40  ;;  %v6843_v46 = vpop.f32.mrf.mxu0  ;;  %v6333_v40 = vld [vmem:[%s9363_s4] ss:$0 sm:$0xff] }
 0x248   :  { %v6865_v47 = vpop.f32.mrf.mxu1  ;;  %v5295_v48 = vadd.f32 %v6842_v43, %v5255_v35 }
 0x249   :  { %v6844_v49 = vpop.f32.mrf.mxu0 }
 0x24a   :  { %v6866_v50 = vpop.f32.mrf.mxu1  ;;  %v5335_v51 = vadd.f32 %v6864_v44, %v5295_v48 }
 0x263   :  { %v6884_v54 = vpop.f32.mrf.mxu0 }
 0x264   :  { %v6906_v55 = vpop.f32.mrf.mxu1 }
 0x265   :  { %v6885_v56 = vpop.f32.mrf.mxu0 }
 0x266   :  { %v6886_v57 = vadd.f32 %v6885_v56, %v6884_v54  ;;  %v6907_v58 = vpop.f32.mrf.mxu1 }
 0x267   :  { %v6908_v59 = vadd.f32 %v6907_v58, %v6906_v55  ;;  %v6887_v60 = vpop.f32.mrf.mxu0 }
 0x268   :  { %v5375_v61 = vadd.f32 %v6886_v57, %v5335_v51  ;;  %v6909_v62 = vpop.f32.mrf.mxu1 }
 0x269   :  { %v6888_v63 = vpop.f32.mrf.mxu0 }
 0x26a   :  { %v5415_v0 = vadd.f32 %v6908_v59, %v5375_v61  ;;  %v6910_v1 = vpop.f32.mrf.mxu1 }
 0x283   :  { %v6928_v2 = vpop.f32.mrf.mxu0 }
 0x284   :  { %v6950_v3 = vpop.f32.mrf.mxu1 }
 0x285   :  { %v6929_v4 = vpop.f32.mrf.mxu0 }
 0x286   :  { %v6951_v5 = vpop.f32.mrf.mxu1  ;;  %v6930_v18 = vadd.f32 %v6929_v4, %v6928_v2 }
 0x287   :  { %v6931_v6 = vpop.f32.mrf.mxu0  ;;  %v6952_v20 = vadd.f32 %v6951_v5, %v6950_v3 }
 0x288   :  { %v6953_v7 = vpop.f32.mrf.mxu1  ;;  %v5455_v19 = vadd.f32 %v6930_v18, %v5415_v0 }
 0x289   :  { %v6932_v8 = vpop.f32.mrf.mxu0 }
 0x28a   :  { %v6954_v9 = vpop.f32.mrf.mxu1  ;;  %v5495_v22 = vadd.f32 %v6952_v20, %v5455_v19 }
 0x2a3   :  { %v6972_v10 = vpop.f32.mrf.mxu0 }
 0x2a4   :  { %v6994_v11 = vpop.f32.mrf.mxu1 }
 0x2a5   :  { %v6973_v12 = vpop.f32.mrf.mxu0 }
 0x2a6   :  { %v6995_v13 = vpop.f32.mrf.mxu1  ;;  %v6974_v21 = vadd.f32 %v6973_v12, %v6972_v10 }
 0x2a7   :  { %v6975_v14 = vpop.f32.mrf.mxu0  ;;  %v6996_v24 = vadd.f32 %v6995_v13, %v6994_v11 }
 0x2a8   :  { %v6997_v15 = vpop.f32.mrf.mxu1  ;;  %v5535_v23 = vadd.f32 %v6974_v21, %v5495_v22 }
 0x2a9   :  { %v6976_v16 = vpop.f32.mrf.mxu0 }
 0x2aa   :  { %v6998_v17 = vpop.f32.mrf.mxu1  ;;  %v5575_v28 = vadd.f32 %v6996_v24, %v5535_v23 }
 0x2c3   :  { %v7016_v25 = vpop.f32.mrf.mxu0 }
 0x2c4   :  { %v7038_v26 = vpop.f32.mrf.mxu1 }
 0x2c5   :  { %v7017_v27 = vpop.f32.mrf.mxu0 }
 0x2c6   :  { %v7018_v29 = vadd.f32 %v7017_v27, %v7016_v25  ;;  %v7039_v30 = vpop.f32.mrf.mxu1 }
 0x2c7   :  { %v7019_v31 = vpop.f32.mrf.mxu0  ;;  %v7040_v33 = vadd.f32 %v7039_v30, %v7038_v26 }
 0x2c8   :  { %v5615_v32 = vadd.f32 %v7018_v29, %v5575_v28  ;;  %v7041_v34 = vpop.f32.mrf.mxu1 }
 0x2c9   :  { %v7020_v35 = vpop.f32.mrf.mxu0 }
 0x2ca   :  { %v5655_v36 = vadd.f32 %v7040_v33, %v5615_v32  ;;  %v7042_v37 = vpop.f32.mrf.mxu1 }
 0x2cc   :  { %v5660_v38 = vmax.f32 %v5655_v36, 0.0 }
 0x2ce   :  { %v5661_v39 = vpack.c.bf16 %v5660_v38, %v5660_v38 }
 0x2d0   :  { %7058 = vmatmul.mubr.msk.bf16.vlgmr.msra.gmra.mxu0 %vm5701_vm1, %v5661_v39 }
 0x390   :  { %v5739_v41 = vpop.f32.mrf.mxu0 }
 0x391   :  { %v5740_v42 = vadd.f32 %v6333_v40, %v5739_v41 }
 0x392   :  { %v7059_v43 = vpop.f32.mrf.mxu0 }
 0x393   :  { %v6339_v44 = vmul.f32 -1.442695, %v5740_v42 }
 0x394   :  { %v5742_v45 = vpop.f32.mrf.mxu0 }
 0x395   :  { %7643 = vpow2.f32 %v6339_v44 }
 0x396   :  { %v7060_v46 = vpop.f32.mrf.mxu0 }
 0x3a2   :  { %v7644_v47 = vpop.eup %7643 }
 0x3a3   :  { %v5748_v48 = vadd.f32 1.0, %v7644_v47 }
 0x3a5   :  { %7645 = vrcp.f32 %v5748_v48 }
 0x3b2   :  { %v7646_v49 = vpop.eup %7645 }
 0x3b3   :  { %5751 = vst [vmem:[%s9364_s5] sm:$0xff] %v7646_v49 }

</bundles_post_ra>
